<compile_context>
chip_gen: v6e
topology: v6e:2x2x1
jax: 0.10.0
libtpu: 0.0.40
codegen_flags: <defaults>
</compile_context>

<pallas_src>
import math
import functools

import jax
import jax.numpy as jnp
from jax.experimental import pallas as pl
from jax.experimental.pallas import tpu as pltpu

# ----------------------------- hyperparameters -------------------------------
VOCAB = 50          # config.token_vocab_dict.vocab_size()
VPAD = 128          # vocab padded to a lane-dense 128 (zeros beyond VOCAB)
D_MODEL = 32        # config.transformer['d_model']
NHEAD = 4           # config.transformer['nhead']
HEAD_DIM = D_MODEL // NHEAD
DFF = 64            # config.transformer['dim_feedforward']
ENC_LAYERS = 2      # config.transformer['enc_nlayers'] (decoder uses same count)
DEC_LAYERS = 2
PAD_ID = 3          # pad mask: seq != 3
LN_EPS = 1e-5
NEG = -1e30         # additive mask value (finite stand-in for -inf)
MAX_POS = 64
STRONG_POS_ENC = False  # False -> embeddings scaled by sqrt(d_model)


# ------------------------------ fused kernel ----------------------------------
def _fused_forward_kernel(treedef, n_in, bsz, s_len, t_len, *refs):
    in_refs = refs[:n_in]
    out_ref = refs[n_in]
    attn_scratch = refs[n_in + 1]          # (B*max(S,T), D) VMEM staging buffer

    tree = jax.tree_util.tree_unflatten(treedef, in_refs)
    p = tree['params']

    d = D_MODEL
    dh = HEAD_DIM
    scale = 1.0 / math.sqrt(dh)
    emb_scale = 1.0 if STRONG_POS_ENC else math.sqrt(D_MODEL)
    f32 = jnp.float32

    emb_tbl = p['embedding'][...]                                    # (VPAD, D)

    # ------------- mask biases built in-kernel from the token ids -------------
    src_tok = tree['src'][...]                                       # (B, S) i32
    tgt_tok = tree['tgt'][...]                                       # (B, T) i32
    src_key_bias = jnp.where(src_tok == PAD_ID, NEG, 0.0).astype(f32)  # (B, S)
    tgt_key_bias = jnp.where(tgt_tok == PAD_ID, NEG, 0.0).astype(f32)  # (B, T)
    row_i = jax.lax.broadcasted_iota(jnp.int32, (t_len, t_len), 0)
    col_j = jax.lax.broadcasted_iota(jnp.int32, (t_len, t_len), 1)
    causal_bias = jnp.where(row_i >= col_j, 0.0, NEG).astype(f32)    # (T, T)

    enc_bias = lambda b: src_key_bias[b:b + 1, :]                    # (1, S)
    dec_self_bias = lambda b: jnp.minimum(causal_bias,
                                          tgt_key_bias[b:b + 1, :])  # (T, T)
    cross_bias = lambda b: src_key_bias[b:b + 1, :]                  # (1, S)

    # ------------------------------ primitives --------------------------------
    def matmul(x, w_ref, b_ref=None):
        y = jnp.dot(x, w_ref[...], preferred_element_type=f32)
        if b_ref is not None:
            y = y + b_ref[...]
        return y

    def layer_norm(x, g_ref, b_ref):
        mu = jnp.mean(x, axis=-1, keepdims=True)
        xc = x - mu
        var = jnp.mean(xc * xc, axis=-1, keepdims=True)
        return xc * jax.lax.rsqrt(var + LN_EPS) * g_ref[...] + b_ref[...]

    def embed(tok_col_ref, pe_ref, tlen):
        # one-hot @ table embedding lookup, done as a single lane-dense matmul
        tok_col = tok_col_ref[...]                                   # (B*L, 1)
        iota_v = jax.lax.broadcasted_iota(jnp.int32, (bsz * tlen, VPAD), 1)
        onehot = (iota_v == tok_col).astype(f32)                     # (B*L, VPAD)
        emb = jnp.dot(onehot, emb_tbl, preferred_element_type=f32)   # (B*L, D)
        # TODO(synk): pos_dropout / transformer dropout are eval-mode identities.
        return emb * emb_scale + pe_ref[...]

    def attention(q2, k2, v2, wo_ref, bo_ref, bias_fn, tq, tk):
        # q2: (B*tq, D); k2/v2: (B*tk, D); batch-major rows.  Output projection
        # is folded into the per-(batch, head) loop so no concat/transpose.
        wo = wo_ref[...]                                             # (D, D)
        for b in range(bsz):
            qb = q2[b * tq:(b + 1) * tq]
            kb = k2[b * tk:(b + 1) * tk]
            vb = v2[b * tk:(b + 1) * tk]
            bias_b = bias_fn(b)
            acc = None
            for h in range(NHEAD):
                c0, c1 = h * dh, (h + 1) * dh
                s = jax.lax.dot_general(
                    qb[:, c0:c1], kb[:, c0:c1], (((1,), (1,)), ((), ())),
                    preferred_element_type=f32) * scale + bias_b
                s = s - jnp.max(s, axis=-1, keepdims=True)
                pexp = jnp.exp(s)
                pnorm = pexp * pl.reciprocal(
                    jnp.sum(pexp, axis=-1, keepdims=True), approx=True)
                head = jnp.dot(pnorm, vb[:, c0:c1], preferred_element_type=f32)
                contrib = jnp.dot(head, wo[c0:c1, :], preferred_element_type=f32)
                acc = contrib if acc is None else acc + contrib
            attn_scratch[b * tq:(b + 1) * tq, :] = acc
        return attn_scratch[0:bsz * tq, :] + bo_ref[...]

    def self_mha(x2, ap, bias_fn, tq):
        qkv = matmul(x2, ap['wqkv'], ap['bqkv'])                     # (B*tq, 3D)
        q2, k2, v2 = qkv[:, 0:d], qkv[:, d:2 * d], qkv[:, 2 * d:3 * d]
        return attention(q2, k2, v2, ap['wo'], ap['bo'], bias_fn, tq, tq)

    def cross_mha(x2, mem2, ap, bias_fn, tq, tk):
        q2 = matmul(x2, ap['wq'], ap['bq'])
        kv = matmul(mem2, ap['wkv'], ap['bkv'])                      # (B*tk, 2D)
        k2, v2 = kv[:, 0:d], kv[:, d:2 * d]
        return attention(q2, k2, v2, ap['wo'], ap['bo'], bias_fn, tq, tk)

    def ffn(x2, lp):
        h = jnp.maximum(matmul(x2, lp['ff1_w'], lp['ff1_b']), 0.0)
        return matmul(h, lp['ff2_w'], lp['ff2_b'])

    # ------------------------------- encoder -----------------------------------
    x = embed(tree['src_col'], tree['pe_src'], s_len)                # (B*S, D)
    for lp in p['enc_layers']:                                       # post-norm
        a = self_mha(x, lp['self_attn'], enc_bias, s_len)
        x = layer_norm(x + a, lp['ln1_g'], lp['ln1_b'])
        h = ffn(x, lp)
        x = layer_norm(x + h, lp['ln2_g'], lp['ln2_b'])
    mem = x

    # ------------------------------- decoder -----------------------------------
    y = embed(tree['tgt_col'], tree['pe_tgt'], t_len)                # (B*T, D)
    for lp in p['dec_layers']:
        a = self_mha(y, lp['self_attn'], dec_self_bias, t_len)
        y = layer_norm(y + a, lp['ln1_g'], lp['ln1_b'])
        a = cross_mha(y, mem, lp['cross_attn'], cross_bias, t_len, s_len)
        y = layer_norm(y + a, lp['ln2_g'], lp['ln2_b'])
        h = ffn(y, lp)
        y = layer_norm(y + h, lp['ln3_g'], lp['ln3_b'])

    # ----------------- final projection: lane-dense (B*T, 128) -----------------
    out_ref[...] = matmul(y, p['fc_w'], p['fc_b'])


# ------------------------------ model wrapper ----------------------------------
def model_forward(params, fn_tensors, tgt_tensors):
    src = fn_tensors[:, 1:].astype(jnp.int32)          # (B, S)
    tgt_in = tgt_tensors[:, :-1].astype(jnp.int32)     # (B, T)
    bsz, s_len = src.shape
    t_len = tgt_in.shape[1]

    pe = params['pos_enc']
    kernel_inputs = dict(
        src=src, tgt=tgt_in,
        src_col=src.reshape(bsz * s_len, 1),           # batch-major token column
        tgt_col=tgt_in.reshape(bsz * t_len, 1),
        pe_src=jnp.tile(pe[:s_len], (bsz, 1)),         # (B*S, D) pos-enc slab
        pe_tgt=jnp.tile(pe[:t_len], (bsz, 1)),         # (B*T, D)
        params={k: v for k, v in params.items() if k != 'pos_enc'},
    )
    leaves, treedef = jax.tree_util.tree_flatten(kernel_inputs)

    kernel = functools.partial(_fused_forward_kernel, treedef, len(leaves),
                               bsz, s_len, t_len)
    logits_pad = pl.pallas_call(
        kernel,
        out_shape=jax.ShapeDtypeStruct((bsz * t_len, VPAD), jnp.float32),
        scratch_shapes=[pltpu.VMEM((bsz * max(s_len, t_len), D_MODEL),
                                   jnp.float32)],
    )(*leaves)

    # logits in the seq-first (T, B, V) PyTorch layout; argmax -> (B, T)
    logits = logits_pad.reshape(bsz, t_len, VPAD)[:, :, :VOCAB].transpose(1, 0, 2)
    model_output = jnp.argmax(logits, axis=-1).T
    # TODO(synk): loss_fn is an external callable in the PyTorch module; not reproduced.
    return logits, model_output


# ------------------------------ parameter setup --------------------------------
def positional_encoding(max_len, d_model):
    pos = jnp.arange(max_len, dtype=jnp.float32)[:, None]
    div = jnp.exp(jnp.arange(0, d_model, 2, dtype=jnp.float32)
                  * (-math.log(10000.0) / d_model))
    pe = jnp.zeros((max_len, d_model), jnp.float32)
    pe = pe.at[:, 0::2].set(jnp.sin(pos * div))
    pe = pe.at[:, 1::2].set(jnp.cos(pos * div))
    return pe


def make_params(key):
    keys = iter(jax.random.split(key, 512))

    def nrm(shape, scl=0.05):
        return jax.random.normal(next(keys), shape, jnp.float32) * scl

    def self_attn_params():
        return dict(wqkv=nrm((D_MODEL, 3 * D_MODEL)), bqkv=nrm((1, 3 * D_MODEL)),
                    wo=nrm((D_MODEL, D_MODEL)), bo=nrm((1, D_MODEL)))

    def cross_attn_params():
        return dict(wq=nrm((D_MODEL, D_MODEL)), bq=nrm((1, D_MODEL)),
                    wkv=nrm((D_MODEL, 2 * D_MODEL)), bkv=nrm((1, 2 * D_MODEL)),
                    wo=nrm((D_MODEL, D_MODEL)), bo=nrm((1, D_MODEL)))

    def ln():
        return (jnp.ones((1, D_MODEL), jnp.float32),
                jnp.zeros((1, D_MODEL), jnp.float32))

    def enc_layer_params():
        ln1_g, ln1_b = ln()
        ln2_g, ln2_b = ln()
        return dict(self_attn=self_attn_params(),
                    ln1_g=ln1_g, ln1_b=ln1_b, ln2_g=ln2_g, ln2_b=ln2_b,
                    ff1_w=nrm((D_MODEL, DFF)), ff1_b=nrm((1, DFF)),
                    ff2_w=nrm((DFF, D_MODEL)), ff2_b=nrm((1, D_MODEL)))

    def dec_layer_params():
        ln1_g, ln1_b = ln()
        ln2_g, ln2_b = ln()
        ln3_g, ln3_b = ln()
        return dict(self_attn=self_attn_params(), cross_attn=cross_attn_params(),
                    ln1_g=ln1_g, ln1_b=ln1_b, ln2_g=ln2_g, ln2_b=ln2_b,
                    ln3_g=ln3_g, ln3_b=ln3_b,
                    ff1_w=nrm((D_MODEL, DFF)), ff1_b=nrm((1, DFF)),
                    ff2_w=nrm((DFF, D_MODEL)), ff2_b=nrm((1, D_MODEL)))

    emb = jnp.zeros((VPAD, D_MODEL), jnp.float32).at[:VOCAB].set(
        nrm((VOCAB, D_MODEL), 1.0))
    fc_w = jnp.zeros((D_MODEL, VPAD), jnp.float32).at[:, :VOCAB].set(
        nrm((D_MODEL, VOCAB)))
    fc_b = jnp.zeros((1, VPAD), jnp.float32).at[:, :VOCAB].set(nrm((1, VOCAB)))

    # note: W1 / W2 exist in the PyTorch module but are unused in forward -> omitted.
    return dict(
        embedding=emb,
        pos_enc=positional_encoding(MAX_POS, D_MODEL),
        enc_layers=[enc_layer_params() for _ in range(ENC_LAYERS)],
        dec_layers=[dec_layer_params() for _ in range(DEC_LAYERS)],
        fc_w=fc_w, fc_b=fc_b,
    )


# ------------------------------------ main --------------------------------------
if __name__ == "__main__":
    key = jax.random.PRNGKey(0)
    pkey, skey, tkey = jax.random.split(key, 3)
    params = make_params(pkey)

    B, SRC_LEN, TGT_LEN = 2, 9, 9   # -> src seq 8, decoder input seq 8
    fn_tensors = jax.random.randint(skey, (B, SRC_LEN), 4, VOCAB, dtype=jnp.int32)
    tgt_tensors = jax.random.randint(tkey, (B, TGT_LEN), 4, VOCAB, dtype=jnp.int32)
    # sprinkle some pad tokens (id 3) to exercise the padding masks
    fn_tensors = fn_tensors.at[0, 7:].set(PAD_ID)
    tgt_tensors = tgt_tensors.at[1, 6:8].set(PAD_ID)

    fwd = jax.jit(model_forward)
    logits, model_output = fwd(params, fn_tensors, tgt_tensors)
    jax.block_until_ready((logits, model_output))

    assert logits.shape == (TGT_LEN - 1, B, VOCAB)
    assert model_output.shape == (B, TGT_LEN - 1)
    print("KERNEL_OK")
</pallas_src>

<mosaic_0001>
module attributes {stable_mosaic.version = 11 : i64} {
  func.func @_fused_forward_kernel(%arg0: memref<1x64xf32, #tpu.memory_space<vmem>>, %arg1: memref<1x32xf32, #tpu.memory_space<vmem>>, %arg2: memref<1x32xf32, #tpu.memory_space<vmem>>, %arg3: memref<32x64xf32, #tpu.memory_space<vmem>>, %arg4: memref<32x32xf32, #tpu.memory_space<vmem>>, %arg5: memref<32x32xf32, #tpu.memory_space<vmem>>, %arg6: memref<1x64xf32, #tpu.memory_space<vmem>>, %arg7: memref<32x64xf32, #tpu.memory_space<vmem>>, %arg8: memref<1x32xf32, #tpu.memory_space<vmem>>, %arg9: memref<64x32xf32, #tpu.memory_space<vmem>>, %arg10: memref<1x32xf32, #tpu.memory_space<vmem>>, %arg11: memref<1x32xf32, #tpu.memory_space<vmem>>, %arg12: memref<1x32xf32, #tpu.memory_space<vmem>>, %arg13: memref<1x32xf32, #tpu.memory_space<vmem>>, %arg14: memref<1x32xf32, #tpu.memory_space<vmem>>, %arg15: memref<1x32xf32, #tpu.memory_space<vmem>>, %arg16: memref<1x32xf32, #tpu.memory_space<vmem>>, %arg17: memref<1x96xf32, #tpu.memory_space<vmem>>, %arg18: memref<32x32xf32, #tpu.memory_space<vmem>>, %arg19: memref<32x96xf32, #tpu.memory_space<vmem>>, %arg20: memref<1x64xf32, #tpu.memory_space<vmem>>, %arg21: memref<1x32xf32, #tpu.memory_space<vmem>>, %arg22: memref<1x32xf32, #tpu.memory_space<vmem>>, %arg23: memref<32x64xf32, #tpu.memory_space<vmem>>, %arg24: memref<32x32xf32, #tpu.memory_space<vmem>>, %arg25: memref<32x32xf32, #tpu.memory_space<vmem>>, %arg26: memref<1x64xf32, #tpu.memory_space<vmem>>, %arg27: memref<32x64xf32, #tpu.memory_space<vmem>>, %arg28: memref<1x32xf32, #tpu.memory_space<vmem>>, %arg29: memref<64x32xf32, #tpu.memory_space<vmem>>, %arg30: memref<1x32xf32, #tpu.memory_space<vmem>>, %arg31: memref<1x32xf32, #tpu.memory_space<vmem>>, %arg32: memref<1x32xf32, #tpu.memory_space<vmem>>, %arg33: memref<1x32xf32, #tpu.memory_space<vmem>>, %arg34: memref<1x32xf32, #tpu.memory_space<vmem>>, %arg35: memref<1x32xf32, #tpu.memory_space<vmem>>, %arg36: memref<1x32xf32, #tpu.memory_space<vmem>>, %arg37: memref<1x96xf32, #tpu.memory_space<vmem>>, %arg38: memref<32x32xf32, #tpu.memory_space<vmem>>, %arg39: memref<32x96xf32, #tpu.memory_space<vmem>>, %arg40: memref<128x32xf32, #tpu.memory_space<vmem>>, %arg41: memref<1x64xf32, #tpu.memory_space<vmem>>, %arg42: memref<32x64xf32, #tpu.memory_space<vmem>>, %arg43: memref<1x32xf32, #tpu.memory_space<vmem>>, %arg44: memref<64x32xf32, #tpu.memory_space<vmem>>, %arg45: memref<1x32xf32, #tpu.memory_space<vmem>>, %arg46: memref<1x32xf32, #tpu.memory_space<vmem>>, %arg47: memref<1x32xf32, #tpu.memory_space<vmem>>, %arg48: memref<1x32xf32, #tpu.memory_space<vmem>>, %arg49: memref<1x32xf32, #tpu.memory_space<vmem>>, %arg50: memref<1x96xf32, #tpu.memory_space<vmem>>, %arg51: memref<32x32xf32, #tpu.memory_space<vmem>>, %arg52: memref<32x96xf32, #tpu.memory_space<vmem>>, %arg53: memref<1x64xf32, #tpu.memory_space<vmem>>, %arg54: memref<32x64xf32, #tpu.memory_space<vmem>>, %arg55: memref<1x32xf32, #tpu.memory_space<vmem>>, %arg56: memref<64x32xf32, #tpu.memory_space<vmem>>, %arg57: memref<1x32xf32, #tpu.memory_space<vmem>>, %arg58: memref<1x32xf32, #tpu.memory_space<vmem>>, %arg59: memref<1x32xf32, #tpu.memory_space<vmem>>, %arg60: memref<1x32xf32, #tpu.memory_space<vmem>>, %arg61: memref<1x32xf32, #tpu.memory_space<vmem>>, %arg62: memref<1x96xf32, #tpu.memory_space<vmem>>, %arg63: memref<32x32xf32, #tpu.memory_space<vmem>>, %arg64: memref<32x96xf32, #tpu.memory_space<vmem>>, %arg65: memref<1x128xf32, #tpu.memory_space<vmem>>, %arg66: memref<32x128xf32, #tpu.memory_space<vmem>>, %arg67: memref<16x32xf32, #tpu.memory_space<vmem>>, %arg68: memref<16x32xf32, #tpu.memory_space<vmem>>, %arg69: memref<2x8xi32, #tpu.memory_space<vmem>>, %arg70: memref<16x1xi32, #tpu.memory_space<vmem>>, %arg71: memref<2x8xi32, #tpu.memory_space<vmem>>, %arg72: memref<16x1xi32, #tpu.memory_space<vmem>>, %arg73: memref<16x128xf32, #tpu.memory_space<vmem>>, %arg74: memref<16x32xf32, #tpu.memory_space<vmem>>) attributes {dimension_semantics = [], scalar_prefetch = 0 : i64, scratch_operands = 1 : i64, tpu.core_type = #tpu.core_type<tc>} {
    %c0 = arith.constant 0 : index
    %c0_0 = arith.constant 0 : index
    %0 = vector.load %arg40[%c0, %c0_0] : memref<128x32xf32, #tpu.memory_space<vmem>>, vector<128x32xf32>
    %c0_1 = arith.constant 0 : index
    %c0_2 = arith.constant 0 : index
    %1 = vector.load %arg69[%c0_1, %c0_2] : memref<2x8xi32, #tpu.memory_space<vmem>>, vector<2x8xi32>
    %c0_3 = arith.constant 0 : index
    %c0_4 = arith.constant 0 : index
    %2 = vector.load %arg71[%c0_3, %c0_4] : memref<2x8xi32, #tpu.memory_space<vmem>>, vector<2x8xi32>
    %c3_i32 = arith.constant 3 : i32
    %3 = vector.broadcast %c3_i32 : i32 to vector<2x8xi32>
    %4 = arith.cmpi eq, %1, %3 : vector<2x8xi32>
    %cst = arith.constant -1.000000e+30 : f32
    %cst_5 = arith.constant 0.000000e+00 : f32
    %5 = vector.broadcast %cst : f32 to vector<2x8xf32>
    %6 = vector.broadcast %cst_5 : f32 to vector<2x8xf32>
    %7 = arith.select %4, %5, %6 : vector<2x8xi1>, vector<2x8xf32>
    %c3_i32_6 = arith.constant 3 : i32
    %8 = vector.broadcast %c3_i32_6 : i32 to vector<2x8xi32>
    %9 = arith.cmpi eq, %2, %8 : vector<2x8xi32>
    %cst_7 = arith.constant -1.000000e+30 : f32
    %cst_8 = arith.constant 0.000000e+00 : f32
    %10 = vector.broadcast %cst_7 : f32 to vector<2x8xf32>
    %11 = vector.broadcast %cst_8 : f32 to vector<2x8xf32>
    %12 = arith.select %9, %10, %11 : vector<2x8xi1>, vector<2x8xf32>
    %13 = tpu.iota {dimensions = array<i32: 0>} : vector<8x8xi32>
    %14 = tpu.iota {dimensions = array<i32: 1>} : vector<8x8xi32>
    %15 = arith.cmpi sge, %13, %14 : vector<8x8xi32>
    %cst_9 = arith.constant 0.000000e+00 : f32
    %cst_10 = arith.constant -1.000000e+30 : f32
    %16 = vector.broadcast %cst_9 : f32 to vector<8x8xf32>
    %17 = vector.broadcast %cst_10 : f32 to vector<8x8xf32>
    %18 = arith.select %15, %16, %17 : vector<8x8xi1>, vector<8x8xf32>
    %c0_11 = arith.constant 0 : index
    %c0_12 = arith.constant 0 : index
    %19 = vector.load %arg70[%c0_11, %c0_12] : memref<16x1xi32, #tpu.memory_space<vmem>>, vector<16x1xi32>
    %20 = tpu.iota {dimensions = array<i32: 1>} : vector<16x128xi32>
    %21 = vector.broadcast %19 : vector<16x1xi32> to vector<16x128xi32>
    %22 = arith.cmpi eq, %20, %21 : vector<16x128xi32>
    %23 = arith.extui %22 : vector<16x128xi1> to vector<16x128xi32>
    %24 = arith.sitofp %23 : vector<16x128xi32> to vector<16x128xf32>
    %cst_13 = arith.constant dense<0.000000e+00> : vector<16x32xf32>
    %25 = tpu.matmul %24, %0, %cst_13 {dimension_numbers = #tpu.dot_dimension_numbers<[1], [0], [0], [1], [0, 0, 1, 1], [], []>} : vector<16x128xf32>, vector<128x32xf32>, vector<16x32xf32> -> vector<16x32xf32>
    %cst_14 = arith.constant 5.65685415 : f32
    %26 = vector.broadcast %cst_14 : f32 to vector<16x32xf32>
    %27 = arith.mulf %25, %26 : vector<16x32xf32>
    %c0_15 = arith.constant 0 : index
    %c0_16 = arith.constant 0 : index
    %28 = vector.load %arg67[%c0_15, %c0_16] : memref<16x32xf32, #tpu.memory_space<vmem>>, vector<16x32xf32>
    %29 = arith.addf %27, %28 : vector<16x32xf32>
    %c0_17 = arith.constant 0 : index
    %c0_18 = arith.constant 0 : index
    %30 = vector.load %arg52[%c0_17, %c0_18] : memref<32x96xf32, #tpu.memory_space<vmem>>, vector<32x96xf32>
    %cst_19 = arith.constant dense<0.000000e+00> : vector<16x96xf32>
    %31 = tpu.matmul %29, %30, %cst_19 {dimension_numbers = #tpu.dot_dimension_numbers<[1], [0], [0], [1], [0, 0, 1, 1], [], []>} : vector<16x32xf32>, vector<32x96xf32>, vector<16x96xf32> -> vector<16x96xf32>
    %c0_20 = arith.constant 0 : index
    %c0_21 = arith.constant 0 : index
    %32 = vector.load %arg50[%c0_20, %c0_21] : memref<1x96xf32, #tpu.memory_space<vmem>>, vector<1x96xf32>
    %33 = vector.broadcast %32 : vector<1x96xf32> to vector<16x96xf32>
    %34 = arith.addf %31, %33 : vector<16x96xf32>
    %35 = vector.extract_strided_slice %34 {offsets = [0, 0], sizes = [16, 32], strides = [1, 1]} : vector<16x96xf32> to vector<16x32xf32>
    %36 = vector.extract_strided_slice %34 {offsets = [0, 32], sizes = [16, 32], strides = [1, 1]} : vector<16x96xf32> to vector<16x32xf32>
    %37 = vector.extract_strided_slice %34 {offsets = [0, 64], sizes = [16, 32], strides = [1, 1]} : vector<16x96xf32> to vector<16x32xf32>
    %c0_22 = arith.constant 0 : index
    %c0_23 = arith.constant 0 : index
    %38 = vector.load %arg51[%c0_22, %c0_23] : memref<32x32xf32, #tpu.memory_space<vmem>>, vector<32x32xf32>
    %39 = vector.extract_strided_slice %35 {offsets = [0, 0], sizes = [8, 32], strides = [1, 1]} : vector<16x32xf32> to vector<8x32xf32>
    %40 = vector.extract_strided_slice %36 {offsets = [0, 0], sizes = [8, 32], strides = [1, 1]} : vector<16x32xf32> to vector<8x32xf32>
    %41 = vector.extract_strided_slice %37 {offsets = [0, 0], sizes = [8, 32], strides = [1, 1]} : vector<16x32xf32> to vector<8x32xf32>
    %42 = vector.extract_strided_slice %7 {offsets = [0, 0], sizes = [1, 8], strides = [1, 1]} : vector<2x8xf32> to vector<1x8xf32>
    %43 = vector.extract_strided_slice %39 {offsets = [0, 0], sizes = [8, 8], strides = [1, 1]} : vector<8x32xf32> to vector<8x8xf32>
    %44 = vector.extract_strided_slice %40 {offsets = [0, 0], sizes = [8, 8], strides = [1, 1]} : vector<8x32xf32> to vector<8x8xf32>
    %cst_24 = arith.constant dense<0.000000e+00> : vector<8x8xf32>
    %45 = tpu.matmul %43, %44, %cst_24 {dimension_numbers = #tpu.dot_dimension_numbers<[1], [1], [0], [0], [0, 0, 1, 0], [], []>} : vector<8x8xf32>, vector<8x8xf32>, vector<8x8xf32> -> vector<8x8xf32>
    %cst_25 = arith.constant 0.353553385 : f32
    %46 = vector.broadcast %cst_25 : f32 to vector<8x8xf32>
    %47 = arith.mulf %45, %46 : vector<8x8xf32>
    %48 = vector.broadcast %42 : vector<1x8xf32> to vector<8x8xf32>
    %49 = arith.addf %47, %48 : vector<8x8xf32>
    %cst_26 = arith.constant dense<0xFF800000> : vector<8xf32>
    %50 = vector.multi_reduction <maximumf>, %49, %cst_26 [1] : vector<8x8xf32> to vector<8xf32>
    %51 = vector.shape_cast %50 : vector<8xf32> to vector<8x1xf32>
    %52 = vector.broadcast %51 : vector<8x1xf32> to vector<8x8xf32>
    %53 = arith.subf %49, %52 : vector<8x8xf32>
    %54 = math.exp %53 : vector<8x8xf32>
    %cst_27 = arith.constant dense<0.000000e+00> : vector<8xf32>
    %55 = vector.multi_reduction <add>, %54, %cst_27 [1] : vector<8x8xf32> to vector<8xf32>
    %56 = vector.shape_cast %55 : vector<8xf32> to vector<8x1xf32>
    %57 = tpu.reciprocal %56 {approx = true} : vector<8x1xf32> -> vector<8x1xf32>
    %58 = vector.broadcast %57 : vector<8x1xf32> to vector<8x8xf32>
    %59 = arith.mulf %54, %58 : vector<8x8xf32>
    %60 = vector.extract_strided_slice %41 {offsets = [0, 0], sizes = [8, 8], strides = [1, 1]} : vector<8x32xf32> to vector<8x8xf32>
    %cst_28 = arith.constant dense<0.000000e+00> : vector<8x8xf32>
    %61 = tpu.matmul %59, %60, %cst_28 {dimension_numbers = #tpu.dot_dimension_numbers<[1], [0], [0], [1], [0, 0, 1, 1], [], []>} : vector<8x8xf32>, vector<8x8xf32>, vector<8x8xf32> -> vector<8x8xf32>
    %62 = vector.extract_strided_slice %38 {offsets = [0, 0], sizes = [8, 32], strides = [1, 1]} : vector<32x32xf32> to vector<8x32xf32>
    %cst_29 = arith.constant dense<0.000000e+00> : vector<8x32xf32>
    %63 = tpu.matmul %61, %62, %cst_29 {dimension_numbers = #tpu.dot_dimension_numbers<[1], [0], [0], [1], [0, 0, 1, 1], [], []>} : vector<8x8xf32>, vector<8x32xf32>, vector<8x32xf32> -> vector<8x32xf32>
    %64 = vector.extract_strided_slice %39 {offsets = [0, 8], sizes = [8, 8], strides = [1, 1]} : vector<8x32xf32> to vector<8x8xf32>
    %65 = vector.extract_strided_slice %40 {offsets = [0, 8], sizes = [8, 8], strides = [1, 1]} : vector<8x32xf32> to vector<8x8xf32>
    %cst_30 = arith.constant dense<0.000000e+00> : vector<8x8xf32>
    %66 = tpu.matmul %64, %65, %cst_30 {dimension_numbers = #tpu.dot_dimension_numbers<[1], [1], [0], [0], [0, 0, 1, 0], [], []>} : vector<8x8xf32>, vector<8x8xf32>, vector<8x8xf32> -> vector<8x8xf32>
    %cst_31 = arith.constant 0.353553385 : f32
    %67 = vector.broadcast %cst_31 : f32 to vector<8x8xf32>
    %68 = arith.mulf %66, %67 : vector<8x8xf32>
    %69 = vector.broadcast %42 : vector<1x8xf32> to vector<8x8xf32>
    %70 = arith.addf %68, %69 : vector<8x8xf32>
    %cst_32 = arith.constant dense<0xFF800000> : vector<8xf32>
    %71 = vector.multi_reduction <maximumf>, %70, %cst_32 [1] : vector<8x8xf32> to vector<8xf32>
    %72 = vector.shape_cast %71 : vector<8xf32> to vector<8x1xf32>
    %73 = vector.broadcast %72 : vector<8x1xf32> to vector<8x8xf32>
    %74 = arith.subf %70, %73 : vector<8x8xf32>
    %75 = math.exp %74 : vector<8x8xf32>
    %cst_33 = arith.constant dense<0.000000e+00> : vector<8xf32>
    %76 = vector.multi_reduction <add>, %75, %cst_33 [1] : vector<8x8xf32> to vector<8xf32>
    %77 = vector.shape_cast %76 : vector<8xf32> to vector<8x1xf32>
    %78 = tpu.reciprocal %77 {approx = true} : vector<8x1xf32> -> vector<8x1xf32>
    %79 = vector.broadcast %78 : vector<8x1xf32> to vector<8x8xf32>
    %80 = arith.mulf %75, %79 : vector<8x8xf32>
    %81 = vector.extract_strided_slice %41 {offsets = [0, 8], sizes = [8, 8], strides = [1, 1]} : vector<8x32xf32> to vector<8x8xf32>
    %cst_34 = arith.constant dense<0.000000e+00> : vector<8x8xf32>
    %82 = tpu.matmul %80, %81, %cst_34 {dimension_numbers = #tpu.dot_dimension_numbers<[1], [0], [0], [1], [0, 0, 1, 1], [], []>} : vector<8x8xf32>, vector<8x8xf32>, vector<8x8xf32> -> vector<8x8xf32>
    %83 = vector.extract_strided_slice %38 {offsets = [8, 0], sizes = [8, 32], strides = [1, 1]} : vector<32x32xf32> to vector<8x32xf32>
    %cst_35 = arith.constant dense<0.000000e+00> : vector<8x32xf32>
    %84 = tpu.matmul %82, %83, %cst_35 {dimension_numbers = #tpu.dot_dimension_numbers<[1], [0], [0], [1], [0, 0, 1, 1], [], []>} : vector<8x8xf32>, vector<8x32xf32>, vector<8x32xf32> -> vector<8x32xf32>
    %85 = arith.addf %63, %84 : vector<8x32xf32>
    %86 = vector.extract_strided_slice %39 {offsets = [0, 16], sizes = [8, 8], strides = [1, 1]} : vector<8x32xf32> to vector<8x8xf32>
    %87 = vector.extract_strided_slice %40 {offsets = [0, 16], sizes = [8, 8], strides = [1, 1]} : vector<8x32xf32> to vector<8x8xf32>
    %cst_36 = arith.constant dense<0.000000e+00> : vector<8x8xf32>
    %88 = tpu.matmul %86, %87, %cst_36 {dimension_numbers = #tpu.dot_dimension_numbers<[1], [1], [0], [0], [0, 0, 1, 0], [], []>} : vector<8x8xf32>, vector<8x8xf32>, vector<8x8xf32> -> vector<8x8xf32>
    %cst_37 = arith.constant 0.353553385 : f32
    %89 = vector.broadcast %cst_37 : f32 to vector<8x8xf32>
    %90 = arith.mulf %88, %89 : vector<8x8xf32>
    %91 = vector.broadcast %42 : vector<1x8xf32> to vector<8x8xf32>
    %92 = arith.addf %90, %91 : vector<8x8xf32>
    %cst_38 = arith.constant dense<0xFF800000> : vector<8xf32>
    %93 = vector.multi_reduction <maximumf>, %92, %cst_38 [1] : vector<8x8xf32> to vector<8xf32>
    %94 = vector.shape_cast %93 : vector<8xf32> to vector<8x1xf32>
    %95 = vector.broadcast %94 : vector<8x1xf32> to vector<8x8xf32>
    %96 = arith.subf %92, %95 : vector<8x8xf32>
    %97 = math.exp %96 : vector<8x8xf32>
    %cst_39 = arith.constant dense<0.000000e+00> : vector<8xf32>
    %98 = vector.multi_reduction <add>, %97, %cst_39 [1] : vector<8x8xf32> to vector<8xf32>
    %99 = vector.shape_cast %98 : vector<8xf32> to vector<8x1xf32>
    %100 = tpu.reciprocal %99 {approx = true} : vector<8x1xf32> -> vector<8x1xf32>
    %101 = vector.broadcast %100 : vector<8x1xf32> to vector<8x8xf32>
    %102 = arith.mulf %97, %101 : vector<8x8xf32>
    %103 = vector.extract_strided_slice %41 {offsets = [0, 16], sizes = [8, 8], strides = [1, 1]} : vector<8x32xf32> to vector<8x8xf32>
    %cst_40 = arith.constant dense<0.000000e+00> : vector<8x8xf32>
    %104 = tpu.matmul %102, %103, %cst_40 {dimension_numbers = #tpu.dot_dimension_numbers<[1], [0], [0], [1], [0, 0, 1, 1], [], []>} : vector<8x8xf32>, vector<8x8xf32>, vector<8x8xf32> -> vector<8x8xf32>
    %105 = vector.extract_strided_slice %38 {offsets = [16, 0], sizes = [8, 32], strides = [1, 1]} : vector<32x32xf32> to vector<8x32xf32>
    %cst_41 = arith.constant dense<0.000000e+00> : vector<8x32xf32>
    %106 = tpu.matmul %104, %105, %cst_41 {dimension_numbers = #tpu.dot_dimension_numbers<[1], [0], [0], [1], [0, 0, 1, 1], [], []>} : vector<8x8xf32>, vector<8x32xf32>, vector<8x32xf32> -> vector<8x32xf32>
    %107 = arith.addf %85, %106 : vector<8x32xf32>
    %108 = vector.extract_strided_slice %39 {offsets = [0, 24], sizes = [8, 8], strides = [1, 1]} : vector<8x32xf32> to vector<8x8xf32>
    %109 = vector.extract_strided_slice %40 {offsets = [0, 24], sizes = [8, 8], strides = [1, 1]} : vector<8x32xf32> to vector<8x8xf32>
    %cst_42 = arith.constant dense<0.000000e+00> : vector<8x8xf32>
    %110 = tpu.matmul %108, %109, %cst_42 {dimension_numbers = #tpu.dot_dimension_numbers<[1], [1], [0], [0], [0, 0, 1, 0], [], []>} : vector<8x8xf32>, vector<8x8xf32>, vector<8x8xf32> -> vector<8x8xf32>
    %cst_43 = arith.constant 0.353553385 : f32
    %111 = vector.broadcast %cst_43 : f32 to vector<8x8xf32>
    %112 = arith.mulf %110, %111 : vector<8x8xf32>
    %113 = vector.broadcast %42 : vector<1x8xf32> to vector<8x8xf32>
    %114 = arith.addf %112, %113 : vector<8x8xf32>
    %cst_44 = arith.constant dense<0xFF800000> : vector<8xf32>
    %115 = vector.multi_reduction <maximumf>, %114, %cst_44 [1] : vector<8x8xf32> to vector<8xf32>
    %116 = vector.shape_cast %115 : vector<8xf32> to vector<8x1xf32>
    %117 = vector.broadcast %116 : vector<8x1xf32> to vector<8x8xf32>
    %118 = arith.subf %114, %117 : vector<8x8xf32>
    %119 = math.exp %118 : vector<8x8xf32>
    %cst_45 = arith.constant dense<0.000000e+00> : vector<8xf32>
    %120 = vector.multi_reduction <add>, %119, %cst_45 [1] : vector<8x8xf32> to vector<8xf32>
    %121 = vector.shape_cast %120 : vector<8xf32> to vector<8x1xf32>
    %122 = tpu.reciprocal %121 {approx = true} : vector<8x1xf32> -> vector<8x1xf32>
    %123 = vector.broadcast %122 : vector<8x1xf32> to vector<8x8xf32>
    %124 = arith.mulf %119, %123 : vector<8x8xf32>
    %125 = vector.extract_strided_slice %41 {offsets = [0, 24], sizes = [8, 8], strides = [1, 1]} : vector<8x32xf32> to vector<8x8xf32>
    %cst_46 = arith.constant dense<0.000000e+00> : vector<8x8xf32>
    %126 = tpu.matmul %124, %125, %cst_46 {dimension_numbers = #tpu.dot_dimension_numbers<[1], [0], [0], [1], [0, 0, 1, 1], [], []>} : vector<8x8xf32>, vector<8x8xf32>, vector<8x8xf32> -> vector<8x8xf32>
    %127 = vector.extract_strided_slice %38 {offsets = [24, 0], sizes = [8, 32], strides = [1, 1]} : vector<32x32xf32> to vector<8x32xf32>
    %cst_47 = arith.constant dense<0.000000e+00> : vector<8x32xf32>
    %128 = tpu.matmul %126, %127, %cst_47 {dimension_numbers = #tpu.dot_dimension_numbers<[1], [0], [0], [1], [0, 0, 1, 1], [], []>} : vector<8x8xf32>, vector<8x32xf32>, vector<8x32xf32> -> vector<8x32xf32>
    %129 = arith.addf %107, %128 : vector<8x32xf32>
    %c0_48 = arith.constant 0 : index
    %c0_49 = arith.constant 0 : index
    %130 = vector.load %arg74[%c0_48, %c0_49] : memref<16x32xf32, #tpu.memory_space<vmem>>, vector<8x32xf32>
    tpu.vector_store %arg74[%c0_48, %c0_49], %129 {strides = array<i32>} : memref<16x32xf32, #tpu.memory_space<vmem>>, vector<8x32xf32>,
    %131 = vector.extract_strided_slice %35 {offsets = [8, 0], sizes = [8, 32], strides = [1, 1]} : vector<16x32xf32> to vector<8x32xf32>
    %132 = vector.extract_strided_slice %36 {offsets = [8, 0], sizes = [8, 32], strides = [1, 1]} : vector<16x32xf32> to vector<8x32xf32>
    %133 = vector.extract_strided_slice %37 {offsets = [8, 0], sizes = [8, 32], strides = [1, 1]} : vector<16x32xf32> to vector<8x32xf32>
    %134 = vector.extract_strided_slice %7 {offsets = [1, 0], sizes = [1, 8], strides = [1, 1]} : vector<2x8xf32> to vector<1x8xf32>
    %135 = vector.extract_strided_slice %131 {offsets = [0, 0], sizes = [8, 8], strides = [1, 1]} : vector<8x32xf32> to vector<8x8xf32>
    %136 = vector.extract_strided_slice %132 {offsets = [0, 0], sizes = [8, 8], strides = [1, 1]} : vector<8x32xf32> to vector<8x8xf32>
    %cst_50 = arith.constant dense<0.000000e+00> : vector<8x8xf32>
    %137 = tpu.matmul %135, %136, %cst_50 {dimension_numbers = #tpu.dot_dimension_numbers<[1], [1], [0], [0], [0, 0, 1, 0], [], []>} : vector<8x8xf32>, vector<8x8xf32>, vector<8x8xf32> -> vector<8x8xf32>
    %cst_51 = arith.constant 0.353553385 : f32
    %138 = vector.broadcast %cst_51 : f32 to vector<8x8xf32>
    %139 = arith.mulf %137, %138 : vector<8x8xf32>
    %140 = vector.broadcast %134 : vector<1x8xf32> to vector<8x8xf32>
    %141 = arith.addf %139, %140 : vector<8x8xf32>
    %cst_52 = arith.constant dense<0xFF800000> : vector<8xf32>
    %142 = vector.multi_reduction <maximumf>, %141, %cst_52 [1] : vector<8x8xf32> to vector<8xf32>
    %143 = vector.shape_cast %142 : vector<8xf32> to vector<8x1xf32>
    %144 = vector.broadcast %143 : vector<8x1xf32> to vector<8x8xf32>
    %145 = arith.subf %141, %144 : vector<8x8xf32>
    %146 = math.exp %145 : vector<8x8xf32>
    %cst_53 = arith.constant dense<0.000000e+00> : vector<8xf32>
    %147 = vector.multi_reduction <add>, %146, %cst_53 [1] : vector<8x8xf32> to vector<8xf32>
    %148 = vector.shape_cast %147 : vector<8xf32> to vector<8x1xf32>
    %149 = tpu.reciprocal %148 {approx = true} : vector<8x1xf32> -> vector<8x1xf32>
    %150 = vector.broadcast %149 : vector<8x1xf32> to vector<8x8xf32>
    %151 = arith.mulf %146, %150 : vector<8x8xf32>
    %152 = vector.extract_strided_slice %133 {offsets = [0, 0], sizes = [8, 8], strides = [1, 1]} : vector<8x32xf32> to vector<8x8xf32>
    %cst_54 = arith.constant dense<0.000000e+00> : vector<8x8xf32>
    %153 = tpu.matmul %151, %152, %cst_54 {dimension_numbers = #tpu.dot_dimension_numbers<[1], [0], [0], [1], [0, 0, 1, 1], [], []>} : vector<8x8xf32>, vector<8x8xf32>, vector<8x8xf32> -> vector<8x8xf32>
    %154 = vector.extract_strided_slice %38 {offsets = [0, 0], sizes = [8, 32], strides = [1, 1]} : vector<32x32xf32> to vector<8x32xf32>
    %cst_55 = arith.constant dense<0.000000e+00> : vector<8x32xf32>
    %155 = tpu.matmul %153, %154, %cst_55 {dimension_numbers = #tpu.dot_dimension_numbers<[1], [0], [0], [1], [0, 0, 1, 1], [], []>} : vector<8x8xf32>, vector<8x32xf32>, vector<8x32xf32> -> vector<8x32xf32>
    %156 = vector.extract_strided_slice %131 {offsets = [0, 8], sizes = [8, 8], strides = [1, 1]} : vector<8x32xf32> to vector<8x8xf32>
    %157 = vector.extract_strided_slice %132 {offsets = [0, 8], sizes = [8, 8], strides = [1, 1]} : vector<8x32xf32> to vector<8x8xf32>
    %cst_56 = arith.constant dense<0.000000e+00> : vector<8x8xf32>
    %158 = tpu.matmul %156, %157, %cst_56 {dimension_numbers = #tpu.dot_dimension_numbers<[1], [1], [0], [0], [0, 0, 1, 0], [], []>} : vector<8x8xf32>, vector<8x8xf32>, vector<8x8xf32> -> vector<8x8xf32>
    %cst_57 = arith.constant 0.353553385 : f32
    %159 = vector.broadcast %cst_57 : f32 to vector<8x8xf32>
    %160 = arith.mulf %158, %159 : vector<8x8xf32>
    %161 = vector.broadcast %134 : vector<1x8xf32> to vector<8x8xf32>
    %162 = arith.addf %160, %161 : vector<8x8xf32>
    %cst_58 = arith.constant dense<0xFF800000> : vector<8xf32>
    %163 = vector.multi_reduction <maximumf>, %162, %cst_58 [1] : vector<8x8xf32> to vector<8xf32>
    %164 = vector.shape_cast %163 : vector<8xf32> to vector<8x1xf32>
    %165 = vector.broadcast %164 : vector<8x1xf32> to vector<8x8xf32>
    %166 = arith.subf %162, %165 : vector<8x8xf32>
    %167 = math.exp %166 : vector<8x8xf32>
    %cst_59 = arith.constant dense<0.000000e+00> : vector<8xf32>
    %168 = vector.multi_reduction <add>, %167, %cst_59 [1] : vector<8x8xf32> to vector<8xf32>
    %169 = vector.shape_cast %168 : vector<8xf32> to vector<8x1xf32>
    %170 = tpu.reciprocal %169 {approx = true} : vector<8x1xf32> -> vector<8x1xf32>
    %171 = vector.broadcast %170 : vector<8x1xf32> to vector<8x8xf32>
    %172 = arith.mulf %167, %171 : vector<8x8xf32>
    %173 = vector.extract_strided_slice %133 {offsets = [0, 8], sizes = [8, 8], strides = [1, 1]} : vector<8x32xf32> to vector<8x8xf32>
    %cst_60 = arith.constant dense<0.000000e+00> : vector<8x8xf32>
    %174 = tpu.matmul %172, %173, %cst_60 {dimension_numbers = #tpu.dot_dimension_numbers<[1], [0], [0], [1], [0, 0, 1, 1], [], []>} : vector<8x8xf32>, vector<8x8xf32>, vector<8x8xf32> -> vector<8x8xf32>
    %175 = vector.extract_strided_slice %38 {offsets = [8, 0], sizes = [8, 32], strides = [1, 1]} : vector<32x32xf32> to vector<8x32xf32>
    %cst_61 = arith.constant dense<0.000000e+00> : vector<8x32xf32>
    %176 = tpu.matmul %174, %175, %cst_61 {dimension_numbers = #tpu.dot_dimension_numbers<[1], [0], [0], [1], [0, 0, 1, 1], [], []>} : vector<8x8xf32>, vector<8x32xf32>, vector<8x32xf32> -> vector<8x32xf32>
    %177 = arith.addf %155, %176 : vector<8x32xf32>
    %178 = vector.extract_strided_slice %131 {offsets = [0, 16], sizes = [8, 8], strides = [1, 1]} : vector<8x32xf32> to vector<8x8xf32>
    %179 = vector.extract_strided_slice %132 {offsets = [0, 16], sizes = [8, 8], strides = [1, 1]} : vector<8x32xf32> to vector<8x8xf32>
    %cst_62 = arith.constant dense<0.000000e+00> : vector<8x8xf32>
    %180 = tpu.matmul %178, %179, %cst_62 {dimension_numbers = #tpu.dot_dimension_numbers<[1], [1], [0], [0], [0, 0, 1, 0], [], []>} : vector<8x8xf32>, vector<8x8xf32>, vector<8x8xf32> -> vector<8x8xf32>
    %cst_63 = arith.constant 0.353553385 : f32
    %181 = vector.broadcast %cst_63 : f32 to vector<8x8xf32>
    %182 = arith.mulf %180, %181 : vector<8x8xf32>
    %183 = vector.broadcast %134 : vector<1x8xf32> to vector<8x8xf32>
    %184 = arith.addf %182, %183 : vector<8x8xf32>
    %cst_64 = arith.constant dense<0xFF800000> : vector<8xf32>
    %185 = vector.multi_reduction <maximumf>, %184, %cst_64 [1] : vector<8x8xf32> to vector<8xf32>
    %186 = vector.shape_cast %185 : vector<8xf32> to vector<8x1xf32>
    %187 = vector.broadcast %186 : vector<8x1xf32> to vector<8x8xf32>
    %188 = arith.subf %184, %187 : vector<8x8xf32>
    %189 = math.exp %188 : vector<8x8xf32>
    %cst_65 = arith.constant dense<0.000000e+00> : vector<8xf32>
    %190 = vector.multi_reduction <add>, %189, %cst_65 [1] : vector<8x8xf32> to vector<8xf32>
    %191 = vector.shape_cast %190 : vector<8xf32> to vector<8x1xf32>
    %192 = tpu.reciprocal %191 {approx = true} : vector<8x1xf32> -> vector<8x1xf32>
    %193 = vector.broadcast %192 : vector<8x1xf32> to vector<8x8xf32>
    %194 = arith.mulf %189, %193 : vector<8x8xf32>
    %195 = vector.extract_strided_slice %133 {offsets = [0, 16], sizes = [8, 8], strides = [1, 1]} : vector<8x32xf32> to vector<8x8xf32>
    %cst_66 = arith.constant dense<0.000000e+00> : vector<8x8xf32>
    %196 = tpu.matmul %194, %195, %cst_66 {dimension_numbers = #tpu.dot_dimension_numbers<[1], [0], [0], [1], [0, 0, 1, 1], [], []>} : vector<8x8xf32>, vector<8x8xf32>, vector<8x8xf32> -> vector<8x8xf32>
    %197 = vector.extract_strided_slice %38 {offsets = [16, 0], sizes = [8, 32], strides = [1, 1]} : vector<32x32xf32> to vector<8x32xf32>
    %cst_67 = arith.constant dense<0.000000e+00> : vector<8x32xf32>
    %198 = tpu.matmul %196, %197, %cst_67 {dimension_numbers = #tpu.dot_dimension_numbers<[1], [0], [0], [1], [0, 0, 1, 1], [], []>} : vector<8x8xf32>, vector<8x32xf32>, vector<8x32xf32> -> vector<8x32xf32>
    %199 = arith.addf %177, %198 : vector<8x32xf32>
    %200 = vector.extract_strided_slice %131 {offsets = [0, 24], sizes = [8, 8], strides = [1, 1]} : vector<8x32xf32> to vector<8x8xf32>
    %201 = vector.extract_strided_slice %132 {offsets = [0, 24], sizes = [8, 8], strides = [1, 1]} : vector<8x32xf32> to vector<8x8xf32>
    %cst_68 = arith.constant dense<0.000000e+00> : vector<8x8xf32>
    %202 = tpu.matmul %200, %201, %cst_68 {dimension_numbers = #tpu.dot_dimension_numbers<[1], [1], [0], [0], [0, 0, 1, 0], [], []>} : vector<8x8xf32>, vector<8x8xf32>, vector<8x8xf32> -> vector<8x8xf32>
    %cst_69 = arith.constant 0.353553385 : f32
    %203 = vector.broadcast %cst_69 : f32 to vector<8x8xf32>
    %204 = arith.mulf %202, %203 : vector<8x8xf32>
    %205 = vector.broadcast %134 : vector<1x8xf32> to vector<8x8xf32>
    %206 = arith.addf %204, %205 : vector<8x8xf32>
    %cst_70 = arith.constant dense<0xFF800000> : vector<8xf32>
    %207 = vector.multi_reduction <maximumf>, %206, %cst_70 [1] : vector<8x8xf32> to vector<8xf32>
    %208 = vector.shape_cast %207 : vector<8xf32> to vector<8x1xf32>
    %209 = vector.broadcast %208 : vector<8x1xf32> to vector<8x8xf32>
    %210 = arith.subf %206, %209 : vector<8x8xf32>
    %211 = math.exp %210 : vector<8x8xf32>
    %cst_71 = arith.constant dense<0.000000e+00> : vector<8xf32>
    %212 = vector.multi_reduction <add>, %211, %cst_71 [1] : vector<8x8xf32> to vector<8xf32>
    %213 = vector.shape_cast %212 : vector<8xf32> to vector<8x1xf32>
    %214 = tpu.reciprocal %213 {approx = true} : vector<8x1xf32> -> vector<8x1xf32>
    %215 = vector.broadcast %214 : vector<8x1xf32> to vector<8x8xf32>
    %216 = arith.mulf %211, %215 : vector<8x8xf32>
    %217 = vector.extract_strided_slice %133 {offsets = [0, 24], sizes = [8, 8], strides = [1, 1]} : vector<8x32xf32> to vector<8x8xf32>
    %cst_72 = arith.constant dense<0.000000e+00> : vector<8x8xf32>
    %218 = tpu.matmul %216, %217, %cst_72 {dimension_numbers = #tpu.dot_dimension_numbers<[1], [0], [0], [1], [0, 0, 1, 1], [], []>} : vector<8x8xf32>, vector<8x8xf32>, vector<8x8xf32> -> vector<8x8xf32>
    %219 = vector.extract_strided_slice %38 {offsets = [24, 0], sizes = [8, 32], strides = [1, 1]} : vector<32x32xf32> to vector<8x32xf32>
    %cst_73 = arith.constant dense<0.000000e+00> : vector<8x32xf32>
    %220 = tpu.matmul %218, %219, %cst_73 {dimension_numbers = #tpu.dot_dimension_numbers<[1], [0], [0], [1], [0, 0, 1, 1], [], []>} : vector<8x8xf32>, vector<8x32xf32>, vector<8x32xf32> -> vector<8x32xf32>
    %221 = arith.addf %199, %220 : vector<8x32xf32>
    %c8 = arith.constant 8 : index
    %c0_74 = arith.constant 0 : index
    %222 = vector.load %arg74[%c8, %c0_74] : memref<16x32xf32, #tpu.memory_space<vmem>>, vector<8x32xf32>
    tpu.vector_store %arg74[%c8, %c0_74], %221 {strides = array<i32>} : memref<16x32xf32, #tpu.memory_space<vmem>>, vector<8x32xf32>,
    %c0_75 = arith.constant 0 : index
    %c0_76 = arith.constant 0 : index
    %223 = vector.load %arg74[%c0_75, %c0_76] : memref<16x32xf32, #tpu.memory_space<vmem>>, vector<16x32xf32>
    %c0_77 = arith.constant 0 : index
    %c0_78 = arith.constant 0 : index
    %224 = vector.load %arg49[%c0_77, %c0_78] : memref<1x32xf32, #tpu.memory_space<vmem>>, vector<1x32xf32>
    %225 = vector.broadcast %224 : vector<1x32xf32> to vector<16x32xf32>
    %226 = arith.addf %223, %225 : vector<16x32xf32>
    %227 = arith.addf %29, %226 : vector<16x32xf32>
    %cst_79 = arith.constant dense<0.000000e+00> : vector<16xf32>
    %228 = vector.multi_reduction <add>, %227, %cst_79 [1] : vector<16x32xf32> to vector<16xf32>
    %229 = vector.shape_cast %228 : vector<16xf32> to vector<16x1xf32>
    %cst_80 = arith.constant 3.200000e+01 : f32
    %230 = vector.broadcast %cst_80 : f32 to vector<16x1xf32>
    %231 = arith.divf %229, %230 : vector<16x1xf32>
    %232 = vector.broadcast %231 : vector<16x1xf32> to vector<16x32xf32>
    %233 = arith.subf %227, %232 : vector<16x32xf32>
    %234 = arith.mulf %233, %233 : vector<16x32xf32>
    %cst_81 = arith.constant dense<0.000000e+00> : vector<16xf32>
    %235 = vector.multi_reduction <add>, %234, %cst_81 [1] : vector<16x32xf32> to vector<16xf32>
    %236 = vector.shape_cast %235 : vector<16xf32> to vector<16x1xf32>
    %cst_82 = arith.constant 3.200000e+01 : f32
    %237 = vector.broadcast %cst_82 : f32 to vector<16x1xf32>
    %238 = arith.divf %236, %237 : vector<16x1xf32>
    %cst_83 = arith.constant 9.99999974E-6 : f32
    %239 = vector.broadcast %cst_83 : f32 to vector<16x1xf32>
    %240 = arith.addf %238, %239 : vector<16x1xf32>
    %241 = math.rsqrt %240 : vector<16x1xf32>
    %242 = vector.broadcast %241 : vector<16x1xf32> to vector<16x32xf32>
    %243 = arith.mulf %233, %242 : vector<16x32xf32>
    %c0_84 = arith.constant 0 : index
    %c0_85 = arith.constant 0 : index
    %244 = vector.load %arg46[%c0_84, %c0_85] : memref<1x32xf32, #tpu.memory_space<vmem>>, vector<1x32xf32>
    %245 = vector.broadcast %244 : vector<1x32xf32> to vector<16x32xf32>
    %246 = arith.mulf %243, %245 : vector<16x32xf32>
    %c0_86 = arith.constant 0 : index
    %c0_87 = arith.constant 0 : index
    %247 = vector.load %arg45[%c0_86, %c0_87] : memref<1x32xf32, #tpu.memory_space<vmem>>, vector<1x32xf32>
    %248 = vector.broadcast %247 : vector<1x32xf32> to vector<16x32xf32>
    %249 = arith.addf %246, %248 : vector<16x32xf32>
    %c0_88 = arith.constant 0 : index
    %c0_89 = arith.constant 0 : index
    %250 = vector.load %arg42[%c0_88, %c0_89] : memref<32x64xf32, #tpu.memory_space<vmem>>, vector<32x64xf32>
    %cst_90 = arith.constant dense<0.000000e+00> : vector<16x64xf32>
    %251 = tpu.matmul %249, %250, %cst_90 {dimension_numbers = #tpu.dot_dimension_numbers<[1], [0], [0], [1], [0, 0, 1, 1], [], []>} : vector<16x32xf32>, vector<32x64xf32>, vector<16x64xf32> -> vector<16x64xf32>
    %c0_91 = arith.constant 0 : index
    %c0_92 = arith.constant 0 : index
    %252 = vector.load %arg41[%c0_91, %c0_92] : memref<1x64xf32, #tpu.memory_space<vmem>>, vector<1x64xf32>
    %253 = vector.broadcast %252 : vector<1x64xf32> to vector<16x64xf32>
    %254 = arith.addf %251, %253 : vector<16x64xf32>
    %cst_93 = arith.constant 0.000000e+00 : f32
    %255 = vector.broadcast %cst_93 : f32 to vector<16x64xf32>
    %256 = arith.maximumf %254, %255 : vector<16x64xf32>
    %c0_94 = arith.constant 0 : index
    %c0_95 = arith.constant 0 : index
    %257 = vector.load %arg44[%c0_94, %c0_95] : memref<64x32xf32, #tpu.memory_space<vmem>>, vector<64x32xf32>
    %cst_96 = arith.constant dense<0.000000e+00> : vector<16x32xf32>
    %258 = tpu.matmul %256, %257, %cst_96 {dimension_numbers = #tpu.dot_dimension_numbers<[1], [0], [0], [1], [0, 0, 1, 1], [], []>} : vector<16x64xf32>, vector<64x32xf32>, vector<16x32xf32> -> vector<16x32xf32>
    %c0_97 = arith.constant 0 : index
    %c0_98 = arith.constant 0 : index
    %259 = vector.load %arg43[%c0_97, %c0_98] : memref<1x32xf32, #tpu.memory_space<vmem>>, vector<1x32xf32>
    %260 = vector.broadcast %259 : vector<1x32xf32> to vector<16x32xf32>
    %261 = arith.addf %258, %260 : vector<16x32xf32>
    %262 = arith.addf %249, %261 : vector<16x32xf32>
    %cst_99 = arith.constant dense<0.000000e+00> : vector<16xf32>
    %263 = vector.multi_reduction <add>, %262, %cst_99 [1] : vector<16x32xf32> to vector<16xf32>
    %264 = vector.shape_cast %263 : vector<16xf32> to vector<16x1xf32>
    %cst_100 = arith.constant 3.200000e+01 : f32
    %265 = vector.broadcast %cst_100 : f32 to vector<16x1xf32>
    %266 = arith.divf %264, %265 : vector<16x1xf32>
    %267 = vector.broadcast %266 : vector<16x1xf32> to vector<16x32xf32>
    %268 = arith.subf %262, %267 : vector<16x32xf32>
    %269 = arith.mulf %268, %268 : vector<16x32xf32>
    %cst_101 = arith.constant dense<0.000000e+00> : vector<16xf32>
    %270 = vector.multi_reduction <add>, %269, %cst_101 [1] : vector<16x32xf32> to vector<16xf32>
    %271 = vector.shape_cast %270 : vector<16xf32> to vector<16x1xf32>
    %cst_102 = arith.constant 3.200000e+01 : f32
    %272 = vector.broadcast %cst_102 : f32 to vector<16x1xf32>
    %273 = arith.divf %271, %272 : vector<16x1xf32>
    %cst_103 = arith.constant 9.99999974E-6 : f32
    %274 = vector.broadcast %cst_103 : f32 to vector<16x1xf32>
    %275 = arith.addf %273, %274 : vector<16x1xf32>
    %276 = math.rsqrt %275 : vector<16x1xf32>
    %277 = vector.broadcast %276 : vector<16x1xf32> to vector<16x32xf32>
    %278 = arith.mulf %268, %277 : vector<16x32xf32>
    %c0_104 = arith.constant 0 : index
    %c0_105 = arith.constant 0 : index
    %279 = vector.load %arg48[%c0_104, %c0_105] : memref<1x32xf32, #tpu.memory_space<vmem>>, vector<1x32xf32>
    %280 = vector.broadcast %279 : vector<1x32xf32> to vector<16x32xf32>
    %281 = arith.mulf %278, %280 : vector<16x32xf32>
    %c0_106 = arith.constant 0 : index
    %c0_107 = arith.constant 0 : index
    %282 = vector.load %arg47[%c0_106, %c0_107] : memref<1x32xf32, #tpu.memory_space<vmem>>, vector<1x32xf32>
    %283 = vector.broadcast %282 : vector<1x32xf32> to vector<16x32xf32>
    %284 = arith.addf %281, %283 : vector<16x32xf32>
    %c0_108 = arith.constant 0 : index
    %c0_109 = arith.constant 0 : index
    %285 = vector.load %arg64[%c0_108, %c0_109] : memref<32x96xf32, #tpu.memory_space<vmem>>, vector<32x96xf32>
    %cst_110 = arith.constant dense<0.000000e+00> : vector<16x96xf32>
    %286 = tpu.matmul %284, %285, %cst_110 {dimension_numbers = #tpu.dot_dimension_numbers<[1], [0], [0], [1], [0, 0, 1, 1], [], []>} : vector<16x32xf32>, vector<32x96xf32>, vector<16x96xf32> -> vector<16x96xf32>
    %c0_111 = arith.constant 0 : index
    %c0_112 = arith.constant 0 : index
    %287 = vector.load %arg62[%c0_111, %c0_112] : memref<1x96xf32, #tpu.memory_space<vmem>>, vector<1x96xf32>
    %288 = vector.broadcast %287 : vector<1x96xf32> to vector<16x96xf32>
    %289 = arith.addf %286, %288 : vector<16x96xf32>
    %290 = vector.extract_strided_slice %289 {offsets = [0, 0], sizes = [16, 32], strides = [1, 1]} : vector<16x96xf32> to vector<16x32xf32>
    %291 = vector.extract_strided_slice %289 {offsets = [0, 32], sizes = [16, 32], strides = [1, 1]} : vector<16x96xf32> to vector<16x32xf32>
    %292 = vector.extract_strided_slice %289 {offsets = [0, 64], sizes = [16, 32], strides = [1, 1]} : vector<16x96xf32> to vector<16x32xf32>
    %c0_113 = arith.constant 0 : index
    %c0_114 = arith.constant 0 : index
    %293 = vector.load %arg63[%c0_113, %c0_114] : memref<32x32xf32, #tpu.memory_space<vmem>>, vector<32x32xf32>
    %294 = vector.extract_strided_slice %290 {offsets = [0, 0], sizes = [8, 32], strides = [1, 1]} : vector<16x32xf32> to vector<8x32xf32>
    %295 = vector.extract_strided_slice %291 {offsets = [0, 0], sizes = [8, 32], strides = [1, 1]} : vector<16x32xf32> to vector<8x32xf32>
    %296 = vector.extract_strided_slice %292 {offsets = [0, 0], sizes = [8, 32], strides = [1, 1]} : vector<16x32xf32> to vector<8x32xf32>
    %297 = vector.extract_strided_slice %7 {offsets = [0, 0], sizes = [1, 8], strides = [1, 1]} : vector<2x8xf32> to vector<1x8xf32>
    %298 = vector.extract_strided_slice %294 {offsets = [0, 0], sizes = [8, 8], strides = [1, 1]} : vector<8x32xf32> to vector<8x8xf32>
    %299 = vector.extract_strided_slice %295 {offsets = [0, 0], sizes = [8, 8], strides = [1, 1]} : vector<8x32xf32> to vector<8x8xf32>
    %cst_115 = arith.constant dense<0.000000e+00> : vector<8x8xf32>
    %300 = tpu.matmul %298, %299, %cst_115 {dimension_numbers = #tpu.dot_dimension_numbers<[1], [1], [0], [0], [0, 0, 1, 0], [], []>} : vector<8x8xf32>, vector<8x8xf32>, vector<8x8xf32> -> vector<8x8xf32>
    %cst_116 = arith.constant 0.353553385 : f32
    %301 = vector.broadcast %cst_116 : f32 to vector<8x8xf32>
    %302 = arith.mulf %300, %301 : vector<8x8xf32>
    %303 = vector.broadcast %297 : vector<1x8xf32> to vector<8x8xf32>
    %304 = arith.addf %302, %303 : vector<8x8xf32>
    %cst_117 = arith.constant dense<0xFF800000> : vector<8xf32>
    %305 = vector.multi_reduction <maximumf>, %304, %cst_117 [1] : vector<8x8xf32> to vector<8xf32>
    %306 = vector.shape_cast %305 : vector<8xf32> to vector<8x1xf32>
    %307 = vector.broadcast %306 : vector<8x1xf32> to vector<8x8xf32>
    %308 = arith.subf %304, %307 : vector<8x8xf32>
    %309 = math.exp %308 : vector<8x8xf32>
    %cst_118 = arith.constant dense<0.000000e+00> : vector<8xf32>
    %310 = vector.multi_reduction <add>, %309, %cst_118 [1] : vector<8x8xf32> to vector<8xf32>
    %311 = vector.shape_cast %310 : vector<8xf32> to vector<8x1xf32>
    %312 = tpu.reciprocal %311 {approx = true} : vector<8x1xf32> -> vector<8x1xf32>
    %313 = vector.broadcast %312 : vector<8x1xf32> to vector<8x8xf32>
    %314 = arith.mulf %309, %313 : vector<8x8xf32>
    %315 = vector.extract_strided_slice %296 {offsets = [0, 0], sizes = [8, 8], strides = [1, 1]} : vector<8x32xf32> to vector<8x8xf32>
    %cst_119 = arith.constant dense<0.000000e+00> : vector<8x8xf32>
    %316 = tpu.matmul %314, %315, %cst_119 {dimension_numbers = #tpu.dot_dimension_numbers<[1], [0], [0], [1], [0, 0, 1, 1], [], []>} : vector<8x8xf32>, vector<8x8xf32>, vector<8x8xf32> -> vector<8x8xf32>
    %317 = vector.extract_strided_slice %293 {offsets = [0, 0], sizes = [8, 32], strides = [1, 1]} : vector<32x32xf32> to vector<8x32xf32>
    %cst_120 = arith.constant dense<0.000000e+00> : vector<8x32xf32>
    %318 = tpu.matmul %316, %317, %cst_120 {dimension_numbers = #tpu.dot_dimension_numbers<[1], [0], [0], [1], [0, 0, 1, 1], [], []>} : vector<8x8xf32>, vector<8x32xf32>, vector<8x32xf32> -> vector<8x32xf32>
    %319 = vector.extract_strided_slice %294 {offsets = [0, 8], sizes = [8, 8], strides = [1, 1]} : vector<8x32xf32> to vector<8x8xf32>
    %320 = vector.extract_strided_slice %295 {offsets = [0, 8], sizes = [8, 8], strides = [1, 1]} : vector<8x32xf32> to vector<8x8xf32>
    %cst_121 = arith.constant dense<0.000000e+00> : vector<8x8xf32>
    %321 = tpu.matmul %319, %320, %cst_121 {dimension_numbers = #tpu.dot_dimension_numbers<[1], [1], [0], [0], [0, 0, 1, 0], [], []>} : vector<8x8xf32>, vector<8x8xf32>, vector<8x8xf32> -> vector<8x8xf32>
    %cst_122 = arith.constant 0.353553385 : f32
    %322 = vector.broadcast %cst_122 : f32 to vector<8x8xf32>
    %323 = arith.mulf %321, %322 : vector<8x8xf32>
    %324 = vector.broadcast %297 : vector<1x8xf32> to vector<8x8xf32>
    %325 = arith.addf %323, %324 : vector<8x8xf32>
    %cst_123 = arith.constant dense<0xFF800000> : vector<8xf32>
    %326 = vector.multi_reduction <maximumf>, %325, %cst_123 [1] : vector<8x8xf32> to vector<8xf32>
    %327 = vector.shape_cast %326 : vector<8xf32> to vector<8x1xf32>
    %328 = vector.broadcast %327 : vector<8x1xf32> to vector<8x8xf32>
    %329 = arith.subf %325, %328 : vector<8x8xf32>
    %330 = math.exp %329 : vector<8x8xf32>
    %cst_124 = arith.constant dense<0.000000e+00> : vector<8xf32>
    %331 = vector.multi_reduction <add>, %330, %cst_124 [1] : vector<8x8xf32> to vector<8xf32>
    %332 = vector.shape_cast %331 : vector<8xf32> to vector<8x1xf32>
    %333 = tpu.reciprocal %332 {approx = true} : vector<8x1xf32> -> vector<8x1xf32>
    %334 = vector.broadcast %333 : vector<8x1xf32> to vector<8x8xf32>
    %335 = arith.mulf %330, %334 : vector<8x8xf32>
    %336 = vector.extract_strided_slice %296 {offsets = [0, 8], sizes = [8, 8], strides = [1, 1]} : vector<8x32xf32> to vector<8x8xf32>
    %cst_125 = arith.constant dense<0.000000e+00> : vector<8x8xf32>
    %337 = tpu.matmul %335, %336, %cst_125 {dimension_numbers = #tpu.dot_dimension_numbers<[1], [0], [0], [1], [0, 0, 1, 1], [], []>} : vector<8x8xf32>, vector<8x8xf32>, vector<8x8xf32> -> vector<8x8xf32>
    %338 = vector.extract_strided_slice %293 {offsets = [8, 0], sizes = [8, 32], strides = [1, 1]} : vector<32x32xf32> to vector<8x32xf32>
    %cst_126 = arith.constant dense<0.000000e+00> : vector<8x32xf32>
    %339 = tpu.matmul %337, %338, %cst_126 {dimension_numbers = #tpu.dot_dimension_numbers<[1], [0], [0], [1], [0, 0, 1, 1], [], []>} : vector<8x8xf32>, vector<8x32xf32>, vector<8x32xf32> -> vector<8x32xf32>
    %340 = arith.addf %318, %339 : vector<8x32xf32>
    %341 = vector.extract_strided_slice %294 {offsets = [0, 16], sizes = [8, 8], strides = [1, 1]} : vector<8x32xf32> to vector<8x8xf32>
    %342 = vector.extract_strided_slice %295 {offsets = [0, 16], sizes = [8, 8], strides = [1, 1]} : vector<8x32xf32> to vector<8x8xf32>
    %cst_127 = arith.constant dense<0.000000e+00> : vector<8x8xf32>
    %343 = tpu.matmul %341, %342, %cst_127 {dimension_numbers = #tpu.dot_dimension_numbers<[1], [1], [0], [0], [0, 0, 1, 0], [], []>} : vector<8x8xf32>, vector<8x8xf32>, vector<8x8xf32> -> vector<8x8xf32>
    %cst_128 = arith.constant 0.353553385 : f32
    %344 = vector.broadcast %cst_128 : f32 to vector<8x8xf32>
    %345 = arith.mulf %343, %344 : vector<8x8xf32>
    %346 = vector.broadcast %297 : vector<1x8xf32> to vector<8x8xf32>
    %347 = arith.addf %345, %346 : vector<8x8xf32>
    %cst_129 = arith.constant dense<0xFF800000> : vector<8xf32>
    %348 = vector.multi_reduction <maximumf>, %347, %cst_129 [1] : vector<8x8xf32> to vector<8xf32>
    %349 = vector.shape_cast %348 : vector<8xf32> to vector<8x1xf32>
    %350 = vector.broadcast %349 : vector<8x1xf32> to vector<8x8xf32>
    %351 = arith.subf %347, %350 : vector<8x8xf32>
    %352 = math.exp %351 : vector<8x8xf32>
    %cst_130 = arith.constant dense<0.000000e+00> : vector<8xf32>
    %353 = vector.multi_reduction <add>, %352, %cst_130 [1] : vector<8x8xf32> to vector<8xf32>
    %354 = vector.shape_cast %353 : vector<8xf32> to vector<8x1xf32>
    %355 = tpu.reciprocal %354 {approx = true} : vector<8x1xf32> -> vector<8x1xf32>
    %356 = vector.broadcast %355 : vector<8x1xf32> to vector<8x8xf32>
    %357 = arith.mulf %352, %356 : vector<8x8xf32>
    %358 = vector.extract_strided_slice %296 {offsets = [0, 16], sizes = [8, 8], strides = [1, 1]} : vector<8x32xf32> to vector<8x8xf32>
    %cst_131 = arith.constant dense<0.000000e+00> : vector<8x8xf32>
    %359 = tpu.matmul %357, %358, %cst_131 {dimension_numbers = #tpu.dot_dimension_numbers<[1], [0], [0], [1], [0, 0, 1, 1], [], []>} : vector<8x8xf32>, vector<8x8xf32>, vector<8x8xf32> -> vector<8x8xf32>
    %360 = vector.extract_strided_slice %293 {offsets = [16, 0], sizes = [8, 32], strides = [1, 1]} : vector<32x32xf32> to vector<8x32xf32>
    %cst_132 = arith.constant dense<0.000000e+00> : vector<8x32xf32>
    %361 = tpu.matmul %359, %360, %cst_132 {dimension_numbers = #tpu.dot_dimension_numbers<[1], [0], [0], [1], [0, 0, 1, 1], [], []>} : vector<8x8xf32>, vector<8x32xf32>, vector<8x32xf32> -> vector<8x32xf32>
    %362 = arith.addf %340, %361 : vector<8x32xf32>
    %363 = vector.extract_strided_slice %294 {offsets = [0, 24], sizes = [8, 8], strides = [1, 1]} : vector<8x32xf32> to vector<8x8xf32>
    %364 = vector.extract_strided_slice %295 {offsets = [0, 24], sizes = [8, 8], strides = [1, 1]} : vector<8x32xf32> to vector<8x8xf32>
    %cst_133 = arith.constant dense<0.000000e+00> : vector<8x8xf32>
    %365 = tpu.matmul %363, %364, %cst_133 {dimension_numbers = #tpu.dot_dimension_numbers<[1], [1], [0], [0], [0, 0, 1, 0], [], []>} : vector<8x8xf32>, vector<8x8xf32>, vector<8x8xf32> -> vector<8x8xf32>
    %cst_134 = arith.constant 0.353553385 : f32
    %366 = vector.broadcast %cst_134 : f32 to vector<8x8xf32>
    %367 = arith.mulf %365, %366 : vector<8x8xf32>
    %368 = vector.broadcast %297 : vector<1x8xf32> to vector<8x8xf32>
    %369 = arith.addf %367, %368 : vector<8x8xf32>
    %cst_135 = arith.constant dense<0xFF800000> : vector<8xf32>
    %370 = vector.multi_reduction <maximumf>, %369, %cst_135 [1] : vector<8x8xf32> to vector<8xf32>
    %371 = vector.shape_cast %370 : vector<8xf32> to vector<8x1xf32>
    %372 = vector.broadcast %371 : vector<8x1xf32> to vector<8x8xf32>
    %373 = arith.subf %369, %372 : vector<8x8xf32>
    %374 = math.exp %373 : vector<8x8xf32>
    %cst_136 = arith.constant dense<0.000000e+00> : vector<8xf32>
    %375 = vector.multi_reduction <add>, %374, %cst_136 [1] : vector<8x8xf32> to vector<8xf32>
    %376 = vector.shape_cast %375 : vector<8xf32> to vector<8x1xf32>
    %377 = tpu.reciprocal %376 {approx = true} : vector<8x1xf32> -> vector<8x1xf32>
    %378 = vector.broadcast %377 : vector<8x1xf32> to vector<8x8xf32>
    %379 = arith.mulf %374, %378 : vector<8x8xf32>
    %380 = vector.extract_strided_slice %296 {offsets = [0, 24], sizes = [8, 8], strides = [1, 1]} : vector<8x32xf32> to vector<8x8xf32>
    %cst_137 = arith.constant dense<0.000000e+00> : vector<8x8xf32>
    %381 = tpu.matmul %379, %380, %cst_137 {dimension_numbers = #tpu.dot_dimension_numbers<[1], [0], [0], [1], [0, 0, 1, 1], [], []>} : vector<8x8xf32>, vector<8x8xf32>, vector<8x8xf32> -> vector<8x8xf32>
    %382 = vector.extract_strided_slice %293 {offsets = [24, 0], sizes = [8, 32], strides = [1, 1]} : vector<32x32xf32> to vector<8x32xf32>
    %cst_138 = arith.constant dense<0.000000e+00> : vector<8x32xf32>
    %383 = tpu.matmul %381, %382, %cst_138 {dimension_numbers = #tpu.dot_dimension_numbers<[1], [0], [0], [1], [0, 0, 1, 1], [], []>} : vector<8x8xf32>, vector<8x32xf32>, vector<8x32xf32> -> vector<8x32xf32>
    %384 = arith.addf %362, %383 : vector<8x32xf32>
    %c0_139 = arith.constant 0 : index
    %c0_140 = arith.constant 0 : index
    %385 = vector.load %arg74[%c0_139, %c0_140] : memref<16x32xf32, #tpu.memory_space<vmem>>, vector<8x32xf32>
    tpu.vector_store %arg74[%c0_139, %c0_140], %384 {strides = array<i32>} : memref<16x32xf32, #tpu.memory_space<vmem>>, vector<8x32xf32>,
    %386 = vector.extract_strided_slice %290 {offsets = [8, 0], sizes = [8, 32], strides = [1, 1]} : vector<16x32xf32> to vector<8x32xf32>
    %387 = vector.extract_strided_slice %291 {offsets = [8, 0], sizes = [8, 32], strides = [1, 1]} : vector<16x32xf32> to vector<8x32xf32>
    %388 = vector.extract_strided_slice %292 {offsets = [8, 0], sizes = [8, 32], strides = [1, 1]} : vector<16x32xf32> to vector<8x32xf32>
    %389 = vector.extract_strided_slice %7 {offsets = [1, 0], sizes = [1, 8], strides = [1, 1]} : vector<2x8xf32> to vector<1x8xf32>
    %390 = vector.extract_strided_slice %386 {offsets = [0, 0], sizes = [8, 8], strides = [1, 1]} : vector<8x32xf32> to vector<8x8xf32>
    %391 = vector.extract_strided_slice %387 {offsets = [0, 0], sizes = [8, 8], strides = [1, 1]} : vector<8x32xf32> to vector<8x8xf32>
    %cst_141 = arith.constant dense<0.000000e+00> : vector<8x8xf32>
    %392 = tpu.matmul %390, %391, %cst_141 {dimension_numbers = #tpu.dot_dimension_numbers<[1], [1], [0], [0], [0, 0, 1, 0], [], []>} : vector<8x8xf32>, vector<8x8xf32>, vector<8x8xf32> -> vector<8x8xf32>
    %cst_142 = arith.constant 0.353553385 : f32
    %393 = vector.broadcast %cst_142 : f32 to vector<8x8xf32>
    %394 = arith.mulf %392, %393 : vector<8x8xf32>
    %395 = vector.broadcast %389 : vector<1x8xf32> to vector<8x8xf32>
    %396 = arith.addf %394, %395 : vector<8x8xf32>
    %cst_143 = arith.constant dense<0xFF800000> : vector<8xf32>
    %397 = vector.multi_reduction <maximumf>, %396, %cst_143 [1] : vector<8x8xf32> to vector<8xf32>
    %398 = vector.shape_cast %397 : vector<8xf32> to vector<8x1xf32>
    %399 = vector.broadcast %398 : vector<8x1xf32> to vector<8x8xf32>
    %400 = arith.subf %396, %399 : vector<8x8xf32>
    %401 = math.exp %400 : vector<8x8xf32>
    %cst_144 = arith.constant dense<0.000000e+00> : vector<8xf32>
    %402 = vector.multi_reduction <add>, %401, %cst_144 [1] : vector<8x8xf32> to vector<8xf32>
    %403 = vector.shape_cast %402 : vector<8xf32> to vector<8x1xf32>
    %404 = tpu.reciprocal %403 {approx = true} : vector<8x1xf32> -> vector<8x1xf32>
    %405 = vector.broadcast %404 : vector<8x1xf32> to vector<8x8xf32>
    %406 = arith.mulf %401, %405 : vector<8x8xf32>
    %407 = vector.extract_strided_slice %388 {offsets = [0, 0], sizes = [8, 8], strides = [1, 1]} : vector<8x32xf32> to vector<8x8xf32>
    %cst_145 = arith.constant dense<0.000000e+00> : vector<8x8xf32>
    %408 = tpu.matmul %406, %407, %cst_145 {dimension_numbers = #tpu.dot_dimension_numbers<[1], [0], [0], [1], [0, 0, 1, 1], [], []>} : vector<8x8xf32>, vector<8x8xf32>, vector<8x8xf32> -> vector<8x8xf32>
    %409 = vector.extract_strided_slice %293 {offsets = [0, 0], sizes = [8, 32], strides = [1, 1]} : vector<32x32xf32> to vector<8x32xf32>
    %cst_146 = arith.constant dense<0.000000e+00> : vector<8x32xf32>
    %410 = tpu.matmul %408, %409, %cst_146 {dimension_numbers = #tpu.dot_dimension_numbers<[1], [0], [0], [1], [0, 0, 1, 1], [], []>} : vector<8x8xf32>, vector<8x32xf32>, vector<8x32xf32> -> vector<8x32xf32>
    %411 = vector.extract_strided_slice %386 {offsets = [0, 8], sizes = [8, 8], strides = [1, 1]} : vector<8x32xf32> to vector<8x8xf32>
    %412 = vector.extract_strided_slice %387 {offsets = [0, 8], sizes = [8, 8], strides = [1, 1]} : vector<8x32xf32> to vector<8x8xf32>
    %cst_147 = arith.constant dense<0.000000e+00> : vector<8x8xf32>
    %413 = tpu.matmul %411, %412, %cst_147 {dimension_numbers = #tpu.dot_dimension_numbers<[1], [1], [0], [0], [0, 0, 1, 0], [], []>} : vector<8x8xf32>, vector<8x8xf32>, vector<8x8xf32> -> vector<8x8xf32>
    %cst_148 = arith.constant 0.353553385 : f32
    %414 = vector.broadcast %cst_148 : f32 to vector<8x8xf32>
    %415 = arith.mulf %413, %414 : vector<8x8xf32>
    %416 = vector.broadcast %389 : vector<1x8xf32> to vector<8x8xf32>
    %417 = arith.addf %415, %416 : vector<8x8xf32>
    %cst_149 = arith.constant dense<0xFF800000> : vector<8xf32>
    %418 = vector.multi_reduction <maximumf>, %417, %cst_149 [1] : vector<8x8xf32> to vector<8xf32>
    %419 = vector.shape_cast %418 : vector<8xf32> to vector<8x1xf32>
    %420 = vector.broadcast %419 : vector<8x1xf32> to vector<8x8xf32>
    %421 = arith.subf %417, %420 : vector<8x8xf32>
    %422 = math.exp %421 : vector<8x8xf32>
    %cst_150 = arith.constant dense<0.000000e+00> : vector<8xf32>
    %423 = vector.multi_reduction <add>, %422, %cst_150 [1] : vector<8x8xf32> to vector<8xf32>
    %424 = vector.shape_cast %423 : vector<8xf32> to vector<8x1xf32>
    %425 = tpu.reciprocal %424 {approx = true} : vector<8x1xf32> -> vector<8x1xf32>
    %426 = vector.broadcast %425 : vector<8x1xf32> to vector<8x8xf32>
    %427 = arith.mulf %422, %426 : vector<8x8xf32>
    %428 = vector.extract_strided_slice %388 {offsets = [0, 8], sizes = [8, 8], strides = [1, 1]} : vector<8x32xf32> to vector<8x8xf32>
    %cst_151 = arith.constant dense<0.000000e+00> : vector<8x8xf32>
    %429 = tpu.matmul %427, %428, %cst_151 {dimension_numbers = #tpu.dot_dimension_numbers<[1], [0], [0], [1], [0, 0, 1, 1], [], []>} : vector<8x8xf32>, vector<8x8xf32>, vector<8x8xf32> -> vector<8x8xf32>
    %430 = vector.extract_strided_slice %293 {offsets = [8, 0], sizes = [8, 32], strides = [1, 1]} : vector<32x32xf32> to vector<8x32xf32>
    %cst_152 = arith.constant dense<0.000000e+00> : vector<8x32xf32>
    %431 = tpu.matmul %429, %430, %cst_152 {dimension_numbers = #tpu.dot_dimension_numbers<[1], [0], [0], [1], [0, 0, 1, 1], [], []>} : vector<8x8xf32>, vector<8x32xf32>, vector<8x32xf32> -> vector<8x32xf32>
    %432 = arith.addf %410, %431 : vector<8x32xf32>
    %433 = vector.extract_strided_slice %386 {offsets = [0, 16], sizes = [8, 8], strides = [1, 1]} : vector<8x32xf32> to vector<8x8xf32>
    %434 = vector.extract_strided_slice %387 {offsets = [0, 16], sizes = [8, 8], strides = [1, 1]} : vector<8x32xf32> to vector<8x8xf32>
    %cst_153 = arith.constant dense<0.000000e+00> : vector<8x8xf32>
    %435 = tpu.matmul %433, %434, %cst_153 {dimension_numbers = #tpu.dot_dimension_numbers<[1], [1], [0], [0], [0, 0, 1, 0], [], []>} : vector<8x8xf32>, vector<8x8xf32>, vector<8x8xf32> -> vector<8x8xf32>
    %cst_154 = arith.constant 0.353553385 : f32
    %436 = vector.broadcast %cst_154 : f32 to vector<8x8xf32>
    %437 = arith.mulf %435, %436 : vector<8x8xf32>
    %438 = vector.broadcast %389 : vector<1x8xf32> to vector<8x8xf32>
    %439 = arith.addf %437, %438 : vector<8x8xf32>
    %cst_155 = arith.constant dense<0xFF800000> : vector<8xf32>
    %440 = vector.multi_reduction <maximumf>, %439, %cst_155 [1] : vector<8x8xf32> to vector<8xf32>
    %441 = vector.shape_cast %440 : vector<8xf32> to vector<8x1xf32>
    %442 = vector.broadcast %441 : vector<8x1xf32> to vector<8x8xf32>
    %443 = arith.subf %439, %442 : vector<8x8xf32>
    %444 = math.exp %443 : vector<8x8xf32>
    %cst_156 = arith.constant dense<0.000000e+00> : vector<8xf32>
    %445 = vector.multi_reduction <add>, %444, %cst_156 [1] : vector<8x8xf32> to vector<8xf32>
    %446 = vector.shape_cast %445 : vector<8xf32> to vector<8x1xf32>
    %447 = tpu.reciprocal %446 {approx = true} : vector<8x1xf32> -> vector<8x1xf32>
    %448 = vector.broadcast %447 : vector<8x1xf32> to vector<8x8xf32>
    %449 = arith.mulf %444, %448 : vector<8x8xf32>
    %450 = vector.extract_strided_slice %388 {offsets = [0, 16], sizes = [8, 8], strides = [1, 1]} : vector<8x32xf32> to vector<8x8xf32>
    %cst_157 = arith.constant dense<0.000000e+00> : vector<8x8xf32>
    %451 = tpu.matmul %449, %450, %cst_157 {dimension_numbers = #tpu.dot_dimension_numbers<[1], [0], [0], [1], [0, 0, 1, 1], [], []>} : vector<8x8xf32>, vector<8x8xf32>, vector<8x8xf32> -> vector<8x8xf32>
    %452 = vector.extract_strided_slice %293 {offsets = [16, 0], sizes = [8, 32], strides = [1, 1]} : vector<32x32xf32> to vector<8x32xf32>
    %cst_158 = arith.constant dense<0.000000e+00> : vector<8x32xf32>
    %453 = tpu.matmul %451, %452, %cst_158 {dimension_numbers = #tpu.dot_dimension_numbers<[1], [0], [0], [1], [0, 0, 1, 1], [], []>} : vector<8x8xf32>, vector<8x32xf32>, vector<8x32xf32> -> vector<8x32xf32>
    %454 = arith.addf %432, %453 : vector<8x32xf32>
    %455 = vector.extract_strided_slice %386 {offsets = [0, 24], sizes = [8, 8], strides = [1, 1]} : vector<8x32xf32> to vector<8x8xf32>
    %456 = vector.extract_strided_slice %387 {offsets = [0, 24], sizes = [8, 8], strides = [1, 1]} : vector<8x32xf32> to vector<8x8xf32>
    %cst_159 = arith.constant dense<0.000000e+00> : vector<8x8xf32>
    %457 = tpu.matmul %455, %456, %cst_159 {dimension_numbers = #tpu.dot_dimension_numbers<[1], [1], [0], [0], [0, 0, 1, 0], [], []>} : vector<8x8xf32>, vector<8x8xf32>, vector<8x8xf32> -> vector<8x8xf32>
    %cst_160 = arith.constant 0.353553385 : f32
    %458 = vector.broadcast %cst_160 : f32 to vector<8x8xf32>
    %459 = arith.mulf %457, %458 : vector<8x8xf32>
    %460 = vector.broadcast %389 : vector<1x8xf32> to vector<8x8xf32>
    %461 = arith.addf %459, %460 : vector<8x8xf32>
    %cst_161 = arith.constant dense<0xFF800000> : vector<8xf32>
    %462 = vector.multi_reduction <maximumf>, %461, %cst_161 [1] : vector<8x8xf32> to vector<8xf32>
    %463 = vector.shape_cast %462 : vector<8xf32> to vector<8x1xf32>
    %464 = vector.broadcast %463 : vector<8x1xf32> to vector<8x8xf32>
    %465 = arith.subf %461, %464 : vector<8x8xf32>
    %466 = math.exp %465 : vector<8x8xf32>
    %cst_162 = arith.constant dense<0.000000e+00> : vector<8xf32>
    %467 = vector.multi_reduction <add>, %466, %cst_162 [1] : vector<8x8xf32> to vector<8xf32>
    %468 = vector.shape_cast %467 : vector<8xf32> to vector<8x1xf32>
    %469 = tpu.reciprocal %468 {approx = true} : vector<8x1xf32> -> vector<8x1xf32>
    %470 = vector.broadcast %469 : vector<8x1xf32> to vector<8x8xf32>
    %471 = arith.mulf %466, %470 : vector<8x8xf32>
    %472 = vector.extract_strided_slice %388 {offsets = [0, 24], sizes = [8, 8], strides = [1, 1]} : vector<8x32xf32> to vector<8x8xf32>
    %cst_163 = arith.constant dense<0.000000e+00> : vector<8x8xf32>
    %473 = tpu.matmul %471, %472, %cst_163 {dimension_numbers = #tpu.dot_dimension_numbers<[1], [0], [0], [1], [0, 0, 1, 1], [], []>} : vector<8x8xf32>, vector<8x8xf32>, vector<8x8xf32> -> vector<8x8xf32>
    %474 = vector.extract_strided_slice %293 {offsets = [24, 0], sizes = [8, 32], strides = [1, 1]} : vector<32x32xf32> to vector<8x32xf32>
    %cst_164 = arith.constant dense<0.000000e+00> : vector<8x32xf32>
    %475 = tpu.matmul %473, %474, %cst_164 {dimension_numbers = #tpu.dot_dimension_numbers<[1], [0], [0], [1], [0, 0, 1, 1], [], []>} : vector<8x8xf32>, vector<8x32xf32>, vector<8x32xf32> -> vector<8x32xf32>
    %476 = arith.addf %454, %475 : vector<8x32xf32>
    %c8_165 = arith.constant 8 : index
    %c0_166 = arith.constant 0 : index
    %477 = vector.load %arg74[%c8_165, %c0_166] : memref<16x32xf32, #tpu.memory_space<vmem>>, vector<8x32xf32>
    tpu.vector_store %arg74[%c8_165, %c0_166], %476 {strides = array<i32>} : memref<16x32xf32, #tpu.memory_space<vmem>>, vector<8x32xf32>,
    %c0_167 = arith.constant 0 : index
    %c0_168 = arith.constant 0 : index
    %478 = vector.load %arg74[%c0_167, %c0_168] : memref<16x32xf32, #tpu.memory_space<vmem>>, vector<16x32xf32>
    %c0_169 = arith.constant 0 : index
    %c0_170 = arith.constant 0 : index
    %479 = vector.load %arg61[%c0_169, %c0_170] : memref<1x32xf32, #tpu.memory_space<vmem>>, vector<1x32xf32>
    %480 = vector.broadcast %479 : vector<1x32xf32> to vector<16x32xf32>
    %481 = arith.addf %478, %480 : vector<16x32xf32>
    %482 = arith.addf %284, %481 : vector<16x32xf32>
    %cst_171 = arith.constant dense<0.000000e+00> : vector<16xf32>
    %483 = vector.multi_reduction <add>, %482, %cst_171 [1] : vector<16x32xf32> to vector<16xf32>
    %484 = vector.shape_cast %483 : vector<16xf32> to vector<16x1xf32>
    %cst_172 = arith.constant 3.200000e+01 : f32
    %485 = vector.broadcast %cst_172 : f32 to vector<16x1xf32>
    %486 = arith.divf %484, %485 : vector<16x1xf32>
    %487 = vector.broadcast %486 : vector<16x1xf32> to vector<16x32xf32>
    %488 = arith.subf %482, %487 : vector<16x32xf32>
    %489 = arith.mulf %488, %488 : vector<16x32xf32>
    %cst_173 = arith.constant dense<0.000000e+00> : vector<16xf32>
    %490 = vector.multi_reduction <add>, %489, %cst_173 [1] : vector<16x32xf32> to vector<16xf32>
    %491 = vector.shape_cast %490 : vector<16xf32> to vector<16x1xf32>
    %cst_174 = arith.constant 3.200000e+01 : f32
    %492 = vector.broadcast %cst_174 : f32 to vector<16x1xf32>
    %493 = arith.divf %491, %492 : vector<16x1xf32>
    %cst_175 = arith.constant 9.99999974E-6 : f32
    %494 = vector.broadcast %cst_175 : f32 to vector<16x1xf32>
    %495 = arith.addf %493, %494 : vector<16x1xf32>
    %496 = math.rsqrt %495 : vector<16x1xf32>
    %497 = vector.broadcast %496 : vector<16x1xf32> to vector<16x32xf32>
    %498 = arith.mulf %488, %497 : vector<16x32xf32>
    %c0_176 = arith.constant 0 : index
    %c0_177 = arith.constant 0 : index
    %499 = vector.load %arg58[%c0_176, %c0_177] : memref<1x32xf32, #tpu.memory_space<vmem>>, vector<1x32xf32>
    %500 = vector.broadcast %499 : vector<1x32xf32> to vector<16x32xf32>
    %501 = arith.mulf %498, %500 : vector<16x32xf32>
    %c0_178 = arith.constant 0 : index
    %c0_179 = arith.constant 0 : index
    %502 = vector.load %arg57[%c0_178, %c0_179] : memref<1x32xf32, #tpu.memory_space<vmem>>, vector<1x32xf32>
    %503 = vector.broadcast %502 : vector<1x32xf32> to vector<16x32xf32>
    %504 = arith.addf %501, %503 : vector<16x32xf32>
    %c0_180 = arith.constant 0 : index
    %c0_181 = arith.constant 0 : index
    %505 = vector.load %arg54[%c0_180, %c0_181] : memref<32x64xf32, #tpu.memory_space<vmem>>, vector<32x64xf32>
    %cst_182 = arith.constant dense<0.000000e+00> : vector<16x64xf32>
    %506 = tpu.matmul %504, %505, %cst_182 {dimension_numbers = #tpu.dot_dimension_numbers<[1], [0], [0], [1], [0, 0, 1, 1], [], []>} : vector<16x32xf32>, vector<32x64xf32>, vector<16x64xf32> -> vector<16x64xf32>
    %c0_183 = arith.constant 0 : index
    %c0_184 = arith.constant 0 : index
    %507 = vector.load %arg53[%c0_183, %c0_184] : memref<1x64xf32, #tpu.memory_space<vmem>>, vector<1x64xf32>
    %508 = vector.broadcast %507 : vector<1x64xf32> to vector<16x64xf32>
    %509 = arith.addf %506, %508 : vector<16x64xf32>
    %cst_185 = arith.constant 0.000000e+00 : f32
    %510 = vector.broadcast %cst_185 : f32 to vector<16x64xf32>
    %511 = arith.maximumf %509, %510 : vector<16x64xf32>
    %c0_186 = arith.constant 0 : index
    %c0_187 = arith.constant 0 : index
    %512 = vector.load %arg56[%c0_186, %c0_187] : memref<64x32xf32, #tpu.memory_space<vmem>>, vector<64x32xf32>
    %cst_188 = arith.constant dense<0.000000e+00> : vector<16x32xf32>
    %513 = tpu.matmul %511, %512, %cst_188 {dimension_numbers = #tpu.dot_dimension_numbers<[1], [0], [0], [1], [0, 0, 1, 1], [], []>} : vector<16x64xf32>, vector<64x32xf32>, vector<16x32xf32> -> vector<16x32xf32>
    %c0_189 = arith.constant 0 : index
    %c0_190 = arith.constant 0 : index
    %514 = vector.load %arg55[%c0_189, %c0_190] : memref<1x32xf32, #tpu.memory_space<vmem>>, vector<1x32xf32>
    %515 = vector.broadcast %514 : vector<1x32xf32> to vector<16x32xf32>
    %516 = arith.addf %513, %515 : vector<16x32xf32>
    %517 = arith.addf %504, %516 : vector<16x32xf32>
    %cst_191 = arith.constant dense<0.000000e+00> : vector<16xf32>
    %518 = vector.multi_reduction <add>, %517, %cst_191 [1] : vector<16x32xf32> to vector<16xf32>
    %519 = vector.shape_cast %518 : vector<16xf32> to vector<16x1xf32>
    %cst_192 = arith.constant 3.200000e+01 : f32
    %520 = vector.broadcast %cst_192 : f32 to vector<16x1xf32>
    %521 = arith.divf %519, %520 : vector<16x1xf32>
    %522 = vector.broadcast %521 : vector<16x1xf32> to vector<16x32xf32>
    %523 = arith.subf %517, %522 : vector<16x32xf32>
    %524 = arith.mulf %523, %523 : vector<16x32xf32>
    %cst_193 = arith.constant dense<0.000000e+00> : vector<16xf32>
    %525 = vector.multi_reduction <add>, %524, %cst_193 [1] : vector<16x32xf32> to vector<16xf32>
    %526 = vector.shape_cast %525 : vector<16xf32> to vector<16x1xf32>
    %cst_194 = arith.constant 3.200000e+01 : f32
    %527 = vector.broadcast %cst_194 : f32 to vector<16x1xf32>
    %528 = arith.divf %526, %527 : vector<16x1xf32>
    %cst_195 = arith.constant 9.99999974E-6 : f32
    %529 = vector.broadcast %cst_195 : f32 to vector<16x1xf32>
    %530 = arith.addf %528, %529 : vector<16x1xf32>
    %531 = math.rsqrt %530 : vector<16x1xf32>
    %532 = vector.broadcast %531 : vector<16x1xf32> to vector<16x32xf32>
    %533 = arith.mulf %523, %532 : vector<16x32xf32>
    %c0_196 = arith.constant 0 : index
    %c0_197 = arith.constant 0 : index
    %534 = vector.load %arg60[%c0_196, %c0_197] : memref<1x32xf32, #tpu.memory_space<vmem>>, vector<1x32xf32>
    %535 = vector.broadcast %534 : vector<1x32xf32> to vector<16x32xf32>
    %536 = arith.mulf %533, %535 : vector<16x32xf32>
    %c0_198 = arith.constant 0 : index
    %c0_199 = arith.constant 0 : index
    %537 = vector.load %arg59[%c0_198, %c0_199] : memref<1x32xf32, #tpu.memory_space<vmem>>, vector<1x32xf32>
    %538 = vector.broadcast %537 : vector<1x32xf32> to vector<16x32xf32>
    %539 = arith.addf %536, %538 : vector<16x32xf32>
    %c0_200 = arith.constant 0 : index
    %c0_201 = arith.constant 0 : index
    %540 = vector.load %arg72[%c0_200, %c0_201] : memref<16x1xi32, #tpu.memory_space<vmem>>, vector<16x1xi32>
    %541 = tpu.iota {dimensions = array<i32: 1>} : vector<16x128xi32>
    %542 = vector.broadcast %540 : vector<16x1xi32> to vector<16x128xi32>
    %543 = arith.cmpi eq, %541, %542 : vector<16x128xi32>
    %544 = arith.extui %543 : vector<16x128xi1> to vector<16x128xi32>
    %545 = arith.sitofp %544 : vector<16x128xi32> to vector<16x128xf32>
    %cst_202 = arith.constant dense<0.000000e+00> : vector<16x32xf32>
    %546 = tpu.matmul %545, %0, %cst_202 {dimension_numbers = #tpu.dot_dimension_numbers<[1], [0], [0], [1], [0, 0, 1, 1], [], []>} : vector<16x128xf32>, vector<128x32xf32>, vector<16x32xf32> -> vector<16x32xf32>
    %cst_203 = arith.constant 5.65685415 : f32
    %547 = vector.broadcast %cst_203 : f32 to vector<16x32xf32>
    %548 = arith.mulf %546, %547 : vector<16x32xf32>
    %c0_204 = arith.constant 0 : index
    %c0_205 = arith.constant 0 : index
    %549 = vector.load %arg68[%c0_204, %c0_205] : memref<16x32xf32, #tpu.memory_space<vmem>>, vector<16x32xf32>
    %550 = arith.addf %548, %549 : vector<16x32xf32>
    %c0_206 = arith.constant 0 : index
    %c0_207 = arith.constant 0 : index
    %551 = vector.load %arg19[%c0_206, %c0_207] : memref<32x96xf32, #tpu.memory_space<vmem>>, vector<32x96xf32>
    %cst_208 = arith.constant dense<0.000000e+00> : vector<16x96xf32>
    %552 = tpu.matmul %550, %551, %cst_208 {dimension_numbers = #tpu.dot_dimension_numbers<[1], [0], [0], [1], [0, 0, 1, 1], [], []>} : vector<16x32xf32>, vector<32x96xf32>, vector<16x96xf32> -> vector<16x96xf32>
    %c0_209 = arith.constant 0 : index
    %c0_210 = arith.constant 0 : index
    %553 = vector.load %arg17[%c0_209, %c0_210] : memref<1x96xf32, #tpu.memory_space<vmem>>, vector<1x96xf32>
    %554 = vector.broadcast %553 : vector<1x96xf32> to vector<16x96xf32>
    %555 = arith.addf %552, %554 : vector<16x96xf32>
    %556 = vector.extract_strided_slice %555 {offsets = [0, 0], sizes = [16, 32], strides = [1, 1]} : vector<16x96xf32> to vector<16x32xf32>
    %557 = vector.extract_strided_slice %555 {offsets = [0, 32], sizes = [16, 32], strides = [1, 1]} : vector<16x96xf32> to vector<16x32xf32>
    %558 = vector.extract_strided_slice %555 {offsets = [0, 64], sizes = [16, 32], strides = [1, 1]} : vector<16x96xf32> to vector<16x32xf32>
    %c0_211 = arith.constant 0 : index
    %c0_212 = arith.constant 0 : index
    %559 = vector.load %arg18[%c0_211, %c0_212] : memref<32x32xf32, #tpu.memory_space<vmem>>, vector<32x32xf32>
    %560 = vector.extract_strided_slice %556 {offsets = [0, 0], sizes = [8, 32], strides = [1, 1]} : vector<16x32xf32> to vector<8x32xf32>
    %561 = vector.extract_strided_slice %557 {offsets = [0, 0], sizes = [8, 32], strides = [1, 1]} : vector<16x32xf32> to vector<8x32xf32>
    %562 = vector.extract_strided_slice %558 {offsets = [0, 0], sizes = [8, 32], strides = [1, 1]} : vector<16x32xf32> to vector<8x32xf32>
    %563 = vector.extract_strided_slice %12 {offsets = [0, 0], sizes = [1, 8], strides = [1, 1]} : vector<2x8xf32> to vector<1x8xf32>
    %564 = vector.broadcast %563 : vector<1x8xf32> to vector<8x8xf32>
    %565 = arith.minimumf %18, %564 : vector<8x8xf32>
    %566 = vector.extract_strided_slice %560 {offsets = [0, 0], sizes = [8, 8], strides = [1, 1]} : vector<8x32xf32> to vector<8x8xf32>
    %567 = vector.extract_strided_slice %561 {offsets = [0, 0], sizes = [8, 8], strides = [1, 1]} : vector<8x32xf32> to vector<8x8xf32>
    %cst_213 = arith.constant dense<0.000000e+00> : vector<8x8xf32>
    %568 = tpu.matmul %566, %567, %cst_213 {dimension_numbers = #tpu.dot_dimension_numbers<[1], [1], [0], [0], [0, 0, 1, 0], [], []>} : vector<8x8xf32>, vector<8x8xf32>, vector<8x8xf32> -> vector<8x8xf32>
    %cst_214 = arith.constant 0.353553385 : f32
    %569 = vector.broadcast %cst_214 : f32 to vector<8x8xf32>
    %570 = arith.mulf %568, %569 : vector<8x8xf32>
    %571 = arith.addf %570, %565 : vector<8x8xf32>
    %cst_215 = arith.constant dense<0xFF800000> : vector<8xf32>
    %572 = vector.multi_reduction <maximumf>, %571, %cst_215 [1] : vector<8x8xf32> to vector<8xf32>
    %573 = vector.shape_cast %572 : vector<8xf32> to vector<8x1xf32>
    %574 = vector.broadcast %573 : vector<8x1xf32> to vector<8x8xf32>
    %575 = arith.subf %571, %574 : vector<8x8xf32>
    %576 = math.exp %575 : vector<8x8xf32>
    %cst_216 = arith.constant dense<0.000000e+00> : vector<8xf32>
    %577 = vector.multi_reduction <add>, %576, %cst_216 [1] : vector<8x8xf32> to vector<8xf32>
    %578 = vector.shape_cast %577 : vector<8xf32> to vector<8x1xf32>
    %579 = tpu.reciprocal %578 {approx = true} : vector<8x1xf32> -> vector<8x1xf32>
    %580 = vector.broadcast %579 : vector<8x1xf32> to vector<8x8xf32>
    %581 = arith.mulf %576, %580 : vector<8x8xf32>
    %582 = vector.extract_strided_slice %562 {offsets = [0, 0], sizes = [8, 8], strides = [1, 1]} : vector<8x32xf32> to vector<8x8xf32>
    %cst_217 = arith.constant dense<0.000000e+00> : vector<8x8xf32>
    %583 = tpu.matmul %581, %582, %cst_217 {dimension_numbers = #tpu.dot_dimension_numbers<[1], [0], [0], [1], [0, 0, 1, 1], [], []>} : vector<8x8xf32>, vector<8x8xf32>, vector<8x8xf32> -> vector<8x8xf32>
    %584 = vector.extract_strided_slice %559 {offsets = [0, 0], sizes = [8, 32], strides = [1, 1]} : vector<32x32xf32> to vector<8x32xf32>
    %cst_218 = arith.constant dense<0.000000e+00> : vector<8x32xf32>
    %585 = tpu.matmul %583, %584, %cst_218 {dimension_numbers = #tpu.dot_dimension_numbers<[1], [0], [0], [1], [0, 0, 1, 1], [], []>} : vector<8x8xf32>, vector<8x32xf32>, vector<8x32xf32> -> vector<8x32xf32>
    %586 = vector.extract_strided_slice %560 {offsets = [0, 8], sizes = [8, 8], strides = [1, 1]} : vector<8x32xf32> to vector<8x8xf32>
    %587 = vector.extract_strided_slice %561 {offsets = [0, 8], sizes = [8, 8], strides = [1, 1]} : vector<8x32xf32> to vector<8x8xf32>
    %cst_219 = arith.constant dense<0.000000e+00> : vector<8x8xf32>
    %588 = tpu.matmul %586, %587, %cst_219 {dimension_numbers = #tpu.dot_dimension_numbers<[1], [1], [0], [0], [0, 0, 1, 0], [], []>} : vector<8x8xf32>, vector<8x8xf32>, vector<8x8xf32> -> vector<8x8xf32>
    %cst_220 = arith.constant 0.353553385 : f32
    %589 = vector.broadcast %cst_220 : f32 to vector<8x8xf32>
    %590 = arith.mulf %588, %589 : vector<8x8xf32>
    %591 = arith.addf %590, %565 : vector<8x8xf32>
    %cst_221 = arith.constant dense<0xFF800000> : vector<8xf32>
    %592 = vector.multi_reduction <maximumf>, %591, %cst_221 [1] : vector<8x8xf32> to vector<8xf32>
    %593 = vector.shape_cast %592 : vector<8xf32> to vector<8x1xf32>
    %594 = vector.broadcast %593 : vector<8x1xf32> to vector<8x8xf32>
    %595 = arith.subf %591, %594 : vector<8x8xf32>
    %596 = math.exp %595 : vector<8x8xf32>
    %cst_222 = arith.constant dense<0.000000e+00> : vector<8xf32>
    %597 = vector.multi_reduction <add>, %596, %cst_222 [1] : vector<8x8xf32> to vector<8xf32>
    %598 = vector.shape_cast %597 : vector<8xf32> to vector<8x1xf32>
    %599 = tpu.reciprocal %598 {approx = true} : vector<8x1xf32> -> vector<8x1xf32>
    %600 = vector.broadcast %599 : vector<8x1xf32> to vector<8x8xf32>
    %601 = arith.mulf %596, %600 : vector<8x8xf32>
    %602 = vector.extract_strided_slice %562 {offsets = [0, 8], sizes = [8, 8], strides = [1, 1]} : vector<8x32xf32> to vector<8x8xf32>
    %cst_223 = arith.constant dense<0.000000e+00> : vector<8x8xf32>
    %603 = tpu.matmul %601, %602, %cst_223 {dimension_numbers = #tpu.dot_dimension_numbers<[1], [0], [0], [1], [0, 0, 1, 1], [], []>} : vector<8x8xf32>, vector<8x8xf32>, vector<8x8xf32> -> vector<8x8xf32>
    %604 = vector.extract_strided_slice %559 {offsets = [8, 0], sizes = [8, 32], strides = [1, 1]} : vector<32x32xf32> to vector<8x32xf32>
    %cst_224 = arith.constant dense<0.000000e+00> : vector<8x32xf32>
    %605 = tpu.matmul %603, %604, %cst_224 {dimension_numbers = #tpu.dot_dimension_numbers<[1], [0], [0], [1], [0, 0, 1, 1], [], []>} : vector<8x8xf32>, vector<8x32xf32>, vector<8x32xf32> -> vector<8x32xf32>
    %606 = arith.addf %585, %605 : vector<8x32xf32>
    %607 = vector.extract_strided_slice %560 {offsets = [0, 16], sizes = [8, 8], strides = [1, 1]} : vector<8x32xf32> to vector<8x8xf32>
    %608 = vector.extract_strided_slice %561 {offsets = [0, 16], sizes = [8, 8], strides = [1, 1]} : vector<8x32xf32> to vector<8x8xf32>
    %cst_225 = arith.constant dense<0.000000e+00> : vector<8x8xf32>
    %609 = tpu.matmul %607, %608, %cst_225 {dimension_numbers = #tpu.dot_dimension_numbers<[1], [1], [0], [0], [0, 0, 1, 0], [], []>} : vector<8x8xf32>, vector<8x8xf32>, vector<8x8xf32> -> vector<8x8xf32>
    %cst_226 = arith.constant 0.353553385 : f32
    %610 = vector.broadcast %cst_226 : f32 to vector<8x8xf32>
    %611 = arith.mulf %609, %610 : vector<8x8xf32>
    %612 = arith.addf %611, %565 : vector<8x8xf32>
    %cst_227 = arith.constant dense<0xFF800000> : vector<8xf32>
    %613 = vector.multi_reduction <maximumf>, %612, %cst_227 [1] : vector<8x8xf32> to vector<8xf32>
    %614 = vector.shape_cast %613 : vector<8xf32> to vector<8x1xf32>
    %615 = vector.broadcast %614 : vector<8x1xf32> to vector<8x8xf32>
    %616 = arith.subf %612, %615 : vector<8x8xf32>
    %617 = math.exp %616 : vector<8x8xf32>
    %cst_228 = arith.constant dense<0.000000e+00> : vector<8xf32>
    %618 = vector.multi_reduction <add>, %617, %cst_228 [1] : vector<8x8xf32> to vector<8xf32>
    %619 = vector.shape_cast %618 : vector<8xf32> to vector<8x1xf32>
    %620 = tpu.reciprocal %619 {approx = true} : vector<8x1xf32> -> vector<8x1xf32>
    %621 = vector.broadcast %620 : vector<8x1xf32> to vector<8x8xf32>
    %622 = arith.mulf %617, %621 : vector<8x8xf32>
    %623 = vector.extract_strided_slice %562 {offsets = [0, 16], sizes = [8, 8], strides = [1, 1]} : vector<8x32xf32> to vector<8x8xf32>
    %cst_229 = arith.constant dense<0.000000e+00> : vector<8x8xf32>
    %624 = tpu.matmul %622, %623, %cst_229 {dimension_numbers = #tpu.dot_dimension_numbers<[1], [0], [0], [1], [0, 0, 1, 1], [], []>} : vector<8x8xf32>, vector<8x8xf32>, vector<8x8xf32> -> vector<8x8xf32>
    %625 = vector.extract_strided_slice %559 {offsets = [16, 0], sizes = [8, 32], strides = [1, 1]} : vector<32x32xf32> to vector<8x32xf32>
    %cst_230 = arith.constant dense<0.000000e+00> : vector<8x32xf32>
    %626 = tpu.matmul %624, %625, %cst_230 {dimension_numbers = #tpu.dot_dimension_numbers<[1], [0], [0], [1], [0, 0, 1, 1], [], []>} : vector<8x8xf32>, vector<8x32xf32>, vector<8x32xf32> -> vector<8x32xf32>
    %627 = arith.addf %606, %626 : vector<8x32xf32>
    %628 = vector.extract_strided_slice %560 {offsets = [0, 24], sizes = [8, 8], strides = [1, 1]} : vector<8x32xf32> to vector<8x8xf32>
    %629 = vector.extract_strided_slice %561 {offsets = [0, 24], sizes = [8, 8], strides = [1, 1]} : vector<8x32xf32> to vector<8x8xf32>
    %cst_231 = arith.constant dense<0.000000e+00> : vector<8x8xf32>
    %630 = tpu.matmul %628, %629, %cst_231 {dimension_numbers = #tpu.dot_dimension_numbers<[1], [1], [0], [0], [0, 0, 1, 0], [], []>} : vector<8x8xf32>, vector<8x8xf32>, vector<8x8xf32> -> vector<8x8xf32>
    %cst_232 = arith.constant 0.353553385 : f32
    %631 = vector.broadcast %cst_232 : f32 to vector<8x8xf32>
    %632 = arith.mulf %630, %631 : vector<8x8xf32>
    %633 = arith.addf %632, %565 : vector<8x8xf32>
    %cst_233 = arith.constant dense<0xFF800000> : vector<8xf32>
    %634 = vector.multi_reduction <maximumf>, %633, %cst_233 [1] : vector<8x8xf32> to vector<8xf32>
    %635 = vector.shape_cast %634 : vector<8xf32> to vector<8x1xf32>
    %636 = vector.broadcast %635 : vector<8x1xf32> to vector<8x8xf32>
    %637 = arith.subf %633, %636 : vector<8x8xf32>
    %638 = math.exp %637 : vector<8x8xf32>
    %cst_234 = arith.constant dense<0.000000e+00> : vector<8xf32>
    %639 = vector.multi_reduction <add>, %638, %cst_234 [1] : vector<8x8xf32> to vector<8xf32>
    %640 = vector.shape_cast %639 : vector<8xf32> to vector<8x1xf32>
    %641 = tpu.reciprocal %640 {approx = true} : vector<8x1xf32> -> vector<8x1xf32>
    %642 = vector.broadcast %641 : vector<8x1xf32> to vector<8x8xf32>
    %643 = arith.mulf %638, %642 : vector<8x8xf32>
    %644 = vector.extract_strided_slice %562 {offsets = [0, 24], sizes = [8, 8], strides = [1, 1]} : vector<8x32xf32> to vector<8x8xf32>
    %cst_235 = arith.constant dense<0.000000e+00> : vector<8x8xf32>
    %645 = tpu.matmul %643, %644, %cst_235 {dimension_numbers = #tpu.dot_dimension_numbers<[1], [0], [0], [1], [0, 0, 1, 1], [], []>} : vector<8x8xf32>, vector<8x8xf32>, vector<8x8xf32> -> vector<8x8xf32>
    %646 = vector.extract_strided_slice %559 {offsets = [24, 0], sizes = [8, 32], strides = [1, 1]} : vector<32x32xf32> to vector<8x32xf32>
    %cst_236 = arith.constant dense<0.000000e+00> : vector<8x32xf32>
    %647 = tpu.matmul %645, %646, %cst_236 {dimension_numbers = #tpu.dot_dimension_numbers<[1], [0], [0], [1], [0, 0, 1, 1], [], []>} : vector<8x8xf32>, vector<8x32xf32>, vector<8x32xf32> -> vector<8x32xf32>
    %648 = arith.addf %627, %647 : vector<8x32xf32>
    %c0_237 = arith.constant 0 : index
    %c0_238 = arith.constant 0 : index
    %649 = vector.load %arg74[%c0_237, %c0_238] : memref<16x32xf32, #tpu.memory_space<vmem>>, vector<8x32xf32>
    tpu.vector_store %arg74[%c0_237, %c0_238], %648 {strides = array<i32>} : memref<16x32xf32, #tpu.memory_space<vmem>>, vector<8x32xf32>,
    %650 = vector.extract_strided_slice %556 {offsets = [8, 0], sizes = [8, 32], strides = [1, 1]} : vector<16x32xf32> to vector<8x32xf32>
    %651 = vector.extract_strided_slice %557 {offsets = [8, 0], sizes = [8, 32], strides = [1, 1]} : vector<16x32xf32> to vector<8x32xf32>
    %652 = vector.extract_strided_slice %558 {offsets = [8, 0], sizes = [8, 32], strides = [1, 1]} : vector<16x32xf32> to vector<8x32xf32>
    %653 = vector.extract_strided_slice %12 {offsets = [1, 0], sizes = [1, 8], strides = [1, 1]} : vector<2x8xf32> to vector<1x8xf32>
    %654 = vector.broadcast %653 : vector<1x8xf32> to vector<8x8xf32>
    %655 = arith.minimumf %18, %654 : vector<8x8xf32>
    %656 = vector.extract_strided_slice %650 {offsets = [0, 0], sizes = [8, 8], strides = [1, 1]} : vector<8x32xf32> to vector<8x8xf32>
    %657 = vector.extract_strided_slice %651 {offsets = [0, 0], sizes = [8, 8], strides = [1, 1]} : vector<8x32xf32> to vector<8x8xf32>
    %cst_239 = arith.constant dense<0.000000e+00> : vector<8x8xf32>
    %658 = tpu.matmul %656, %657, %cst_239 {dimension_numbers = #tpu.dot_dimension_numbers<[1], [1], [0], [0], [0, 0, 1, 0], [], []>} : vector<8x8xf32>, vector<8x8xf32>, vector<8x8xf32> -> vector<8x8xf32>
    %cst_240 = arith.constant 0.353553385 : f32
    %659 = vector.broadcast %cst_240 : f32 to vector<8x8xf32>
    %660 = arith.mulf %658, %659 : vector<8x8xf32>
    %661 = arith.addf %660, %655 : vector<8x8xf32>
    %cst_241 = arith.constant dense<0xFF800000> : vector<8xf32>
    %662 = vector.multi_reduction <maximumf>, %661, %cst_241 [1] : vector<8x8xf32> to vector<8xf32>
    %663 = vector.shape_cast %662 : vector<8xf32> to vector<8x1xf32>
    %664 = vector.broadcast %663 : vector<8x1xf32> to vector<8x8xf32>
    %665 = arith.subf %661, %664 : vector<8x8xf32>
    %666 = math.exp %665 : vector<8x8xf32>
    %cst_242 = arith.constant dense<0.000000e+00> : vector<8xf32>
    %667 = vector.multi_reduction <add>, %666, %cst_242 [1] : vector<8x8xf32> to vector<8xf32>
    %668 = vector.shape_cast %667 : vector<8xf32> to vector<8x1xf32>
    %669 = tpu.reciprocal %668 {approx = true} : vector<8x1xf32> -> vector<8x1xf32>
    %670 = vector.broadcast %669 : vector<8x1xf32> to vector<8x8xf32>
    %671 = arith.mulf %666, %670 : vector<8x8xf32>
    %672 = vector.extract_strided_slice %652 {offsets = [0, 0], sizes = [8, 8], strides = [1, 1]} : vector<8x32xf32> to vector<8x8xf32>
    %cst_243 = arith.constant dense<0.000000e+00> : vector<8x8xf32>
    %673 = tpu.matmul %671, %672, %cst_243 {dimension_numbers = #tpu.dot_dimension_numbers<[1], [0], [0], [1], [0, 0, 1, 1], [], []>} : vector<8x8xf32>, vector<8x8xf32>, vector<8x8xf32> -> vector<8x8xf32>
    %674 = vector.extract_strided_slice %559 {offsets = [0, 0], sizes = [8, 32], strides = [1, 1]} : vector<32x32xf32> to vector<8x32xf32>
    %cst_244 = arith.constant dense<0.000000e+00> : vector<8x32xf32>
    %675 = tpu.matmul %673, %674, %cst_244 {dimension_numbers = #tpu.dot_dimension_numbers<[1], [0], [0], [1], [0, 0, 1, 1], [], []>} : vector<8x8xf32>, vector<8x32xf32>, vector<8x32xf32> -> vector<8x32xf32>
    %676 = vector.extract_strided_slice %650 {offsets = [0, 8], sizes = [8, 8], strides = [1, 1]} : vector<8x32xf32> to vector<8x8xf32>
    %677 = vector.extract_strided_slice %651 {offsets = [0, 8], sizes = [8, 8], strides = [1, 1]} : vector<8x32xf32> to vector<8x8xf32>
    %cst_245 = arith.constant dense<0.000000e+00> : vector<8x8xf32>
    %678 = tpu.matmul %676, %677, %cst_245 {dimension_numbers = #tpu.dot_dimension_numbers<[1], [1], [0], [0], [0, 0, 1, 0], [], []>} : vector<8x8xf32>, vector<8x8xf32>, vector<8x8xf32> -> vector<8x8xf32>
    %cst_246 = arith.constant 0.353553385 : f32
    %679 = vector.broadcast %cst_246 : f32 to vector<8x8xf32>
    %680 = arith.mulf %678, %679 : vector<8x8xf32>
    %681 = arith.addf %680, %655 : vector<8x8xf32>
    %cst_247 = arith.constant dense<0xFF800000> : vector<8xf32>
    %682 = vector.multi_reduction <maximumf>, %681, %cst_247 [1] : vector<8x8xf32> to vector<8xf32>
    %683 = vector.shape_cast %682 : vector<8xf32> to vector<8x1xf32>
    %684 = vector.broadcast %683 : vector<8x1xf32> to vector<8x8xf32>
    %685 = arith.subf %681, %684 : vector<8x8xf32>
    %686 = math.exp %685 : vector<8x8xf32>
    %cst_248 = arith.constant dense<0.000000e+00> : vector<8xf32>
    %687 = vector.multi_reduction <add>, %686, %cst_248 [1] : vector<8x8xf32> to vector<8xf32>
    %688 = vector.shape_cast %687 : vector<8xf32> to vector<8x1xf32>
    %689 = tpu.reciprocal %688 {approx = true} : vector<8x1xf32> -> vector<8x1xf32>
    %690 = vector.broadcast %689 : vector<8x1xf32> to vector<8x8xf32>
    %691 = arith.mulf %686, %690 : vector<8x8xf32>
    %692 = vector.extract_strided_slice %652 {offsets = [0, 8], sizes = [8, 8], strides = [1, 1]} : vector<8x32xf32> to vector<8x8xf32>
    %cst_249 = arith.constant dense<0.000000e+00> : vector<8x8xf32>
    %693 = tpu.matmul %691, %692, %cst_249 {dimension_numbers = #tpu.dot_dimension_numbers<[1], [0], [0], [1], [0, 0, 1, 1], [], []>} : vector<8x8xf32>, vector<8x8xf32>, vector<8x8xf32> -> vector<8x8xf32>
    %694 = vector.extract_strided_slice %559 {offsets = [8, 0], sizes = [8, 32], strides = [1, 1]} : vector<32x32xf32> to vector<8x32xf32>
    %cst_250 = arith.constant dense<0.000000e+00> : vector<8x32xf32>
    %695 = tpu.matmul %693, %694, %cst_250 {dimension_numbers = #tpu.dot_dimension_numbers<[1], [0], [0], [1], [0, 0, 1, 1], [], []>} : vector<8x8xf32>, vector<8x32xf32>, vector<8x32xf32> -> vector<8x32xf32>
    %696 = arith.addf %675, %695 : vector<8x32xf32>
    %697 = vector.extract_strided_slice %650 {offsets = [0, 16], sizes = [8, 8], strides = [1, 1]} : vector<8x32xf32> to vector<8x8xf32>
    %698 = vector.extract_strided_slice %651 {offsets = [0, 16], sizes = [8, 8], strides = [1, 1]} : vector<8x32xf32> to vector<8x8xf32>
    %cst_251 = arith.constant dense<0.000000e+00> : vector<8x8xf32>
    %699 = tpu.matmul %697, %698, %cst_251 {dimension_numbers = #tpu.dot_dimension_numbers<[1], [1], [0], [0], [0, 0, 1, 0], [], []>} : vector<8x8xf32>, vector<8x8xf32>, vector<8x8xf32> -> vector<8x8xf32>
    %cst_252 = arith.constant 0.353553385 : f32
    %700 = vector.broadcast %cst_252 : f32 to vector<8x8xf32>
    %701 = arith.mulf %699, %700 : vector<8x8xf32>
    %702 = arith.addf %701, %655 : vector<8x8xf32>
    %cst_253 = arith.constant dense<0xFF800000> : vector<8xf32>
    %703 = vector.multi_reduction <maximumf>, %702, %cst_253 [1] : vector<8x8xf32> to vector<8xf32>
    %704 = vector.shape_cast %703 : vector<8xf32> to vector<8x1xf32>
    %705 = vector.broadcast %704 : vector<8x1xf32> to vector<8x8xf32>
    %706 = arith.subf %702, %705 : vector<8x8xf32>
    %707 = math.exp %706 : vector<8x8xf32>
    %cst_254 = arith.constant dense<0.000000e+00> : vector<8xf32>
    %708 = vector.multi_reduction <add>, %707, %cst_254 [1] : vector<8x8xf32> to vector<8xf32>
    %709 = vector.shape_cast %708 : vector<8xf32> to vector<8x1xf32>
    %710 = tpu.reciprocal %709 {approx = true} : vector<8x1xf32> -> vector<8x1xf32>
    %711 = vector.broadcast %710 : vector<8x1xf32> to vector<8x8xf32>
    %712 = arith.mulf %707, %711 : vector<8x8xf32>
    %713 = vector.extract_strided_slice %652 {offsets = [0, 16], sizes = [8, 8], strides = [1, 1]} : vector<8x32xf32> to vector<8x8xf32>
    %cst_255 = arith.constant dense<0.000000e+00> : vector<8x8xf32>
    %714 = tpu.matmul %712, %713, %cst_255 {dimension_numbers = #tpu.dot_dimension_numbers<[1], [0], [0], [1], [0, 0, 1, 1], [], []>} : vector<8x8xf32>, vector<8x8xf32>, vector<8x8xf32> -> vector<8x8xf32>
    %715 = vector.extract_strided_slice %559 {offsets = [16, 0], sizes = [8, 32], strides = [1, 1]} : vector<32x32xf32> to vector<8x32xf32>
    %cst_256 = arith.constant dense<0.000000e+00> : vector<8x32xf32>
    %716 = tpu.matmul %714, %715, %cst_256 {dimension_numbers = #tpu.dot_dimension_numbers<[1], [0], [0], [1], [0, 0, 1, 1], [], []>} : vector<8x8xf32>, vector<8x32xf32>, vector<8x32xf32> -> vector<8x32xf32>
    %717 = arith.addf %696, %716 : vector<8x32xf32>
    %718 = vector.extract_strided_slice %650 {offsets = [0, 24], sizes = [8, 8], strides = [1, 1]} : vector<8x32xf32> to vector<8x8xf32>
    %719 = vector.extract_strided_slice %651 {offsets = [0, 24], sizes = [8, 8], strides = [1, 1]} : vector<8x32xf32> to vector<8x8xf32>
    %cst_257 = arith.constant dense<0.000000e+00> : vector<8x8xf32>
    %720 = tpu.matmul %718, %719, %cst_257 {dimension_numbers = #tpu.dot_dimension_numbers<[1], [1], [0], [0], [0, 0, 1, 0], [], []>} : vector<8x8xf32>, vector<8x8xf32>, vector<8x8xf32> -> vector<8x8xf32>
    %cst_258 = arith.constant 0.353553385 : f32
    %721 = vector.broadcast %cst_258 : f32 to vector<8x8xf32>
    %722 = arith.mulf %720, %721 : vector<8x8xf32>
    %723 = arith.addf %722, %655 : vector<8x8xf32>
    %cst_259 = arith.constant dense<0xFF800000> : vector<8xf32>
    %724 = vector.multi_reduction <maximumf>, %723, %cst_259 [1] : vector<8x8xf32> to vector<8xf32>
    %725 = vector.shape_cast %724 : vector<8xf32> to vector<8x1xf32>
    %726 = vector.broadcast %725 : vector<8x1xf32> to vector<8x8xf32>
    %727 = arith.subf %723, %726 : vector<8x8xf32>
    %728 = math.exp %727 : vector<8x8xf32>
    %cst_260 = arith.constant dense<0.000000e+00> : vector<8xf32>
    %729 = vector.multi_reduction <add>, %728, %cst_260 [1] : vector<8x8xf32> to vector<8xf32>
    %730 = vector.shape_cast %729 : vector<8xf32> to vector<8x1xf32>
    %731 = tpu.reciprocal %730 {approx = true} : vector<8x1xf32> -> vector<8x1xf32>
    %732 = vector.broadcast %731 : vector<8x1xf32> to vector<8x8xf32>
    %733 = arith.mulf %728, %732 : vector<8x8xf32>
    %734 = vector.extract_strided_slice %652 {offsets = [0, 24], sizes = [8, 8], strides = [1, 1]} : vector<8x32xf32> to vector<8x8xf32>
    %cst_261 = arith.constant dense<0.000000e+00> : vector<8x8xf32>
    %735 = tpu.matmul %733, %734, %cst_261 {dimension_numbers = #tpu.dot_dimension_numbers<[1], [0], [0], [1], [0, 0, 1, 1], [], []>} : vector<8x8xf32>, vector<8x8xf32>, vector<8x8xf32> -> vector<8x8xf32>
    %736 = vector.extract_strided_slice %559 {offsets = [24, 0], sizes = [8, 32], strides = [1, 1]} : vector<32x32xf32> to vector<8x32xf32>
    %cst_262 = arith.constant dense<0.000000e+00> : vector<8x32xf32>
    %737 = tpu.matmul %735, %736, %cst_262 {dimension_numbers = #tpu.dot_dimension_numbers<[1], [0], [0], [1], [0, 0, 1, 1], [], []>} : vector<8x8xf32>, vector<8x32xf32>, vector<8x32xf32> -> vector<8x32xf32>
    %738 = arith.addf %717, %737 : vector<8x32xf32>
    %c8_263 = arith.constant 8 : index
    %c0_264 = arith.constant 0 : index
    %739 = vector.load %arg74[%c8_263, %c0_264] : memref<16x32xf32, #tpu.memory_space<vmem>>, vector<8x32xf32>
    tpu.vector_store %arg74[%c8_263, %c0_264], %738 {strides = array<i32>} : memref<16x32xf32, #tpu.memory_space<vmem>>, vector<8x32xf32>,
    %c0_265 = arith.constant 0 : index
    %c0_266 = arith.constant 0 : index
    %740 = vector.load %arg74[%c0_265, %c0_266] : memref<16x32xf32, #tpu.memory_space<vmem>>, vector<16x32xf32>
    %c0_267 = arith.constant 0 : index
    %c0_268 = arith.constant 0 : index
    %741 = vector.load %arg16[%c0_267, %c0_268] : memref<1x32xf32, #tpu.memory_space<vmem>>, vector<1x32xf32>
    %742 = vector.broadcast %741 : vector<1x32xf32> to vector<16x32xf32>
    %743 = arith.addf %740, %742 : vector<16x32xf32>
    %744 = arith.addf %550, %743 : vector<16x32xf32>
    %cst_269 = arith.constant dense<0.000000e+00> : vector<16xf32>
    %745 = vector.multi_reduction <add>, %744, %cst_269 [1] : vector<16x32xf32> to vector<16xf32>
    %746 = vector.shape_cast %745 : vector<16xf32> to vector<16x1xf32>
    %cst_270 = arith.constant 3.200000e+01 : f32
    %747 = vector.broadcast %cst_270 : f32 to vector<16x1xf32>
    %748 = arith.divf %746, %747 : vector<16x1xf32>
    %749 = vector.broadcast %748 : vector<16x1xf32> to vector<16x32xf32>
    %750 = arith.subf %744, %749 : vector<16x32xf32>
    %751 = arith.mulf %750, %750 : vector<16x32xf32>
    %cst_271 = arith.constant dense<0.000000e+00> : vector<16xf32>
    %752 = vector.multi_reduction <add>, %751, %cst_271 [1] : vector<16x32xf32> to vector<16xf32>
    %753 = vector.shape_cast %752 : vector<16xf32> to vector<16x1xf32>
    %cst_272 = arith.constant 3.200000e+01 : f32
    %754 = vector.broadcast %cst_272 : f32 to vector<16x1xf32>
    %755 = arith.divf %753, %754 : vector<16x1xf32>
    %cst_273 = arith.constant 9.99999974E-6 : f32
    %756 = vector.broadcast %cst_273 : f32 to vector<16x1xf32>
    %757 = arith.addf %755, %756 : vector<16x1xf32>
    %758 = math.rsqrt %757 : vector<16x1xf32>
    %759 = vector.broadcast %758 : vector<16x1xf32> to vector<16x32xf32>
    %760 = arith.mulf %750, %759 : vector<16x32xf32>
    %c0_274 = arith.constant 0 : index
    %c0_275 = arith.constant 0 : index
    %761 = vector.load %arg11[%c0_274, %c0_275] : memref<1x32xf32, #tpu.memory_space<vmem>>, vector<1x32xf32>
    %762 = vector.broadcast %761 : vector<1x32xf32> to vector<16x32xf32>
    %763 = arith.mulf %760, %762 : vector<16x32xf32>
    %c0_276 = arith.constant 0 : index
    %c0_277 = arith.constant 0 : index
    %764 = vector.load %arg10[%c0_276, %c0_277] : memref<1x32xf32, #tpu.memory_space<vmem>>, vector<1x32xf32>
    %765 = vector.broadcast %764 : vector<1x32xf32> to vector<16x32xf32>
    %766 = arith.addf %763, %765 : vector<16x32xf32>
    %c0_278 = arith.constant 0 : index
    %c0_279 = arith.constant 0 : index
    %767 = vector.load %arg5[%c0_278, %c0_279] : memref<32x32xf32, #tpu.memory_space<vmem>>, vector<32x32xf32>
    %cst_280 = arith.constant dense<0.000000e+00> : vector<16x32xf32>
    %768 = tpu.matmul %766, %767, %cst_280 {dimension_numbers = #tpu.dot_dimension_numbers<[1], [0], [0], [1], [0, 0, 1, 1], [], []>} : vector<16x32xf32>, vector<32x32xf32>, vector<16x32xf32> -> vector<16x32xf32>
    %c0_281 = arith.constant 0 : index
    %c0_282 = arith.constant 0 : index
    %769 = vector.load %arg2[%c0_281, %c0_282] : memref<1x32xf32, #tpu.memory_space<vmem>>, vector<1x32xf32>
    %770 = vector.broadcast %769 : vector<1x32xf32> to vector<16x32xf32>
    %771 = arith.addf %768, %770 : vector<16x32xf32>
    %c0_283 = arith.constant 0 : index
    %c0_284 = arith.constant 0 : index
    %772 = vector.load %arg3[%c0_283, %c0_284] : memref<32x64xf32, #tpu.memory_space<vmem>>, vector<32x64xf32>
    %cst_285 = arith.constant dense<0.000000e+00> : vector<16x64xf32>
    %773 = tpu.matmul %539, %772, %cst_285 {dimension_numbers = #tpu.dot_dimension_numbers<[1], [0], [0], [1], [0, 0, 1, 1], [], []>} : vector<16x32xf32>, vector<32x64xf32>, vector<16x64xf32> -> vector<16x64xf32>
    %c0_286 = arith.constant 0 : index
    %c0_287 = arith.constant 0 : index
    %774 = vector.load %arg0[%c0_286, %c0_287] : memref<1x64xf32, #tpu.memory_space<vmem>>, vector<1x64xf32>
    %775 = vector.broadcast %774 : vector<1x64xf32> to vector<16x64xf32>
    %776 = arith.addf %773, %775 : vector<16x64xf32>
    %777 = vector.extract_strided_slice %776 {offsets = [0, 0], sizes = [16, 32], strides = [1, 1]} : vector<16x64xf32> to vector<16x32xf32>
    %778 = vector.extract_strided_slice %776 {offsets = [0, 32], sizes = [16, 32], strides = [1, 1]} : vector<16x64xf32> to vector<16x32xf32>
    %c0_288 = arith.constant 0 : index
    %c0_289 = arith.constant 0 : index
    %779 = vector.load %arg4[%c0_288, %c0_289] : memref<32x32xf32, #tpu.memory_space<vmem>>, vector<32x32xf32>
    %780 = vector.extract_strided_slice %771 {offsets = [0, 0], sizes = [8, 32], strides = [1, 1]} : vector<16x32xf32> to vector<8x32xf32>
    %781 = vector.extract_strided_slice %777 {offsets = [0, 0], sizes = [8, 32], strides = [1, 1]} : vector<16x32xf32> to vector<8x32xf32>
    %782 = vector.extract_strided_slice %778 {offsets = [0, 0], sizes = [8, 32], strides = [1, 1]} : vector<16x32xf32> to vector<8x32xf32>
    %783 = vector.extract_strided_slice %7 {offsets = [0, 0], sizes = [1, 8], strides = [1, 1]} : vector<2x8xf32> to vector<1x8xf32>
    %784 = vector.extract_strided_slice %780 {offsets = [0, 0], sizes = [8, 8], strides = [1, 1]} : vector<8x32xf32> to vector<8x8xf32>
    %785 = vector.extract_strided_slice %781 {offsets = [0, 0], sizes = [8, 8], strides = [1, 1]} : vector<8x32xf32> to vector<8x8xf32>
    %cst_290 = arith.constant dense<0.000000e+00> : vector<8x8xf32>
    %786 = tpu.matmul %784, %785, %cst_290 {dimension_numbers = #tpu.dot_dimension_numbers<[1], [1], [0], [0], [0, 0, 1, 0], [], []>} : vector<8x8xf32>, vector<8x8xf32>, vector<8x8xf32> -> vector<8x8xf32>
    %cst_291 = arith.constant 0.353553385 : f32
    %787 = vector.broadcast %cst_291 : f32 to vector<8x8xf32>
    %788 = arith.mulf %786, %787 : vector<8x8xf32>
    %789 = vector.broadcast %783 : vector<1x8xf32> to vector<8x8xf32>
    %790 = arith.addf %788, %789 : vector<8x8xf32>
    %cst_292 = arith.constant dense<0xFF800000> : vector<8xf32>
    %791 = vector.multi_reduction <maximumf>, %790, %cst_292 [1] : vector<8x8xf32> to vector<8xf32>
    %792 = vector.shape_cast %791 : vector<8xf32> to vector<8x1xf32>
    %793 = vector.broadcast %792 : vector<8x1xf32> to vector<8x8xf32>
    %794 = arith.subf %790, %793 : vector<8x8xf32>
    %795 = math.exp %794 : vector<8x8xf32>
    %cst_293 = arith.constant dense<0.000000e+00> : vector<8xf32>
    %796 = vector.multi_reduction <add>, %795, %cst_293 [1] : vector<8x8xf32> to vector<8xf32>
    %797 = vector.shape_cast %796 : vector<8xf32> to vector<8x1xf32>
    %798 = tpu.reciprocal %797 {approx = true} : vector<8x1xf32> -> vector<8x1xf32>
    %799 = vector.broadcast %798 : vector<8x1xf32> to vector<8x8xf32>
    %800 = arith.mulf %795, %799 : vector<8x8xf32>
    %801 = vector.extract_strided_slice %782 {offsets = [0, 0], sizes = [8, 8], strides = [1, 1]} : vector<8x32xf32> to vector<8x8xf32>
    %cst_294 = arith.constant dense<0.000000e+00> : vector<8x8xf32>
    %802 = tpu.matmul %800, %801, %cst_294 {dimension_numbers = #tpu.dot_dimension_numbers<[1], [0], [0], [1], [0, 0, 1, 1], [], []>} : vector<8x8xf32>, vector<8x8xf32>, vector<8x8xf32> -> vector<8x8xf32>
    %803 = vector.extract_strided_slice %779 {offsets = [0, 0], sizes = [8, 32], strides = [1, 1]} : vector<32x32xf32> to vector<8x32xf32>
    %cst_295 = arith.constant dense<0.000000e+00> : vector<8x32xf32>
    %804 = tpu.matmul %802, %803, %cst_295 {dimension_numbers = #tpu.dot_dimension_numbers<[1], [0], [0], [1], [0, 0, 1, 1], [], []>} : vector<8x8xf32>, vector<8x32xf32>, vector<8x32xf32> -> vector<8x32xf32>
    %805 = vector.extract_strided_slice %780 {offsets = [0, 8], sizes = [8, 8], strides = [1, 1]} : vector<8x32xf32> to vector<8x8xf32>
    %806 = vector.extract_strided_slice %781 {offsets = [0, 8], sizes = [8, 8], strides = [1, 1]} : vector<8x32xf32> to vector<8x8xf32>
    %cst_296 = arith.constant dense<0.000000e+00> : vector<8x8xf32>
    %807 = tpu.matmul %805, %806, %cst_296 {dimension_numbers = #tpu.dot_dimension_numbers<[1], [1], [0], [0], [0, 0, 1, 0], [], []>} : vector<8x8xf32>, vector<8x8xf32>, vector<8x8xf32> -> vector<8x8xf32>
    %cst_297 = arith.constant 0.353553385 : f32
    %808 = vector.broadcast %cst_297 : f32 to vector<8x8xf32>
    %809 = arith.mulf %807, %808 : vector<8x8xf32>
    %810 = vector.broadcast %783 : vector<1x8xf32> to vector<8x8xf32>
    %811 = arith.addf %809, %810 : vector<8x8xf32>
    %cst_298 = arith.constant dense<0xFF800000> : vector<8xf32>
    %812 = vector.multi_reduction <maximumf>, %811, %cst_298 [1] : vector<8x8xf32> to vector<8xf32>
    %813 = vector.shape_cast %812 : vector<8xf32> to vector<8x1xf32>
    %814 = vector.broadcast %813 : vector<8x1xf32> to vector<8x8xf32>
    %815 = arith.subf %811, %814 : vector<8x8xf32>
    %816 = math.exp %815 : vector<8x8xf32>
    %cst_299 = arith.constant dense<0.000000e+00> : vector<8xf32>
    %817 = vector.multi_reduction <add>, %816, %cst_299 [1] : vector<8x8xf32> to vector<8xf32>
    %818 = vector.shape_cast %817 : vector<8xf32> to vector<8x1xf32>
    %819 = tpu.reciprocal %818 {approx = true} : vector<8x1xf32> -> vector<8x1xf32>
    %820 = vector.broadcast %819 : vector<8x1xf32> to vector<8x8xf32>
    %821 = arith.mulf %816, %820 : vector<8x8xf32>
    %822 = vector.extract_strided_slice %782 {offsets = [0, 8], sizes = [8, 8], strides = [1, 1]} : vector<8x32xf32> to vector<8x8xf32>
    %cst_300 = arith.constant dense<0.000000e+00> : vector<8x8xf32>
    %823 = tpu.matmul %821, %822, %cst_300 {dimension_numbers = #tpu.dot_dimension_numbers<[1], [0], [0], [1], [0, 0, 1, 1], [], []>} : vector<8x8xf32>, vector<8x8xf32>, vector<8x8xf32> -> vector<8x8xf32>
    %824 = vector.extract_strided_slice %779 {offsets = [8, 0], sizes = [8, 32], strides = [1, 1]} : vector<32x32xf32> to vector<8x32xf32>
    %cst_301 = arith.constant dense<0.000000e+00> : vector<8x32xf32>
    %825 = tpu.matmul %823, %824, %cst_301 {dimension_numbers = #tpu.dot_dimension_numbers<[1], [0], [0], [1], [0, 0, 1, 1], [], []>} : vector<8x8xf32>, vector<8x32xf32>, vector<8x32xf32> -> vector<8x32xf32>
    %826 = arith.addf %804, %825 : vector<8x32xf32>
    %827 = vector.extract_strided_slice %780 {offsets = [0, 16], sizes = [8, 8], strides = [1, 1]} : vector<8x32xf32> to vector<8x8xf32>
    %828 = vector.extract_strided_slice %781 {offsets = [0, 16], sizes = [8, 8], strides = [1, 1]} : vector<8x32xf32> to vector<8x8xf32>
    %cst_302 = arith.constant dense<0.000000e+00> : vector<8x8xf32>
    %829 = tpu.matmul %827, %828, %cst_302 {dimension_numbers = #tpu.dot_dimension_numbers<[1], [1], [0], [0], [0, 0, 1, 0], [], []>} : vector<8x8xf32>, vector<8x8xf32>, vector<8x8xf32> -> vector<8x8xf32>
    %cst_303 = arith.constant 0.353553385 : f32
    %830 = vector.broadcast %cst_303 : f32 to vector<8x8xf32>
    %831 = arith.mulf %829, %830 : vector<8x8xf32>
    %832 = vector.broadcast %783 : vector<1x8xf32> to vector<8x8xf32>
    %833 = arith.addf %831, %832 : vector<8x8xf32>
    %cst_304 = arith.constant dense<0xFF800000> : vector<8xf32>
    %834 = vector.multi_reduction <maximumf>, %833, %cst_304 [1] : vector<8x8xf32> to vector<8xf32>
    %835 = vector.shape_cast %834 : vector<8xf32> to vector<8x1xf32>
    %836 = vector.broadcast %835 : vector<8x1xf32> to vector<8x8xf32>
    %837 = arith.subf %833, %836 : vector<8x8xf32>
    %838 = math.exp %837 : vector<8x8xf32>
    %cst_305 = arith.constant dense<0.000000e+00> : vector<8xf32>
    %839 = vector.multi_reduction <add>, %838, %cst_305 [1] : vector<8x8xf32> to vector<8xf32>
    %840 = vector.shape_cast %839 : vector<8xf32> to vector<8x1xf32>
    %841 = tpu.reciprocal %840 {approx = true} : vector<8x1xf32> -> vector<8x1xf32>
    %842 = vector.broadcast %841 : vector<8x1xf32> to vector<8x8xf32>
    %843 = arith.mulf %838, %842 : vector<8x8xf32>
    %844 = vector.extract_strided_slice %782 {offsets = [0, 16], sizes = [8, 8], strides = [1, 1]} : vector<8x32xf32> to vector<8x8xf32>
    %cst_306 = arith.constant dense<0.000000e+00> : vector<8x8xf32>
    %845 = tpu.matmul %843, %844, %cst_306 {dimension_numbers = #tpu.dot_dimension_numbers<[1], [0], [0], [1], [0, 0, 1, 1], [], []>} : vector<8x8xf32>, vector<8x8xf32>, vector<8x8xf32> -> vector<8x8xf32>
    %846 = vector.extract_strided_slice %779 {offsets = [16, 0], sizes = [8, 32], strides = [1, 1]} : vector<32x32xf32> to vector<8x32xf32>
    %cst_307 = arith.constant dense<0.000000e+00> : vector<8x32xf32>
    %847 = tpu.matmul %845, %846, %cst_307 {dimension_numbers = #tpu.dot_dimension_numbers<[1], [0], [0], [1], [0, 0, 1, 1], [], []>} : vector<8x8xf32>, vector<8x32xf32>, vector<8x32xf32> -> vector<8x32xf32>
    %848 = arith.addf %826, %847 : vector<8x32xf32>
    %849 = vector.extract_strided_slice %780 {offsets = [0, 24], sizes = [8, 8], strides = [1, 1]} : vector<8x32xf32> to vector<8x8xf32>
    %850 = vector.extract_strided_slice %781 {offsets = [0, 24], sizes = [8, 8], strides = [1, 1]} : vector<8x32xf32> to vector<8x8xf32>
    %cst_308 = arith.constant dense<0.000000e+00> : vector<8x8xf32>
    %851 = tpu.matmul %849, %850, %cst_308 {dimension_numbers = #tpu.dot_dimension_numbers<[1], [1], [0], [0], [0, 0, 1, 0], [], []>} : vector<8x8xf32>, vector<8x8xf32>, vector<8x8xf32> -> vector<8x8xf32>
    %cst_309 = arith.constant 0.353553385 : f32
    %852 = vector.broadcast %cst_309 : f32 to vector<8x8xf32>
    %853 = arith.mulf %851, %852 : vector<8x8xf32>
    %854 = vector.broadcast %783 : vector<1x8xf32> to vector<8x8xf32>
    %855 = arith.addf %853, %854 : vector<8x8xf32>
    %cst_310 = arith.constant dense<0xFF800000> : vector<8xf32>
    %856 = vector.multi_reduction <maximumf>, %855, %cst_310 [1] : vector<8x8xf32> to vector<8xf32>
    %857 = vector.shape_cast %856 : vector<8xf32> to vector<8x1xf32>
    %858 = vector.broadcast %857 : vector<8x1xf32> to vector<8x8xf32>
    %859 = arith.subf %855, %858 : vector<8x8xf32>
    %860 = math.exp %859 : vector<8x8xf32>
    %cst_311 = arith.constant dense<0.000000e+00> : vector<8xf32>
    %861 = vector.multi_reduction <add>, %860, %cst_311 [1] : vector<8x8xf32> to vector<8xf32>
    %862 = vector.shape_cast %861 : vector<8xf32> to vector<8x1xf32>
    %863 = tpu.reciprocal %862 {approx = true} : vector<8x1xf32> -> vector<8x1xf32>
    %864 = vector.broadcast %863 : vector<8x1xf32> to vector<8x8xf32>
    %865 = arith.mulf %860, %864 : vector<8x8xf32>
    %866 = vector.extract_strided_slice %782 {offsets = [0, 24], sizes = [8, 8], strides = [1, 1]} : vector<8x32xf32> to vector<8x8xf32>
    %cst_312 = arith.constant dense<0.000000e+00> : vector<8x8xf32>
    %867 = tpu.matmul %865, %866, %cst_312 {dimension_numbers = #tpu.dot_dimension_numbers<[1], [0], [0], [1], [0, 0, 1, 1], [], []>} : vector<8x8xf32>, vector<8x8xf32>, vector<8x8xf32> -> vector<8x8xf32>
    %868 = vector.extract_strided_slice %779 {offsets = [24, 0], sizes = [8, 32], strides = [1, 1]} : vector<32x32xf32> to vector<8x32xf32>
    %cst_313 = arith.constant dense<0.000000e+00> : vector<8x32xf32>
    %869 = tpu.matmul %867, %868, %cst_313 {dimension_numbers = #tpu.dot_dimension_numbers<[1], [0], [0], [1], [0, 0, 1, 1], [], []>} : vector<8x8xf32>, vector<8x32xf32>, vector<8x32xf32> -> vector<8x32xf32>
    %870 = arith.addf %848, %869 : vector<8x32xf32>
    %c0_314 = arith.constant 0 : index
    %c0_315 = arith.constant 0 : index
    %871 = vector.load %arg74[%c0_314, %c0_315] : memref<16x32xf32, #tpu.memory_space<vmem>>, vector<8x32xf32>
    tpu.vector_store %arg74[%c0_314, %c0_315], %870 {strides = array<i32>} : memref<16x32xf32, #tpu.memory_space<vmem>>, vector<8x32xf32>,
    %872 = vector.extract_strided_slice %771 {offsets = [8, 0], sizes = [8, 32], strides = [1, 1]} : vector<16x32xf32> to vector<8x32xf32>
    %873 = vector.extract_strided_slice %777 {offsets = [8, 0], sizes = [8, 32], strides = [1, 1]} : vector<16x32xf32> to vector<8x32xf32>
    %874 = vector.extract_strided_slice %778 {offsets = [8, 0], sizes = [8, 32], strides = [1, 1]} : vector<16x32xf32> to vector<8x32xf32>
    %875 = vector.extract_strided_slice %7 {offsets = [1, 0], sizes = [1, 8], strides = [1, 1]} : vector<2x8xf32> to vector<1x8xf32>
    %876 = vector.extract_strided_slice %872 {offsets = [0, 0], sizes = [8, 8], strides = [1, 1]} : vector<8x32xf32> to vector<8x8xf32>
    %877 = vector.extract_strided_slice %873 {offsets = [0, 0], sizes = [8, 8], strides = [1, 1]} : vector<8x32xf32> to vector<8x8xf32>
    %cst_316 = arith.constant dense<0.000000e+00> : vector<8x8xf32>
    %878 = tpu.matmul %876, %877, %cst_316 {dimension_numbers = #tpu.dot_dimension_numbers<[1], [1], [0], [0], [0, 0, 1, 0], [], []>} : vector<8x8xf32>, vector<8x8xf32>, vector<8x8xf32> -> vector<8x8xf32>
    %cst_317 = arith.constant 0.353553385 : f32
    %879 = vector.broadcast %cst_317 : f32 to vector<8x8xf32>
    %880 = arith.mulf %878, %879 : vector<8x8xf32>
    %881 = vector.broadcast %875 : vector<1x8xf32> to vector<8x8xf32>
    %882 = arith.addf %880, %881 : vector<8x8xf32>
    %cst_318 = arith.constant dense<0xFF800000> : vector<8xf32>
    %883 = vector.multi_reduction <maximumf>, %882, %cst_318 [1] : vector<8x8xf32> to vector<8xf32>
    %884 = vector.shape_cast %883 : vector<8xf32> to vector<8x1xf32>
    %885 = vector.broadcast %884 : vector<8x1xf32> to vector<8x8xf32>
    %886 = arith.subf %882, %885 : vector<8x8xf32>
    %887 = math.exp %886 : vector<8x8xf32>
    %cst_319 = arith.constant dense<0.000000e+00> : vector<8xf32>
    %888 = vector.multi_reduction <add>, %887, %cst_319 [1] : vector<8x8xf32> to vector<8xf32>
    %889 = vector.shape_cast %888 : vector<8xf32> to vector<8x1xf32>
    %890 = tpu.reciprocal %889 {approx = true} : vector<8x1xf32> -> vector<8x1xf32>
    %891 = vector.broadcast %890 : vector<8x1xf32> to vector<8x8xf32>
    %892 = arith.mulf %887, %891 : vector<8x8xf32>
    %893 = vector.extract_strided_slice %874 {offsets = [0, 0], sizes = [8, 8], strides = [1, 1]} : vector<8x32xf32> to vector<8x8xf32>
    %cst_320 = arith.constant dense<0.000000e+00> : vector<8x8xf32>
    %894 = tpu.matmul %892, %893, %cst_320 {dimension_numbers = #tpu.dot_dimension_numbers<[1], [0], [0], [1], [0, 0, 1, 1], [], []>} : vector<8x8xf32>, vector<8x8xf32>, vector<8x8xf32> -> vector<8x8xf32>
    %895 = vector.extract_strided_slice %779 {offsets = [0, 0], sizes = [8, 32], strides = [1, 1]} : vector<32x32xf32> to vector<8x32xf32>
    %cst_321 = arith.constant dense<0.000000e+00> : vector<8x32xf32>
    %896 = tpu.matmul %894, %895, %cst_321 {dimension_numbers = #tpu.dot_dimension_numbers<[1], [0], [0], [1], [0, 0, 1, 1], [], []>} : vector<8x8xf32>, vector<8x32xf32>, vector<8x32xf32> -> vector<8x32xf32>
    %897 = vector.extract_strided_slice %872 {offsets = [0, 8], sizes = [8, 8], strides = [1, 1]} : vector<8x32xf32> to vector<8x8xf32>
    %898 = vector.extract_strided_slice %873 {offsets = [0, 8], sizes = [8, 8], strides = [1, 1]} : vector<8x32xf32> to vector<8x8xf32>
    %cst_322 = arith.constant dense<0.000000e+00> : vector<8x8xf32>
    %899 = tpu.matmul %897, %898, %cst_322 {dimension_numbers = #tpu.dot_dimension_numbers<[1], [1], [0], [0], [0, 0, 1, 0], [], []>} : vector<8x8xf32>, vector<8x8xf32>, vector<8x8xf32> -> vector<8x8xf32>
    %cst_323 = arith.constant 0.353553385 : f32
    %900 = vector.broadcast %cst_323 : f32 to vector<8x8xf32>
    %901 = arith.mulf %899, %900 : vector<8x8xf32>
    %902 = vector.broadcast %875 : vector<1x8xf32> to vector<8x8xf32>
    %903 = arith.addf %901, %902 : vector<8x8xf32>
    %cst_324 = arith.constant dense<0xFF800000> : vector<8xf32>
    %904 = vector.multi_reduction <maximumf>, %903, %cst_324 [1] : vector<8x8xf32> to vector<8xf32>
    %905 = vector.shape_cast %904 : vector<8xf32> to vector<8x1xf32>
    %906 = vector.broadcast %905 : vector<8x1xf32> to vector<8x8xf32>
    %907 = arith.subf %903, %906 : vector<8x8xf32>
    %908 = math.exp %907 : vector<8x8xf32>
    %cst_325 = arith.constant dense<0.000000e+00> : vector<8xf32>
    %909 = vector.multi_reduction <add>, %908, %cst_325 [1] : vector<8x8xf32> to vector<8xf32>
    %910 = vector.shape_cast %909 : vector<8xf32> to vector<8x1xf32>
    %911 = tpu.reciprocal %910 {approx = true} : vector<8x1xf32> -> vector<8x1xf32>
    %912 = vector.broadcast %911 : vector<8x1xf32> to vector<8x8xf32>
    %913 = arith.mulf %908, %912 : vector<8x8xf32>
    %914 = vector.extract_strided_slice %874 {offsets = [0, 8], sizes = [8, 8], strides = [1, 1]} : vector<8x32xf32> to vector<8x8xf32>
    %cst_326 = arith.constant dense<0.000000e+00> : vector<8x8xf32>
    %915 = tpu.matmul %913, %914, %cst_326 {dimension_numbers = #tpu.dot_dimension_numbers<[1], [0], [0], [1], [0, 0, 1, 1], [], []>} : vector<8x8xf32>, vector<8x8xf32>, vector<8x8xf32> -> vector<8x8xf32>
    %916 = vector.extract_strided_slice %779 {offsets = [8, 0], sizes = [8, 32], strides = [1, 1]} : vector<32x32xf32> to vector<8x32xf32>
    %cst_327 = arith.constant dense<0.000000e+00> : vector<8x32xf32>
    %917 = tpu.matmul %915, %916, %cst_327 {dimension_numbers = #tpu.dot_dimension_numbers<[1], [0], [0], [1], [0, 0, 1, 1], [], []>} : vector<8x8xf32>, vector<8x32xf32>, vector<8x32xf32> -> vector<8x32xf32>
    %918 = arith.addf %896, %917 : vector<8x32xf32>
    %919 = vector.extract_strided_slice %872 {offsets = [0, 16], sizes = [8, 8], strides = [1, 1]} : vector<8x32xf32> to vector<8x8xf32>
    %920 = vector.extract_strided_slice %873 {offsets = [0, 16], sizes = [8, 8], strides = [1, 1]} : vector<8x32xf32> to vector<8x8xf32>
    %cst_328 = arith.constant dense<0.000000e+00> : vector<8x8xf32>
    %921 = tpu.matmul %919, %920, %cst_328 {dimension_numbers = #tpu.dot_dimension_numbers<[1], [1], [0], [0], [0, 0, 1, 0], [], []>} : vector<8x8xf32>, vector<8x8xf32>, vector<8x8xf32> -> vector<8x8xf32>
    %cst_329 = arith.constant 0.353553385 : f32
    %922 = vector.broadcast %cst_329 : f32 to vector<8x8xf32>
    %923 = arith.mulf %921, %922 : vector<8x8xf32>
    %924 = vector.broadcast %875 : vector<1x8xf32> to vector<8x8xf32>
    %925 = arith.addf %923, %924 : vector<8x8xf32>
    %cst_330 = arith.constant dense<0xFF800000> : vector<8xf32>
    %926 = vector.multi_reduction <maximumf>, %925, %cst_330 [1] : vector<8x8xf32> to vector<8xf32>
    %927 = vector.shape_cast %926 : vector<8xf32> to vector<8x1xf32>
    %928 = vector.broadcast %927 : vector<8x1xf32> to vector<8x8xf32>
    %929 = arith.subf %925, %928 : vector<8x8xf32>
    %930 = math.exp %929 : vector<8x8xf32>
    %cst_331 = arith.constant dense<0.000000e+00> : vector<8xf32>
    %931 = vector.multi_reduction <add>, %930, %cst_331 [1] : vector<8x8xf32> to vector<8xf32>
    %932 = vector.shape_cast %931 : vector<8xf32> to vector<8x1xf32>
    %933 = tpu.reciprocal %932 {approx = true} : vector<8x1xf32> -> vector<8x1xf32>
    %934 = vector.broadcast %933 : vector<8x1xf32> to vector<8x8xf32>
    %935 = arith.mulf %930, %934 : vector<8x8xf32>
    %936 = vector.extract_strided_slice %874 {offsets = [0, 16], sizes = [8, 8], strides = [1, 1]} : vector<8x32xf32> to vector<8x8xf32>
    %cst_332 = arith.constant dense<0.000000e+00> : vector<8x8xf32>
    %937 = tpu.matmul %935, %936, %cst_332 {dimension_numbers = #tpu.dot_dimension_numbers<[1], [0], [0], [1], [0, 0, 1, 1], [], []>} : vector<8x8xf32>, vector<8x8xf32>, vector<8x8xf32> -> vector<8x8xf32>
    %938 = vector.extract_strided_slice %779 {offsets = [16, 0], sizes = [8, 32], strides = [1, 1]} : vector<32x32xf32> to vector<8x32xf32>
    %cst_333 = arith.constant dense<0.000000e+00> : vector<8x32xf32>
    %939 = tpu.matmul %937, %938, %cst_333 {dimension_numbers = #tpu.dot_dimension_numbers<[1], [0], [0], [1], [0, 0, 1, 1], [], []>} : vector<8x8xf32>, vector<8x32xf32>, vector<8x32xf32> -> vector<8x32xf32>
    %940 = arith.addf %918, %939 : vector<8x32xf32>
    %941 = vector.extract_strided_slice %872 {offsets = [0, 24], sizes = [8, 8], strides = [1, 1]} : vector<8x32xf32> to vector<8x8xf32>
    %942 = vector.extract_strided_slice %873 {offsets = [0, 24], sizes = [8, 8], strides = [1, 1]} : vector<8x32xf32> to vector<8x8xf32>
    %cst_334 = arith.constant dense<0.000000e+00> : vector<8x8xf32>
    %943 = tpu.matmul %941, %942, %cst_334 {dimension_numbers = #tpu.dot_dimension_numbers<[1], [1], [0], [0], [0, 0, 1, 0], [], []>} : vector<8x8xf32>, vector<8x8xf32>, vector<8x8xf32> -> vector<8x8xf32>
    %cst_335 = arith.constant 0.353553385 : f32
    %944 = vector.broadcast %cst_335 : f32 to vector<8x8xf32>
    %945 = arith.mulf %943, %944 : vector<8x8xf32>
    %946 = vector.broadcast %875 : vector<1x8xf32> to vector<8x8xf32>
    %947 = arith.addf %945, %946 : vector<8x8xf32>
    %cst_336 = arith.constant dense<0xFF800000> : vector<8xf32>
    %948 = vector.multi_reduction <maximumf>, %947, %cst_336 [1] : vector<8x8xf32> to vector<8xf32>
    %949 = vector.shape_cast %948 : vector<8xf32> to vector<8x1xf32>
    %950 = vector.broadcast %949 : vector<8x1xf32> to vector<8x8xf32>
    %951 = arith.subf %947, %950 : vector<8x8xf32>
    %952 = math.exp %951 : vector<8x8xf32>
    %cst_337 = arith.constant dense<0.000000e+00> : vector<8xf32>
    %953 = vector.multi_reduction <add>, %952, %cst_337 [1] : vector<8x8xf32> to vector<8xf32>
    %954 = vector.shape_cast %953 : vector<8xf32> to vector<8x1xf32>
    %955 = tpu.reciprocal %954 {approx = true} : vector<8x1xf32> -> vector<8x1xf32>
    %956 = vector.broadcast %955 : vector<8x1xf32> to vector<8x8xf32>
    %957 = arith.mulf %952, %956 : vector<8x8xf32>
    %958 = vector.extract_strided_slice %874 {offsets = [0, 24], sizes = [8, 8], strides = [1, 1]} : vector<8x32xf32> to vector<8x8xf32>
    %cst_338 = arith.constant dense<0.000000e+00> : vector<8x8xf32>
    %959 = tpu.matmul %957, %958, %cst_338 {dimension_numbers = #tpu.dot_dimension_numbers<[1], [0], [0], [1], [0, 0, 1, 1], [], []>} : vector<8x8xf32>, vector<8x8xf32>, vector<8x8xf32> -> vector<8x8xf32>
    %960 = vector.extract_strided_slice %779 {offsets = [24, 0], sizes = [8, 32], strides = [1, 1]} : vector<32x32xf32> to vector<8x32xf32>
    %cst_339 = arith.constant dense<0.000000e+00> : vector<8x32xf32>
    %961 = tpu.matmul %959, %960, %cst_339 {dimension_numbers = #tpu.dot_dimension_numbers<[1], [0], [0], [1], [0, 0, 1, 1], [], []>} : vector<8x8xf32>, vector<8x32xf32>, vector<8x32xf32> -> vector<8x32xf32>
    %962 = arith.addf %940, %961 : vector<8x32xf32>
    %c8_340 = arith.constant 8 : index
    %c0_341 = arith.constant 0 : index
    %963 = vector.load %arg74[%c8_340, %c0_341] : memref<16x32xf32, #tpu.memory_space<vmem>>, vector<8x32xf32>
    tpu.vector_store %arg74[%c8_340, %c0_341], %962 {strides = array<i32>} : memref<16x32xf32, #tpu.memory_space<vmem>>, vector<8x32xf32>,
    %c0_342 = arith.constant 0 : index
    %c0_343 = arith.constant 0 : index
    %964 = vector.load %arg74[%c0_342, %c0_343] : memref<16x32xf32, #tpu.memory_space<vmem>>, vector<16x32xf32>
    %c0_344 = arith.constant 0 : index
    %c0_345 = arith.constant 0 : index
    %965 = vector.load %arg1[%c0_344, %c0_345] : memref<1x32xf32, #tpu.memory_space<vmem>>, vector<1x32xf32>
    %966 = vector.broadcast %965 : vector<1x32xf32> to vector<16x32xf32>
    %967 = arith.addf %964, %966 : vector<16x32xf32>
    %968 = arith.addf %766, %967 : vector<16x32xf32>
    %cst_346 = arith.constant dense<0.000000e+00> : vector<16xf32>
    %969 = vector.multi_reduction <add>, %968, %cst_346 [1] : vector<16x32xf32> to vector<16xf32>
    %970 = vector.shape_cast %969 : vector<16xf32> to vector<16x1xf32>
    %cst_347 = arith.constant 3.200000e+01 : f32
    %971 = vector.broadcast %cst_347 : f32 to vector<16x1xf32>
    %972 = arith.divf %970, %971 : vector<16x1xf32>
    %973 = vector.broadcast %972 : vector<16x1xf32> to vector<16x32xf32>
    %974 = arith.subf %968, %973 : vector<16x32xf32>
    %975 = arith.mulf %974, %974 : vector<16x32xf32>
    %cst_348 = arith.constant dense<0.000000e+00> : vector<16xf32>
    %976 = vector.multi_reduction <add>, %975, %cst_348 [1] : vector<16x32xf32> to vector<16xf32>
    %977 = vector.shape_cast %976 : vector<16xf32> to vector<16x1xf32>
    %cst_349 = arith.constant 3.200000e+01 : f32
    %978 = vector.broadcast %cst_349 : f32 to vector<16x1xf32>
    %979 = arith.divf %977, %978 : vector<16x1xf32>
    %cst_350 = arith.constant 9.99999974E-6 : f32
    %980 = vector.broadcast %cst_350 : f32 to vector<16x1xf32>
    %981 = arith.addf %979, %980 : vector<16x1xf32>
    %982 = math.rsqrt %981 : vector<16x1xf32>
    %983 = vector.broadcast %982 : vector<16x1xf32> to vector<16x32xf32>
    %984 = arith.mulf %974, %983 : vector<16x32xf32>
    %c0_351 = arith.constant 0 : index
    %c0_352 = arith.constant 0 : index
    %985 = vector.load %arg13[%c0_351, %c0_352] : memref<1x32xf32, #tpu.memory_space<vmem>>, vector<1x32xf32>
    %986 = vector.broadcast %985 : vector<1x32xf32> to vector<16x32xf32>
    %987 = arith.mulf %984, %986 : vector<16x32xf32>
    %c0_353 = arith.constant 0 : index
    %c0_354 = arith.constant 0 : index
    %988 = vector.load %arg12[%c0_353, %c0_354] : memref<1x32xf32, #tpu.memory_space<vmem>>, vector<1x32xf32>
    %989 = vector.broadcast %988 : vector<1x32xf32> to vector<16x32xf32>
    %990 = arith.addf %987, %989 : vector<16x32xf32>
    %c0_355 = arith.constant 0 : index
    %c0_356 = arith.constant 0 : index
    %991 = vector.load %arg7[%c0_355, %c0_356] : memref<32x64xf32, #tpu.memory_space<vmem>>, vector<32x64xf32>
    %cst_357 = arith.constant dense<0.000000e+00> : vector<16x64xf32>
    %992 = tpu.matmul %990, %991, %cst_357 {dimension_numbers = #tpu.dot_dimension_numbers<[1], [0], [0], [1], [0, 0, 1, 1], [], []>} : vector<16x32xf32>, vector<32x64xf32>, vector<16x64xf32> -> vector<16x64xf32>
    %c0_358 = arith.constant 0 : index
    %c0_359 = arith.constant 0 : index
    %993 = vector.load %arg6[%c0_358, %c0_359] : memref<1x64xf32, #tpu.memory_space<vmem>>, vector<1x64xf32>
    %994 = vector.broadcast %993 : vector<1x64xf32> to vector<16x64xf32>
    %995 = arith.addf %992, %994 : vector<16x64xf32>
    %cst_360 = arith.constant 0.000000e+00 : f32
    %996 = vector.broadcast %cst_360 : f32 to vector<16x64xf32>
    %997 = arith.maximumf %995, %996 : vector<16x64xf32>
    %c0_361 = arith.constant 0 : index
    %c0_362 = arith.constant 0 : index
    %998 = vector.load %arg9[%c0_361, %c0_362] : memref<64x32xf32, #tpu.memory_space<vmem>>, vector<64x32xf32>
    %cst_363 = arith.constant dense<0.000000e+00> : vector<16x32xf32>
    %999 = tpu.matmul %997, %998, %cst_363 {dimension_numbers = #tpu.dot_dimension_numbers<[1], [0], [0], [1], [0, 0, 1, 1], [], []>} : vector<16x64xf32>, vector<64x32xf32>, vector<16x32xf32> -> vector<16x32xf32>
    %c0_364 = arith.constant 0 : index
    %c0_365 = arith.constant 0 : index
    %1000 = vector.load %arg8[%c0_364, %c0_365] : memref<1x32xf32, #tpu.memory_space<vmem>>, vector<1x32xf32>
    %1001 = vector.broadcast %1000 : vector<1x32xf32> to vector<16x32xf32>
    %1002 = arith.addf %999, %1001 : vector<16x32xf32>
    %1003 = arith.addf %990, %1002 : vector<16x32xf32>
    %cst_366 = arith.constant dense<0.000000e+00> : vector<16xf32>
    %1004 = vector.multi_reduction <add>, %1003, %cst_366 [1] : vector<16x32xf32> to vector<16xf32>
    %1005 = vector.shape_cast %1004 : vector<16xf32> to vector<16x1xf32>
    %cst_367 = arith.constant 3.200000e+01 : f32
    %1006 = vector.broadcast %cst_367 : f32 to vector<16x1xf32>
    %1007 = arith.divf %1005, %1006 : vector<16x1xf32>
    %1008 = vector.broadcast %1007 : vector<16x1xf32> to vector<16x32xf32>
    %1009 = arith.subf %1003, %1008 : vector<16x32xf32>
    %1010 = arith.mulf %1009, %1009 : vector<16x32xf32>
    %cst_368 = arith.constant dense<0.000000e+00> : vector<16xf32>
    %1011 = vector.multi_reduction <add>, %1010, %cst_368 [1] : vector<16x32xf32> to vector<16xf32>
    %1012 = vector.shape_cast %1011 : vector<16xf32> to vector<16x1xf32>
    %cst_369 = arith.constant 3.200000e+01 : f32
    %1013 = vector.broadcast %cst_369 : f32 to vector<16x1xf32>
    %1014 = arith.divf %1012, %1013 : vector<16x1xf32>
    %cst_370 = arith.constant 9.99999974E-6 : f32
    %1015 = vector.broadcast %cst_370 : f32 to vector<16x1xf32>
    %1016 = arith.addf %1014, %1015 : vector<16x1xf32>
    %1017 = math.rsqrt %1016 : vector<16x1xf32>
    %1018 = vector.broadcast %1017 : vector<16x1xf32> to vector<16x32xf32>
    %1019 = arith.mulf %1009, %1018 : vector<16x32xf32>
    %c0_371 = arith.constant 0 : index
    %c0_372 = arith.constant 0 : index
    %1020 = vector.load %arg15[%c0_371, %c0_372] : memref<1x32xf32, #tpu.memory_space<vmem>>, vector<1x32xf32>
    %1021 = vector.broadcast %1020 : vector<1x32xf32> to vector<16x32xf32>
    %1022 = arith.mulf %1019, %1021 : vector<16x32xf32>
    %c0_373 = arith.constant 0 : index
    %c0_374 = arith.constant 0 : index
    %1023 = vector.load %arg14[%c0_373, %c0_374] : memref<1x32xf32, #tpu.memory_space<vmem>>, vector<1x32xf32>
    %1024 = vector.broadcast %1023 : vector<1x32xf32> to vector<16x32xf32>
    %1025 = arith.addf %1022, %1024 : vector<16x32xf32>
    %c0_375 = arith.constant 0 : index
    %c0_376 = arith.constant 0 : index
    %1026 = vector.load %arg39[%c0_375, %c0_376] : memref<32x96xf32, #tpu.memory_space<vmem>>, vector<32x96xf32>
    %cst_377 = arith.constant dense<0.000000e+00> : vector<16x96xf32>
    %1027 = tpu.matmul %1025, %1026, %cst_377 {dimension_numbers = #tpu.dot_dimension_numbers<[1], [0], [0], [1], [0, 0, 1, 1], [], []>} : vector<16x32xf32>, vector<32x96xf32>, vector<16x96xf32> -> vector<16x96xf32>
    %c0_378 = arith.constant 0 : index
    %c0_379 = arith.constant 0 : index
    %1028 = vector.load %arg37[%c0_378, %c0_379] : memref<1x96xf32, #tpu.memory_space<vmem>>, vector<1x96xf32>
    %1029 = vector.broadcast %1028 : vector<1x96xf32> to vector<16x96xf32>
    %1030 = arith.addf %1027, %1029 : vector<16x96xf32>
    %1031 = vector.extract_strided_slice %1030 {offsets = [0, 0], sizes = [16, 32], strides = [1, 1]} : vector<16x96xf32> to vector<16x32xf32>
    %1032 = vector.extract_strided_slice %1030 {offsets = [0, 32], sizes = [16, 32], strides = [1, 1]} : vector<16x96xf32> to vector<16x32xf32>
    %1033 = vector.extract_strided_slice %1030 {offsets = [0, 64], sizes = [16, 32], strides = [1, 1]} : vector<16x96xf32> to vector<16x32xf32>
    %c0_380 = arith.constant 0 : index
    %c0_381 = arith.constant 0 : index
    %1034 = vector.load %arg38[%c0_380, %c0_381] : memref<32x32xf32, #tpu.memory_space<vmem>>, vector<32x32xf32>
    %1035 = vector.extract_strided_slice %1031 {offsets = [0, 0], sizes = [8, 32], strides = [1, 1]} : vector<16x32xf32> to vector<8x32xf32>
    %1036 = vector.extract_strided_slice %1032 {offsets = [0, 0], sizes = [8, 32], strides = [1, 1]} : vector<16x32xf32> to vector<8x32xf32>
    %1037 = vector.extract_strided_slice %1033 {offsets = [0, 0], sizes = [8, 32], strides = [1, 1]} : vector<16x32xf32> to vector<8x32xf32>
    %1038 = vector.extract_strided_slice %12 {offsets = [0, 0], sizes = [1, 8], strides = [1, 1]} : vector<2x8xf32> to vector<1x8xf32>
    %1039 = vector.broadcast %1038 : vector<1x8xf32> to vector<8x8xf32>
    %1040 = arith.minimumf %18, %1039 : vector<8x8xf32>
    %1041 = vector.extract_strided_slice %1035 {offsets = [0, 0], sizes = [8, 8], strides = [1, 1]} : vector<8x32xf32> to vector<8x8xf32>
    %1042 = vector.extract_strided_slice %1036 {offsets = [0, 0], sizes = [8, 8], strides = [1, 1]} : vector<8x32xf32> to vector<8x8xf32>
    %cst_382 = arith.constant dense<0.000000e+00> : vector<8x8xf32>
    %1043 = tpu.matmul %1041, %1042, %cst_382 {dimension_numbers = #tpu.dot_dimension_numbers<[1], [1], [0], [0], [0, 0, 1, 0], [], []>} : vector<8x8xf32>, vector<8x8xf32>, vector<8x8xf32> -> vector<8x8xf32>
    %cst_383 = arith.constant 0.353553385 : f32
    %1044 = vector.broadcast %cst_383 : f32 to vector<8x8xf32>
    %1045 = arith.mulf %1043, %1044 : vector<8x8xf32>
    %1046 = arith.addf %1045, %1040 : vector<8x8xf32>
    %cst_384 = arith.constant dense<0xFF800000> : vector<8xf32>
    %1047 = vector.multi_reduction <maximumf>, %1046, %cst_384 [1] : vector<8x8xf32> to vector<8xf32>
    %1048 = vector.shape_cast %1047 : vector<8xf32> to vector<8x1xf32>
    %1049 = vector.broadcast %1048 : vector<8x1xf32> to vector<8x8xf32>
    %1050 = arith.subf %1046, %1049 : vector<8x8xf32>
    %1051 = math.exp %1050 : vector<8x8xf32>
    %cst_385 = arith.constant dense<0.000000e+00> : vector<8xf32>
    %1052 = vector.multi_reduction <add>, %1051, %cst_385 [1] : vector<8x8xf32> to vector<8xf32>
    %1053 = vector.shape_cast %1052 : vector<8xf32> to vector<8x1xf32>
    %1054 = tpu.reciprocal %1053 {approx = true} : vector<8x1xf32> -> vector<8x1xf32>
    %1055 = vector.broadcast %1054 : vector<8x1xf32> to vector<8x8xf32>
    %1056 = arith.mulf %1051, %1055 : vector<8x8xf32>
    %1057 = vector.extract_strided_slice %1037 {offsets = [0, 0], sizes = [8, 8], strides = [1, 1]} : vector<8x32xf32> to vector<8x8xf32>
    %cst_386 = arith.constant dense<0.000000e+00> : vector<8x8xf32>
    %1058 = tpu.matmul %1056, %1057, %cst_386 {dimension_numbers = #tpu.dot_dimension_numbers<[1], [0], [0], [1], [0, 0, 1, 1], [], []>} : vector<8x8xf32>, vector<8x8xf32>, vector<8x8xf32> -> vector<8x8xf32>
    %1059 = vector.extract_strided_slice %1034 {offsets = [0, 0], sizes = [8, 32], strides = [1, 1]} : vector<32x32xf32> to vector<8x32xf32>
    %cst_387 = arith.constant dense<0.000000e+00> : vector<8x32xf32>
    %1060 = tpu.matmul %1058, %1059, %cst_387 {dimension_numbers = #tpu.dot_dimension_numbers<[1], [0], [0], [1], [0, 0, 1, 1], [], []>} : vector<8x8xf32>, vector<8x32xf32>, vector<8x32xf32> -> vector<8x32xf32>
    %1061 = vector.extract_strided_slice %1035 {offsets = [0, 8], sizes = [8, 8], strides = [1, 1]} : vector<8x32xf32> to vector<8x8xf32>
    %1062 = vector.extract_strided_slice %1036 {offsets = [0, 8], sizes = [8, 8], strides = [1, 1]} : vector<8x32xf32> to vector<8x8xf32>
    %cst_388 = arith.constant dense<0.000000e+00> : vector<8x8xf32>
    %1063 = tpu.matmul %1061, %1062, %cst_388 {dimension_numbers = #tpu.dot_dimension_numbers<[1], [1], [0], [0], [0, 0, 1, 0], [], []>} : vector<8x8xf32>, vector<8x8xf32>, vector<8x8xf32> -> vector<8x8xf32>
    %cst_389 = arith.constant 0.353553385 : f32
    %1064 = vector.broadcast %cst_389 : f32 to vector<8x8xf32>
    %1065 = arith.mulf %1063, %1064 : vector<8x8xf32>
    %1066 = arith.addf %1065, %1040 : vector<8x8xf32>
    %cst_390 = arith.constant dense<0xFF800000> : vector<8xf32>
    %1067 = vector.multi_reduction <maximumf>, %1066, %cst_390 [1] : vector<8x8xf32> to vector<8xf32>
    %1068 = vector.shape_cast %1067 : vector<8xf32> to vector<8x1xf32>
    %1069 = vector.broadcast %1068 : vector<8x1xf32> to vector<8x8xf32>
    %1070 = arith.subf %1066, %1069 : vector<8x8xf32>
    %1071 = math.exp %1070 : vector<8x8xf32>
    %cst_391 = arith.constant dense<0.000000e+00> : vector<8xf32>
    %1072 = vector.multi_reduction <add>, %1071, %cst_391 [1] : vector<8x8xf32> to vector<8xf32>
    %1073 = vector.shape_cast %1072 : vector<8xf32> to vector<8x1xf32>
    %1074 = tpu.reciprocal %1073 {approx = true} : vector<8x1xf32> -> vector<8x1xf32>
    %1075 = vector.broadcast %1074 : vector<8x1xf32> to vector<8x8xf32>
    %1076 = arith.mulf %1071, %1075 : vector<8x8xf32>
    %1077 = vector.extract_strided_slice %1037 {offsets = [0, 8], sizes = [8, 8], strides = [1, 1]} : vector<8x32xf32> to vector<8x8xf32>
    %cst_392 = arith.constant dense<0.000000e+00> : vector<8x8xf32>
    %1078 = tpu.matmul %1076, %1077, %cst_392 {dimension_numbers = #tpu.dot_dimension_numbers<[1], [0], [0], [1], [0, 0, 1, 1], [], []>} : vector<8x8xf32>, vector<8x8xf32>, vector<8x8xf32> -> vector<8x8xf32>
    %1079 = vector.extract_strided_slice %1034 {offsets = [8, 0], sizes = [8, 32], strides = [1, 1]} : vector<32x32xf32> to vector<8x32xf32>
    %cst_393 = arith.constant dense<0.000000e+00> : vector<8x32xf32>
    %1080 = tpu.matmul %1078, %1079, %cst_393 {dimension_numbers = #tpu.dot_dimension_numbers<[1], [0], [0], [1], [0, 0, 1, 1], [], []>} : vector<8x8xf32>, vector<8x32xf32>, vector<8x32xf32> -> vector<8x32xf32>
    %1081 = arith.addf %1060, %1080 : vector<8x32xf32>
    %1082 = vector.extract_strided_slice %1035 {offsets = [0, 16], sizes = [8, 8], strides = [1, 1]} : vector<8x32xf32> to vector<8x8xf32>
    %1083 = vector.extract_strided_slice %1036 {offsets = [0, 16], sizes = [8, 8], strides = [1, 1]} : vector<8x32xf32> to vector<8x8xf32>
    %cst_394 = arith.constant dense<0.000000e+00> : vector<8x8xf32>
    %1084 = tpu.matmul %1082, %1083, %cst_394 {dimension_numbers = #tpu.dot_dimension_numbers<[1], [1], [0], [0], [0, 0, 1, 0], [], []>} : vector<8x8xf32>, vector<8x8xf32>, vector<8x8xf32> -> vector<8x8xf32>
    %cst_395 = arith.constant 0.353553385 : f32
    %1085 = vector.broadcast %cst_395 : f32 to vector<8x8xf32>
    %1086 = arith.mulf %1084, %1085 : vector<8x8xf32>
    %1087 = arith.addf %1086, %1040 : vector<8x8xf32>
    %cst_396 = arith.constant dense<0xFF800000> : vector<8xf32>
    %1088 = vector.multi_reduction <maximumf>, %1087, %cst_396 [1] : vector<8x8xf32> to vector<8xf32>
    %1089 = vector.shape_cast %1088 : vector<8xf32> to vector<8x1xf32>
    %1090 = vector.broadcast %1089 : vector<8x1xf32> to vector<8x8xf32>
    %1091 = arith.subf %1087, %1090 : vector<8x8xf32>
    %1092 = math.exp %1091 : vector<8x8xf32>
    %cst_397 = arith.constant dense<0.000000e+00> : vector<8xf32>
    %1093 = vector.multi_reduction <add>, %1092, %cst_397 [1] : vector<8x8xf32> to vector<8xf32>
    %1094 = vector.shape_cast %1093 : vector<8xf32> to vector<8x1xf32>
    %1095 = tpu.reciprocal %1094 {approx = true} : vector<8x1xf32> -> vector<8x1xf32>
    %1096 = vector.broadcast %1095 : vector<8x1xf32> to vector<8x8xf32>
    %1097 = arith.mulf %1092, %1096 : vector<8x8xf32>
    %1098 = vector.extract_strided_slice %1037 {offsets = [0, 16], sizes = [8, 8], strides = [1, 1]} : vector<8x32xf32> to vector<8x8xf32>
    %cst_398 = arith.constant dense<0.000000e+00> : vector<8x8xf32>
    %1099 = tpu.matmul %1097, %1098, %cst_398 {dimension_numbers = #tpu.dot_dimension_numbers<[1], [0], [0], [1], [0, 0, 1, 1], [], []>} : vector<8x8xf32>, vector<8x8xf32>, vector<8x8xf32> -> vector<8x8xf32>
    %1100 = vector.extract_strided_slice %1034 {offsets = [16, 0], sizes = [8, 32], strides = [1, 1]} : vector<32x32xf32> to vector<8x32xf32>
    %cst_399 = arith.constant dense<0.000000e+00> : vector<8x32xf32>
    %1101 = tpu.matmul %1099, %1100, %cst_399 {dimension_numbers = #tpu.dot_dimension_numbers<[1], [0], [0], [1], [0, 0, 1, 1], [], []>} : vector<8x8xf32>, vector<8x32xf32>, vector<8x32xf32> -> vector<8x32xf32>
    %1102 = arith.addf %1081, %1101 : vector<8x32xf32>
    %1103 = vector.extract_strided_slice %1035 {offsets = [0, 24], sizes = [8, 8], strides = [1, 1]} : vector<8x32xf32> to vector<8x8xf32>
    %1104 = vector.extract_strided_slice %1036 {offsets = [0, 24], sizes = [8, 8], strides = [1, 1]} : vector<8x32xf32> to vector<8x8xf32>
    %cst_400 = arith.constant dense<0.000000e+00> : vector<8x8xf32>
    %1105 = tpu.matmul %1103, %1104, %cst_400 {dimension_numbers = #tpu.dot_dimension_numbers<[1], [1], [0], [0], [0, 0, 1, 0], [], []>} : vector<8x8xf32>, vector<8x8xf32>, vector<8x8xf32> -> vector<8x8xf32>
    %cst_401 = arith.constant 0.353553385 : f32
    %1106 = vector.broadcast %cst_401 : f32 to vector<8x8xf32>
    %1107 = arith.mulf %1105, %1106 : vector<8x8xf32>
    %1108 = arith.addf %1107, %1040 : vector<8x8xf32>
    %cst_402 = arith.constant dense<0xFF800000> : vector<8xf32>
    %1109 = vector.multi_reduction <maximumf>, %1108, %cst_402 [1] : vector<8x8xf32> to vector<8xf32>
    %1110 = vector.shape_cast %1109 : vector<8xf32> to vector<8x1xf32>
    %1111 = vector.broadcast %1110 : vector<8x1xf32> to vector<8x8xf32>
    %1112 = arith.subf %1108, %1111 : vector<8x8xf32>
    %1113 = math.exp %1112 : vector<8x8xf32>
    %cst_403 = arith.constant dense<0.000000e+00> : vector<8xf32>
    %1114 = vector.multi_reduction <add>, %1113, %cst_403 [1] : vector<8x8xf32> to vector<8xf32>
    %1115 = vector.shape_cast %1114 : vector<8xf32> to vector<8x1xf32>
    %1116 = tpu.reciprocal %1115 {approx = true} : vector<8x1xf32> -> vector<8x1xf32>
    %1117 = vector.broadcast %1116 : vector<8x1xf32> to vector<8x8xf32>
    %1118 = arith.mulf %1113, %1117 : vector<8x8xf32>
    %1119 = vector.extract_strided_slice %1037 {offsets = [0, 24], sizes = [8, 8], strides = [1, 1]} : vector<8x32xf32> to vector<8x8xf32>
    %cst_404 = arith.constant dense<0.000000e+00> : vector<8x8xf32>
    %1120 = tpu.matmul %1118, %1119, %cst_404 {dimension_numbers = #tpu.dot_dimension_numbers<[1], [0], [0], [1], [0, 0, 1, 1], [], []>} : vector<8x8xf32>, vector<8x8xf32>, vector<8x8xf32> -> vector<8x8xf32>
    %1121 = vector.extract_strided_slice %1034 {offsets = [24, 0], sizes = [8, 32], strides = [1, 1]} : vector<32x32xf32> to vector<8x32xf32>
    %cst_405 = arith.constant dense<0.000000e+00> : vector<8x32xf32>
    %1122 = tpu.matmul %1120, %1121, %cst_405 {dimension_numbers = #tpu.dot_dimension_numbers<[1], [0], [0], [1], [0, 0, 1, 1], [], []>} : vector<8x8xf32>, vector<8x32xf32>, vector<8x32xf32> -> vector<8x32xf32>
    %1123 = arith.addf %1102, %1122 : vector<8x32xf32>
    %c0_406 = arith.constant 0 : index
    %c0_407 = arith.constant 0 : index
    %1124 = vector.load %arg74[%c0_406, %c0_407] : memref<16x32xf32, #tpu.memory_space<vmem>>, vector<8x32xf32>
    tpu.vector_store %arg74[%c0_406, %c0_407], %1123 {strides = array<i32>} : memref<16x32xf32, #tpu.memory_space<vmem>>, vector<8x32xf32>,
    %1125 = vector.extract_strided_slice %1031 {offsets = [8, 0], sizes = [8, 32], strides = [1, 1]} : vector<16x32xf32> to vector<8x32xf32>
    %1126 = vector.extract_strided_slice %1032 {offsets = [8, 0], sizes = [8, 32], strides = [1, 1]} : vector<16x32xf32> to vector<8x32xf32>
    %1127 = vector.extract_strided_slice %1033 {offsets = [8, 0], sizes = [8, 32], strides = [1, 1]} : vector<16x32xf32> to vector<8x32xf32>
    %1128 = vector.extract_strided_slice %12 {offsets = [1, 0], sizes = [1, 8], strides = [1, 1]} : vector<2x8xf32> to vector<1x8xf32>
    %1129 = vector.broadcast %1128 : vector<1x8xf32> to vector<8x8xf32>
    %1130 = arith.minimumf %18, %1129 : vector<8x8xf32>
    %1131 = vector.extract_strided_slice %1125 {offsets = [0, 0], sizes = [8, 8], strides = [1, 1]} : vector<8x32xf32> to vector<8x8xf32>
    %1132 = vector.extract_strided_slice %1126 {offsets = [0, 0], sizes = [8, 8], strides = [1, 1]} : vector<8x32xf32> to vector<8x8xf32>
    %cst_408 = arith.constant dense<0.000000e+00> : vector<8x8xf32>
    %1133 = tpu.matmul %1131, %1132, %cst_408 {dimension_numbers = #tpu.dot_dimension_numbers<[1], [1], [0], [0], [0, 0, 1, 0], [], []>} : vector<8x8xf32>, vector<8x8xf32>, vector<8x8xf32> -> vector<8x8xf32>
    %cst_409 = arith.constant 0.353553385 : f32
    %1134 = vector.broadcast %cst_409 : f32 to vector<8x8xf32>
    %1135 = arith.mulf %1133, %1134 : vector<8x8xf32>
    %1136 = arith.addf %1135, %1130 : vector<8x8xf32>
    %cst_410 = arith.constant dense<0xFF800000> : vector<8xf32>
    %1137 = vector.multi_reduction <maximumf>, %1136, %cst_410 [1] : vector<8x8xf32> to vector<8xf32>
    %1138 = vector.shape_cast %1137 : vector<8xf32> to vector<8x1xf32>
    %1139 = vector.broadcast %1138 : vector<8x1xf32> to vector<8x8xf32>
    %1140 = arith.subf %1136, %1139 : vector<8x8xf32>
    %1141 = math.exp %1140 : vector<8x8xf32>
    %cst_411 = arith.constant dense<0.000000e+00> : vector<8xf32>
    %1142 = vector.multi_reduction <add>, %1141, %cst_411 [1] : vector<8x8xf32> to vector<8xf32>
    %1143 = vector.shape_cast %1142 : vector<8xf32> to vector<8x1xf32>
    %1144 = tpu.reciprocal %1143 {approx = true} : vector<8x1xf32> -> vector<8x1xf32>
    %1145 = vector.broadcast %1144 : vector<8x1xf32> to vector<8x8xf32>
    %1146 = arith.mulf %1141, %1145 : vector<8x8xf32>
    %1147 = vector.extract_strided_slice %1127 {offsets = [0, 0], sizes = [8, 8], strides = [1, 1]} : vector<8x32xf32> to vector<8x8xf32>
    %cst_412 = arith.constant dense<0.000000e+00> : vector<8x8xf32>
    %1148 = tpu.matmul %1146, %1147, %cst_412 {dimension_numbers = #tpu.dot_dimension_numbers<[1], [0], [0], [1], [0, 0, 1, 1], [], []>} : vector<8x8xf32>, vector<8x8xf32>, vector<8x8xf32> -> vector<8x8xf32>
    %1149 = vector.extract_strided_slice %1034 {offsets = [0, 0], sizes = [8, 32], strides = [1, 1]} : vector<32x32xf32> to vector<8x32xf32>
    %cst_413 = arith.constant dense<0.000000e+00> : vector<8x32xf32>
    %1150 = tpu.matmul %1148, %1149, %cst_413 {dimension_numbers = #tpu.dot_dimension_numbers<[1], [0], [0], [1], [0, 0, 1, 1], [], []>} : vector<8x8xf32>, vector<8x32xf32>, vector<8x32xf32> -> vector<8x32xf32>
    %1151 = vector.extract_strided_slice %1125 {offsets = [0, 8], sizes = [8, 8], strides = [1, 1]} : vector<8x32xf32> to vector<8x8xf32>
    %1152 = vector.extract_strided_slice %1126 {offsets = [0, 8], sizes = [8, 8], strides = [1, 1]} : vector<8x32xf32> to vector<8x8xf32>
    %cst_414 = arith.constant dense<0.000000e+00> : vector<8x8xf32>
    %1153 = tpu.matmul %1151, %1152, %cst_414 {dimension_numbers = #tpu.dot_dimension_numbers<[1], [1], [0], [0], [0, 0, 1, 0], [], []>} : vector<8x8xf32>, vector<8x8xf32>, vector<8x8xf32> -> vector<8x8xf32>
    %cst_415 = arith.constant 0.353553385 : f32
    %1154 = vector.broadcast %cst_415 : f32 to vector<8x8xf32>
    %1155 = arith.mulf %1153, %1154 : vector<8x8xf32>
    %1156 = arith.addf %1155, %1130 : vector<8x8xf32>
    %cst_416 = arith.constant dense<0xFF800000> : vector<8xf32>
    %1157 = vector.multi_reduction <maximumf>, %1156, %cst_416 [1] : vector<8x8xf32> to vector<8xf32>
    %1158 = vector.shape_cast %1157 : vector<8xf32> to vector<8x1xf32>
    %1159 = vector.broadcast %1158 : vector<8x1xf32> to vector<8x8xf32>
    %1160 = arith.subf %1156, %1159 : vector<8x8xf32>
    %1161 = math.exp %1160 : vector<8x8xf32>
    %cst_417 = arith.constant dense<0.000000e+00> : vector<8xf32>
    %1162 = vector.multi_reduction <add>, %1161, %cst_417 [1] : vector<8x8xf32> to vector<8xf32>
    %1163 = vector.shape_cast %1162 : vector<8xf32> to vector<8x1xf32>
    %1164 = tpu.reciprocal %1163 {approx = true} : vector<8x1xf32> -> vector<8x1xf32>
    %1165 = vector.broadcast %1164 : vector<8x1xf32> to vector<8x8xf32>
    %1166 = arith.mulf %1161, %1165 : vector<8x8xf32>
    %1167 = vector.extract_strided_slice %1127 {offsets = [0, 8], sizes = [8, 8], strides = [1, 1]} : vector<8x32xf32> to vector<8x8xf32>
    %cst_418 = arith.constant dense<0.000000e+00> : vector<8x8xf32>
    %1168 = tpu.matmul %1166, %1167, %cst_418 {dimension_numbers = #tpu.dot_dimension_numbers<[1], [0], [0], [1], [0, 0, 1, 1], [], []>} : vector<8x8xf32>, vector<8x8xf32>, vector<8x8xf32> -> vector<8x8xf32>
    %1169 = vector.extract_strided_slice %1034 {offsets = [8, 0], sizes = [8, 32], strides = [1, 1]} : vector<32x32xf32> to vector<8x32xf32>
    %cst_419 = arith.constant dense<0.000000e+00> : vector<8x32xf32>
    %1170 = tpu.matmul %1168, %1169, %cst_419 {dimension_numbers = #tpu.dot_dimension_numbers<[1], [0], [0], [1], [0, 0, 1, 1], [], []>} : vector<8x8xf32>, vector<8x32xf32>, vector<8x32xf32> -> vector<8x32xf32>
    %1171 = arith.addf %1150, %1170 : vector<8x32xf32>
    %1172 = vector.extract_strided_slice %1125 {offsets = [0, 16], sizes = [8, 8], strides = [1, 1]} : vector<8x32xf32> to vector<8x8xf32>
    %1173 = vector.extract_strided_slice %1126 {offsets = [0, 16], sizes = [8, 8], strides = [1, 1]} : vector<8x32xf32> to vector<8x8xf32>
    %cst_420 = arith.constant dense<0.000000e+00> : vector<8x8xf32>
    %1174 = tpu.matmul %1172, %1173, %cst_420 {dimension_numbers = #tpu.dot_dimension_numbers<[1], [1], [0], [0], [0, 0, 1, 0], [], []>} : vector<8x8xf32>, vector<8x8xf32>, vector<8x8xf32> -> vector<8x8xf32>
    %cst_421 = arith.constant 0.353553385 : f32
    %1175 = vector.broadcast %cst_421 : f32 to vector<8x8xf32>
    %1176 = arith.mulf %1174, %1175 : vector<8x8xf32>
    %1177 = arith.addf %1176, %1130 : vector<8x8xf32>
    %cst_422 = arith.constant dense<0xFF800000> : vector<8xf32>
    %1178 = vector.multi_reduction <maximumf>, %1177, %cst_422 [1] : vector<8x8xf32> to vector<8xf32>
    %1179 = vector.shape_cast %1178 : vector<8xf32> to vector<8x1xf32>
    %1180 = vector.broadcast %1179 : vector<8x1xf32> to vector<8x8xf32>
    %1181 = arith.subf %1177, %1180 : vector<8x8xf32>
    %1182 = math.exp %1181 : vector<8x8xf32>
    %cst_423 = arith.constant dense<0.000000e+00> : vector<8xf32>
    %1183 = vector.multi_reduction <add>, %1182, %cst_423 [1] : vector<8x8xf32> to vector<8xf32>
    %1184 = vector.shape_cast %1183 : vector<8xf32> to vector<8x1xf32>
    %1185 = tpu.reciprocal %1184 {approx = true} : vector<8x1xf32> -> vector<8x1xf32>
    %1186 = vector.broadcast %1185 : vector<8x1xf32> to vector<8x8xf32>
    %1187 = arith.mulf %1182, %1186 : vector<8x8xf32>
    %1188 = vector.extract_strided_slice %1127 {offsets = [0, 16], sizes = [8, 8], strides = [1, 1]} : vector<8x32xf32> to vector<8x8xf32>
    %cst_424 = arith.constant dense<0.000000e+00> : vector<8x8xf32>
    %1189 = tpu.matmul %1187, %1188, %cst_424 {dimension_numbers = #tpu.dot_dimension_numbers<[1], [0], [0], [1], [0, 0, 1, 1], [], []>} : vector<8x8xf32>, vector<8x8xf32>, vector<8x8xf32> -> vector<8x8xf32>
    %1190 = vector.extract_strided_slice %1034 {offsets = [16, 0], sizes = [8, 32], strides = [1, 1]} : vector<32x32xf32> to vector<8x32xf32>
    %cst_425 = arith.constant dense<0.000000e+00> : vector<8x32xf32>
    %1191 = tpu.matmul %1189, %1190, %cst_425 {dimension_numbers = #tpu.dot_dimension_numbers<[1], [0], [0], [1], [0, 0, 1, 1], [], []>} : vector<8x8xf32>, vector<8x32xf32>, vector<8x32xf32> -> vector<8x32xf32>
    %1192 = arith.addf %1171, %1191 : vector<8x32xf32>
    %1193 = vector.extract_strided_slice %1125 {offsets = [0, 24], sizes = [8, 8], strides = [1, 1]} : vector<8x32xf32> to vector<8x8xf32>
    %1194 = vector.extract_strided_slice %1126 {offsets = [0, 24], sizes = [8, 8], strides = [1, 1]} : vector<8x32xf32> to vector<8x8xf32>
    %cst_426 = arith.constant dense<0.000000e+00> : vector<8x8xf32>
    %1195 = tpu.matmul %1193, %1194, %cst_426 {dimension_numbers = #tpu.dot_dimension_numbers<[1], [1], [0], [0], [0, 0, 1, 0], [], []>} : vector<8x8xf32>, vector<8x8xf32>, vector<8x8xf32> -> vector<8x8xf32>
    %cst_427 = arith.constant 0.353553385 : f32
    %1196 = vector.broadcast %cst_427 : f32 to vector<8x8xf32>
    %1197 = arith.mulf %1195, %1196 : vector<8x8xf32>
    %1198 = arith.addf %1197, %1130 : vector<8x8xf32>
    %cst_428 = arith.constant dense<0xFF800000> : vector<8xf32>
    %1199 = vector.multi_reduction <maximumf>, %1198, %cst_428 [1] : vector<8x8xf32> to vector<8xf32>
    %1200 = vector.shape_cast %1199 : vector<8xf32> to vector<8x1xf32>
    %1201 = vector.broadcast %1200 : vector<8x1xf32> to vector<8x8xf32>
    %1202 = arith.subf %1198, %1201 : vector<8x8xf32>
    %1203 = math.exp %1202 : vector<8x8xf32>
    %cst_429 = arith.constant dense<0.000000e+00> : vector<8xf32>
    %1204 = vector.multi_reduction <add>, %1203, %cst_429 [1] : vector<8x8xf32> to vector<8xf32>
    %1205 = vector.shape_cast %1204 : vector<8xf32> to vector<8x1xf32>
    %1206 = tpu.reciprocal %1205 {approx = true} : vector<8x1xf32> -> vector<8x1xf32>
    %1207 = vector.broadcast %1206 : vector<8x1xf32> to vector<8x8xf32>
    %1208 = arith.mulf %1203, %1207 : vector<8x8xf32>
    %1209 = vector.extract_strided_slice %1127 {offsets = [0, 24], sizes = [8, 8], strides = [1, 1]} : vector<8x32xf32> to vector<8x8xf32>
    %cst_430 = arith.constant dense<0.000000e+00> : vector<8x8xf32>
    %1210 = tpu.matmul %1208, %1209, %cst_430 {dimension_numbers = #tpu.dot_dimension_numbers<[1], [0], [0], [1], [0, 0, 1, 1], [], []>} : vector<8x8xf32>, vector<8x8xf32>, vector<8x8xf32> -> vector<8x8xf32>
    %1211 = vector.extract_strided_slice %1034 {offsets = [24, 0], sizes = [8, 32], strides = [1, 1]} : vector<32x32xf32> to vector<8x32xf32>
    %cst_431 = arith.constant dense<0.000000e+00> : vector<8x32xf32>
    %1212 = tpu.matmul %1210, %1211, %cst_431 {dimension_numbers = #tpu.dot_dimension_numbers<[1], [0], [0], [1], [0, 0, 1, 1], [], []>} : vector<8x8xf32>, vector<8x32xf32>, vector<8x32xf32> -> vector<8x32xf32>
    %1213 = arith.addf %1192, %1212 : vector<8x32xf32>
    %c8_432 = arith.constant 8 : index
    %c0_433 = arith.constant 0 : index
    %1214 = vector.load %arg74[%c8_432, %c0_433] : memref<16x32xf32, #tpu.memory_space<vmem>>, vector<8x32xf32>
    tpu.vector_store %arg74[%c8_432, %c0_433], %1213 {strides = array<i32>} : memref<16x32xf32, #tpu.memory_space<vmem>>, vector<8x32xf32>,
    %c0_434 = arith.constant 0 : index
    %c0_435 = arith.constant 0 : index
    %1215 = vector.load %arg74[%c0_434, %c0_435] : memref<16x32xf32, #tpu.memory_space<vmem>>, vector<16x32xf32>
    %c0_436 = arith.constant 0 : index
    %c0_437 = arith.constant 0 : index
    %1216 = vector.load %arg36[%c0_436, %c0_437] : memref<1x32xf32, #tpu.memory_space<vmem>>, vector<1x32xf32>
    %1217 = vector.broadcast %1216 : vector<1x32xf32> to vector<16x32xf32>
    %1218 = arith.addf %1215, %1217 : vector<16x32xf32>
    %1219 = arith.addf %1025, %1218 : vector<16x32xf32>
    %cst_438 = arith.constant dense<0.000000e+00> : vector<16xf32>
    %1220 = vector.multi_reduction <add>, %1219, %cst_438 [1] : vector<16x32xf32> to vector<16xf32>
    %1221 = vector.shape_cast %1220 : vector<16xf32> to vector<16x1xf32>
    %cst_439 = arith.constant 3.200000e+01 : f32
    %1222 = vector.broadcast %cst_439 : f32 to vector<16x1xf32>
    %1223 = arith.divf %1221, %1222 : vector<16x1xf32>
    %1224 = vector.broadcast %1223 : vector<16x1xf32> to vector<16x32xf32>
    %1225 = arith.subf %1219, %1224 : vector<16x32xf32>
    %1226 = arith.mulf %1225, %1225 : vector<16x32xf32>
    %cst_440 = arith.constant dense<0.000000e+00> : vector<16xf32>
    %1227 = vector.multi_reduction <add>, %1226, %cst_440 [1] : vector<16x32xf32> to vector<16xf32>
    %1228 = vector.shape_cast %1227 : vector<16xf32> to vector<16x1xf32>
    %cst_441 = arith.constant 3.200000e+01 : f32
    %1229 = vector.broadcast %cst_441 : f32 to vector<16x1xf32>
    %1230 = arith.divf %1228, %1229 : vector<16x1xf32>
    %cst_442 = arith.constant 9.99999974E-6 : f32
    %1231 = vector.broadcast %cst_442 : f32 to vector<16x1xf32>
    %1232 = arith.addf %1230, %1231 : vector<16x1xf32>
    %1233 = math.rsqrt %1232 : vector<16x1xf32>
    %1234 = vector.broadcast %1233 : vector<16x1xf32> to vector<16x32xf32>
    %1235 = arith.mulf %1225, %1234 : vector<16x32xf32>
    %c0_443 = arith.constant 0 : index
    %c0_444 = arith.constant 0 : index
    %1236 = vector.load %arg31[%c0_443, %c0_444] : memref<1x32xf32, #tpu.memory_space<vmem>>, vector<1x32xf32>
    %1237 = vector.broadcast %1236 : vector<1x32xf32> to vector<16x32xf32>
    %1238 = arith.mulf %1235, %1237 : vector<16x32xf32>
    %c0_445 = arith.constant 0 : index
    %c0_446 = arith.constant 0 : index
    %1239 = vector.load %arg30[%c0_445, %c0_446] : memref<1x32xf32, #tpu.memory_space<vmem>>, vector<1x32xf32>
    %1240 = vector.broadcast %1239 : vector<1x32xf32> to vector<16x32xf32>
    %1241 = arith.addf %1238, %1240 : vector<16x32xf32>
    %c0_447 = arith.constant 0 : index
    %c0_448 = arith.constant 0 : index
    %1242 = vector.load %arg25[%c0_447, %c0_448] : memref<32x32xf32, #tpu.memory_space<vmem>>, vector<32x32xf32>
    %cst_449 = arith.constant dense<0.000000e+00> : vector<16x32xf32>
    %1243 = tpu.matmul %1241, %1242, %cst_449 {dimension_numbers = #tpu.dot_dimension_numbers<[1], [0], [0], [1], [0, 0, 1, 1], [], []>} : vector<16x32xf32>, vector<32x32xf32>, vector<16x32xf32> -> vector<16x32xf32>
    %c0_450 = arith.constant 0 : index
    %c0_451 = arith.constant 0 : index
    %1244 = vector.load %arg22[%c0_450, %c0_451] : memref<1x32xf32, #tpu.memory_space<vmem>>, vector<1x32xf32>
    %1245 = vector.broadcast %1244 : vector<1x32xf32> to vector<16x32xf32>
    %1246 = arith.addf %1243, %1245 : vector<16x32xf32>
    %c0_452 = arith.constant 0 : index
    %c0_453 = arith.constant 0 : index
    %1247 = vector.load %arg23[%c0_452, %c0_453] : memref<32x64xf32, #tpu.memory_space<vmem>>, vector<32x64xf32>
    %cst_454 = arith.constant dense<0.000000e+00> : vector<16x64xf32>
    %1248 = tpu.matmul %539, %1247, %cst_454 {dimension_numbers = #tpu.dot_dimension_numbers<[1], [0], [0], [1], [0, 0, 1, 1], [], []>} : vector<16x32xf32>, vector<32x64xf32>, vector<16x64xf32> -> vector<16x64xf32>
    %c0_455 = arith.constant 0 : index
    %c0_456 = arith.constant 0 : index
    %1249 = vector.load %arg20[%c0_455, %c0_456] : memref<1x64xf32, #tpu.memory_space<vmem>>, vector<1x64xf32>
    %1250 = vector.broadcast %1249 : vector<1x64xf32> to vector<16x64xf32>
    %1251 = arith.addf %1248, %1250 : vector<16x64xf32>
    %1252 = vector.extract_strided_slice %1251 {offsets = [0, 0], sizes = [16, 32], strides = [1, 1]} : vector<16x64xf32> to vector<16x32xf32>
    %1253 = vector.extract_strided_slice %1251 {offsets = [0, 32], sizes = [16, 32], strides = [1, 1]} : vector<16x64xf32> to vector<16x32xf32>
    %c0_457 = arith.constant 0 : index
    %c0_458 = arith.constant 0 : index
    %1254 = vector.load %arg24[%c0_457, %c0_458] : memref<32x32xf32, #tpu.memory_space<vmem>>, vector<32x32xf32>
    %1255 = vector.extract_strided_slice %1246 {offsets = [0, 0], sizes = [8, 32], strides = [1, 1]} : vector<16x32xf32> to vector<8x32xf32>
    %1256 = vector.extract_strided_slice %1252 {offsets = [0, 0], sizes = [8, 32], strides = [1, 1]} : vector<16x32xf32> to vector<8x32xf32>
    %1257 = vector.extract_strided_slice %1253 {offsets = [0, 0], sizes = [8, 32], strides = [1, 1]} : vector<16x32xf32> to vector<8x32xf32>
    %1258 = vector.extract_strided_slice %7 {offsets = [0, 0], sizes = [1, 8], strides = [1, 1]} : vector<2x8xf32> to vector<1x8xf32>
    %1259 = vector.extract_strided_slice %1255 {offsets = [0, 0], sizes = [8, 8], strides = [1, 1]} : vector<8x32xf32> to vector<8x8xf32>
    %1260 = vector.extract_strided_slice %1256 {offsets = [0, 0], sizes = [8, 8], strides = [1, 1]} : vector<8x32xf32> to vector<8x8xf32>
    %cst_459 = arith.constant dense<0.000000e+00> : vector<8x8xf32>
    %1261 = tpu.matmul %1259, %1260, %cst_459 {dimension_numbers = #tpu.dot_dimension_numbers<[1], [1], [0], [0], [0, 0, 1, 0], [], []>} : vector<8x8xf32>, vector<8x8xf32>, vector<8x8xf32> -> vector<8x8xf32>
    %cst_460 = arith.constant 0.353553385 : f32
    %1262 = vector.broadcast %cst_460 : f32 to vector<8x8xf32>
    %1263 = arith.mulf %1261, %1262 : vector<8x8xf32>
    %1264 = vector.broadcast %1258 : vector<1x8xf32> to vector<8x8xf32>
    %1265 = arith.addf %1263, %1264 : vector<8x8xf32>
    %cst_461 = arith.constant dense<0xFF800000> : vector<8xf32>
    %1266 = vector.multi_reduction <maximumf>, %1265, %cst_461 [1] : vector<8x8xf32> to vector<8xf32>
    %1267 = vector.shape_cast %1266 : vector<8xf32> to vector<8x1xf32>
    %1268 = vector.broadcast %1267 : vector<8x1xf32> to vector<8x8xf32>
    %1269 = arith.subf %1265, %1268 : vector<8x8xf32>
    %1270 = math.exp %1269 : vector<8x8xf32>
    %cst_462 = arith.constant dense<0.000000e+00> : vector<8xf32>
    %1271 = vector.multi_reduction <add>, %1270, %cst_462 [1] : vector<8x8xf32> to vector<8xf32>
    %1272 = vector.shape_cast %1271 : vector<8xf32> to vector<8x1xf32>
    %1273 = tpu.reciprocal %1272 {approx = true} : vector<8x1xf32> -> vector<8x1xf32>
    %1274 = vector.broadcast %1273 : vector<8x1xf32> to vector<8x8xf32>
    %1275 = arith.mulf %1270, %1274 : vector<8x8xf32>
    %1276 = vector.extract_strided_slice %1257 {offsets = [0, 0], sizes = [8, 8], strides = [1, 1]} : vector<8x32xf32> to vector<8x8xf32>
    %cst_463 = arith.constant dense<0.000000e+00> : vector<8x8xf32>
    %1277 = tpu.matmul %1275, %1276, %cst_463 {dimension_numbers = #tpu.dot_dimension_numbers<[1], [0], [0], [1], [0, 0, 1, 1], [], []>} : vector<8x8xf32>, vector<8x8xf32>, vector<8x8xf32> -> vector<8x8xf32>
    %1278 = vector.extract_strided_slice %1254 {offsets = [0, 0], sizes = [8, 32], strides = [1, 1]} : vector<32x32xf32> to vector<8x32xf32>
    %cst_464 = arith.constant dense<0.000000e+00> : vector<8x32xf32>
    %1279 = tpu.matmul %1277, %1278, %cst_464 {dimension_numbers = #tpu.dot_dimension_numbers<[1], [0], [0], [1], [0, 0, 1, 1], [], []>} : vector<8x8xf32>, vector<8x32xf32>, vector<8x32xf32> -> vector<8x32xf32>
    %1280 = vector.extract_strided_slice %1255 {offsets = [0, 8], sizes = [8, 8], strides = [1, 1]} : vector<8x32xf32> to vector<8x8xf32>
    %1281 = vector.extract_strided_slice %1256 {offsets = [0, 8], sizes = [8, 8], strides = [1, 1]} : vector<8x32xf32> to vector<8x8xf32>
    %cst_465 = arith.constant dense<0.000000e+00> : vector<8x8xf32>
    %1282 = tpu.matmul %1280, %1281, %cst_465 {dimension_numbers = #tpu.dot_dimension_numbers<[1], [1], [0], [0], [0, 0, 1, 0], [], []>} : vector<8x8xf32>, vector<8x8xf32>, vector<8x8xf32> -> vector<8x8xf32>
    %cst_466 = arith.constant 0.353553385 : f32
    %1283 = vector.broadcast %cst_466 : f32 to vector<8x8xf32>
    %1284 = arith.mulf %1282, %1283 : vector<8x8xf32>
    %1285 = vector.broadcast %1258 : vector<1x8xf32> to vector<8x8xf32>
    %1286 = arith.addf %1284, %1285 : vector<8x8xf32>
    %cst_467 = arith.constant dense<0xFF800000> : vector<8xf32>
    %1287 = vector.multi_reduction <maximumf>, %1286, %cst_467 [1] : vector<8x8xf32> to vector<8xf32>
    %1288 = vector.shape_cast %1287 : vector<8xf32> to vector<8x1xf32>
    %1289 = vector.broadcast %1288 : vector<8x1xf32> to vector<8x8xf32>
    %1290 = arith.subf %1286, %1289 : vector<8x8xf32>
    %1291 = math.exp %1290 : vector<8x8xf32>
    %cst_468 = arith.constant dense<0.000000e+00> : vector<8xf32>
    %1292 = vector.multi_reduction <add>, %1291, %cst_468 [1] : vector<8x8xf32> to vector<8xf32>
    %1293 = vector.shape_cast %1292 : vector<8xf32> to vector<8x1xf32>
    %1294 = tpu.reciprocal %1293 {approx = true} : vector<8x1xf32> -> vector<8x1xf32>
    %1295 = vector.broadcast %1294 : vector<8x1xf32> to vector<8x8xf32>
    %1296 = arith.mulf %1291, %1295 : vector<8x8xf32>
    %1297 = vector.extract_strided_slice %1257 {offsets = [0, 8], sizes = [8, 8], strides = [1, 1]} : vector<8x32xf32> to vector<8x8xf32>
    %cst_469 = arith.constant dense<0.000000e+00> : vector<8x8xf32>
    %1298 = tpu.matmul %1296, %1297, %cst_469 {dimension_numbers = #tpu.dot_dimension_numbers<[1], [0], [0], [1], [0, 0, 1, 1], [], []>} : vector<8x8xf32>, vector<8x8xf32>, vector<8x8xf32> -> vector<8x8xf32>
    %1299 = vector.extract_strided_slice %1254 {offsets = [8, 0], sizes = [8, 32], strides = [1, 1]} : vector<32x32xf32> to vector<8x32xf32>
    %cst_470 = arith.constant dense<0.000000e+00> : vector<8x32xf32>
    %1300 = tpu.matmul %1298, %1299, %cst_470 {dimension_numbers = #tpu.dot_dimension_numbers<[1], [0], [0], [1], [0, 0, 1, 1], [], []>} : vector<8x8xf32>, vector<8x32xf32>, vector<8x32xf32> -> vector<8x32xf32>
    %1301 = arith.addf %1279, %1300 : vector<8x32xf32>
    %1302 = vector.extract_strided_slice %1255 {offsets = [0, 16], sizes = [8, 8], strides = [1, 1]} : vector<8x32xf32> to vector<8x8xf32>
    %1303 = vector.extract_strided_slice %1256 {offsets = [0, 16], sizes = [8, 8], strides = [1, 1]} : vector<8x32xf32> to vector<8x8xf32>
    %cst_471 = arith.constant dense<0.000000e+00> : vector<8x8xf32>
    %1304 = tpu.matmul %1302, %1303, %cst_471 {dimension_numbers = #tpu.dot_dimension_numbers<[1], [1], [0], [0], [0, 0, 1, 0], [], []>} : vector<8x8xf32>, vector<8x8xf32>, vector<8x8xf32> -> vector<8x8xf32>
    %cst_472 = arith.constant 0.353553385 : f32
    %1305 = vector.broadcast %cst_472 : f32 to vector<8x8xf32>
    %1306 = arith.mulf %1304, %1305 : vector<8x8xf32>
    %1307 = vector.broadcast %1258 : vector<1x8xf32> to vector<8x8xf32>
    %1308 = arith.addf %1306, %1307 : vector<8x8xf32>
    %cst_473 = arith.constant dense<0xFF800000> : vector<8xf32>
    %1309 = vector.multi_reduction <maximumf>, %1308, %cst_473 [1] : vector<8x8xf32> to vector<8xf32>
    %1310 = vector.shape_cast %1309 : vector<8xf32> to vector<8x1xf32>
    %1311 = vector.broadcast %1310 : vector<8x1xf32> to vector<8x8xf32>
    %1312 = arith.subf %1308, %1311 : vector<8x8xf32>
    %1313 = math.exp %1312 : vector<8x8xf32>
    %cst_474 = arith.constant dense<0.000000e+00> : vector<8xf32>
    %1314 = vector.multi_reduction <add>, %1313, %cst_474 [1] : vector<8x8xf32> to vector<8xf32>
    %1315 = vector.shape_cast %1314 : vector<8xf32> to vector<8x1xf32>
    %1316 = tpu.reciprocal %1315 {approx = true} : vector<8x1xf32> -> vector<8x1xf32>
    %1317 = vector.broadcast %1316 : vector<8x1xf32> to vector<8x8xf32>
    %1318 = arith.mulf %1313, %1317 : vector<8x8xf32>
    %1319 = vector.extract_strided_slice %1257 {offsets = [0, 16], sizes = [8, 8], strides = [1, 1]} : vector<8x32xf32> to vector<8x8xf32>
    %cst_475 = arith.constant dense<0.000000e+00> : vector<8x8xf32>
    %1320 = tpu.matmul %1318, %1319, %cst_475 {dimension_numbers = #tpu.dot_dimension_numbers<[1], [0], [0], [1], [0, 0, 1, 1], [], []>} : vector<8x8xf32>, vector<8x8xf32>, vector<8x8xf32> -> vector<8x8xf32>
    %1321 = vector.extract_strided_slice %1254 {offsets = [16, 0], sizes = [8, 32], strides = [1, 1]} : vector<32x32xf32> to vector<8x32xf32>
    %cst_476 = arith.constant dense<0.000000e+00> : vector<8x32xf32>
    %1322 = tpu.matmul %1320, %1321, %cst_476 {dimension_numbers = #tpu.dot_dimension_numbers<[1], [0], [0], [1], [0, 0, 1, 1], [], []>} : vector<8x8xf32>, vector<8x32xf32>, vector<8x32xf32> -> vector<8x32xf32>
    %1323 = arith.addf %1301, %1322 : vector<8x32xf32>
    %1324 = vector.extract_strided_slice %1255 {offsets = [0, 24], sizes = [8, 8], strides = [1, 1]} : vector<8x32xf32> to vector<8x8xf32>
    %1325 = vector.extract_strided_slice %1256 {offsets = [0, 24], sizes = [8, 8], strides = [1, 1]} : vector<8x32xf32> to vector<8x8xf32>
    %cst_477 = arith.constant dense<0.000000e+00> : vector<8x8xf32>
    %1326 = tpu.matmul %1324, %1325, %cst_477 {dimension_numbers = #tpu.dot_dimension_numbers<[1], [1], [0], [0], [0, 0, 1, 0], [], []>} : vector<8x8xf32>, vector<8x8xf32>, vector<8x8xf32> -> vector<8x8xf32>
    %cst_478 = arith.constant 0.353553385 : f32
    %1327 = vector.broadcast %cst_478 : f32 to vector<8x8xf32>
    %1328 = arith.mulf %1326, %1327 : vector<8x8xf32>
    %1329 = vector.broadcast %1258 : vector<1x8xf32> to vector<8x8xf32>
    %1330 = arith.addf %1328, %1329 : vector<8x8xf32>
    %cst_479 = arith.constant dense<0xFF800000> : vector<8xf32>
    %1331 = vector.multi_reduction <maximumf>, %1330, %cst_479 [1] : vector<8x8xf32> to vector<8xf32>
    %1332 = vector.shape_cast %1331 : vector<8xf32> to vector<8x1xf32>
    %1333 = vector.broadcast %1332 : vector<8x1xf32> to vector<8x8xf32>
    %1334 = arith.subf %1330, %1333 : vector<8x8xf32>
    %1335 = math.exp %1334 : vector<8x8xf32>
    %cst_480 = arith.constant dense<0.000000e+00> : vector<8xf32>
    %1336 = vector.multi_reduction <add>, %1335, %cst_480 [1] : vector<8x8xf32> to vector<8xf32>
    %1337 = vector.shape_cast %1336 : vector<8xf32> to vector<8x1xf32>
    %1338 = tpu.reciprocal %1337 {approx = true} : vector<8x1xf32> -> vector<8x1xf32>
    %1339 = vector.broadcast %1338 : vector<8x1xf32> to vector<8x8xf32>
    %1340 = arith.mulf %1335, %1339 : vector<8x8xf32>
    %1341 = vector.extract_strided_slice %1257 {offsets = [0, 24], sizes = [8, 8], strides = [1, 1]} : vector<8x32xf32> to vector<8x8xf32>
    %cst_481 = arith.constant dense<0.000000e+00> : vector<8x8xf32>
    %1342 = tpu.matmul %1340, %1341, %cst_481 {dimension_numbers = #tpu.dot_dimension_numbers<[1], [0], [0], [1], [0, 0, 1, 1], [], []>} : vector<8x8xf32>, vector<8x8xf32>, vector<8x8xf32> -> vector<8x8xf32>
    %1343 = vector.extract_strided_slice %1254 {offsets = [24, 0], sizes = [8, 32], strides = [1, 1]} : vector<32x32xf32> to vector<8x32xf32>
    %cst_482 = arith.constant dense<0.000000e+00> : vector<8x32xf32>
    %1344 = tpu.matmul %1342, %1343, %cst_482 {dimension_numbers = #tpu.dot_dimension_numbers<[1], [0], [0], [1], [0, 0, 1, 1], [], []>} : vector<8x8xf32>, vector<8x32xf32>, vector<8x32xf32> -> vector<8x32xf32>
    %1345 = arith.addf %1323, %1344 : vector<8x32xf32>
    %c0_483 = arith.constant 0 : index
    %c0_484 = arith.constant 0 : index
    %1346 = vector.load %arg74[%c0_483, %c0_484] : memref<16x32xf32, #tpu.memory_space<vmem>>, vector<8x32xf32>
    tpu.vector_store %arg74[%c0_483, %c0_484], %1345 {strides = array<i32>} : memref<16x32xf32, #tpu.memory_space<vmem>>, vector<8x32xf32>,
    %1347 = vector.extract_strided_slice %1246 {offsets = [8, 0], sizes = [8, 32], strides = [1, 1]} : vector<16x32xf32> to vector<8x32xf32>
    %1348 = vector.extract_strided_slice %1252 {offsets = [8, 0], sizes = [8, 32], strides = [1, 1]} : vector<16x32xf32> to vector<8x32xf32>
    %1349 = vector.extract_strided_slice %1253 {offsets = [8, 0], sizes = [8, 32], strides = [1, 1]} : vector<16x32xf32> to vector<8x32xf32>
    %1350 = vector.extract_strided_slice %7 {offsets = [1, 0], sizes = [1, 8], strides = [1, 1]} : vector<2x8xf32> to vector<1x8xf32>
    %1351 = vector.extract_strided_slice %1347 {offsets = [0, 0], sizes = [8, 8], strides = [1, 1]} : vector<8x32xf32> to vector<8x8xf32>
    %1352 = vector.extract_strided_slice %1348 {offsets = [0, 0], sizes = [8, 8], strides = [1, 1]} : vector<8x32xf32> to vector<8x8xf32>
    %cst_485 = arith.constant dense<0.000000e+00> : vector<8x8xf32>
    %1353 = tpu.matmul %1351, %1352, %cst_485 {dimension_numbers = #tpu.dot_dimension_numbers<[1], [1], [0], [0], [0, 0, 1, 0], [], []>} : vector<8x8xf32>, vector<8x8xf32>, vector<8x8xf32> -> vector<8x8xf32>
    %cst_486 = arith.constant 0.353553385 : f32
    %1354 = vector.broadcast %cst_486 : f32 to vector<8x8xf32>
    %1355 = arith.mulf %1353, %1354 : vector<8x8xf32>
    %1356 = vector.broadcast %1350 : vector<1x8xf32> to vector<8x8xf32>
    %1357 = arith.addf %1355, %1356 : vector<8x8xf32>
    %cst_487 = arith.constant dense<0xFF800000> : vector<8xf32>
    %1358 = vector.multi_reduction <maximumf>, %1357, %cst_487 [1] : vector<8x8xf32> to vector<8xf32>
    %1359 = vector.shape_cast %1358 : vector<8xf32> to vector<8x1xf32>
    %1360 = vector.broadcast %1359 : vector<8x1xf32> to vector<8x8xf32>
    %1361 = arith.subf %1357, %1360 : vector<8x8xf32>
    %1362 = math.exp %1361 : vector<8x8xf32>
    %cst_488 = arith.constant dense<0.000000e+00> : vector<8xf32>
    %1363 = vector.multi_reduction <add>, %1362, %cst_488 [1] : vector<8x8xf32> to vector<8xf32>
    %1364 = vector.shape_cast %1363 : vector<8xf32> to vector<8x1xf32>
    %1365 = tpu.reciprocal %1364 {approx = true} : vector<8x1xf32> -> vector<8x1xf32>
    %1366 = vector.broadcast %1365 : vector<8x1xf32> to vector<8x8xf32>
    %1367 = arith.mulf %1362, %1366 : vector<8x8xf32>
    %1368 = vector.extract_strided_slice %1349 {offsets = [0, 0], sizes = [8, 8], strides = [1, 1]} : vector<8x32xf32> to vector<8x8xf32>
    %cst_489 = arith.constant dense<0.000000e+00> : vector<8x8xf32>
    %1369 = tpu.matmul %1367, %1368, %cst_489 {dimension_numbers = #tpu.dot_dimension_numbers<[1], [0], [0], [1], [0, 0, 1, 1], [], []>} : vector<8x8xf32>, vector<8x8xf32>, vector<8x8xf32> -> vector<8x8xf32>
    %1370 = vector.extract_strided_slice %1254 {offsets = [0, 0], sizes = [8, 32], strides = [1, 1]} : vector<32x32xf32> to vector<8x32xf32>
    %cst_490 = arith.constant dense<0.000000e+00> : vector<8x32xf32>
    %1371 = tpu.matmul %1369, %1370, %cst_490 {dimension_numbers = #tpu.dot_dimension_numbers<[1], [0], [0], [1], [0, 0, 1, 1], [], []>} : vector<8x8xf32>, vector<8x32xf32>, vector<8x32xf32> -> vector<8x32xf32>
    %1372 = vector.extract_strided_slice %1347 {offsets = [0, 8], sizes = [8, 8], strides = [1, 1]} : vector<8x32xf32> to vector<8x8xf32>
    %1373 = vector.extract_strided_slice %1348 {offsets = [0, 8], sizes = [8, 8], strides = [1, 1]} : vector<8x32xf32> to vector<8x8xf32>
    %cst_491 = arith.constant dense<0.000000e+00> : vector<8x8xf32>
    %1374 = tpu.matmul %1372, %1373, %cst_491 {dimension_numbers = #tpu.dot_dimension_numbers<[1], [1], [0], [0], [0, 0, 1, 0], [], []>} : vector<8x8xf32>, vector<8x8xf32>, vector<8x8xf32> -> vector<8x8xf32>
    %cst_492 = arith.constant 0.353553385 : f32
    %1375 = vector.broadcast %cst_492 : f32 to vector<8x8xf32>
    %1376 = arith.mulf %1374, %1375 : vector<8x8xf32>
    %1377 = vector.broadcast %1350 : vector<1x8xf32> to vector<8x8xf32>
    %1378 = arith.addf %1376, %1377 : vector<8x8xf32>
    %cst_493 = arith.constant dense<0xFF800000> : vector<8xf32>
    %1379 = vector.multi_reduction <maximumf>, %1378, %cst_493 [1] : vector<8x8xf32> to vector<8xf32>
    %1380 = vector.shape_cast %1379 : vector<8xf32> to vector<8x1xf32>
    %1381 = vector.broadcast %1380 : vector<8x1xf32> to vector<8x8xf32>
    %1382 = arith.subf %1378, %1381 : vector<8x8xf32>
    %1383 = math.exp %1382 : vector<8x8xf32>
    %cst_494 = arith.constant dense<0.000000e+00> : vector<8xf32>
    %1384 = vector.multi_reduction <add>, %1383, %cst_494 [1] : vector<8x8xf32> to vector<8xf32>
    %1385 = vector.shape_cast %1384 : vector<8xf32> to vector<8x1xf32>
    %1386 = tpu.reciprocal %1385 {approx = true} : vector<8x1xf32> -> vector<8x1xf32>
    %1387 = vector.broadcast %1386 : vector<8x1xf32> to vector<8x8xf32>
    %1388 = arith.mulf %1383, %1387 : vector<8x8xf32>
    %1389 = vector.extract_strided_slice %1349 {offsets = [0, 8], sizes = [8, 8], strides = [1, 1]} : vector<8x32xf32> to vector<8x8xf32>
    %cst_495 = arith.constant dense<0.000000e+00> : vector<8x8xf32>
    %1390 = tpu.matmul %1388, %1389, %cst_495 {dimension_numbers = #tpu.dot_dimension_numbers<[1], [0], [0], [1], [0, 0, 1, 1], [], []>} : vector<8x8xf32>, vector<8x8xf32>, vector<8x8xf32> -> vector<8x8xf32>
    %1391 = vector.extract_strided_slice %1254 {offsets = [8, 0], sizes = [8, 32], strides = [1, 1]} : vector<32x32xf32> to vector<8x32xf32>
    %cst_496 = arith.constant dense<0.000000e+00> : vector<8x32xf32>
    %1392 = tpu.matmul %1390, %1391, %cst_496 {dimension_numbers = #tpu.dot_dimension_numbers<[1], [0], [0], [1], [0, 0, 1, 1], [], []>} : vector<8x8xf32>, vector<8x32xf32>, vector<8x32xf32> -> vector<8x32xf32>
    %1393 = arith.addf %1371, %1392 : vector<8x32xf32>
    %1394 = vector.extract_strided_slice %1347 {offsets = [0, 16], sizes = [8, 8], strides = [1, 1]} : vector<8x32xf32> to vector<8x8xf32>
    %1395 = vector.extract_strided_slice %1348 {offsets = [0, 16], sizes = [8, 8], strides = [1, 1]} : vector<8x32xf32> to vector<8x8xf32>
    %cst_497 = arith.constant dense<0.000000e+00> : vector<8x8xf32>
    %1396 = tpu.matmul %1394, %1395, %cst_497 {dimension_numbers = #tpu.dot_dimension_numbers<[1], [1], [0], [0], [0, 0, 1, 0], [], []>} : vector<8x8xf32>, vector<8x8xf32>, vector<8x8xf32> -> vector<8x8xf32>
    %cst_498 = arith.constant 0.353553385 : f32
    %1397 = vector.broadcast %cst_498 : f32 to vector<8x8xf32>
    %1398 = arith.mulf %1396, %1397 : vector<8x8xf32>
    %1399 = vector.broadcast %1350 : vector<1x8xf32> to vector<8x8xf32>
    %1400 = arith.addf %1398, %1399 : vector<8x8xf32>
    %cst_499 = arith.constant dense<0xFF800000> : vector<8xf32>
    %1401 = vector.multi_reduction <maximumf>, %1400, %cst_499 [1] : vector<8x8xf32> to vector<8xf32>
    %1402 = vector.shape_cast %1401 : vector<8xf32> to vector<8x1xf32>
    %1403 = vector.broadcast %1402 : vector<8x1xf32> to vector<8x8xf32>
    %1404 = arith.subf %1400, %1403 : vector<8x8xf32>
    %1405 = math.exp %1404 : vector<8x8xf32>
    %cst_500 = arith.constant dense<0.000000e+00> : vector<8xf32>
    %1406 = vector.multi_reduction <add>, %1405, %cst_500 [1] : vector<8x8xf32> to vector<8xf32>
    %1407 = vector.shape_cast %1406 : vector<8xf32> to vector<8x1xf32>
    %1408 = tpu.reciprocal %1407 {approx = true} : vector<8x1xf32> -> vector<8x1xf32>
    %1409 = vector.broadcast %1408 : vector<8x1xf32> to vector<8x8xf32>
    %1410 = arith.mulf %1405, %1409 : vector<8x8xf32>
    %1411 = vector.extract_strided_slice %1349 {offsets = [0, 16], sizes = [8, 8], strides = [1, 1]} : vector<8x32xf32> to vector<8x8xf32>
    %cst_501 = arith.constant dense<0.000000e+00> : vector<8x8xf32>
    %1412 = tpu.matmul %1410, %1411, %cst_501 {dimension_numbers = #tpu.dot_dimension_numbers<[1], [0], [0], [1], [0, 0, 1, 1], [], []>} : vector<8x8xf32>, vector<8x8xf32>, vector<8x8xf32> -> vector<8x8xf32>
    %1413 = vector.extract_strided_slice %1254 {offsets = [16, 0], sizes = [8, 32], strides = [1, 1]} : vector<32x32xf32> to vector<8x32xf32>
    %cst_502 = arith.constant dense<0.000000e+00> : vector<8x32xf32>
    %1414 = tpu.matmul %1412, %1413, %cst_502 {dimension_numbers = #tpu.dot_dimension_numbers<[1], [0], [0], [1], [0, 0, 1, 1], [], []>} : vector<8x8xf32>, vector<8x32xf32>, vector<8x32xf32> -> vector<8x32xf32>
    %1415 = arith.addf %1393, %1414 : vector<8x32xf32>
    %1416 = vector.extract_strided_slice %1347 {offsets = [0, 24], sizes = [8, 8], strides = [1, 1]} : vector<8x32xf32> to vector<8x8xf32>
    %1417 = vector.extract_strided_slice %1348 {offsets = [0, 24], sizes = [8, 8], strides = [1, 1]} : vector<8x32xf32> to vector<8x8xf32>
    %cst_503 = arith.constant dense<0.000000e+00> : vector<8x8xf32>
    %1418 = tpu.matmul %1416, %1417, %cst_503 {dimension_numbers = #tpu.dot_dimension_numbers<[1], [1], [0], [0], [0, 0, 1, 0], [], []>} : vector<8x8xf32>, vector<8x8xf32>, vector<8x8xf32> -> vector<8x8xf32>
    %cst_504 = arith.constant 0.353553385 : f32
    %1419 = vector.broadcast %cst_504 : f32 to vector<8x8xf32>
    %1420 = arith.mulf %1418, %1419 : vector<8x8xf32>
    %1421 = vector.broadcast %1350 : vector<1x8xf32> to vector<8x8xf32>
    %1422 = arith.addf %1420, %1421 : vector<8x8xf32>
    %cst_505 = arith.constant dense<0xFF800000> : vector<8xf32>
    %1423 = vector.multi_reduction <maximumf>, %1422, %cst_505 [1] : vector<8x8xf32> to vector<8xf32>
    %1424 = vector.shape_cast %1423 : vector<8xf32> to vector<8x1xf32>
    %1425 = vector.broadcast %1424 : vector<8x1xf32> to vector<8x8xf32>
    %1426 = arith.subf %1422, %1425 : vector<8x8xf32>
    %1427 = math.exp %1426 : vector<8x8xf32>
    %cst_506 = arith.constant dense<0.000000e+00> : vector<8xf32>
    %1428 = vector.multi_reduction <add>, %1427, %cst_506 [1] : vector<8x8xf32> to vector<8xf32>
    %1429 = vector.shape_cast %1428 : vector<8xf32> to vector<8x1xf32>
    %1430 = tpu.reciprocal %1429 {approx = true} : vector<8x1xf32> -> vector<8x1xf32>
    %1431 = vector.broadcast %1430 : vector<8x1xf32> to vector<8x8xf32>
    %1432 = arith.mulf %1427, %1431 : vector<8x8xf32>
    %1433 = vector.extract_strided_slice %1349 {offsets = [0, 24], sizes = [8, 8], strides = [1, 1]} : vector<8x32xf32> to vector<8x8xf32>
    %cst_507 = arith.constant dense<0.000000e+00> : vector<8x8xf32>
    %1434 = tpu.matmul %1432, %1433, %cst_507 {dimension_numbers = #tpu.dot_dimension_numbers<[1], [0], [0], [1], [0, 0, 1, 1], [], []>} : vector<8x8xf32>, vector<8x8xf32>, vector<8x8xf32> -> vector<8x8xf32>
    %1435 = vector.extract_strided_slice %1254 {offsets = [24, 0], sizes = [8, 32], strides = [1, 1]} : vector<32x32xf32> to vector<8x32xf32>
    %cst_508 = arith.constant dense<0.000000e+00> : vector<8x32xf32>
    %1436 = tpu.matmul %1434, %1435, %cst_508 {dimension_numbers = #tpu.dot_dimension_numbers<[1], [0], [0], [1], [0, 0, 1, 1], [], []>} : vector<8x8xf32>, vector<8x32xf32>, vector<8x32xf32> -> vector<8x32xf32>
    %1437 = arith.addf %1415, %1436 : vector<8x32xf32>
    %c8_509 = arith.constant 8 : index
    %c0_510 = arith.constant 0 : index
    %1438 = vector.load %arg74[%c8_509, %c0_510] : memref<16x32xf32, #tpu.memory_space<vmem>>, vector<8x32xf32>
    tpu.vector_store %arg74[%c8_509, %c0_510], %1437 {strides = array<i32>} : memref<16x32xf32, #tpu.memory_space<vmem>>, vector<8x32xf32>,
    %c0_511 = arith.constant 0 : index
    %c0_512 = arith.constant 0 : index
    %1439 = vector.load %arg74[%c0_511, %c0_512] : memref<16x32xf32, #tpu.memory_space<vmem>>, vector<16x32xf32>
    %c0_513 = arith.constant 0 : index
    %c0_514 = arith.constant 0 : index
    %1440 = vector.load %arg21[%c0_513, %c0_514] : memref<1x32xf32, #tpu.memory_space<vmem>>, vector<1x32xf32>
    %1441 = vector.broadcast %1440 : vector<1x32xf32> to vector<16x32xf32>
    %1442 = arith.addf %1439, %1441 : vector<16x32xf32>
    %1443 = arith.addf %1241, %1442 : vector<16x32xf32>
    %cst_515 = arith.constant dense<0.000000e+00> : vector<16xf32>
    %1444 = vector.multi_reduction <add>, %1443, %cst_515 [1] : vector<16x32xf32> to vector<16xf32>
    %1445 = vector.shape_cast %1444 : vector<16xf32> to vector<16x1xf32>
    %cst_516 = arith.constant 3.200000e+01 : f32
    %1446 = vector.broadcast %cst_516 : f32 to vector<16x1xf32>
    %1447 = arith.divf %1445, %1446 : vector<16x1xf32>
    %1448 = vector.broadcast %1447 : vector<16x1xf32> to vector<16x32xf32>
    %1449 = arith.subf %1443, %1448 : vector<16x32xf32>
    %1450 = arith.mulf %1449, %1449 : vector<16x32xf32>
    %cst_517 = arith.constant dense<0.000000e+00> : vector<16xf32>
    %1451 = vector.multi_reduction <add>, %1450, %cst_517 [1] : vector<16x32xf32> to vector<16xf32>
    %1452 = vector.shape_cast %1451 : vector<16xf32> to vector<16x1xf32>
    %cst_518 = arith.constant 3.200000e+01 : f32
    %1453 = vector.broadcast %cst_518 : f32 to vector<16x1xf32>
    %1454 = arith.divf %1452, %1453 : vector<16x1xf32>
    %cst_519 = arith.constant 9.99999974E-6 : f32
    %1455 = vector.broadcast %cst_519 : f32 to vector<16x1xf32>
    %1456 = arith.addf %1454, %1455 : vector<16x1xf32>
    %1457 = math.rsqrt %1456 : vector<16x1xf32>
    %1458 = vector.broadcast %1457 : vector<16x1xf32> to vector<16x32xf32>
    %1459 = arith.mulf %1449, %1458 : vector<16x32xf32>
    %c0_520 = arith.constant 0 : index
    %c0_521 = arith.constant 0 : index
    %1460 = vector.load %arg33[%c0_520, %c0_521] : memref<1x32xf32, #tpu.memory_space<vmem>>, vector<1x32xf32>
    %1461 = vector.broadcast %1460 : vector<1x32xf32> to vector<16x32xf32>
    %1462 = arith.mulf %1459, %1461 : vector<16x32xf32>
    %c0_522 = arith.constant 0 : index
    %c0_523 = arith.constant 0 : index
    %1463 = vector.load %arg32[%c0_522, %c0_523] : memref<1x32xf32, #tpu.memory_space<vmem>>, vector<1x32xf32>
    %1464 = vector.broadcast %1463 : vector<1x32xf32> to vector<16x32xf32>
    %1465 = arith.addf %1462, %1464 : vector<16x32xf32>
    %c0_524 = arith.constant 0 : index
    %c0_525 = arith.constant 0 : index
    %1466 = vector.load %arg27[%c0_524, %c0_525] : memref<32x64xf32, #tpu.memory_space<vmem>>, vector<32x64xf32>
    %cst_526 = arith.constant dense<0.000000e+00> : vector<16x64xf32>
    %1467 = tpu.matmul %1465, %1466, %cst_526 {dimension_numbers = #tpu.dot_dimension_numbers<[1], [0], [0], [1], [0, 0, 1, 1], [], []>} : vector<16x32xf32>, vector<32x64xf32>, vector<16x64xf32> -> vector<16x64xf32>
    %c0_527 = arith.constant 0 : index
    %c0_528 = arith.constant 0 : index
    %1468 = vector.load %arg26[%c0_527, %c0_528] : memref<1x64xf32, #tpu.memory_space<vmem>>, vector<1x64xf32>
    %1469 = vector.broadcast %1468 : vector<1x64xf32> to vector<16x64xf32>
    %1470 = arith.addf %1467, %1469 : vector<16x64xf32>
    %cst_529 = arith.constant 0.000000e+00 : f32
    %1471 = vector.broadcast %cst_529 : f32 to vector<16x64xf32>
    %1472 = arith.maximumf %1470, %1471 : vector<16x64xf32>
    %c0_530 = arith.constant 0 : index
    %c0_531 = arith.constant 0 : index
    %1473 = vector.load %arg29[%c0_530, %c0_531] : memref<64x32xf32, #tpu.memory_space<vmem>>, vector<64x32xf32>
    %cst_532 = arith.constant dense<0.000000e+00> : vector<16x32xf32>
    %1474 = tpu.matmul %1472, %1473, %cst_532 {dimension_numbers = #tpu.dot_dimension_numbers<[1], [0], [0], [1], [0, 0, 1, 1], [], []>} : vector<16x64xf32>, vector<64x32xf32>, vector<16x32xf32> -> vector<16x32xf32>
    %c0_533 = arith.constant 0 : index
    %c0_534 = arith.constant 0 : index
    %1475 = vector.load %arg28[%c0_533, %c0_534] : memref<1x32xf32, #tpu.memory_space<vmem>>, vector<1x32xf32>
    %1476 = vector.broadcast %1475 : vector<1x32xf32> to vector<16x32xf32>
    %1477 = arith.addf %1474, %1476 : vector<16x32xf32>
    %1478 = arith.addf %1465, %1477 : vector<16x32xf32>
    %cst_535 = arith.constant dense<0.000000e+00> : vector<16xf32>
    %1479 = vector.multi_reduction <add>, %1478, %cst_535 [1] : vector<16x32xf32> to vector<16xf32>
    %1480 = vector.shape_cast %1479 : vector<16xf32> to vector<16x1xf32>
    %cst_536 = arith.constant 3.200000e+01 : f32
    %1481 = vector.broadcast %cst_536 : f32 to vector<16x1xf32>
    %1482 = arith.divf %1480, %1481 : vector<16x1xf32>
    %1483 = vector.broadcast %1482 : vector<16x1xf32> to vector<16x32xf32>
    %1484 = arith.subf %1478, %1483 : vector<16x32xf32>
    %1485 = arith.mulf %1484, %1484 : vector<16x32xf32>
    %cst_537 = arith.constant dense<0.000000e+00> : vector<16xf32>
    %1486 = vector.multi_reduction <add>, %1485, %cst_537 [1] : vector<16x32xf32> to vector<16xf32>
    %1487 = vector.shape_cast %1486 : vector<16xf32> to vector<16x1xf32>
    %cst_538 = arith.constant 3.200000e+01 : f32
    %1488 = vector.broadcast %cst_538 : f32 to vector<16x1xf32>
    %1489 = arith.divf %1487, %1488 : vector<16x1xf32>
    %cst_539 = arith.constant 9.99999974E-6 : f32
    %1490 = vector.broadcast %cst_539 : f32 to vector<16x1xf32>
    %1491 = arith.addf %1489, %1490 : vector<16x1xf32>
    %1492 = math.rsqrt %1491 : vector<16x1xf32>
    %1493 = vector.broadcast %1492 : vector<16x1xf32> to vector<16x32xf32>
    %1494 = arith.mulf %1484, %1493 : vector<16x32xf32>
    %c0_540 = arith.constant 0 : index
    %c0_541 = arith.constant 0 : index
    %1495 = vector.load %arg35[%c0_540, %c0_541] : memref<1x32xf32, #tpu.memory_space<vmem>>, vector<1x32xf32>
    %1496 = vector.broadcast %1495 : vector<1x32xf32> to vector<16x32xf32>
    %1497 = arith.mulf %1494, %1496 : vector<16x32xf32>
    %c0_542 = arith.constant 0 : index
    %c0_543 = arith.constant 0 : index
    %1498 = vector.load %arg34[%c0_542, %c0_543] : memref<1x32xf32, #tpu.memory_space<vmem>>, vector<1x32xf32>
    %1499 = vector.broadcast %1498 : vector<1x32xf32> to vector<16x32xf32>
    %1500 = arith.addf %1497, %1499 : vector<16x32xf32>
    %c0_544 = arith.constant 0 : index
    %c0_545 = arith.constant 0 : index
    %1501 = vector.load %arg66[%c0_544, %c0_545] : memref<32x128xf32, #tpu.memory_space<vmem>>, vector<32x128xf32>
    %cst_546 = arith.constant dense<0.000000e+00> : vector<16x128xf32>
    %1502 = tpu.matmul %1500, %1501, %cst_546 {dimension_numbers = #tpu.dot_dimension_numbers<[1], [0], [0], [1], [0, 0, 1, 1], [], []>} : vector<16x32xf32>, vector<32x128xf32>, vector<16x128xf32> -> vector<16x128xf32>
    %c0_547 = arith.constant 0 : index
    %c0_548 = arith.constant 0 : index
    %1503 = vector.load %arg65[%c0_547, %c0_548] : memref<1x128xf32, #tpu.memory_space<vmem>>, vector<1x128xf32>
    %1504 = vector.broadcast %1503 : vector<1x128xf32> to vector<16x128xf32>
    %1505 = arith.addf %1502, %1504 : vector<16x128xf32>
    %c0_549 = arith.constant 0 : index
    %c0_550 = arith.constant 0 : index
    %1506 = vector.load %arg73[%c0_549, %c0_550] : memref<16x128xf32, #tpu.memory_space<vmem>>, vector<16x128xf32>
    tpu.vector_store %arg73[%c0_549, %c0_550], %1505 {strides = array<i32>} : memref<16x128xf32, #tpu.memory_space<vmem>>, vector<16x128xf32>,
    return
  }
}

</mosaic_0001>

<bundles_post_ra>
// kernel: model_forward.1
= control target key start
LH: loop header
LB: loop body
LE: loop exit
PB: predicated region body
PF: predicated region fallthrough
CT: control target
= control target key end

     0   :  { %s17860_s6 = smov 1   ;;  %s17861_s10 = smov 2   ;;  %s19941_s0 = inlined_call_operand.smem [shape: u32[74], index: -1, kind: input, shape index: {}] }
   0x1   :  { %s18003_s5 = sld [smem:[%s19941_s0]]   ;;  %s17862_s14 = smov 3  }
   0x2   :  { %s18008_s9 = sld [smem:[%s19941_s0 + %s17860_s6]]   ;;  %s17863_s18 = smov 4  }
   0x3   :  { %s18013_s13 = sld [smem:[%s19941_s0 + %s17861_s10]]   ;;  %s17864_s22 = smov 5  }
   0x4   :  { %s18018_s17 = sld [smem:[%s19941_s0 + %s17862_s14]]   ;;  %s17865_s26 = smov 6  }
   0x5   :  { %s18023_s21 = sld [smem:[%s19941_s0 + %s17863_s18]]   ;;  %s17866_s30 = smov 7  }
   0x6   :  { %s18028_s25 = sld [smem:[%s19941_s0 + %s17864_s22]]   ;;  %s17867_s4 = smov 8  }
   0x7   :  { %19967 = sst [smem:[#allocation93_spill]] %s18003_s5  ;;  %s17868_s10 = smov 9  }
   0x8   :  { %s18033_s29 = sld [smem:[%s19941_s0 + %s17865_s26]]   ;;  %s17869_s15 = smov 10  }
   0x9   :  { %19968 = sst [smem:[#allocation94_spill]] %s18013_s13  ;;  %s17870_s20 = smov 11  }
   0xa   :  { %19969 = sst [smem:[#allocation95_spill]] %s18018_s17  ;;  %s17871_s26 = smov 12  }
   0xb   :  { %19970 = sst [smem:[#allocation96_spill]] %s18023_s21  ;;  %s17872_s1 = smov 13  }
   0xc   :  { %19971 = sst [smem:[#allocation97_spill]] %s18028_s25  ;;  %s17873_s7 = smov 14  }
   0xd   :  { %s18038_s3 = sld [smem:[%s19941_s0 + %s17866_s30]]   ;;  %s17875_s22 = smov 16  }
   0xe   :  { %s18043_s8 = sld [smem:[%s19941_s0 + %s17867_s4]]   ;;  %s17876_s28 = smov 17  }
   0xf   :  { %s18048_s14 = sld [smem:[%s19941_s0 + %s17868_s10]]  }
  0x10   :  { %s18053_s19 = sld [smem:[%s19941_s0 + %s17869_s15]]   ;;  %s17874_s15 = smov 15  }
  0x11   :  { %s18058_s24 = sld [smem:[%s19941_s0 + %s17870_s20]]  }
  0x12   :  { %s18063_s30 = sld [smem:[%s19941_s0 + %s17871_s26]]  }
  0x13   :  { %19972 = sst [smem:[#allocation98_spill]] %s18038_s3 }
  0x14   :  { %19973 = sst [smem:[#allocation99_spill]] %s18043_s8 }
  0x15   :  { %19974 = sst [smem:[#allocation100_spill]] %s18048_s14 }
  0x16   :  { %s18068_s6 = sld [smem:[%s19941_s0 + %s17872_s1]]  }
  0x17   :  { %19975 = sst [smem:[#allocation101_spill]] %s18058_s24 }
  0x18   :  { %s18073_s12 = sld [smem:[%s19941_s0 + %s17873_s7]]   ;;  %s17877_s7 = smov 18  }
  0x19   :  { %s18078_s20 = sld [smem:[%s19941_s0 + %s17874_s15]]   ;;  %s17878_s15 = smov 19  }
  0x1a   :  { %s18083_s27 = sld [smem:[%s19941_s0 + %s17875_s22]]   ;;  %s17879_s22 = smov 20  }
  0x1b   :  { %s18088_s4 = sld [smem:[%s19941_s0 + %s17876_s28]]   ;;  %s17880_s28 = smov 21  }
  0x1c   :  { %19976 = sst [smem:[#allocation102_spill]] %s18068_s6 }
  0x1d   :  { %s18093_s14 = sld [smem:[%s19941_s0 + %s17877_s7]]   ;;  %s17881_s7 = smov 22  }
  0x1e   :  { %s18098_s3 = sld [smem:[%s19941_s0 + %s17878_s15]]   ;;  %s17882_s15 = smov 23  }
  0x1f   :  { %19977 = sst [smem:[#allocation103_spill]] %s18078_s20 }
  0x20   :  { %s18103_s21 = sld [smem:[%s19941_s0 + %s17879_s22]]   ;;  %s17883_s22 = smov 24  }
  0x21   :  { %19978 = sst [smem:[#allocation104_spill]] %s18088_s4 }
  0x22   :  { %s18108_s25 = sld [smem:[%s19941_s0 + %s17880_s28]]   ;;  %s17884_s28 = smov 25  }
  0x23   :  { %19979 = sst [smem:[#allocation105_spill]] %s18093_s14 }
  0x24   :  { %19980 = sst [smem:[#allocation106_spill]] %s18098_s3 }
  0x25   :  { %s18113_s17 = sld [smem:[%s19941_s0 + %s17881_s7]]   ;;  %s17885_s7 = smov 26  }
  0x26   :  { %s18118_s14 = sld [smem:[%s19941_s0 + %s17882_s15]]   ;;  %s17886_s15 = smov 27  }
  0x27   :  { %s18123_s3 = sld [smem:[%s19941_s0 + %s17883_s22]]   ;;  %s17887_s22 = smov 28  }
  0x28   :  { %19981 = sst [smem:[#allocation107_spill]] %s18108_s25 }
  0x29   :  { %s18128_s25 = sld [smem:[%s19941_s0 + %s17884_s28]]   ;;  %s17888_s28 = smov 29  }
  0x2a   :  { %s18133_s4 = sld [smem:[%s19941_s0 + %s17885_s7]]   ;;  %s17889_s7 = smov 30  }
  0x2c   :  { %19982 = sst [smem:[#allocation108_spill]] %s18118_s14 }
  0x2d   :  { %19983 = sst [smem:[#allocation109_spill]] %s18123_s3 }
  0x2e   :  { %s18138_s14 = sld [smem:[%s19941_s0 + %s17886_s15]]   ;;  %s17890_s15 = smov 31  }
  0x2f   :  { %19984 = sst [smem:[#allocation110_spill]] %s18128_s25 }
  0x30   :  { %19985 = sst [smem:[#allocation111_spill]] %s18133_s4 }
  0x31   :  { %s18143_s3 = sld [smem:[%s19941_s0 + %s17887_s22]]   ;;  %s17891_s22 = smov 32  }
  0x32   :  { %s18148_s25 = sld [smem:[%s19941_s0 + %s17888_s28]]   ;;  %s17892_s28 = smov 33  }
  0x33   :  { %s18153_s4 = sld [smem:[%s19941_s0 + %s17889_s7]]   ;;  %s17893_s7 = smov 34  }
  0x34   :  { %19986 = sst [smem:[#allocation112_spill]] %s18138_s14 }
  0x35   :  { %s18158_s14 = sld [smem:[%s19941_s0 + %s17890_s15]]   ;;  %s17894_s15 = smov 35  }
  0x36   :  { %s18163_s20 = sld [smem:[%s19941_s0 + %s17891_s22]]   ;;  %s17895_s22 = smov 36  }
  0x37   :  { %s18178_s6 = sld [smem:[%s19941_s0 + %s17894_s15]]   ;;  %s17898_s15 = smov 39  }
  0x38   :  { %19987 = sst [smem:[#allocation113_spill]] %s18148_s25 }
  0x39   :  { %19988 = sst [smem:[#allocation114_spill]] %s18153_s4 }
  0x3a   :  { %s18168_s25 = sld [smem:[%s19941_s0 + %s17892_s28]]   ;;  %s17896_s28 = smov 37  }
  0x3b   :  { %s18173_s4 = sld [smem:[%s19941_s0 + %s17893_s7]]   ;;  %s17897_s7 = smov 38  }
  0x3c   :  { %19989 = sst [smem:[#allocation115_spill]] %s18163_s20 }
  0x3d   :  { %s18183_s20 = sld [smem:[%s19941_s0 + %s17895_s22]]   ;;  %s17899_s22 = smov 40  }
  0x3e   :  { %s18188_s24 = sld [smem:[%s19941_s0 + %s17896_s28]]   ;;  %s17900_s28 = smov 41  }
  0x3f   :  { %s18198_s8 = sld [smem:[%s19941_s0 + %s17898_s15]]   ;;  %s17902_s15 = smov 43  }
  0x40   :  { %s18208_s13 = sld [smem:[%s19941_s0 + %s17900_s28]]   ;;  %s17904_s28 = smov 45  }
  0x41   :  { %19990 = sst [smem:[#allocation116_spill]] %s18173_s4 }
  0x42   :  { %s18193_s4 = sld [smem:[%s19941_s0 + %s17897_s7]]   ;;  %s17901_s7 = smov 42  }
  0x43   :  { %19991 = sst [smem:[#allocation117_spill]] %s18183_s20 }
  0x44   :  { %s18203_s20 = sld [smem:[%s19941_s0 + %s17899_s22]]   ;;  %s17903_s22 = smov 44  }
  0x45   :  { %19993 = sst [smem:[#allocation119_spill]] %s18198_s8 }
  0x46   :  { %19995 = sst [smem:[#allocation121_spill]] %s18208_s13 }
  0x47   :  { %s18218_s8 = sld [smem:[%s19941_s0 + %s17902_s15]]   ;;  %s17906_s15 = smov 47  }
  0x48   :  { %19992 = sst [smem:[#allocation118_spill]] %s18193_s4 }
  0x49   :  { %s18213_s4 = sld [smem:[%s19941_s0 + %s17901_s7]]   ;;  %s17905_s7 = smov 46  }
  0x4a   :  { %19994 = sst [smem:[#allocation120_spill]] %s18203_s20 }
  0x4b   :  { %s18223_s20 = sld [smem:[%s19941_s0 + %s17903_s22]]   ;;  %s17907_s22 = smov 48  }
  0x4c   :  { %s18228_s13 = sld [smem:[%s19941_s0 + %s17904_s28]]   ;;  %s17908_s28 = smov 49  }
  0x4d   :  { %s18238_s5 = sld [smem:[%s19941_s0 + %s17906_s15]]   ;;  %s17910_s15 = smov 51  }
  0x4f   :  { %19996 = sst [smem:[#allocation122_spill]] %s18213_s4 }
  0x50   :  { %s18233_s4 = sld [smem:[%s19941_s0 + %s17905_s7]]   ;;  %s17909_s7 = smov 50  }
  0x51   :  { %19997 = sst [smem:[#allocation123_spill]] %s18223_s20 }
  0x52   :  { %19998 = sst [smem:[#allocation124_spill]] %s18228_s13 }
  0x53   :  { %20000 = sst [smem:[#allocation126_spill]] %s18238_s5 }
  0x54   :  { %s18243_s20 = sld [smem:[%s19941_s0 + %s17907_s22]]   ;;  %s17911_s22 = smov 52  }
  0x55   :  { %s18248_s13 = sld [smem:[%s19941_s0 + %s17908_s28]]   ;;  %s17912_s28 = smov 53  }
  0x56   :  { %19999 = sst [smem:[#allocation125_spill]] %s18233_s4 }
  0x57   :  { %s18253_s4 = sld [smem:[%s19941_s0 + %s17909_s7]]   ;;  %s17913_s7 = smov 54  }
  0x58   :  { %s18258_s5 = sld [smem:[%s19941_s0 + %s17910_s15]]   ;;  %s17914_s15 = smov 55  }
  0x5a   :  { %20001 = sst [smem:[#allocation127_spill]] %s18243_s20 }
  0x5b   :  { %20002 = sst [smem:[#allocation128_spill]] %s18248_s13 }
  0x5c   :  { %s18263_s20 = sld [smem:[%s19941_s0 + %s17911_s22]]   ;;  %s17915_s22 = smov 56  }
  0x5d   :  { %20003 = sst [smem:[#allocation129_spill]] %s18253_s4 }
  0x5e   :  { %20004 = sst [smem:[#allocation130_spill]] %s18258_s5 }
  0x5f   :  { %s18268_s13 = sld [smem:[%s19941_s0 + %s17912_s28]]   ;;  %s17916_s28 = smov 57  }
  0x60   :  { %s18273_s4 = sld [smem:[%s19941_s0 + %s17913_s7]]   ;;  %s17917_s7 = smov 58  }
  0x61   :  { %s18278_s5 = sld [smem:[%s19941_s0 + %s17914_s15]]   ;;  %s17918_s15 = smov 59  }
  0x62   :  { %20005 = sst [smem:[#allocation131_spill]] %s18263_s20 }
  0x63   :  { %s18283_s20 = sld [smem:[%s19941_s0 + %s17915_s22]]   ;;  %s17919_s22 = smov 60  }
  0x65   :  { %20006 = sst [smem:[#allocation132_spill]] %s18268_s13 }
  0x66   :  { %20007 = sst [smem:[#allocation133_spill]] %s18273_s4 }
  0x67   :  { %20008 = sst [smem:[#allocation134_spill]] %s18278_s5 }
  0x68   :  { %s18288_s13 = sld [smem:[%s19941_s0 + %s17916_s28]]   ;;  %s17920_s28 = smov 61  }
  0x69   :  { %20009 = sst [smem:[#allocation135_spill]] %s18283_s20 }
  0x6a   :  { %s18293_s4 = sld [smem:[%s19941_s0 + %s17917_s7]]   ;;  %s17921_s7 = smov 62  }
  0x6b   :  { %s18298_s5 = sld [smem:[%s19941_s0 + %s17918_s15]]   ;;  %s17922_s15 = smov 63  }
  0x6c   :  { %s18303_s20 = sld [smem:[%s19941_s0 + %s17919_s22]]   ;;  %s17923_s22 = smov 64  }
  0x6e   :  { %20010 = sst [smem:[#allocation136_spill]] %s18288_s13 }
  0x6f   :  { %s18308_s13 = sld [smem:[%s19941_s0 + %s17920_s28]]   ;;  %s17924_s28 = smov 65  }
  0x70   :  { %20011 = sst [smem:[#allocation137_spill]] %s18293_s4 }
  0x71   :  { %20012 = sst [smem:[#allocation138_spill]] %s18298_s5 }
  0x72   :  { %20013 = sst [smem:[#allocation139_spill]] %s18303_s20 }
  0x73   :  { %s18313_s4 = sld [smem:[%s19941_s0 + %s17921_s7]]   ;;  %s17925_s7 = smov 66  }
  0x74   :  { %s18318_s5 = sld [smem:[%s19941_s0 + %s17922_s15]]   ;;  %s17926_s15 = smov 67  }
  0x75   :  { %20014 = sst [smem:[#allocation140_spill]] %s18308_s13 }
  0x76   :  { %s18323_s20 = sld [smem:[%s19941_s0 + %s17923_s22]]   ;;  %s17927_s22 = smov 68  }
  0x77   :  { %s18328_s13 = sld [smem:[%s19941_s0 + %s17924_s28]]   ;;  %s17928_s28 = smov 69  }
  0x79   :  { %20015 = sst [smem:[#allocation141_spill]] %s18313_s4 }
  0x7a   :  { %20016 = sst [smem:[#allocation142_spill]] %s18318_s5 }
  0x7b   :  { %s18333_s4 = sld [smem:[%s19941_s0 + %s17925_s7]]   ;;  %s17929_s7 = smov 70  }
  0x7c   :  { %20017 = sst [smem:[#allocation143_spill]] %s18323_s20 }
  0x7d   :  { %20018 = sst [smem:[#allocation144_spill]] %s18328_s13 }
  0x7e   :  { %s18338_s5 = sld [smem:[%s19941_s0 + %s17926_s15]]   ;;  %s17930_s15 = smov 71  }
  0x7f   :  { %s18343_s20 = sld [smem:[%s19941_s0 + %s17927_s22]]   ;;  %s17931_s22 = smov 72  }
  0x80   :  { %s18348_s13 = sld [smem:[%s19941_s0 + %s17928_s28]]   ;;  %s17932_s28 = smov 73  }
  0x81   :  { %20019 = sst [smem:[#allocation145_spill]] %s18333_s4 }
  0x82   :  { %s18353_s4 = sld [smem:[%s19941_s0 + %s17929_s7]]  }
  0x84   :  { %20020 = sst [smem:[#allocation146_spill]] %s18338_s5 }
  0x85   :  { %20021 = sst [smem:[#allocation147_spill]] %s18343_s20 }
  0x86   :  { %20022 = sst [smem:[#allocation148_spill]] %s18348_s13 }
  0x87   :  { %s18358_s5 = sld [smem:[%s19941_s0 + %s17930_s15]]  }
  0x88   :  { %s18363_s20 = sld [smem:[%s19941_s0 + %s17931_s22]]  }
  0x89   :  { %s18368_s13 = sld [smem:[%s19941_s0 + %s17932_s28]]  }
  0x8a   :  { %152 = vsyncpa [#allocation4], 0 }
  0x8b   :  { %153 = vsyncpa [#allocation6], 0 }
  0x8c   :  { %154 = vsyncpa [#allocation9], 0 }
  0x8d   :  { %155 = vsyncpa [#allocation12], 0 }
  0x8e   :  { %156 = vsyncpa [#allocation15], 0 }
  0x8f   :  { %157 = vsyncpa [#allocation18], 0 }
  0x90   :  { %158 = vsyncpa [#allocation21], 0 }
  0x91   :  { %159 = vsyncpa [#allocation24], 0 }
  0x92   :  { %160 = vsyncpa [#allocation27], 0 }
  0x93   :  { %161 = vsyncpa [#allocation30], 0 }
  0x94   :  { %162 = vsyncpa [#allocation33], 0 }
  0x95   :  { %163 = vsyncpa [#allocation36], 0 }
  0x96   :  { %164 = vsyncpa [#allocation39], 0 }
  0x97   :  { %165 = vsyncpa [#allocation42], 0 }
  0x98   :  { %166 = vsyncpa [#allocation45], 0 }
  0x99   :  { %167 = vsyncpa [#allocation48], 0 }
  0x9a   :  { %168 = vsyncpa [#allocation51], 0 }
  0x9b   :  { %169 = vsyncpa [#allocation54], 0 }
  0x9c   :  { %170 = vsyncpa [#allocation57], 0 }
  0x9d   :  { %171 = vsyncpa [#allocation60], 0 }
  0x9e   :  { %172 = vsyncpa [#allocation63], 0 }
  0x9f   :  { %173 = vsyncpa [#allocation66], 0 }
  0xa0   :  { %174 = vsyncpa [#allocation69], 0  ;;  %s17933_s0 = smov [#allocation5]   ;;  %s17934_s10 = smov [#allocation8]  }
  0xa1   :  { %s191_s7 = sshll.u32 %s17933_s0, 4  ;;  %s217_s11 = sshll.u32 %s17934_s10, 4  ;;  %s192_s7 = int_to_ptr.vmem [resolvable:$true] %s191_s7  ;;  %s218_s11 = int_to_ptr.vmem [resolvable:$true] %s217_s11 }
  0xa2   :  { %s16942_s15 = scalar_lea.vmem %s192_s7, 16  ;;  %s16946_s16 = scalar_lea.vmem %s192_s7, 32 }
  0xa3   :  { %p16943_p0 = scmp.ne.s32.totalorder %s192_s7, %s16942_s15  ;;  %p16947_p1 = scmp.lt.s32.totalorder %s192_s7, %s192_s7 }
  0xa4   :  { %p16948_p2 = scmp.lt.s32.totalorder %s16946_s16, %s16942_s15 }
  0xa6   :  { %p16949_p3 = por %p16948_p2, %p16947_p1 }
  0xa8   :  { %p16950_p4 = pnand %p16949_p3, %p16943_p0 }
  0xaa   :  { %16953 = shalt.err (!%p16950_p4)
}
  0xab   :  { %194 = dma.hbm_to_vmem [thread:$0]  %s18008_s9, 16, %s192_s7, [#allocation6]  }
  0xac   :  { %s16962_s18 = scalar_lea.vmem %s218_s11, 16  ;;  %s16966_s22 = scalar_lea.vmem %s218_s11, 32 }
  0xad   :  { %p16963_p5 = scmp.ne.s32.totalorder %s218_s11, %s16962_s18  ;;  %p16967_p6 = scmp.lt.s32.totalorder %s218_s11, %s218_s11 }
  0xae   :  { %p16968_p7 = scmp.lt.s32.totalorder %s16966_s22, %s16962_s18 }
  0xb0   :  { %p16969_p8 = por %p16968_p7, %p16967_p6 }
  0xb2   :  { %p16970_p9 = pnand %p16969_p8, %p16963_p5 }
  0xb4   :  { %16973 = shalt.err (!%p16970_p9)
}
  0xb5   :  { %220 = dma.hbm_to_vmem [thread:$0]  %s18033_s29, 16, %s218_s11, [#allocation9]  }
  0xb6   :  { %s17935_s23 = smov [#allocation11]   ;;  %s17936_s28 = smov [#allocation14]  }
  0xb7   :  { %s241_s26 = sshll.u32 %s17935_s23, 4  ;;  %s261_s1 = sshll.u32 %s17936_s28, 4  ;;  %s242_s26 = int_to_ptr.vmem [resolvable:$true] %s241_s26  ;;  %s262_s1 = int_to_ptr.vmem [resolvable:$true] %s261_s1 }
  0xb8   :  { %s16982_s2 = scalar_lea.vmem %s242_s26, 16  ;;  %s16986_s0 = scalar_lea.vmem %s242_s26, 32 }
  0xb9   :  { %p16983_p10 = scmp.ne.s32.totalorder %s242_s26, %s16982_s2  ;;  %p16987_p11 = scmp.lt.s32.totalorder %s242_s26, %s242_s26 }
  0xba   :  { %p16988_p12 = scmp.lt.s32.totalorder %s16986_s0, %s16982_s2 }
  0xbc   :  { %p16989_p13 = por %p16988_p12, %p16987_p11 }
  0xbe   :  { %p16990_p0 = pnand %p16989_p13, %p16983_p10 }
  0xc0   :  { %16993 = shalt.err (!%p16990_p0)
}
  0xc1   :  { %244 = dma.hbm_to_vmem [thread:$0]  %s18053_s19, 16, %s242_s26, [#allocation12]  }
  0xc2   :  { %s17002_s9 = scalar_lea.vmem %s262_s1, 16  ;;  %s17006_s7 = scalar_lea.vmem %s262_s1, 32 }
  0xc3   :  { %p17003_p1 = scmp.ne.s32.totalorder %s262_s1, %s17002_s9  ;;  %p17007_p2 = scmp.lt.s32.totalorder %s262_s1, %s262_s1 }
  0xc4   :  { %p17008_p3 = scmp.lt.s32.totalorder %s17006_s7, %s17002_s9 }
  0xc6   :  { %p17009_p4 = por %p17008_p3, %p17007_p2 }
  0xc8   :  { %p17010_p5 = pnand %p17009_p4, %p17003_p1 }
  0xca   :  { %17013 = shalt.err (!%p17010_p5)
}
  0xcb   :  { %264 = dma.hbm_to_vmem [thread:$0]  %s18063_s30, 16, %s262_s1, [#allocation15]  }
  0xcc   :  { %s17937_s29 = smov [#allocation17]   ;;  %s17938_s11 = smov [#allocation20]  }
  0xcd   :  { %s281_s10 = sshll.u32 %s17937_s29, 4  ;;  %s301_s15 = sshll.u32 %s17938_s11, 4  ;;  %s282_s10 = int_to_ptr.vmem [resolvable:$true] %s281_s10  ;;  %s302_s15 = int_to_ptr.vmem [resolvable:$true] %s301_s15 }
  0xce   :  { %s17022_s16 = scalar_lea.vmem %s282_s10, 16  ;;  %s17026_s18 = scalar_lea.vmem %s282_s10, 32 }
  0xcf   :  { %p17023_p6 = scmp.ne.s32.totalorder %s282_s10, %s17022_s16  ;;  %p17027_p7 = scmp.lt.s32.totalorder %s282_s10, %s282_s10 }
  0xd0   :  { %p17028_p8 = scmp.lt.s32.totalorder %s17026_s18, %s17022_s16 }
  0xd2   :  { %p17029_p9 = por %p17028_p8, %p17027_p7 }
  0xd4   :  { %p17030_p10 = pnand %p17029_p9, %p17023_p6 }
  0xd6   :  { %17033 = shalt.err (!%p17030_p10)
}
  0xd7   :  { %284 = dma.hbm_to_vmem [thread:$0]  %s18073_s12, 16, %s282_s10, [#allocation18]  }
  0xd8   :  { %s17042_s19 = scalar_lea.vmem %s302_s15, 16  ;;  %s17046_s22 = scalar_lea.vmem %s302_s15, 32 }
  0xd9   :  { %p17043_p11 = scmp.ne.s32.totalorder %s302_s15, %s17042_s19  ;;  %p17047_p12 = scmp.lt.s32.totalorder %s302_s15, %s302_s15 }
  0xda   :  { %p17048_p13 = scmp.lt.s32.totalorder %s17046_s22, %s17042_s19 }
  0xdc   :  { %p17049_p0 = por %p17048_p13, %p17047_p12 }
  0xde   :  { %p17050_p1 = pnand %p17049_p0, %p17043_p11 }
  0xe0   :  { %17053 = shalt.err (!%p17050_p1)
}
  0xe1   :  { %304 = dma.hbm_to_vmem [thread:$0]  %s18083_s27, 16, %s302_s15, [#allocation21]  }
  0xe2   :  { %s17939_s30 = smov [#allocation23]   ;;  %s17940_s26 = smov [#allocation26]  }
  0xe3   :  { %s325_s23 = sshll.u32 %s17939_s30, 4  ;;  %s345_s28 = sshll.u32 %s17940_s26, 4  ;;  %s326_s23 = int_to_ptr.vmem [resolvable:$true] %s325_s23  ;;  %s346_s28 = int_to_ptr.vmem [resolvable:$true] %s345_s28 }
  0xe4   :  { %s17062_s1 = scalar_lea.vmem %s326_s23, 16  ;;  %s17066_s2 = scalar_lea.vmem %s326_s23, 32 }
  0xe5   :  { %p17063_p2 = scmp.ne.s32.totalorder %s326_s23, %s17062_s1  ;;  %p17067_p3 = scmp.lt.s32.totalorder %s326_s23, %s326_s23 }
  0xe6   :  { %p17068_p4 = scmp.lt.s32.totalorder %s17066_s2, %s17062_s1 }
  0xe8   :  { %p17069_p5 = por %p17068_p4, %p17067_p3 }
  0xea   :  { %p17070_p6 = pnand %p17069_p5, %p17063_p2 }
  0xec   :  { %17073 = shalt.err (!%p17070_p6)
}
  0xed   :  { %328 = dma.hbm_to_vmem [thread:$0]  %s18103_s21, 16, %s326_s23, [#allocation24]  }
  0xee   :  { %s17082_s12 = scalar_lea.vmem %s346_s28, 16  ;;  %s17086_s0 = scalar_lea.vmem %s346_s28, 32 }
  0xef   :  { %p17083_p7 = scmp.ne.s32.totalorder %s346_s28, %s17082_s12  ;;  %p17087_p8 = scmp.lt.s32.totalorder %s346_s28, %s346_s28 }
  0xf0   :  { %p17088_p9 = scmp.lt.s32.totalorder %s17086_s0, %s17082_s12 }
  0xf2   :  { %p17089_p10 = por %p17088_p9, %p17087_p8 }
  0xf4   :  { %p17090_p11 = pnand %p17089_p10, %p17083_p7 }
  0xf6   :  { %17093 = shalt.err (!%p17090_p11)
}
  0xf7   :  { %348 = dma.hbm_to_vmem [thread:$0]  %s18113_s17, 16, %s346_s28, [#allocation27]  }
  0xf8   :  { %s17941_s27 = smov [#allocation29]   ;;  %s17942_s7 = smov [#allocation32]  }
  0xf9   :  { %s373_s9 = sshll.u32 %s17941_s27, 4  ;;  %s395_s29 = sshll.u32 %s17942_s7, 4  ;;  %s374_s9 = int_to_ptr.vmem [resolvable:$true] %s373_s9  ;;  %s396_s29 = int_to_ptr.vmem [resolvable:$true] %s395_s29 }
  0xfa   :  { %s17102_s10 = scalar_lea.vmem %s374_s9, 16  ;;  %s17106_s11 = scalar_lea.vmem %s374_s9, 32 }
  0xfb   :  { %p17103_p12 = scmp.ne.s32.totalorder %s374_s9, %s17102_s10  ;;  %p17107_p13 = scmp.lt.s32.totalorder %s374_s9, %s374_s9 }
  0xfc   :  { %p17108_p0 = scmp.lt.s32.totalorder %s17106_s11, %s17102_s10 }
  0xfe   :  { %p17109_p1 = por %p17108_p0, %p17107_p13 }
 0x100   :  { %p17110_p2 = pnand %p17109_p1, %p17103_p12 }
 0x102   :  { %17113 = shalt.err (!%p17110_p2)
}
 0x103   :  { %376 = dma.hbm_to_vmem [thread:$0]  %s18143_s3, 16, %s374_s9, [#allocation30]  }
 0x104   :  { %s17122_s21 = scalar_lea.vmem %s396_s29, 16  ;;  %s17126_s15 = scalar_lea.vmem %s396_s29, 32 }
 0x105   :  { %p17123_p3 = scmp.ne.s32.totalorder %s396_s29, %s17122_s21  ;;  %p17127_p4 = scmp.lt.s32.totalorder %s396_s29, %s396_s29 }
 0x106   :  { %p17128_p5 = scmp.lt.s32.totalorder %s17126_s15, %s17122_s21 }
 0x108   :  { %p17129_p6 = por %p17128_p5, %p17127_p4 }
 0x10a   :  { %p17130_p7 = pnand %p17129_p6, %p17123_p3 }
 0x10c   :  { %17133 = shalt.err (!%p17130_p7)
}
 0x10d   :  { %398 = dma.hbm_to_vmem [thread:$0]  %s18158_s14, 16, %s396_s29, [#allocation33]  }
 0x10e   :  { %s17943_s17 = smov [#allocation35]   ;;  %s17944_s18 = smov [#allocation38]  }
 0x10f   :  { %s415_s16 = sshll.u32 %s17943_s17, 4  ;;  %s435_s19 = sshll.u32 %s17944_s18, 4  ;;  %s416_s16 = int_to_ptr.vmem [resolvable:$true] %s415_s16  ;;  %s436_s19 = int_to_ptr.vmem [resolvable:$true] %s435_s19 }
 0x110   :  { %s17142_s22 = scalar_lea.vmem %s416_s16, 16  ;;  %s17146_s30 = scalar_lea.vmem %s416_s16, 32 }
 0x111   :  { %p17143_p8 = scmp.ne.s32.totalorder %s416_s16, %s17142_s22  ;;  %p17147_p9 = scmp.lt.s32.totalorder %s416_s16, %s416_s16 }
 0x112   :  { %p17148_p10 = scmp.lt.s32.totalorder %s17146_s30, %s17142_s22 }
 0x114   :  { %p17149_p11 = por %p17148_p10, %p17147_p9 }
 0x116   :  { %p17150_p12 = pnand %p17149_p11, %p17143_p8 }
 0x118   :  { %17153 = shalt.err (!%p17150_p12)
}
 0x119   :  { %418 = dma.hbm_to_vmem [thread:$0]  %s18168_s25, 16, %s416_s16, [#allocation36]  }
 0x11a   :  { %s17162_s3 = scalar_lea.vmem %s436_s19, 16  ;;  %s17166_s23 = scalar_lea.vmem %s436_s19, 32 }
 0x11b   :  { %p17163_p13 = scmp.ne.s32.totalorder %s436_s19, %s17162_s3  ;;  %p17167_p0 = scmp.lt.s32.totalorder %s436_s19, %s436_s19 }
 0x11c   :  { %p17168_p1 = scmp.lt.s32.totalorder %s17166_s23, %s17162_s3 }
 0x11e   :  { %p17169_p2 = por %p17168_p1, %p17167_p0 }
 0x120   :  { %p17170_p3 = pnand %p17169_p2, %p17163_p13 }
 0x122   :  { %17173 = shalt.err (!%p17170_p3)
}
 0x123   :  { %438 = dma.hbm_to_vmem [thread:$0]  %s18178_s6, 16, %s436_s19, [#allocation39]  }
 0x124   :  { %s17945_s14 = smov [#allocation41]   ;;  %s17946_s28 = smov [#allocation44]  }
 0x125   :  { %s455_s26 = sshll.u32 %s17945_s14, 4  ;;  %s483_s1 = sshll.u32 %s17946_s28, 4  ;;  %s456_s26 = int_to_ptr.vmem [resolvable:$true] %s455_s26  ;;  %s484_s1 = int_to_ptr.vmem [resolvable:$true] %s483_s1 }
 0x126   :  { %s17182_s2 = scalar_lea.vmem %s456_s26, 16  ;;  %s17186_s12 = scalar_lea.vmem %s456_s26, 32 }
 0x127   :  { %p17183_p4 = scmp.ne.s32.totalorder %s456_s26, %s17182_s2  ;;  %p17187_p5 = scmp.lt.s32.totalorder %s456_s26, %s456_s26 }
 0x128   :  { %p17188_p6 = scmp.lt.s32.totalorder %s17186_s12, %s17182_s2 }
 0x12a   :  { %p17189_p7 = por %p17188_p6, %p17187_p5 }
 0x12c   :  { %p17190_p8 = pnand %p17189_p7, %p17183_p4 }
 0x12e   :  { %17193 = shalt.err (!%p17190_p8)
}
 0x12f   :  { %458 = dma.hbm_to_vmem [thread:$0]  %s18188_s24, 16, %s456_s26, [#allocation42]  }
 0x130   :  { %s17202_s25 = scalar_lea.vmem %s484_s1, 16  ;;  %s17206_s0 = scalar_lea.vmem %s484_s1, 32 }
 0x131   :  { %p17203_p9 = scmp.ne.s32.totalorder %s484_s1, %s17202_s25  ;;  %p17207_p10 = scmp.lt.s32.totalorder %s484_s1, %s484_s1 }
 0x132   :  { %p17208_p11 = scmp.lt.s32.totalorder %s17206_s0, %s17202_s25 }
 0x134   :  { %p17209_p12 = por %p17208_p11, %p17207_p10 }
 0x136   :  { %p17210_p13 = pnand %p17209_p12, %p17203_p9 }
 0x138   :  { %17213 = shalt.err (!%p17210_p13)
}
 0x139   :  { %486 = dma.hbm_to_vmem [thread:$0]  %s18218_s8, 16, %s484_s1, [#allocation45]  }
 0x13a   :  { %s17947_s6 = smov [#allocation47]   ;;  %s17948_s9 = smov [#allocation50]  }
 0x13b   :  { %s505_s27 = sshll.u32 %s17947_s6, 4  ;;  %s525_s7 = sshll.u32 %s17948_s9, 4  ;;  %s506_s27 = int_to_ptr.vmem [resolvable:$true] %s505_s27  ;;  %s526_s7 = int_to_ptr.vmem [resolvable:$true] %s525_s7 }
 0x13c   :  { %s17222_s29 = scalar_lea.vmem %s506_s27, 16  ;;  %s17226_s10 = scalar_lea.vmem %s506_s27, 32 }
 0x13d   :  { %p17223_p0 = scmp.ne.s32.totalorder %s506_s27, %s17222_s29  ;;  %p17227_p1 = scmp.lt.s32.totalorder %s506_s27, %s506_s27 }
 0x13e   :  { %p17228_p2 = scmp.lt.s32.totalorder %s17226_s10, %s17222_s29 }
 0x140   :  { %p17229_p3 = por %p17228_p2, %p17227_p1 }
 0x142   :  { %p17230_p4 = pnand %p17229_p3, %p17223_p0 }
 0x144   :  { %17233 = shalt.err (!%p17230_p4)
}
 0x145   :  { %s20023_s24 = sld [smem:[#allocation125_spill]]  ;;  %s17242_s11 = scalar_lea.vmem %s526_s7, 16 }
 0x146   :  { %p17243_p5 = scmp.ne.s32.totalorder %s526_s7, %s17242_s11  ;;  %s17246_s21 = scalar_lea.vmem %s526_s7, 32 }
 0x147   :  { %p17247_p6 = scmp.lt.s32.totalorder %s526_s7, %s526_s7  ;;  %p17248_p7 = scmp.lt.s32.totalorder %s17246_s21, %s17242_s11 }
 0x149   :  { %p17249_p8 = por %p17248_p7, %p17247_p6 }
 0x14b   :  { %508 = dma.hbm_to_vmem [thread:$0]  %s20023_s24, 16, %s506_s27, [#allocation48]  }
 0x14c   :  { %p17250_p9 = pnand %p17249_p8, %p17243_p5 }
 0x14e   :  { %17253 = shalt.err (!%p17250_p9)
}
 0x14f   :  { %s20024_s8 = sld [smem:[#allocation127_spill]]  ;;  %s17949_s15 = smov [#allocation53]  }
 0x150   :  { %s545_s17 = sshll.u32 %s17949_s15, 4  ;;  %s17950_s16 = smov [#allocation56]   ;;  %s546_s17 = int_to_ptr.vmem [resolvable:$true] %s545_s17 }
 0x151   :  { %s571_s18 = sshll.u32 %s17950_s16, 4  ;;  %s17262_s19 = scalar_lea.vmem %s546_s17, 16  ;;  %s572_s18 = int_to_ptr.vmem [resolvable:$true] %s571_s18 }
 0x152   :  { %p17263_p10 = scmp.ne.s32.totalorder %s546_s17, %s17262_s19  ;;  %s17266_s22 = scalar_lea.vmem %s546_s17, 32 }
 0x153   :  { %p17267_p11 = scmp.lt.s32.totalorder %s546_s17, %s546_s17  ;;  %p17268_p12 = scmp.lt.s32.totalorder %s17266_s22, %s17262_s19 }
 0x155   :  { %528 = dma.hbm_to_vmem [thread:$0]  %s20024_s8, 16, %s526_s7, [#allocation51]  }
 0x156   :  { %p17269_p13 = por %p17268_p12, %p17267_p11 }
 0x158   :  { %p17270_p0 = pnand %p17269_p13, %p17263_p10 }
 0x15a   :  { %17273 = shalt.err (!%p17270_p0)
}
 0x15b   :  { %s20025_s30 = sld [smem:[#allocation129_spill]]  ;;  %s17282_s3 = scalar_lea.vmem %s572_s18, 16 }
 0x15c   :  { %p17283_p1 = scmp.ne.s32.totalorder %s572_s18, %s17282_s3  ;;  %s17286_s23 = scalar_lea.vmem %s572_s18, 32 }
 0x15d   :  { %p17287_p2 = scmp.lt.s32.totalorder %s572_s18, %s572_s18  ;;  %p17288_p3 = scmp.lt.s32.totalorder %s17286_s23, %s17282_s3 }
 0x15f   :  { %p17289_p4 = por %p17288_p3, %p17287_p2 }
 0x161   :  { %548 = dma.hbm_to_vmem [thread:$0]  %s20025_s30, 16, %s546_s17, [#allocation54]  }
 0x162   :  { %p17290_p5 = pnand %p17289_p4, %p17283_p1 }
 0x164   :  { %17293 = shalt.err (!%p17290_p5)
}
 0x165   :  { %s20026_s14 = sld [smem:[#allocation134_spill]]  ;;  %s17951_s26 = smov [#allocation59]  }
 0x166   :  { %s593_s28 = sshll.u32 %s17951_s26, 4  ;;  %s17952_s1 = smov [#allocation62]   ;;  %s594_s28 = int_to_ptr.vmem [resolvable:$true] %s593_s28 }
 0x167   :  { %s613_s2 = sshll.u32 %s17952_s1, 4  ;;  %s17302_s12 = scalar_lea.vmem %s594_s28, 16  ;;  %s614_s2 = int_to_ptr.vmem [resolvable:$true] %s613_s2 }
 0x168   :  { %p17303_p6 = scmp.ne.s32.totalorder %s594_s28, %s17302_s12  ;;  %s17306_s25 = scalar_lea.vmem %s594_s28, 32 }
 0x169   :  { %p17307_p7 = scmp.lt.s32.totalorder %s594_s28, %s594_s28  ;;  %p17308_p8 = scmp.lt.s32.totalorder %s17306_s25, %s17302_s12 }
 0x16b   :  { %574 = dma.hbm_to_vmem [thread:$0]  %s20026_s14, 16, %s572_s18, [#allocation57]  }
 0x16c   :  { %p17309_p9 = por %p17308_p8, %p17307_p7 }
 0x16e   :  { %p17310_p10 = pnand %p17309_p9, %p17303_p6 }
 0x170   :  { %17313 = shalt.err (!%p17310_p10)
}
 0x171   :  { %s20027_s0 = sld [smem:[#allocation137_spill]]  ;;  %s17322_s6 = scalar_lea.vmem %s614_s2, 16 }
 0x172   :  { %p17323_p11 = scmp.ne.s32.totalorder %s614_s2, %s17322_s6  ;;  %s17326_s27 = scalar_lea.vmem %s614_s2, 32 }
 0x173   :  { %p17327_p12 = scmp.lt.s32.totalorder %s614_s2, %s614_s2  ;;  %p17328_p13 = scmp.lt.s32.totalorder %s17326_s27, %s17322_s6 }
 0x175   :  { %p17329_p0 = por %p17328_p13, %p17327_p12 }
 0x177   :  { %596 = dma.hbm_to_vmem [thread:$0]  %s20027_s0, 16, %s594_s28, [#allocation60]  }
 0x178   :  { %p17330_p1 = pnand %p17329_p0, %p17323_p11 }
 0x17a   :  { %17333 = shalt.err (!%p17330_p1)
}
 0x17b   :  { %s20028_s9 = sld [smem:[#allocation139_spill]]  ;;  %s17953_s7 = smov [#allocation65]  }
 0x17c   :  { %s633_s29 = sshll.u32 %s17953_s7, 4  ;;  %s17954_s10 = smov [#allocation3]   ;;  %s634_s29 = int_to_ptr.vmem [resolvable:$true] %s633_s29 }
 0x17d   :  { %s181_s24 = sshll.u32 %s17954_s10, 4  ;;  %s17342_s11 = scalar_lea.vmem %s634_s29, 16  ;;  %s182_s24 = int_to_ptr.vmem [resolvable:$true] %s181_s24 }
 0x17e   :  { %p17343_p2 = scmp.ne.s32.totalorder %s634_s29, %s17342_s11  ;;  %s17346_s21 = scalar_lea.vmem %s634_s29, 32 }
 0x17f   :  { %p17347_p3 = scmp.lt.s32.totalorder %s634_s29, %s634_s29  ;;  %p17348_p4 = scmp.lt.s32.totalorder %s17346_s21, %s17342_s11 }
 0x181   :  { %616 = dma.hbm_to_vmem [thread:$0]  %s20028_s9, 16, %s614_s2, [#allocation63]  }
 0x182   :  { %p17349_p5 = por %p17348_p4, %p17347_p3 }
 0x184   :  { %p17350_p6 = pnand %p17349_p5, %p17343_p2 }
 0x186   :  { %17353 = shalt.err (!%p17350_p6)
}
 0x187   :  { %s20029_s8 = sld [smem:[#allocation141_spill]]  ;;  %s17362_s15 = scalar_lea.vmem %s182_s24, 16 }
 0x188   :  { %p17363_p7 = scmp.ne.s32.totalorder %s182_s24, %s17362_s15  ;;  %s17366_s17 = scalar_lea.vmem %s182_s24, 32 }
 0x189   :  { %p17367_p8 = scmp.lt.s32.totalorder %s182_s24, %s182_s24  ;;  %p17368_p9 = scmp.lt.s32.totalorder %s17366_s17, %s17362_s15 }
 0x18b   :  { %p17369_p10 = por %p17368_p9, %p17367_p8 }
 0x18d   :  { %636 = dma.hbm_to_vmem [thread:$0]  %s20029_s8, 16, %s634_s29, [#allocation66]  }
 0x18e   :  { %p17370_p11 = pnand %p17369_p10, %p17363_p7 }
 0x190   :  { %17373 = shalt.err (!%p17370_p11)
}
 0x191   :  { %s20030_s16 = sld [smem:[#allocation93_spill]]  ;;  %s17955_s18 = smov [#allocation7]  }
 0x192   :  { %s201_s19 = sshll.u32 %s17955_s18, 4  ;;  %s17956_s22 = smov [#allocation10]   ;;  %s202_s19 = int_to_ptr.vmem [resolvable:$true] %s201_s19 }
 0x193   :  { %s229_s30 = sshll.u32 %s17956_s22, 4  ;;  %s17382_s3 = scalar_lea.vmem %s202_s19, 16  ;;  %s230_s30 = int_to_ptr.vmem [resolvable:$true] %s229_s30 }
 0x194   :  { %p17383_p12 = scmp.ne.s32.totalorder %s202_s19, %s17382_s3  ;;  %s17386_s23 = scalar_lea.vmem %s202_s19, 32 }
 0x195   :  { %p17387_p13 = scmp.lt.s32.totalorder %s202_s19, %s202_s19  ;;  %p17388_p0 = scmp.lt.s32.totalorder %s17386_s23, %s17382_s3 }
 0x197   :  { %184 = dma.hbm_to_vmem [thread:$0]  %s20030_s16, 16, %s182_s24, [#allocation4]  }
 0x198   :  { %p17389_p1 = por %p17388_p0, %p17387_p13 }
 0x19a   :  { %p17390_p2 = pnand %p17389_p1, %p17383_p12 }
 0x19c   :  { %17393 = shalt.err (!%p17390_p2)
}
 0x19d   :  { %s20031_s14 = sld [smem:[#allocation94_spill]]  ;;  %s17402_s26 = scalar_lea.vmem %s230_s30, 16 }
 0x19e   :  { %p17403_p3 = scmp.ne.s32.totalorder %s230_s30, %s17402_s26  ;;  %s17406_s28 = scalar_lea.vmem %s230_s30, 32 }
 0x19f   :  { %p17407_p4 = scmp.lt.s32.totalorder %s230_s30, %s230_s30  ;;  %p17408_p5 = scmp.lt.s32.totalorder %s17406_s28, %s17402_s26 }
 0x1a1   :  { %p17409_p6 = por %p17408_p5, %p17407_p4 }
 0x1a3   :  { %204 = dma.hbm_to_vmem [thread:$0]  %s20031_s14, 16, %s202_s19, [#allocation6]  }
 0x1a4   :  { %p17410_p7 = pnand %p17409_p6, %p17403_p3 }
 0x1a6   :  { %17413 = shalt.err (!%p17410_p7)
}
 0x1a7   :  { %s20032_s1 = sld [smem:[#allocation99_spill]]  ;;  %s17957_s2 = smov [#allocation13]  }
 0x1a8   :  { %s251_s12 = sshll.u32 %s17957_s2, 4  ;;  %s17958_s25 = smov [#allocation16]   ;;  %s252_s12 = int_to_ptr.vmem [resolvable:$true] %s251_s12 }
 0x1a9   :  { %s271_s0 = sshll.u32 %s17958_s25, 4  ;;  %s17422_s6 = scalar_lea.vmem %s252_s12, 16  ;;  %s272_s0 = int_to_ptr.vmem [resolvable:$true] %s271_s0 }
 0x1aa   :  { %p17423_p8 = scmp.ne.s32.totalorder %s252_s12, %s17422_s6  ;;  %s17426_s27 = scalar_lea.vmem %s252_s12, 32 }
 0x1ab   :  { %p17427_p9 = scmp.lt.s32.totalorder %s252_s12, %s252_s12  ;;  %p17428_p10 = scmp.lt.s32.totalorder %s17426_s27, %s17422_s6 }
 0x1ad   :  { %232 = dma.hbm_to_vmem [thread:$0]  %s20032_s1, 16, %s230_s30, [#allocation9]  }
 0x1ae   :  { %p17429_p11 = por %p17428_p10, %p17427_p9 }
 0x1b0   :  { %p17430_p12 = pnand %p17429_p11, %p17423_p8 }
 0x1b2   :  { %17433 = shalt.err (!%p17430_p12)
}
 0x1b3   :  { %s20033_s9 = sld [smem:[#allocation101_spill]]  ;;  %s17442_s7 = scalar_lea.vmem %s272_s0, 16 }
 0x1b4   :  { %p17443_p13 = scmp.ne.s32.totalorder %s272_s0, %s17442_s7  ;;  %s17446_s29 = scalar_lea.vmem %s272_s0, 32 }
 0x1b5   :  { %p17447_p0 = scmp.lt.s32.totalorder %s272_s0, %s272_s0  ;;  %p17448_p1 = scmp.lt.s32.totalorder %s17446_s29, %s17442_s7 }
 0x1b7   :  { %p17449_p2 = por %p17448_p1, %p17447_p0 }
 0x1b9   :  { %254 = dma.hbm_to_vmem [thread:$0]  %s20033_s9, 16, %s252_s12, [#allocation12]  }
 0x1ba   :  { %p17450_p3 = pnand %p17449_p2, %p17443_p13 }
 0x1bc   :  { %17453 = shalt.err (!%p17450_p3)
}
 0x1bd   :  { %s20034_s10 = sld [smem:[#allocation102_spill]]  ;;  %s17959_s24 = smov [#allocation19]  }
 0x1be   :  { %s291_s11 = sshll.u32 %s17959_s24, 4  ;;  %s17960_s21 = smov [#allocation22]   ;;  %s292_s11 = int_to_ptr.vmem [resolvable:$true] %s291_s11 }
 0x1bf   :  { %s311_s8 = sshll.u32 %s17960_s21, 4  ;;  %s17462_s15 = scalar_lea.vmem %s292_s11, 16  ;;  %s312_s8 = int_to_ptr.vmem [resolvable:$true] %s311_s8 }
 0x1c0   :  { %p17463_p4 = scmp.ne.s32.totalorder %s292_s11, %s17462_s15  ;;  %s17466_s17 = scalar_lea.vmem %s292_s11, 32 }
 0x1c1   :  { %p17467_p5 = scmp.lt.s32.totalorder %s292_s11, %s292_s11  ;;  %p17468_p6 = scmp.lt.s32.totalorder %s17466_s17, %s17462_s15 }
 0x1c3   :  { %274 = dma.hbm_to_vmem [thread:$0]  %s20034_s10, 16, %s272_s0, [#allocation15]  }
 0x1c4   :  { %p17469_p7 = por %p17468_p6, %p17467_p5 }
 0x1c6   :  { %p17470_p8 = pnand %p17469_p7, %p17463_p4 }
 0x1c8   :  { %17473 = shalt.err (!%p17470_p8)
}
 0x1c9   :  { %s20035_s16 = sld [smem:[#allocation103_spill]]  ;;  %s17482_s18 = scalar_lea.vmem %s312_s8, 16 }
 0x1ca   :  { %p17483_p9 = scmp.ne.s32.totalorder %s312_s8, %s17482_s18  ;;  %s17486_s19 = scalar_lea.vmem %s312_s8, 32 }
 0x1cb   :  { %p17487_p10 = scmp.lt.s32.totalorder %s312_s8, %s312_s8  ;;  %p17488_p11 = scmp.lt.s32.totalorder %s17486_s19, %s17482_s18 }
 0x1cd   :  { %p17489_p12 = por %p17488_p11, %p17487_p10 }
 0x1cf   :  { %294 = dma.hbm_to_vmem [thread:$0]  %s20035_s16, 16, %s292_s11, [#allocation18]  }
 0x1d0   :  { %p17490_p13 = pnand %p17489_p12, %p17483_p9 }
 0x1d2   :  { %17493 = shalt.err (!%p17490_p13)
}
 0x1d3   :  { %s20036_s22 = sld [smem:[#allocation104_spill]]  ;;  %s17961_s30 = smov [#allocation25]  }
 0x1d4   :  { %s335_s3 = sshll.u32 %s17961_s30, 4  ;;  %s17962_s23 = smov [#allocation28]   ;;  %s336_s3 = int_to_ptr.vmem [resolvable:$true] %s335_s3 }
 0x1d5   :  { %s361_s14 = sshll.u32 %s17962_s23, 4  ;;  %s17502_s26 = scalar_lea.vmem %s336_s3, 16  ;;  %s362_s14 = int_to_ptr.vmem [resolvable:$true] %s361_s14 }
 0x1d6   :  { %p17503_p0 = scmp.ne.s32.totalorder %s336_s3, %s17502_s26  ;;  %s17506_s28 = scalar_lea.vmem %s336_s3, 32 }
 0x1d7   :  { %p17507_p1 = scmp.lt.s32.totalorder %s336_s3, %s336_s3  ;;  %p17508_p2 = scmp.lt.s32.totalorder %s17506_s28, %s17502_s26 }
 0x1d9   :  { %314 = dma.hbm_to_vmem [thread:$0]  %s20036_s22, 16, %s312_s8, [#allocation21]  }
 0x1da   :  { %p17509_p3 = por %p17508_p2, %p17507_p1 }
 0x1dc   :  { %p17510_p4 = pnand %p17509_p3, %p17503_p0 }
 0x1de   :  { %17513 = shalt.err (!%p17510_p4)
}
 0x1df   :  { %s20037_s1 = sld [smem:[#allocation107_spill]]  ;;  %s17522_s2 = scalar_lea.vmem %s362_s14, 16 }
 0x1e0   :  { %p17523_p5 = scmp.ne.s32.totalorder %s362_s14, %s17522_s2  ;;  %s17526_s12 = scalar_lea.vmem %s362_s14, 32 }
 0x1e1   :  { %p17527_p6 = scmp.lt.s32.totalorder %s362_s14, %s362_s14  ;;  %p17528_p7 = scmp.lt.s32.totalorder %s17526_s12, %s17522_s2 }
 0x1e3   :  { %p17529_p8 = por %p17528_p7, %p17527_p6 }
 0x1e5   :  { %338 = dma.hbm_to_vmem [thread:$0]  %s20037_s1, 16, %s336_s3, [#allocation24]  }
 0x1e6   :  { %p17530_p9 = pnand %p17529_p8, %p17523_p5 }
 0x1e8   :  { %17533 = shalt.err (!%p17530_p9)
}
 0x1e9   :  { %s20038_s25 = sld [smem:[#allocation111_spill]]  ;;  %s17963_s0 = smov [#allocation31]  }
 0x1ea   :  { %s385_s6 = sshll.u32 %s17963_s0, 4  ;;  %s17964_s27 = smov [#allocation34]   ;;  %s386_s6 = int_to_ptr.vmem [resolvable:$true] %s385_s6 }
 0x1eb   :  { %s405_s9 = sshll.u32 %s17964_s27, 4  ;;  %s17542_s7 = scalar_lea.vmem %s386_s6, 16  ;;  %s406_s9 = int_to_ptr.vmem [resolvable:$true] %s405_s9 }
 0x1ec   :  { %p17543_p10 = scmp.ne.s32.totalorder %s386_s6, %s17542_s7  ;;  %s17546_s29 = scalar_lea.vmem %s386_s6, 32 }
 0x1ed   :  { %p17547_p11 = scmp.lt.s32.totalorder %s386_s6, %s386_s6  ;;  %p17548_p12 = scmp.lt.s32.totalorder %s17546_s29, %s17542_s7 }
 0x1ef   :  { %364 = dma.hbm_to_vmem [thread:$0]  %s20038_s25, 16, %s362_s14, [#allocation27]  }
 0x1f0   :  { %p17549_p13 = por %p17548_p12, %p17547_p11 }
 0x1f2   :  { %p17550_p0 = pnand %p17549_p13, %p17543_p10 }
 0x1f4   :  { %17553 = shalt.err (!%p17550_p0)
}
 0x1f5   :  { %s20039_s10 = sld [smem:[#allocation114_spill]]  ;;  %s17562_s24 = scalar_lea.vmem %s406_s9, 16 }
 0x1f6   :  { %p17563_p1 = scmp.ne.s32.totalorder %s406_s9, %s17562_s24  ;;  %s17566_s11 = scalar_lea.vmem %s406_s9, 32 }
 0x1f7   :  { %p17567_p2 = scmp.lt.s32.totalorder %s406_s9, %s406_s9  ;;  %p17568_p3 = scmp.lt.s32.totalorder %s17566_s11, %s17562_s24 }
 0x1f9   :  { %p17569_p4 = por %p17568_p3, %p17567_p2 }
 0x1fb   :  { %388 = dma.hbm_to_vmem [thread:$0]  %s20039_s10, 16, %s386_s6, [#allocation30]  }
 0x1fc   :  { %p17570_p5 = pnand %p17569_p4, %p17563_p1 }
 0x1fe   :  { %17573 = shalt.err (!%p17570_p5)
}
 0x1ff   :  { %s20040_s21 = sld [smem:[#allocation115_spill]]  ;;  %s17965_s8 = smov [#allocation37]  }
 0x200   :  { %s425_s15 = sshll.u32 %s17965_s8, 4  ;;  %s17966_s17 = smov [#allocation40]   ;;  %s426_s15 = int_to_ptr.vmem [resolvable:$true] %s425_s15 }
 0x201   :  { %s445_s16 = sshll.u32 %s17966_s17, 4  ;;  %s17582_s18 = scalar_lea.vmem %s426_s15, 16  ;;  %s446_s16 = int_to_ptr.vmem [resolvable:$true] %s445_s16 }
 0x202   :  { %p17583_p6 = scmp.ne.s32.totalorder %s426_s15, %s17582_s18  ;;  %s17586_s19 = scalar_lea.vmem %s426_s15, 32 }
 0x203   :  { %p17587_p7 = scmp.lt.s32.totalorder %s426_s15, %s426_s15  ;;  %p17588_p8 = scmp.lt.s32.totalorder %s17586_s19, %s17582_s18 }
 0x205   :  { %408 = dma.hbm_to_vmem [thread:$0]  %s20040_s21, 16, %s406_s9, [#allocation33]  }
 0x206   :  { %p17589_p9 = por %p17588_p8, %p17587_p7 }
 0x208   :  { %p17590_p10 = pnand %p17589_p9, %p17583_p6 }
 0x20a   :  { %17593 = shalt.err (!%p17590_p10)
}
 0x20b   :  { %s20041_s22 = sld [smem:[#allocation116_spill]]  ;;  %s17602_s30 = scalar_lea.vmem %s446_s16, 16 }
 0x20c   :  { %p17603_p11 = scmp.ne.s32.totalorder %s446_s16, %s17602_s30  ;;  %s17606_s3 = scalar_lea.vmem %s446_s16, 32 }
 0x20d   :  { %p17607_p12 = scmp.lt.s32.totalorder %s446_s16, %s446_s16  ;;  %p17608_p13 = scmp.lt.s32.totalorder %s17606_s3, %s17602_s30 }
 0x20f   :  { %p17609_p0 = por %p17608_p13, %p17607_p12 }
 0x211   :  { %428 = dma.hbm_to_vmem [thread:$0]  %s20041_s22, 16, %s426_s15, [#allocation36]  }
 0x212   :  { %p17610_p1 = pnand %p17609_p0, %p17603_p11 }
 0x214   :  { %17613 = shalt.err (!%p17610_p1)
}
 0x215   :  { %s20042_s23 = sld [smem:[#allocation117_spill]]  ;;  %s17967_s14 = smov [#allocation43]  }
 0x216   :  { %s471_s26 = sshll.u32 %s17967_s14, 4  ;;  %s17968_s28 = smov [#allocation46]   ;;  %s472_s26 = int_to_ptr.vmem [resolvable:$true] %s471_s26 }
 0x217   :  { %s495_s1 = sshll.u32 %s17968_s28, 4  ;;  %s17622_s2 = scalar_lea.vmem %s472_s26, 16  ;;  %s496_s1 = int_to_ptr.vmem [resolvable:$true] %s495_s1 }
 0x218   :  { %p17623_p2 = scmp.ne.s32.totalorder %s472_s26, %s17622_s2  ;;  %s17626_s12 = scalar_lea.vmem %s472_s26, 32 }
 0x219   :  { %p17627_p3 = scmp.lt.s32.totalorder %s472_s26, %s472_s26  ;;  %p17628_p4 = scmp.lt.s32.totalorder %s17626_s12, %s17622_s2 }
 0x21b   :  { %448 = dma.hbm_to_vmem [thread:$0]  %s20042_s23, 16, %s446_s16, [#allocation39]  }
 0x21c   :  { %p17629_p5 = por %p17628_p4, %p17627_p3 }
 0x21e   :  { %p17630_p6 = pnand %p17629_p5, %p17623_p2 }
 0x220   :  { %17633 = shalt.err (!%p17630_p6)
}
 0x221   :  { %s20043_s25 = sld [smem:[#allocation121_spill]]  ;;  %s17642_s0 = scalar_lea.vmem %s496_s1, 16 }
 0x222   :  { %p17643_p7 = scmp.ne.s32.totalorder %s496_s1, %s17642_s0  ;;  %s17646_s6 = scalar_lea.vmem %s496_s1, 32 }
 0x223   :  { %p17647_p8 = scmp.lt.s32.totalorder %s496_s1, %s496_s1  ;;  %p17648_p9 = scmp.lt.s32.totalorder %s17646_s6, %s17642_s0 }
 0x225   :  { %p17649_p10 = por %p17648_p9, %p17647_p8 }
 0x227   :  { %474 = dma.hbm_to_vmem [thread:$0]  %s20043_s25, 16, %s472_s26, [#allocation42]  }
 0x228   :  { %p17650_p11 = pnand %p17649_p10, %p17643_p7 }
 0x22a   :  { %17653 = shalt.err (!%p17650_p11)
}
 0x22b   :  { %s20044_s27 = sld [smem:[#allocation124_spill]]  ;;  %s17969_s9 = smov [#allocation49]  }
 0x22c   :  { %s515_s7 = sshll.u32 %s17969_s9, 4  ;;  %s17970_s29 = smov [#allocation52]   ;;  %s516_s7 = int_to_ptr.vmem [resolvable:$true] %s515_s7 }
 0x22d   :  { %s535_s10 = sshll.u32 %s17970_s29, 4  ;;  %s17662_s24 = scalar_lea.vmem %s516_s7, 16  ;;  %s536_s10 = int_to_ptr.vmem [resolvable:$true] %s535_s10 }
 0x22e   :  { %p17663_p12 = scmp.ne.s32.totalorder %s516_s7, %s17662_s24  ;;  %s17666_s11 = scalar_lea.vmem %s516_s7, 32 }
 0x22f   :  { %p17667_p13 = scmp.lt.s32.totalorder %s516_s7, %s516_s7  ;;  %p17668_p0 = scmp.lt.s32.totalorder %s17666_s11, %s17662_s24 }
 0x231   :  { %498 = dma.hbm_to_vmem [thread:$0]  %s20044_s27, 16, %s496_s1, [#allocation45]  }
 0x232   :  { %p17669_p1 = por %p17668_p0, %p17667_p13 }
 0x234   :  { %p17670_p2 = pnand %p17669_p1, %p17663_p12 }
 0x236   :  { %17673 = shalt.err (!%p17670_p2)
}
 0x237   :  { %s20045_s21 = sld [smem:[#allocation126_spill]]  ;;  %s17682_s8 = scalar_lea.vmem %s536_s10, 16 }
 0x238   :  { %p17683_p3 = scmp.ne.s32.totalorder %s536_s10, %s17682_s8  ;;  %s17686_s15 = scalar_lea.vmem %s536_s10, 32 }
 0x239   :  { %p17687_p4 = scmp.lt.s32.totalorder %s536_s10, %s536_s10  ;;  %p17688_p5 = scmp.lt.s32.totalorder %s17686_s15, %s17682_s8 }
 0x23b   :  { %p17689_p6 = por %p17688_p5, %p17687_p4 }
 0x23d   :  { %518 = dma.hbm_to_vmem [thread:$0]  %s20045_s21, 16, %s516_s7, [#allocation48]  }
 0x23e   :  { %p17690_p7 = pnand %p17689_p6, %p17683_p3 }
 0x240   :  { %17693 = shalt.err (!%p17690_p7)
}
 0x241   :  { %s20046_s17 = sld [smem:[#allocation128_spill]]  ;;  %s17971_s16 = smov [#allocation55]  }
 0x242   :  { %s559_s18 = sshll.u32 %s17971_s16, 4  ;;  %s17972_s19 = smov [#allocation58]   ;;  %s560_s18 = int_to_ptr.vmem [resolvable:$true] %s559_s18 }
 0x243   :  { %s583_s22 = sshll.u32 %s17972_s19, 4  ;;  %s17702_s30 = scalar_lea.vmem %s560_s18, 16  ;;  %s584_s22 = int_to_ptr.vmem [resolvable:$true] %s583_s22 }
 0x244   :  { %p17703_p8 = scmp.ne.s32.totalorder %s560_s18, %s17702_s30  ;;  %s17706_s3 = scalar_lea.vmem %s560_s18, 32 }
 0x245   :  { %p17707_p9 = scmp.lt.s32.totalorder %s560_s18, %s560_s18  ;;  %p17708_p10 = scmp.lt.s32.totalorder %s17706_s3, %s17702_s30 }
 0x247   :  { %538 = dma.hbm_to_vmem [thread:$0]  %s20046_s17, 16, %s536_s10, [#allocation51]  }
 0x248   :  { %p17709_p11 = por %p17708_p10, %p17707_p9 }
 0x24a   :  { %p17710_p12 = pnand %p17709_p11, %p17703_p8 }
 0x24c   :  { %17713 = shalt.err (!%p17710_p12)
}
 0x24d   :  { %s20047_s23 = sld [smem:[#allocation132_spill]]  ;;  %s17722_s14 = scalar_lea.vmem %s584_s22, 16 }
 0x24e   :  { %p17723_p13 = scmp.ne.s32.totalorder %s584_s22, %s17722_s14  ;;  %s17726_s26 = scalar_lea.vmem %s584_s22, 32 }
 0x24f   :  { %p17727_p0 = scmp.lt.s32.totalorder %s584_s22, %s584_s22  ;;  %p17728_p1 = scmp.lt.s32.totalorder %s17726_s26, %s17722_s14 }
 0x251   :  { %p17729_p2 = por %p17728_p1, %p17727_p0 }
 0x253   :  { %562 = dma.hbm_to_vmem [thread:$0]  %s20047_s23, 16, %s560_s18, [#allocation54]  }
 0x254   :  { %p17730_p3 = pnand %p17729_p2, %p17723_p13 }
 0x256   :  { %17733 = shalt.err (!%p17730_p3)
}
 0x257   :  { %s20048_s28 = sld [smem:[#allocation136_spill]]  ;;  %s17973_s1 = smov [#allocation61]  }
 0x258   :  { %s603_s2 = sshll.u32 %s17973_s1, 4  ;;  %s17974_s12 = smov [#allocation64]   ;;  %s604_s2 = int_to_ptr.vmem [resolvable:$true] %s603_s2 }
 0x259   :  { %s623_s25 = sshll.u32 %s17974_s12, 4  ;;  %s17742_s0 = scalar_lea.vmem %s604_s2, 16  ;;  %s624_s25 = int_to_ptr.vmem [resolvable:$true] %s623_s25 }
 0x25a   :  { %p17743_p4 = scmp.ne.s32.totalorder %s604_s2, %s17742_s0  ;;  %s17746_s6 = scalar_lea.vmem %s604_s2, 32 }
 0x25b   :  { %p17747_p5 = scmp.lt.s32.totalorder %s604_s2, %s604_s2  ;;  %p17748_p6 = scmp.lt.s32.totalorder %s17746_s6, %s17742_s0 }
 0x25d   :  { %586 = dma.hbm_to_vmem [thread:$0]  %s20048_s28, 16, %s584_s22, [#allocation57]  }
 0x25e   :  { %p17749_p7 = por %p17748_p6, %p17747_p5 }
 0x260   :  { %p17750_p8 = pnand %p17749_p7, %p17743_p4 }
 0x262   :  { %17753 = shalt.err (!%p17750_p8)
}
 0x263   :  { %s20049_s27 = sld [smem:[#allocation138_spill]]  ;;  %s17762_s9 = scalar_lea.vmem %s624_s25, 16 }
 0x264   :  { %p17763_p9 = scmp.ne.s32.totalorder %s624_s25, %s17762_s9  ;;  %s17766_s7 = scalar_lea.vmem %s624_s25, 32 }
 0x265   :  { %p17767_p10 = scmp.lt.s32.totalorder %s624_s25, %s624_s25  ;;  %p17768_p11 = scmp.lt.s32.totalorder %s17766_s7, %s17762_s9 }
 0x267   :  { %p17769_p12 = por %p17768_p11, %p17767_p10 }
 0x269   :  { %606 = dma.hbm_to_vmem [thread:$0]  %s20049_s27, 16, %s604_s2, [#allocation60]  }
 0x26a   :  { %p17770_p13 = pnand %p17769_p12, %p17763_p9 }
 0x26c   :  { %17773 = shalt.err (!%p17770_p13)
}
 0x26d   :  { %s20050_s29 = sld [smem:[#allocation140_spill]]  ;;  %s17975_s10 = smov [#allocation67]  }
 0x26e   :  { %s644_s24 = sshll.u32 %s17975_s10, 4  ;;  %s645_s24 = int_to_ptr.vmem [resolvable:$true] %s644_s24 }
 0x26f   :  { %s17782_s11 = scalar_lea.vmem %s645_s24, 512  ;;  %p17787_p1 = scmp.lt.s32.totalorder %s645_s24, %s645_s24 }
 0x270   :  { %p17783_p0 = scmp.ne.s32.totalorder %s645_s24, %s17782_s11  ;;  %p17788_p2 = scmp.lt.s32.totalorder %s17782_s11, %s17782_s11 }
 0x272   :  { %p17789_p3 = por %p17788_p2, %p17787_p1 }
 0x273   :  { %626 = dma.hbm_to_vmem [thread:$0]  %s20050_s29, 16, %s624_s25, [#allocation63]  }
 0x274   :  { %p17790_p4 = pnand %p17789_p3, %p17783_p0 }
 0x276   :  { %17793 = shalt.err (!%p17790_p4)
}
 0x277   :  { %s17976_s21 = smov 128   ;;  %s20051_s8 = sld [smem:[#allocation143_spill]] }
 0x278   :  { %s17977_s15 = smov 8   ;;  %s17978_s17 = smov [#allocation68]  }
 0x279   :  { %s657_s16 = sshll.u32 %s17978_s17, 4  ;;  %s658_s16 = int_to_ptr.vmem [resolvable:$true] %s657_s16 }
 0x27a   :  { %s17802_s18 = scalar_lea.vmem %s658_s16, 16  ;;  %s17806_s19 = scalar_lea.vmem %s658_s16, 32 }
 0x27b   :  { %p17803_p5 = scmp.ne.s32.totalorder %s658_s16, %s17802_s18  ;;  %p17807_p6 = scmp.lt.s32.totalorder %s658_s16, %s658_s16 }
 0x27c   :  { %p17808_p7 = scmp.lt.s32.totalorder %s17806_s19, %s17802_s18 }
 0x27d   :  { %650 = dma.hbm_to_vmem [thread:$0]  %s20051_s8, 512, %s645_s24, [#allocation66], %s17976_s21, %s17976_s21, %s17977_s15  }
 0x27e   :  { %p17809_p8 = por %p17808_p7, %p17807_p6 }
 0x280   :  { %p17810_p9 = pnand %p17809_p8, %p17803_p5 }
 0x282   :  { %17813 = shalt.err (!%p17810_p9)
}
 0x283   :  { %s20052_s22 = sld [smem:[#allocation144_spill]] }
 0x289   :  { %660 = dma.hbm_to_vmem [thread:$0]  %s20052_s22, 16, %s658_s16, [#allocation69]  }
 0x28a   :  { %17814 = dma.done.wait [#allocation4], 16  }
 0x28b   :  { %17815 = vsyncadd [#allocation4], 4294967280 }
 0x28c   :  { %17816 = dma.done.wait [#allocation6], 32  }
 0x28d   :  { %17817 = vsyncadd [#allocation6], 4294967264 }
 0x28e   :  { %17818 = dma.done.wait [#allocation9], 32  }
 0x28f   :  { %17819 = vsyncadd [#allocation9], 4294967264 }
 0x290   :  { %17820 = dma.done.wait [#allocation12], 32  }
 0x291   :  { %17821 = vsyncadd [#allocation12], 4294967264 }
 0x292   :  { %17822 = dma.done.wait [#allocation15], 32  }
 0x293   :  { %17823 = vsyncadd [#allocation15], 4294967264 }
 0x294   :  { %17824 = dma.done.wait [#allocation18], 32  }
 0x295   :  { %17825 = vsyncadd [#allocation18], 4294967264 }
 0x296   :  { %17826 = dma.done.wait [#allocation21], 32  }
 0x297   :  { %17827 = vsyncadd [#allocation21], 4294967264 }
 0x298   :  { %17828 = dma.done.wait [#allocation24], 32  }
 0x299   :  { %17829 = vsyncadd [#allocation24], 4294967264 }
 0x29a   :  { %17830 = dma.done.wait [#allocation27], 32  }
 0x29b   :  { %17831 = vsyncadd [#allocation27], 4294967264 }
 0x29c   :  { %17832 = dma.done.wait [#allocation30], 32  }
 0x29d   :  { %17833 = vsyncadd [#allocation30], 4294967264 }
 0x29e   :  { %17834 = dma.done.wait [#allocation33], 32  }
 0x29f   :  { %17835 = vsyncadd [#allocation33], 4294967264 }
 0x2a0   :  { %17836 = dma.done.wait [#allocation36], 32  }
 0x2a1   :  { %17837 = vsyncadd [#allocation36], 4294967264 }
 0x2a2   :  { %17838 = dma.done.wait [#allocation39], 32  }
 0x2a3   :  { %17839 = vsyncadd [#allocation39], 4294967264 }
 0x2a4   :  { %17840 = dma.done.wait [#allocation42], 32  }
 0x2a5   :  { %17841 = vsyncadd [#allocation42], 4294967264 }
 0x2a6   :  { %17842 = dma.done.wait [#allocation45], 32  }
 0x2a7   :  { %17843 = vsyncadd [#allocation45], 4294967264 }
 0x2a8   :  { %17844 = dma.done.wait [#allocation48], 32  }
 0x2a9   :  { %17845 = vsyncadd [#allocation48], 4294967264 }
 0x2aa   :  { %17846 = dma.done.wait [#allocation51], 32  }
 0x2ab   :  { %17847 = vsyncadd [#allocation51], 4294967264 }
 0x2ac   :  { %17848 = dma.done.wait [#allocation54], 32  }
 0x2ad   :  { %17849 = vsyncadd [#allocation54], 4294967264 }
 0x2ae   :  { %17850 = dma.done.wait [#allocation57], 32  }
 0x2af   :  { %17851 = vsyncadd [#allocation57], 4294967264 }
 0x2b0   :  { %17852 = dma.done.wait [#allocation60], 32  }
 0x2b1   :  { %17853 = vsyncadd [#allocation60], 4294967264 }
 0x2b2   :  { %17854 = dma.done.wait [#allocation63], 32  }
 0x2b3   :  { %17855 = vsyncadd [#allocation63], 4294967264 }
 0x2b4   :  { %17856 = dma.done.wait [#allocation66], 528  }
 0x2b5   :  { %17857 = vsyncadd [#allocation66], 4294966768 }
 0x2b6   :  { %17858 = dma.done.wait [#allocation69], 16  }
 0x2b7   :  { %17859 = vsyncadd [#allocation69], 4294967280  ;;  %s20053_s30 = sld [smem:[#allocation120_spill]]  ;;  %v17979_v0 = vmov 0   ;;  %v829_v1 = vlaneseq  ;;  %v835_v2 = vld [vmem:[%s18353_s4] sm:$0xff]  ;;  %v836_v5 = vld [vmem:[%s18353_s4 + $0x8] sm:$0xff] }
 0x2b8   :  { %16684 = vset.pattern.permute.xlu0 %v17979_v0  ;;  %16685 = vset.pattern.permute.xlu1 %v17979_v0  ;;  %s20054_s3 = sld [smem:[#allocation148_spill]]  ;;  %v824_v13 = vld [vmem:[%s18358_s5] sm:$0x3]  ;;  %v17980_v14 = vmov 0.0   ;;  %v17981_v19 = vmov -1e+30  }
 0x2b9   :  { %838 = vperm.xlu0 %16684, %v835_v2   ;;  %v18419_v7 = vshrl.u32 %v829_v1, 7  ;;  %v18421_v8 = vand.u32 127, %v829_v1  ;;  %vm827_vm2 = vcmp.eq.s32.totalorder %v824_v13, 3  ;;  %s20055_s5 = sld [smem:[#allocation131_spill]]  ;;  %v17982_v37 = vmov 1.0   ;;  %s17984_s23 = smov 96  }
 0x2ba   :  { %v828_v18 = vsel %vm827_vm2, -1e+30, %v17980_v14  ;;  %s20056_s4 = sld [smem:[#allocation146_spill]]  ;;  %vm941_vm5 = vcmask 261120   ;;  %vm17983_vm6 = vmmov 0   ;;  %vm1030_vm7 = vcmask 64512  }
 0x2bb   :  { %v2074_v10 = vsub.s32 1, %v18419_v7  ;;  %vm833_vm0 = vcmp.ge.s32.totalorder %v18419_v7, %v18421_v8  ;;  %v1108_v16 = vsub.s32 0, %v18419_v7  ;;  %v14825_v51 = vld [vmem:[#allocation53] ss:$0 sm:$0xff]  ;;  %s17985_s14 = smov 88   ;;  %s17986_s26 = smov 120  }
 0x2bc   :  { %v834_v20 = vsel %vm833_vm0, 0.0, %v17981_v19  ;;  %s17987_s28 = smov 112   ;;  %s17988_s1 = smov 64   ;;  %vm3127_vm8 = vcmask 523264  }
 0x2bd   :  { %v822_v3 = vld [vmem:[%s20053_s30 + $0x78] sm:$0xff]  ;;  %v821_v4 = vld [vmem:[%s20053_s30 + $0x70] sm:$0xff]  ;;  %v820_v6 = vld [vmem:[%s20053_s30 + $0x68] sm:$0xff]  ;;  %841 = vperm.xlu0 %16684, %v836_v5   ;;  %v5762_v22 = vrot.slane %v828_v18, %v1108_v16  ;;  %v6729_v23 = vrot.slane %v828_v18, %v2074_v10  ;;  %s17989_s2 = smov 80   ;;  %s17990_s12 = smov 56  }
 0x2be   :  { %15540 = vmatprep.subr.mxu0 %v822_v3  ;;  %v819_v9 = vld [vmem:[%s20053_s30 + $0x60] sm:$0xff]  ;;  %v818_v12 = vld [vmem:[%s20053_s30 + $0x58] sm:$0xff]  ;;  %v817_v17 = vld [vmem:[%s20053_s30 + $0x50] sm:$0xff]  ;;  %s17991_s25 = smov 72   ;;  %s17992_s0 = smov 104  }
 0x2bf   :  { %15541 = vmatpush3.msra.mxu0 %v822_v3  ;;  %v823_v11 = vld [vmem:[%s20054_s3] sm:$0x3]  ;;  %v816_v24 = vld [vmem:[%s20053_s30 + $0x48] sm:$0xff]  ;;  %v18442_v25 = vmin.f32 %v834_v20, %v5762_v22  ;;  %v18444_v26 = vmin.f32 %v834_v20, %v6729_v23  ;;  %v814_v28 = vld [vmem:[%s20053_s30 + $0x38] sm:$0xff]  ;;  %s20057_s6 = sld [smem:[#allocation130_spill]]  ;;  %s17993_s27 = smov 48  }
 0x2c0   :  { %15542 = vmatprep.subr.mxu0 %v821_v4  ;;  %vm825_vm1 = vcmp.eq.s32.totalorder %v823_v11, 3  ;;  %v815_v27 = vld [vmem:[%s20053_s30 + $0x40] sm:$0xff]  ;;  %v813_v29 = vld [vmem:[%s20053_s30 + $0x30] sm:$0xff]  ;;  %v812_v30 = vld [vmem:[%s20053_s30 + $0x28] sm:$0xff]  ;;  %s17994_s9 = smov 40   ;;  %s20058_s7 = sld [smem:[#allocation122_spill]] }
 0x2c1   :  { %15543 = vmatpush3.msra.mxu0 %v821_v4  ;;  %v18431_v15 = vsel %vm825_vm1, -1e+30, %v17980_v14  ;;  %v811_v31 = vld [vmem:[%s20053_s30 + $0x20] sm:$0xff]  ;;  %v810_v32 = vld [vmem:[%s20053_s30 + $0x18] sm:$0xff]  ;;  %v809_v33 = vld [vmem:[%s20053_s30 + $0x10] sm:$0xff]  ;;  %s20059_s29 = sld [smem:[#allocation123_spill]] }
 0x2c2   :  { %15544 = vmatprep.subr.mxu0 %v820_v6  ;;  %v18437_v21 = vrot.slane %v18431_v15, %v2074_v10  ;;  %v808_v34 = vld [vmem:[%s20053_s30 + $0x8] sm:$0xff]  ;;  %v807_v35 = vld [vmem:[%s20053_s30] sm:$0xff]  ;;  %v933_v39 = vld [vmem:[%s20055_s5 + $0x18] sm:$0xff]  ;;  %v18494_v57 = vrot.slane %v18431_v15, %v1108_v16  ;;  %s20060_s10 = sld [smem:[#allocation142_spill]] }
 0x2c3   :  { %15545 = vmatpush3.msra.mxu0 %v820_v6  ;;  %15575 = vmatprep.subr.mxu1 %v933_v39  ;;  %v932_v40 = vld [vmem:[%s20055_s5 + $0x10] sm:$0xff]  ;;  %v931_v41 = vld [vmem:[%s20055_s5 + $0x8] sm:$0xff]  ;;  %v930_v42 = vld [vmem:[%s20055_s5] sm:$0xff]  ;;  %s20061_s24 = sld [smem:[#allocation133_spill]] }
 0x2c4   :  { %15546 = vmatprep.subr.mxu0 %v819_v9  ;;  %15576 = vmatpush3.msra.mxu1 %v933_v39  ;;  %v926_v46 = vld [vmem:[%s20056_s4] sm:$0xff]  ;;  %v927_v47 = vld [vmem:[%s20056_s4 + $0x8] sm:$0xff]  ;;  %s20062_s11 = sld [smem:[#allocation135_spill]] }
 0x2c5   :  { %15547 = vmatpush3.msra.mxu0 %v819_v9  ;;  %15577 = vmatprep.subr.mxu1 %v932_v40  ;;  %s20064_s21 = sld [smem:[#allocation147_spill]] }
 0x2c6   :  { %15548 = vmatprep.subr.mxu0 %v818_v12  ;;  %15578 = vmatpush3.msra.mxu1 %v932_v40  ;;  %s20065_s8 = sld [smem:[#allocation105_spill]] }
 0x2c7   :  { %15549 = vmatpush3.msra.mxu0 %v818_v12  ;;  %15579 = vmatprep.subr.mxu1 %v931_v41  ;;  %s20066_s15 = sld [smem:[#allocation95_spill]] }
 0x2c8   :  { %15550 = vmatprep.subr.mxu0 %v817_v17  ;;  %15580 = vmatpush3.msra.mxu1 %v931_v41  ;;  %s20067_s17 = sld [smem:[#allocation97_spill]] }
 0x2c9   :  { %15551 = vmatpush3.msra.mxu0 %v817_v17  ;;  %15581 = vmatprep.subr.mxu1 %v930_v42  ;;  %s20068_s16 = sld [smem:[#allocation96_spill]] }
 0x2ca   :  { %15552 = vmatprep.subr.mxu0 %v816_v24  ;;  %15582 = vmatpush3.msra.mxu1 %v930_v42  ;;  %s20069_s18 = sld [smem:[#allocation98_spill]] }
 0x2cb   :  { %15553 = vmatpush3.msra.mxu0 %v816_v24  ;;  %15586 = vmatprep.subr.mxu1 %v17980_v14  ;;  %s20070_s19 = sld [smem:[#allocation100_spill]] }
 0x2cc   :  { %15554 = vmatprep.subr.mxu0 %v815_v27  ;;  %s20071_s22 = sld [smem:[#allocation119_spill]] }
 0x2cd   :  { %15555 = vmatpush3.msra.mxu0 %v815_v27  ;;  %s20073_s3 = sld [smem:[#allocation108_spill]] }
 0x2ce   :  { %15556 = vmatprep.subr.mxu0 %v814_v28  ;;  %s20074_s5 = sld [smem:[#allocation110_spill]] }
 0x2cf   :  { %15557 = vmatpush3.msra.mxu0 %v814_v28  ;;  %s20075_s4 = sld [smem:[#allocation109_spill]] }
 0x2d0   :  { %15558 = vmatprep.subr.mxu0 %v813_v29 }
 0x2d1   :  { %15559 = vmatpush3.msra.mxu0 %v813_v29 }
 0x2d2   :  { %15560 = vmatprep.subr.mxu0 %v812_v30 }
 0x2d3   :  { %15561 = vmatpush3.msra.mxu0 %v812_v30 }
 0x2d4   :  { %15562 = vmatprep.subr.mxu0 %v811_v31 }
 0x2d5   :  { %15563 = vmatpush3.msra.mxu0 %v811_v31 }
 0x2d6   :  { %15564 = vmatprep.subr.mxu0 %v810_v32 }
 0x2d7   :  { %15565 = vmatpush3.msra.mxu0 %v810_v32 }
 0x2d8   :  { %15566 = vmatprep.subr.mxu0 %v809_v33 }
 0x2d9   :  { %15567 = vmatpush3.msra.mxu0 %v809_v33 }
 0x2da   :  { %15568 = vmatprep.subr.mxu0 %v808_v34 }
 0x2db   :  { %15569 = vmatpush3.msra.mxu0 %v808_v34 }
 0x2dc   :  { %15570 = vmatprep.subr.mxu0 %v807_v35 }
 0x2dd   :  { %15571 = vmatpush3.msra.mxu0 %v807_v35 }
 0x2de   :  { %15616 = vmatprep.subr.mxu0 %v17980_v14 }
 0x334   :  { %v839_v36 = vpop.permute.xlu0 %838 }
 0x335   :  { %vm843_vm3 = vcmp.eq.s32.totalorder %v18421_v8, %v839_v36 }
 0x336   :  { %15572 = vmatprep.mubr.msk.f32.mxu0 %vm843_vm3, %v17982_v37 }
 0x338   :  { %v842_v38 = vpop.permute.xlu0 %841 }
 0x339   :  { %vm844_vm4 = vcmp.eq.s32.totalorder %v18421_v8, %v842_v38 }
 0x33a   :  { %15573 = vmatmul.mubr.msk.f32.vlgmr.msra.gmra.mxu0 %vm844_vm4, %v17982_v37 }
 0x33b   :  { %15618 = vmatprep.mubr.msk.f32.mxu0 %vm17983_vm6, %v17980_v14 }
 0x3fa   :  { %v15574_v43 = vpop.f32.mrf.mxu0 }
 0x3fb   :  { %v925_v44 = vmul.f32 5.656854, %v15574_v43 }
 0x3fc   :  { %v915_v45 = vpop.f32.mrf.mxu0 }
 0x3fd   :  { %v924_v48 = vmul.f32 5.656854, %v915_v45  ;;  %v18469_v50 = vadd.f32 %v927_v47, %v925_v44  ;;  %v18542_v44 = vld [vmem:[%s20057_s6 + $0x8] sm:$0xff] }
 0x3ff   :  { %v18467_v49 = vadd.f32 %v926_v46, %v924_v48  ;;  %v18549_v46 = vld [vmem:[%s20057_s6] sm:$0xff] }
 0x401   :  { %15583 = vmatprep.mubr.msk.f32.mxu1 %vm941_vm5, %v18467_v49 }
 0x402   :  { %15584 = vmatmul.mubr.msk.f32.vlgmr.msra.gmra.mxu1 %vm941_vm5, %v18469_v50 }
 0x403   :  { %15588 = vmatprep.mubr.msk.f32.mxu1 %vm17983_vm6, %v17980_v14 }
 0x4c2   :  { %v15585_v52 = vpop.f32.mrf.mxu1 }
 0x4c3   :  { %v18479_v53 = vadd.f32 %v15585_v52, %v14825_v51 }
 0x4c4   :  { %v1014_v54 = vpop.f32.mrf.mxu1 }
 0x4c5   :  { %v18481_v55 = vadd.f32 %v14825_v51, %v1014_v54 }
 0x4c7   :  { %1028 = vrot.lane.b32.xlu1 %v18481_v55, %s17984_s23 }
 0x539   :  { %v1029_v56 = vpop.permute.xlu1 %1028 }
 0x53a   :  { %15587 = vmatpush3.xpose.msk.msra.mxu1 %vm1030_vm7, %v1029_v56 }
 0x53b   :  { %15591 = vmatprep.subr.mxu1 %v17980_v14 }
 0x53d   :  { %15589 = vmatmul.mubr.msk.f32.vlgmr.msra.gmra.mxu1 %vm1030_vm7, %v18481_v55 }
 0x53e   :  { %15593 = vmatprep.mubr.msk.f32.mxu1 %vm17983_vm6, %v17980_v14 }
 0x5fd   :  { %v1101_v58 = vpop.f32.mrf.mxu1 }
 0x5fe   :  { %v1105_v59 = vmul.f32 0.35355338, %v1101_v58 }
 0x5ff   :  { %v15590_v60 = vpop.f32.mrf.mxu1 }
 0x600   :  { %v1110_v61 = vadd.f32 %v18494_v57, %v1105_v59  ;;  %v18569_v59 = vld [vmem:[%s20057_s6 + $0x10] sm:$0xff] }
 0x602   :  { %v1111_v62 = vsel %vm1030_vm7, %v1110_v61, -inf }
 0x603   :  { %1112 = vmax.xlane.f32.xlu1 %v1111_v62 }
 0x614   :  { %1200 = vrot.lane.b32.xlu1 %v18481_v55, %s17985_s14 }
 0x618   :  { %1198 = vrot.lane.b32.xlu1 %v18481_v55, %s17986_s26 }
 0x61c   :  { %1511 = vrot.lane.b32.xlu1 %v18481_v55, %s17987_s28 }
 0x68c   :  { %v1113_v63 = vpop.xlane.xlu1 %1112 }
 0x68d   :  { %v1114_v0 = vsub.f32 %v1110_v61, %v1113_v63 }
 0x68f   :  { %v1115_v1 = vmul.f32 1.442695, %v1114_v0 }
 0x690   :  { %v1201_v4 = vpop.permute.xlu1 %1200 }
 0x691   :  { %16686 = vpow2.f32 %v1115_v1 }
 0x694   :  { %v1199_v7 = vpop.permute.xlu1 %1198 }
 0x698   :  { %v1512_v10 = vpop.permute.xlu1 %1511 }
 0x69e   :  { %v16687_v2 = vpop.eup %16686 }
 0x69f   :  { %v1117_v3 = vsel %vm1030_vm7, %v16687_v2, 0.0 }
 0x6a0   :  { %1118 = vadd.xlane.f32.xlu0 %v1117_v3 }
 0x6b6   :  { %1122 = vrot.lane.b32.xlu0 %v18481_v55, %s17988_s1 }
 0x6ba   :  { %1513 = vrot.lane.b32.xlu0 %v18481_v55, %s17989_s2 }
 0x729   :  { %v1119_v5 = vpop.xlane.xlu0 %1118 }
 0x72a   :  { %16688 = vrcp.f32 %v1119_v5 }
 0x72d   :  { %v1123_v6 = vpop.permute.xlu0 %1122 }
 0x72e   :  { %15592 = vmatpush3.msra.mxu1 %v1123_v6 }
 0x72f   :  { %15596 = vmatprep.subr.mxu1 %v17980_v14 }
 0x731   :  { %v1514_v9 = vpop.permute.xlu0 %1513 }
 0x732   :  { %15617 = vmatpush3.xpose.msk.msra.mxu0 %vm1030_vm7, %v1514_v9 }
 0x733   :  { %15626 = vmatprep.subr.mxu0 %v17980_v14 }
 0x735   :  { %15619 = vmatmul.mubr.msk.f32.vlgmr.msra.gmra.mxu0 %vm1030_vm7, %v1512_v10 }
 0x736   :  { %15628 = vmatprep.mubr.msk.f32.mxu0 %vm17983_vm6, %v17980_v14  ;;  %15627 = vmatpush3.msra.mxu0 %v18569_v59 }
 0x737   :  { %v16689_v11 = vpop.eup %16688  ;;  %15636 = vmatprep.subr.mxu0 %v17980_v14 }
 0x738   :  { %v1121_v12 = vmul.f32 %v16689_v11, %v16687_v2 }
 0x73a   :  { %15594 = vmatmul.mubr.msk.f32.vlgmr.msra.gmra.mxu1 %vm1030_vm7, %v1121_v12 }
 0x73b   :  { %15597 = vmatpush3.xpose.msk.msra.mxu1 %vm1030_vm7, %v1201_v4  ;;  %15598 = vmatprep.mubr.msk.f32.mxu1 %vm17983_vm6, %v17980_v14 }
 0x73c   :  { %15601 = vmatprep.subr.mxu1 %v17980_v14 }
 0x73e   :  { %15599 = vmatmul.mubr.msk.f32.vlgmr.msra.gmra.mxu1 %vm1030_vm7, %v1199_v7 }
 0x73f   :  { %15603 = vmatprep.mubr.msk.f32.mxu1 %vm17983_vm6, %v17980_v14 }
 0x7f5   :  { %v1585_v13 = vpop.f32.mrf.mxu0 }
 0x7f6   :  { %v1589_v30 = vmul.f32 0.35355338, %v1585_v13 }
 0x7f7   :  { %v15620_v15 = vpop.f32.mrf.mxu0 }
 0x7f8   :  { %v1590_v33 = vadd.f32 %v1589_v30, %v18494_v57 }
 0x7fa   :  { %v1194_v16 = vpop.f32.mrf.mxu1  ;;  %v1591_v34 = vsel %vm1030_vm7, %v1590_v33, -inf }
 0x7fc   :  { %v15595_v17 = vpop.f32.mrf.mxu1 }
 0x7fe   :  { %v1272_v18 = vpop.f32.mrf.mxu1 }
 0x7ff   :  { %v1276_v19 = vmul.f32 0.35355338, %v1272_v18 }
 0x800   :  { %v15600_v20 = vpop.f32.mrf.mxu1 }
 0x801   :  { %v1277_v22 = vadd.f32 %v1276_v19, %v18494_v57 }
 0x803   :  { %v1278_v23 = vsel %vm1030_vm7, %v1277_v22, -inf }
 0x804   :  { %1279 = vmax.xlane.f32.xlu0 %v1278_v23 }
 0x81a   :  { %1289 = vrot.lane.b32.xlu0 %v18481_v55, %s17990_s12 }
 0x81e   :  { %1754 = vrot.lane.b32.xlu0 %v18481_v55, %s17991_s25 }
 0x822   :  { %1752 = vrot.lane.b32.xlu0 %v18481_v55, %s17992_s0 }
 0x88d   :  { %v1280_v24 = vpop.xlane.xlu0 %1279 }
 0x88e   :  { %v1281_v27 = vsub.f32 %v1277_v22, %v1280_v24 }
 0x890   :  { %v1282_v28 = vmul.f32 1.442695, %v1281_v27  ;;  %v18603_v27 = vld [vmem:[%s20057_s6 + $0x18] sm:$0xff] }
 0x891   :  { %v1290_v29 = vpop.permute.xlu0 %1289 }
 0x892   :  { %16690 = vpow2.f32 %v1282_v28  ;;  %15602 = vmatpush3.msra.mxu1 %v1290_v29 }
 0x893   :  { %15606 = vmatprep.subr.mxu1 %v17980_v14 }
 0x895   :  { %v1755_v54 = vpop.permute.xlu0 %1754 }
 0x899   :  { %v1753_v58 = vpop.permute.xlu0 %1752 }
 0x89f   :  { %v16691_v31 = vpop.eup %16690 }
 0x8a0   :  { %v1284_v32 = vsel %vm1030_vm7, %v16691_v31, 0.0 }
 0x8a1   :  { %1285 = vadd.xlane.f32.xlu1 %v1284_v32 }
 0x8a5   :  { %1592 = vmax.xlane.f32.xlu1 %v1591_v34 }
 0x92a   :  { %v1286_v35 = vpop.xlane.xlu1 %1285 }
 0x92b   :  { %16692 = vrcp.f32 %v1286_v35 }
 0x92e   :  { %v1593_v36 = vpop.xlane.xlu1 %1592 }
 0x92f   :  { %v1594_v38 = vsub.f32 %v1590_v33, %v1593_v36 }
 0x931   :  { %v1595_v39 = vmul.f32 1.442695, %v1594_v38 }
 0x933   :  { %16694 = vpow2.f32 %v1595_v39 }
 0x938   :  { %v16693_v40 = vpop.eup %16692 }
 0x939   :  { %v1288_v41 = vmul.f32 %v16693_v40, %v16691_v31 }
 0x93b   :  { %15604 = vmatmul.mubr.msk.f32.vlgmr.msra.gmra.mxu1 %vm1030_vm7, %v1288_v41 }
 0x93c   :  { %15608 = vmatprep.mubr.msk.f32.mxu1 %vm17983_vm6, %v17980_v14  ;;  %15607 = vmatpush3.msra.mxu1 %v18542_v44 }
 0x93d   :  { %15611 = vmatprep.subr.mxu1 %v17980_v14 }
 0x940   :  { %v16695_v42 = vpop.eup %16694 }
 0x941   :  { %v1597_v43 = vsel %vm1030_vm7, %v16695_v42, 0.0 }
 0x942   :  { %1598 = vadd.xlane.f32.xlu1 %v1597_v43 }
 0x953   :  { %1602 = vrot.lane.b32.xlu1 %v18481_v55, %s17993_s27 }
 0x957   :  { %1995 = vrot.lane.b32.xlu1 %v18479_v53, %s17984_s23 }
 0x9cb   :  { %v1599_v45 = vpop.xlane.xlu1 %1598 }
 0x9cc   :  { %16696 = vrcp.f32 %v1599_v45 }
 0x9cf   :  { %v1603_v52 = vpop.permute.xlu1 %1602 }
 0x9d3   :  { %v1996_v18 = vpop.permute.xlu1 %1995 }
 0x9d9   :  { %v16697_v51 = vpop.eup %16696 }
 0x9da   :  { %v1601_v56 = vmul.f32 %v16697_v51, %v16695_v42 }
 0x9fb   :  { %v1361_v47 = vpop.f32.mrf.mxu1 }
 0x9fc   :  { %15609 = vmatmul.mubr.msk.f32.vlgmr.msra.gmra.mxu1 %vm1030_vm7, %v1361_v47 }
 0x9fd   :  { %v15605_v48 = vpop.f32.mrf.mxu1  ;;  %15612 = vmatpush3.msra.mxu1 %v18549_v46  ;;  %15613 = vmatprep.mubr.msk.f32.mxu1 %vm17983_vm6, %v17980_v14 }
 0x9fe   :  { %15621 = vmatprep.subr.mxu1 %v17980_v14 }
 0xa00   :  { %15614 = vmatmul.mubr.msk.f32.vlgmr.msra.gmra.mxu1 %vm1030_vm7, %v1194_v16 }
 0xa01   :  { %15622 = vmatpush3.msra.mxu1 %v1603_v52  ;;  %15623 = vmatprep.mubr.msk.f32.mxu1 %vm17983_vm6, %v17980_v14 }
 0xa02   :  { %15631 = vmatprep.subr.mxu1 %v17980_v14 }
 0xa04   :  { %15624 = vmatmul.mubr.msk.f32.vlgmr.msra.gmra.mxu1 %vm1030_vm7, %v1601_v56 }
 0xa05   :  { %15632 = vmatpush3.xpose.msk.msra.mxu1 %vm1030_vm7, %v1755_v54  ;;  %15633 = vmatprep.mubr.msk.f32.mxu1 %vm17983_vm6, %v17980_v14 }
 0xa06   :  { %15641 = vmatprep.subr.mxu1 %v17980_v14 }
 0xa08   :  { %15634 = vmatmul.mubr.msk.f32.vlgmr.msra.gmra.mxu1 %vm1030_vm7, %v1753_v58 }
 0xa09   :  { %15643 = vmatprep.mubr.msk.f32.mxu1 %vm17983_vm6, %v17980_v14  ;;  %15642 = vmatpush3.msra.mxu1 %v18603_v27 }
 0xa0a   :  { %15651 = vmatprep.subr.mxu1 %v17980_v14 }
 0xabc   :  { %v1434_v60 = vpop.f32.mrf.mxu1 }
 0xabe   :  { %v15610_v61 = vpop.f32.mrf.mxu1 }
 0xac0   :  { %v1507_v62 = vpop.f32.mrf.mxu1 }
 0xac1   :  { %v1508_v63 = vadd.f32 %v1507_v62, %v1434_v60 }
 0xac2   :  { %v15615_v0 = vpop.f32.mrf.mxu1 }
 0xac4   :  { %v1674_v1 = vpop.f32.mrf.mxu1 }
 0xac5   :  { %15629 = vmatmul.mubr.msk.f32.vlgmr.msra.gmra.mxu0 %vm1030_vm7, %v1674_v1 }
 0xac6   :  { %v15625_v2 = vpop.f32.mrf.mxu1  ;;  %15638 = vmatprep.mubr.msk.f32.mxu0 %vm17983_vm6, %v17980_v14 }
 0xac8   :  { %v1826_v3 = vpop.f32.mrf.mxu1 }
 0xac9   :  { %v1830_v4 = vmul.f32 0.35355338, %v1826_v3 }
 0xaca   :  { %v15635_v5 = vpop.f32.mrf.mxu1 }
 0xacb   :  { %v1831_v6 = vadd.f32 %v1830_v4, %v18494_v57 }
 0xacd   :  { %v1832_v7 = vsel %vm1030_vm7, %v1831_v6, -inf }
 0xace   :  { %1833 = vmax.xlane.f32.xlu0 %v1832_v7 }
 0xae4   :  { %1843 = vrot.lane.b32.xlu0 %v18481_v55, %s17994_s9 }
 0xae8   :  { %2166 = vrot.lane.b32.xlu0 %v18479_v53, %s17985_s14 }
 0xb57   :  { %v1834_v9 = vpop.xlane.xlu0 %1833 }
 0xb58   :  { %v1835_v10 = vsub.f32 %v1831_v6, %v1834_v9 }
 0xb5a   :  { %v1836_v11 = vmul.f32 1.442695, %v1835_v10 }
 0xb5b   :  { %v1844_v12 = vpop.permute.xlu0 %1843 }
 0xb5c   :  { %16698 = vpow2.f32 %v1836_v11  ;;  %15637 = vmatpush3.msra.mxu0 %v1844_v12 }
 0xb5d   :  { %15646 = vmatprep.subr.mxu0 %v17980_v14 }
 0xb5f   :  { %v2167_v23 = vpop.permute.xlu0 %2166 }
 0xb69   :  { %v16699_v13 = vpop.eup %16698 }
 0xb6a   :  { %v1838_v15 = vsel %vm1030_vm7, %v16699_v13, 0.0 }
 0xb6b   :  { %1839 = vadd.xlane.f32.xlu1 %v1838_v15 }
 0xb7c   :  { %2164 = vrot.lane.b32.xlu1 %v18479_v53, %s17986_s26 }
 0xb85   :  { %v1747_v16 = vpop.f32.mrf.mxu0 }
 0xb86   :  { %v1751_v55 = vadd.f32 %v1747_v16, %v1508_v63 }
 0xb87   :  { %v15630_v17 = vpop.f32.mrf.mxu0 }
 0xbf4   :  { %v1840_v19 = vpop.xlane.xlu1 %1839 }
 0xbf5   :  { %16700 = vrcp.f32 %v1840_v19 }
 0xbf8   :  { %v2165_v24 = vpop.permute.xlu1 %2164 }
 0xc02   :  { %v16701_v20 = vpop.eup %16700 }
 0xc03   :  { %v1842_v22 = vmul.f32 %v16701_v20, %v16699_v13 }
 0xc05   :  { %15639 = vmatmul.mubr.msk.f32.vlgmr.msra.gmra.mxu0 %vm1030_vm7, %v1842_v22 }
 0xc06   :  { %15647 = vmatpush3.xpose.msk.msra.mxu0 %vm1030_vm7, %v1996_v18  ;;  %15648 = vmatprep.mubr.msk.f32.mxu0 %vm17983_vm6, %v17980_v14 }
 0xc07   :  { %15656 = vmatprep.subr.mxu0 %v17980_v14 }
 0xc09   :  { %15649 = vmatmul.mubr.msk.f32.vlgmr.msra.gmra.mxu0 %vm1030_vm7, %v18479_v53 }
 0xc0a   :  { %15657 = vmatpush3.xpose.msk.msra.mxu0 %vm1030_vm7, %v2167_v23  ;;  %15658 = vmatprep.mubr.msk.f32.mxu0 %vm17983_vm6, %v17980_v14 }
 0xc0b   :  { %15666 = vmatprep.subr.mxu0 %v17980_v14 }
 0xc0d   :  { %15659 = vmatmul.mubr.msk.f32.vlgmr.msra.gmra.mxu0 %vm1030_vm7, %v2165_v24 }
 0xc0e   :  { %15667 = vmatpush3.msra.mxu0 %v18542_v44  ;;  %15668 = vmatprep.mubr.msk.f32.mxu0 %vm17983_vm6, %v17980_v14 }
 0xc0f   :  { %15676 = vmatprep.subr.mxu0 %v17980_v14 }
 0xcc5   :  { %v1915_v28 = vpop.f32.mrf.mxu0 }
 0xcc6   :  { %15644 = vmatmul.mubr.msk.f32.vlgmr.msra.gmra.mxu1 %vm1030_vm7, %v1915_v28 }
 0xcc7   :  { %v15640_v29 = vpop.f32.mrf.mxu0  ;;  %15653 = vmatprep.mubr.msk.f32.mxu1 %vm17983_vm6, %v17980_v14 }
 0xcc9   :  { %v2067_v30 = vpop.f32.mrf.mxu0 }
 0xcca   :  { %v2071_v31 = vmul.f32 0.35355338, %v2067_v30 }
 0xccb   :  { %v15650_v32 = vpop.f32.mrf.mxu0 }
 0xccc   :  { %v2076_v33 = vadd.f32 %v18437_v21, %v2071_v31 }
 0xccd   :  { %v2238_v34 = vpop.f32.mrf.mxu0 }
 0xcce   :  { %v2242_v35 = vmul.f32 0.35355338, %v2238_v34  ;;  %v2077_v36 = vsel %vm1030_vm7, %v2076_v33, -inf }
 0xccf   :  { %2078 = vmax.xlane.f32.xlu0 %v2077_v36  ;;  %v15660_v38 = vpop.f32.mrf.mxu0 }
 0xcd0   :  { %v2243_v39 = vadd.f32 %v2242_v35, %v18437_v21 }
 0xcd2   :  { %v2244_v40 = vsel %vm1030_vm7, %v2243_v39, -inf }
 0xcd3   :  { %2245 = vmax.xlane.f32.xlu1 %v2244_v40 }
 0xce4   :  { %2088 = vrot.lane.b32.xlu1 %v18479_v53, %s17988_s1 }
 0xce8   :  { %2479 = vrot.lane.b32.xlu1 %v18479_v53, %s17989_s2 }
 0xcec   :  { %2477 = vrot.lane.b32.xlu1 %v18479_v53, %s17987_s28 }
 0xd58   :  { %v2079_v41 = vpop.xlane.xlu0 %2078 }
 0xd59   :  { %v2080_v42 = vsub.f32 %v2076_v33, %v2079_v41 }
 0xd5b   :  { %v2081_v43 = vmul.f32 1.442695, %v2080_v42 }
 0xd5c   :  { %v2246_v44 = vpop.xlane.xlu1 %2245 }
 0xd5d   :  { %16702 = vpow2.f32 %v2081_v43  ;;  %v2247_v45 = vsub.f32 %v2243_v39, %v2246_v44  ;;  %v14860_v39 = vld [vmem:[#allocation52] ss:$0 sm:$0xff] }
 0xd5f   :  { %v2248_v47 = vmul.f32 1.442695, %v2247_v45 }
 0xd60   :  { %v2089_v48 = vpop.permute.xlu1 %2088 }
 0xd61   :  { %16704 = vpow2.f32 %v2248_v47  ;;  %15652 = vmatpush3.msra.mxu1 %v2089_v48 }
 0xd62   :  { %15661 = vmatprep.subr.mxu1 %v17980_v14 }
 0xd64   :  { %v2480_v6 = vpop.permute.xlu1 %2479 }
 0xd6a   :  { %v16703_v51 = vpop.eup %16702 }
 0xd6b   :  { %v2083_v52 = vsel %vm1030_vm7, %v16703_v51, 0.0 }
 0xd6c   :  { %2084 = vadd.xlane.f32.xlu0 %v2083_v52 }
 0xd6e   :  { %v16705_v54 = vpop.eup %16704 }
 0xd6f   :  { %v2250_v56 = vsel %vm1030_vm7, %v16705_v54, 0.0 }
 0xd70   :  { %2251 = vadd.xlane.f32.xlu0 %v2250_v56 }
 0xd86   :  { %2255 = vrot.lane.b32.xlu0 %v18479_v53, %s17990_s12  ;;  %v1988_v58 = vpop.f32.mrf.mxu1 }
 0xd87   :  { %v1992_v60 = vadd.f32 %v1988_v58, %v1751_v55 }
 0xd88   :  { %v15645_v61 = vpop.f32.mrf.mxu1 }
 0xd89   :  { %1993 = vst.msk [vmem:[#allocation2] sm:$0xff] %vm941_vm5, %v1992_v60 }
 0xd90   :  { %v2960_v38 = vld [vmem:[#allocation2] sm:$0xff] }
 0xd91   :  { %v2969_v42 = vadd.f32 %v14860_v39, %v2960_v38  ;;  %v3116_v38 = vld [vmem:[%s20059_s29 + $0x20] sm:$0xff] }
 0xd93   :  { %v2971_v45 = vadd.f32 %v2969_v42, %v18467_v49 }
 0xd95   :  { %v2973_v47 = vsel %vm941_vm5, %v2971_v45, 0.0 }
 0xdf5   :  { %v2085_v62 = vpop.xlane.xlu0 %2084 }
 0xdf6   :  { %16706 = vrcp.f32 %v2085_v62 }
 0xdf9   :  { %v2252_v63 = vpop.xlane.xlu0 %2251 }
 0xdfa   :  { %16708 = vrcp.f32 %v2252_v63 }
 0xdfd   :  { %v2256_v2 = vpop.permute.xlu0 %2255 }
 0xe03   :  { %v16707_v0 = vpop.eup %16706 }
 0xe04   :  { %v2087_v1 = vmul.f32 %v16707_v0, %v16703_v51 }
 0xe06   :  { %15654 = vmatmul.mubr.msk.f32.vlgmr.msra.gmra.mxu1 %vm1030_vm7, %v2087_v1 }
 0xe07   :  { %v16709_v3 = vpop.eup %16708  ;;  %15662 = vmatpush3.msra.mxu1 %v2256_v2  ;;  %15663 = vmatprep.mubr.msk.f32.mxu1 %vm17983_vm6, %v17980_v14 }
 0xe08   :  { %v2254_v4 = vmul.f32 %v16709_v3, %v16705_v54  ;;  %15671 = vmatprep.subr.mxu1 %v17980_v14 }
 0xe0a   :  { %15664 = vmatmul.mubr.msk.f32.vlgmr.msra.gmra.mxu1 %vm1030_vm7, %v2254_v4 }
 0xe0b   :  { %15672 = vmatpush3.msra.mxu1 %v18549_v46  ;;  %15673 = vmatprep.mubr.msk.f32.mxu1 %vm17983_vm6, %v17980_v14  ;;  %v2478_v46 = vpop.permute.xlu1 %2477 }
 0xe0c   :  { %15681 = vmatprep.subr.mxu1 %v17980_v14 }
 0xec6   :  { %v2160_v5 = vpop.f32.mrf.mxu1 }
 0xec7   :  { %15674 = vmatmul.mubr.msk.f32.vlgmr.msra.gmra.mxu1 %vm1030_vm7, %v2160_v5 }
 0xec8   :  { %v15655_v7 = vpop.f32.mrf.mxu1  ;;  %15683 = vmatprep.mubr.msk.f32.mxu1 %vm17983_vm6, %v17980_v14 }
 0xeca   :  { %v2327_v9 = vpop.f32.mrf.mxu1 }
 0xecb   :  { %15669 = vmatmul.mubr.msk.f32.vlgmr.msra.gmra.mxu0 %vm1030_vm7, %v2327_v9 }
 0xecc   :  { %15677 = vmatpush3.xpose.msk.msra.mxu0 %vm1030_vm7, %v2480_v6  ;;  %v15665_v10 = vpop.f32.mrf.mxu1  ;;  %15678 = vmatprep.mubr.msk.f32.mxu0 %vm17983_vm6, %v17980_v14 }
 0xecd   :  { %15686 = vmatprep.subr.mxu0 %v17980_v14 }
 0xecf   :  { %15679 = vmatmul.mubr.msk.f32.vlgmr.msra.gmra.mxu0 %vm1030_vm7, %v2478_v46 }
 0xed0   :  { %15687 = vmatpush3.msra.mxu0 %v18569_v59  ;;  %15688 = vmatprep.mubr.msk.f32.mxu0 %vm17983_vm6, %v17980_v14 }
 0xed1   :  { %15696 = vmatprep.subr.mxu0 %v17980_v14 }
 0xf87   :  { %v2473_v11 = vpop.f32.mrf.mxu1 }
 0xf89   :  { %v15675_v12 = vpop.f32.mrf.mxu1 }
 0xf8b   :  { %v2400_v13 = vpop.f32.mrf.mxu0 }
 0xf8c   :  { %v2474_v15 = vadd.f32 %v2473_v11, %v2400_v13 }
 0xf8d   :  { %v15670_v16 = vpop.f32.mrf.mxu0 }
 0xf8f   :  { %v2551_v55 = vpop.f32.mrf.mxu0 }
 0xf90   :  { %v2555_v17 = vmul.f32 0.35355338, %v2551_v55 }
 0xf91   :  { %v15680_v18 = vpop.f32.mrf.mxu0 }
 0xf92   :  { %v2556_v19 = vadd.f32 %v2555_v17, %v18437_v21 }
 0xf94   :  { %v2557_v20 = vsel %vm1030_vm7, %v2556_v19, -inf }
 0xf95   :  { %2558 = vmax.xlane.f32.xlu0 %v2557_v20 }
 0xfab   :  { %2568 = vrot.lane.b32.xlu0 %v18479_v53, %s17993_s27 }
 0xfaf   :  { %2718 = vrot.lane.b32.xlu0 %v18479_v53, %s17992_s0 }
0x101e   :  { %v2559_v59 = vpop.xlane.xlu0 %2558 }
0x101f   :  { %v2560_v22 = vsub.f32 %v2556_v19, %v2559_v59 }
0x1021   :  { %v2561_v23 = vmul.f32 1.442695, %v2560_v22  ;;  %v14861_v22 = vld [vmem:[#allocation47] ss:$0 sm:$0xff] }
0x1022   :  { %v2569_v24 = vpop.permute.xlu0 %2568 }
0x1023   :  { %16710 = vpow2.f32 %v2561_v23  ;;  %15682 = vmatpush3.msra.mxu1 %v2569_v24  ;;  %v3021_v23 = vld [vmem:[%s20058_s7 + $0x18] sm:$0xff]  ;;  %v3020_v24 = vld [vmem:[%s20058_s7 + $0x10] sm:$0xff] }
0x1024   :  { %15691 = vmatprep.subr.mxu1 %v17980_v14 }
0x1026   :  { %v2719_v34 = vpop.permute.xlu0 %2718 }
0x1030   :  { %v16711_v28 = vpop.eup %16710 }
0x1031   :  { %v2563_v29 = vsel %vm1030_vm7, %v16711_v28, 0.0 }
0x1032   :  { %2564 = vadd.xlane.f32.xlu1 %v2563_v29  ;;  %v14862_v29 = vld [vmem:[#allocation46] ss:$0 sm:$0xff] }
0x1043   :  { %2720 = vrot.lane.b32.xlu1 %v18479_v53, %s17991_s25 }
0x10bb   :  { %v2565_v30 = vpop.xlane.xlu1 %2564 }
0x10bc   :  { %16712 = vrcp.f32 %v2565_v30  ;;  %v3019_v30 = vld [vmem:[%s20058_s7 + $0x8] sm:$0xff] }
0x10bf   :  { %v2721_v33 = vpop.permute.xlu1 %2720 }
0x10c9   :  { %v16713_v31 = vpop.eup %16712 }
0x10ca   :  { %v2567_v32 = vmul.f32 %v16713_v31, %v16711_v28 }
0x10cc   :  { %15684 = vmatmul.mubr.msk.f32.vlgmr.msra.gmra.mxu1 %vm1030_vm7, %v2567_v32  ;;  %v3018_v32 = vld [vmem:[%s20058_s7] sm:$0xff] }
0x10cd   :  { %15692 = vmatpush3.xpose.msk.msra.mxu1 %vm1030_vm7, %v2721_v33  ;;  %15693 = vmatprep.mubr.msk.f32.mxu1 %vm17983_vm6, %v17980_v14 }
0x10ce   :  { %15701 = vmatprep.subr.mxu1 %v17980_v14 }
0x10d0   :  { %15694 = vmatmul.mubr.msk.f32.vlgmr.msra.gmra.mxu1 %vm1030_vm7, %v2719_v34  ;;  %v3119_v34 = vld [vmem:[%s20059_s29 + $0x38] sm:$0xff] }
0x10d1   :  { %15702 = vmatpush3.msra.mxu1 %v18603_v27  ;;  %15703 = vmatprep.mubr.msk.f32.mxu1 %vm17983_vm6, %v17980_v14 }
0x10d2   :  { %15717 = vmatprep.subr.mxu1 %v3119_v34 }
0x118c   :  { %v2640_v35 = vpop.f32.mrf.mxu1 }
0x118d   :  { %15689 = vmatmul.mubr.msk.f32.vlgmr.msra.gmra.mxu0 %vm1030_vm7, %v2640_v35  ;;  %v3118_v35 = vld [vmem:[%s20059_s29 + $0x30] sm:$0xff] }
0x118e   :  { %v15685_v36 = vpop.f32.mrf.mxu1  ;;  %15698 = vmatprep.mubr.msk.f32.mxu0 %vm17983_vm6, %v17980_v14 }
0x118f   :  { %v3117_v36 = vld [vmem:[%s20059_s29 + $0x28] sm:$0xff] }
0x1190   :  { %v2792_v40 = vpop.f32.mrf.mxu1 }
0x1191   :  { %v2796_v41 = vmul.f32 0.35355338, %v2792_v40 }
0x1192   :  { %v15695_v43 = vpop.f32.mrf.mxu1 }
0x1193   :  { %v2797_v44 = vadd.f32 %v2796_v41, %v18437_v21 }
0x1195   :  { %v2798_v27 = vsel %vm1030_vm7, %v2797_v44, -inf }
0x1196   :  { %2799 = vmax.xlane.f32.xlu1 %v2798_v27 }
0x119a   :  { %2974 = vadd.xlane.f32.xlu1 %v2973_v47  ;;  %v3114_v47 = vld [vmem:[%s20059_s29 + $0x10] sm:$0xff] }
0x121f   :  { %v2800_v48 = vpop.xlane.xlu1 %2799 }
0x1220   :  { %v2801_v51 = vsub.f32 %v2797_v44, %v2800_v48  ;;  %v3113_v48 = vld [vmem:[%s20059_s29 + $0x8] sm:$0xff] }
0x1222   :  { %v2802_v52 = vmul.f32 1.442695, %v2801_v51  ;;  %v3112_v51 = vld [vmem:[%s20059_s29] sm:$0xff] }
0x1224   :  { %16714 = vpow2.f32 %v2802_v52  ;;  %v14863_v52 = vld [vmem:[#allocation43] ss:$0 sm:$0xff] }
0x1231   :  { %v16715_v54 = vpop.eup %16714 }
0x1232   :  { %v2804_v56 = vsel %vm1030_vm7, %v16715_v54, 0.0 }
0x1233   :  { %2805 = vadd.xlane.f32.xlu0 %v2804_v56 }
0x1249   :  { %2809 = vrot.lane.b32.xlu0 %v18479_v53, %s17994_s9  ;;  %v2975_v53 = vpop.xlane.xlu1 %2974 }
0x124a   :  { %v2980_v6 = vmul.f32 0.03125, %v2975_v53 }
0x124c   :  { %v2982_v9 = vsub.f32 %v2971_v45, %v2980_v6  ;;  %v3115_v45 = vld [vmem:[%s20059_s29 + $0x18] sm:$0xff] }
0x124d   :  { %v2713_v58 = vpop.f32.mrf.mxu0 }
0x124e   :  { %v2717_v60 = vadd.f32 %v2713_v58, %v2474_v15  ;;  %v2984_v12 = vmul.f32 %v2982_v9, %v2982_v9 }
0x124f   :  { %v15690_v61 = vpop.f32.mrf.mxu0 }
0x1250   :  { %v2986_v13 = vsel %vm941_vm5, %v2984_v12, 0.0 }
0x12bc   :  { %v2806_v62 = vpop.xlane.xlu0 %2805 }
0x12bd   :  { %16716 = vrcp.f32 %v2806_v62 }
0x12c0   :  { %v2810_v49 = vpop.permute.xlu0 %2809 }
0x12c1   :  { %15697 = vmatpush3.msra.mxu0 %v2810_v49 }
0x12c2   :  { %15706 = vmatprep.subr.mxu0 %v3021_v23 }
0x12ca   :  { %v16717_v63 = vpop.eup %16716 }
0x12cb   :  { %v2808_v0 = vmul.f32 %v16717_v63, %v16715_v54  ;;  %v14866_v63 = vld [vmem:[#allocation44] ss:$0 sm:$0xff] }
0x12cd   :  { %15699 = vmatmul.mubr.msk.f32.vlgmr.msra.gmra.mxu0 %vm1030_vm7, %v2808_v0 }
0x12ce   :  { %15707 = vmatpush3.msra.mxu0 %v3021_v23 }
0x12cf   :  { %15708 = vmatprep.subr.mxu0 %v3020_v24 }
0x12d0   :  { %15709 = vmatpush3.msra.mxu0 %v3020_v24 }
0x12d1   :  { %15710 = vmatprep.subr.mxu0 %v3019_v30 }
0x12d2   :  { %15711 = vmatpush3.msra.mxu0 %v3019_v30 }
0x12d3   :  { %15712 = vmatprep.subr.mxu0 %v3018_v32 }
0x12d4   :  { %15713 = vmatpush3.msra.mxu0 %v3018_v32 }
0x138d   :  { %v2881_v1 = vpop.f32.mrf.mxu0 }
0x138e   :  { %15704 = vmatmul.mubr.msk.f32.vlgmr.msra.gmra.mxu1 %vm1030_vm7, %v2881_v1 }
0x138f   :  { %v15700_v2 = vpop.f32.mrf.mxu0  ;;  %15718 = vmatpush3.msra.mxu1 %v3119_v34 }
0x1390   :  { %15719 = vmatprep.subr.mxu1 %v3118_v35 }
0x1391   :  { %15720 = vmatpush3.msra.mxu1 %v3118_v35 }
0x1392   :  { %15721 = vmatprep.subr.mxu1 %v3117_v36 }
0x1393   :  { %15722 = vmatpush3.msra.mxu1 %v3117_v36 }
0x1394   :  { %15723 = vmatprep.subr.mxu1 %v3116_v38 }
0x1395   :  { %15724 = vmatpush3.msra.mxu1 %v3116_v38 }
0x1396   :  { %15725 = vmatprep.subr.mxu1 %v3115_v45 }
0x1397   :  { %15726 = vmatpush3.msra.mxu1 %v3115_v45 }
0x1398   :  { %15727 = vmatprep.subr.mxu1 %v3114_v47 }
0x1399   :  { %15728 = vmatpush3.msra.mxu1 %v3114_v47 }
0x139a   :  { %15729 = vmatprep.subr.mxu1 %v3113_v48 }
0x139b   :  { %15730 = vmatpush3.msra.mxu1 %v3113_v48 }
0x139c   :  { %15731 = vmatprep.subr.mxu1 %v3112_v51 }
0x139d   :  { %15732 = vmatpush3.msra.mxu1 %v3112_v51 }
0x139e   :  { %15752 = vmatprep.subr.mxu1 %v17980_v14 }
0x144e   :  { %v2954_v3 = vpop.f32.mrf.mxu1 }
0x144f   :  { %v2958_v4 = vadd.f32 %v2954_v3, %v2717_v60 }
0x1450   :  { %v15705_v5 = vpop.f32.mrf.mxu1 }
0x1451   :  { %2959 = vst.msk [vmem:[#allocation2 + $0x8] sm:$0xff] %vm941_vm5, %v2958_v4 }
0x1458   :  { %v2961_v7 = vld [vmem:[#allocation2 + $0x8] sm:$0xff] }
0x1459   :  { %v2970_v10 = vadd.f32 %v14860_v39, %v2961_v7 }
0x145b   :  { %v2972_v46 = vadd.f32 %v2970_v10, %v18469_v50 }
0x145d   :  { %v2976_v11 = vsel %vm941_vm5, %v2972_v46, 0.0 }
0x145e   :  { %2977 = vadd.xlane.f32.xlu1 %v2976_v11 }
0x1462   :  { %2987 = vadd.xlane.f32.xlu1 %v2986_v13 }
0x14e7   :  { %v2978_v15 = vpop.xlane.xlu1 %2977 }
0x14e8   :  { %v2981_v16 = vmul.f32 0.03125, %v2978_v15 }
0x14ea   :  { %v2983_v55 = vsub.f32 %v2972_v46, %v2981_v16 }
0x14eb   :  { %v2988_v17 = vpop.xlane.xlu1 %2987 }
0x14ec   :  { %v2992_v18 = vmul.f32 0.03125, %v2988_v17  ;;  %v2985_v19 = vmul.f32 %v2983_v55, %v2983_v55  ;;  %v3257_v17 = vld [vmem:[#allocation67 + $0x10] sm:$0xff] }
0x14ee   :  { %v2994_v20 = vadd.f32 1e-05, %v2992_v18  ;;  %v2989_v50 = vsel %vm941_vm5, %v2985_v19, 0.0  ;;  %v3256_v18 = vld [vmem:[#allocation67 + $0x8] sm:$0xff]  ;;  %v3255_v19 = vld [vmem:[#allocation67] sm:$0xff] }
0x14ef   :  { %2990 = vadd.xlane.f32.xlu1 %v2989_v50 }
0x14f0   :  { %16718 = vrsqrt.f32 %v2994_v20 }
0x14fd   :  { %v16719_v59 = vpop.eup %16718 }
0x14fe   :  { %v2998_v28 = vmul.f32 %v16719_v59, %v2982_v9 }
0x1500   :  { %v3007_v31 = vmul.f32 %v14861_v22, %v2998_v28 }
0x1502   :  { %v3016_v33 = vadd.f32 %v14862_v29, %v3007_v31  ;;  %v14870_v31 = vld [vmem:[#allocation49] ss:$0 sm:$0xff] }
0x1504   :  { %15714 = vmatprep.mubr.msk.f32.mxu0 %vm941_vm5, %v3016_v33 }
0x1578   :  { %v2991_v39 = vpop.xlane.xlu1 %2990 }
0x1579   :  { %v2993_v40 = vmul.f32 0.03125, %v2991_v39  ;;  %v14871_v39 = vld [vmem:[#allocation65] ss:$0 sm:$0xff] }
0x157b   :  { %v2995_v41 = vadd.f32 1e-05, %v2993_v40 }
0x157d   :  { %16720 = vrsqrt.f32 %v2995_v41 }
0x158a   :  { %v16721_v42 = vpop.eup %16720 }
0x158b   :  { %v2999_v43 = vmul.f32 %v16721_v42, %v2983_v55  ;;  %v3258_v55 = vld [vmem:[#allocation67 + $0x18] sm:$0xff] }
0x158c   :  { %15736 = vmatprep.subr.mxu0 %v3258_v55 }
0x158d   :  { %v3008_v44 = vmul.f32 %v14861_v22, %v2999_v43 }
0x158f   :  { %v3017_v27 = vadd.f32 %v14862_v29, %v3008_v44  ;;  %v14869_v29 = vld [vmem:[#allocation50] ss:$0 sm:$0xff] }
0x1591   :  { %15715 = vmatmul.mubr.msk.f32.vlgmr.msra.gmra.mxu0 %vm941_vm5, %v3017_v27 }
0x1592   :  { %15737 = vmatpush3.msra.mxu0 %v3258_v55  ;;  %v18766_v55 = vld [vmem:[%s20060_s10 + $0x8] sm:$0xff] }
0x1593   :  { %15738 = vmatprep.subr.mxu0 %v3257_v17 }
0x1594   :  { %15739 = vmatpush3.msra.mxu0 %v3257_v17 }
0x1595   :  { %15740 = vmatprep.subr.mxu0 %v3256_v18 }
0x1596   :  { %15741 = vmatpush3.msra.mxu0 %v3256_v18 }
0x1597   :  { %15742 = vmatprep.subr.mxu0 %v3255_v19 }
0x1598   :  { %15743 = vmatpush3.msra.mxu0 %v3255_v19 }
0x1599   :  { %15747 = vmatprep.subr.mxu0 %v17980_v14 }
0x1651   :  { %v15716_v54 = vpop.f32.mrf.mxu0 }
0x1652   :  { %v3107_v56 = vadd.f32 %v15716_v54, %v14863_v52 }
0x1653   :  { %v3101_v58 = vpop.f32.mrf.mxu0 }
0x1654   :  { %v3102_v60 = vadd.f32 %v14863_v52, %v3101_v58  ;;  %v3111_v62 = vmax.f32 %v3107_v56, 0.0 }
0x1656   :  { %v3110_v61 = vmax.f32 %v3102_v60, 0.0 }
0x1658   :  { %15733 = vmatprep.mubr.msk.f32.mxu1 %vm3127_vm8, %v3110_v61 }
0x1659   :  { %15734 = vmatmul.mubr.msk.f32.vlgmr.msra.gmra.mxu1 %vm3127_vm8, %v3111_v62 }
0x165a   :  { %15754 = vmatprep.mubr.msk.f32.mxu1 %vm17983_vm6, %v17980_v14 }
0x1719   :  { %v15735_v49 = vpop.f32.mrf.mxu1 }
0x171a   :  { %v3206_v1 = vadd.f32 %v15735_v49, %v14866_v63 }
0x171b   :  { %v3200_v0 = vpop.f32.mrf.mxu1 }
0x171c   :  { %v3201_v2 = vadd.f32 %v14866_v63, %v3200_v0  ;;  %v3210_v5 = vadd.f32 %v3206_v1, %v3017_v27 }
0x171e   :  { %v3209_v3 = vadd.f32 %v3201_v2, %v3016_v33  ;;  %v3214_v53 = vsel %vm941_vm5, %v3210_v5, 0.0 }
0x1720   :  { %v3211_v4 = vsel %vm941_vm5, %v3209_v3, 0.0 }
0x1721   :  { %3212 = vadd.xlane.f32.xlu1 %v3211_v4 }
0x1725   :  { %3215 = vadd.xlane.f32.xlu1 %v3214_v53 }
0x17aa   :  { %v3213_v6 = vpop.xlane.xlu1 %3212 }
0x17ab   :  { %v3217_v7 = vmul.f32 0.03125, %v3213_v6 }
0x17ad   :  { %v3219_v9 = vsub.f32 %v3209_v3, %v3217_v7 }
0x17ae   :  { %v3216_v10 = vpop.xlane.xlu1 %3215 }
0x17af   :  { %v3218_v46 = vmul.f32 0.03125, %v3216_v10  ;;  %v3221_v11 = vmul.f32 %v3219_v9, %v3219_v9 }
0x17b1   :  { %v3220_v12 = vsub.f32 %v3210_v5, %v3218_v46  ;;  %v3223_v13 = vsel %vm941_vm5, %v3221_v11, 0.0 }
0x17b2   :  { %3224 = vadd.xlane.f32.xlu0 %v3223_v13 }
0x17b3   :  { %v3222_v15 = vmul.f32 %v3220_v12, %v3220_v12 }
0x17b5   :  { %v3226_v16 = vsel %vm941_vm5, %v3222_v15, 0.0 }
0x17b6   :  { %3227 = vadd.xlane.f32.xlu1 %v3226_v16  ;;  %v18762_v16 = vld [vmem:[%s20060_s10] sm:$0xff] }
0x183b   :  { %v3225_v20 = vpop.xlane.xlu0 %3224 }
0x183c   :  { %v3229_v50 = vmul.f32 0.03125, %v3225_v20 }
0x183e   :  { %v3231_v59 = vadd.f32 1e-05, %v3229_v50 }
0x183f   :  { %v3228_v22 = vpop.xlane.xlu1 %3227 }
0x1840   :  { %16722 = vrsqrt.f32 %v3231_v59  ;;  %v3230_v23 = vmul.f32 0.03125, %v3228_v22 }
0x1842   :  { %v3232_v24 = vadd.f32 1e-05, %v3230_v23 }
0x1844   :  { %16724 = vrsqrt.f32 %v3232_v24 }
0x184d   :  { %v16723_v28 = vpop.eup %16722 }
0x184e   :  { %v3235_v30 = vmul.f32 %v16723_v28, %v3219_v9 }
0x1850   :  { %v3244_v32 = vmul.f32 %v14869_v29, %v3235_v30 }
0x1851   :  { %v16725_v33 = vpop.eup %16724 }
0x1852   :  { %v3236_v34 = vmul.f32 %v16725_v33, %v3220_v12  ;;  %v18708_v35 = vadd.f32 %v14870_v31, %v3244_v32 }
0x1854   :  { %v3245_v36 = vmul.f32 %v14869_v29, %v3236_v34  ;;  %15744 = vmatprep.mubr.msk.f32.mxu0 %vm941_vm5, %v18708_v35 }
0x1856   :  { %v18712_v38 = vadd.f32 %v14870_v31, %v3245_v36 }
0x1858   :  { %15745 = vmatmul.mubr.msk.f32.vlgmr.msra.gmra.mxu0 %vm941_vm5, %v18712_v38 }
0x1859   :  { %15749 = vmatprep.mubr.msk.f32.mxu0 %vm17983_vm6, %v17980_v14 }
0x1918   :  { %v15746_v40 = vpop.f32.mrf.mxu0 }
0x1919   :  { %v18718_v41 = vadd.f32 %v15746_v40, %v14871_v39 }
0x191a   :  { %v3338_v42 = vpop.f32.mrf.mxu0 }
0x191b   :  { %v18720_v43 = vadd.f32 %v14871_v39, %v3338_v42 }
0x191d   :  { %3352 = vrot.lane.b32.xlu1 %v18720_v43, %s17984_s23 }
0x1921   :  { %3519 = vrot.lane.b32.xlu1 %v18720_v43, %s17985_s14 }
0x1925   :  { %3517 = vrot.lane.b32.xlu1 %v18720_v43, %s17986_s26 }
0x198f   :  { %v3353_v44 = vpop.permute.xlu1 %3352 }
0x1990   :  { %15748 = vmatpush3.xpose.msk.msra.mxu0 %vm1030_vm7, %v3353_v44 }
0x1991   :  { %15757 = vmatprep.subr.mxu0 %v17980_v14 }
0x1993   :  { %15750 = vmatmul.mubr.msk.f32.vlgmr.msra.gmra.mxu0 %vm1030_vm7, %v18720_v43  ;;  %v3520_v27 = vpop.permute.xlu1 %3519 }
0x1994   :  { %15758 = vmatpush3.xpose.msk.msra.mxu0 %vm1030_vm7, %v3520_v27  ;;  %15759 = vmatprep.mubr.msk.f32.mxu0 %vm17983_vm6, %v17980_v14 }
0x1995   :  { %15767 = vmatprep.subr.mxu0 %v17980_v14 }
0x1997   :  { %v3518_v45 = vpop.permute.xlu1 %3517 }
0x1998   :  { %15760 = vmatmul.mubr.msk.f32.vlgmr.msra.gmra.mxu0 %vm1030_vm7, %v3518_v45 }
0x1999   :  { %15769 = vmatprep.mubr.msk.f32.mxu0 %vm17983_vm6, %v17980_v14  ;;  %15768 = vmatpush3.msra.mxu0 %v18766_v55 }
0x199a   :  { %15777 = vmatprep.subr.mxu0 %v17980_v14 }
0x1a53   :  { %v3424_v47 = vpop.f32.mrf.mxu0 }
0x1a54   :  { %v3428_v48 = vmul.f32 0.35355338, %v3424_v47 }
0x1a55   :  { %v15751_v51 = vpop.f32.mrf.mxu0 }
0x1a56   :  { %v3429_v52 = vadd.f32 %v3428_v48, %v18494_v57 }
0x1a58   :  { %v3591_v54 = vpop.f32.mrf.mxu0  ;;  %v3430_v56 = vsel %vm1030_vm7, %v3429_v52, -inf }
0x1a59   :  { %v3595_v58 = vmul.f32 0.35355338, %v3591_v54  ;;  %3431 = vmax.xlane.f32.xlu0 %v3430_v56  ;;  %v18801_v54 = vld [vmem:[%s20060_s10 + $0x10] sm:$0xff] }
0x1a5a   :  { %v15761_v60 = vpop.f32.mrf.mxu0 }
0x1a5b   :  { %v3596_v61 = vadd.f32 %v3595_v58, %v18494_v57 }
0x1a5d   :  { %v3597_v62 = vsel %vm1030_vm7, %v3596_v61, -inf }
0x1a5e   :  { %3598 = vmax.xlane.f32.xlu1 %v3597_v62 }
0x1a6f   :  { %3441 = vrot.lane.b32.xlu0 %v18720_v43, %s17988_s1  ;;  %3832 = vrot.lane.b32.xlu1 %v18720_v43, %s17989_s2 }
0x1ae2   :  { %v3432_v49 = vpop.xlane.xlu0 %3431 }
0x1ae3   :  { %v3433_v63 = vsub.f32 %v3429_v52, %v3432_v49 }
0x1ae5   :  { %v3434_v0 = vmul.f32 1.442695, %v3433_v63 }
0x1ae6   :  { %v3442_v1 = vpop.permute.xlu0 %3441 }
0x1ae7   :  { %16726 = vpow2.f32 %v3434_v0  ;;  %15753 = vmatpush3.msra.mxu1 %v3442_v1  ;;  %v3599_v2 = vpop.xlane.xlu1 %3598 }
0x1ae8   :  { %v3600_v3 = vsub.f32 %v3596_v61, %v3599_v2  ;;  %15762 = vmatprep.subr.mxu1 %v17980_v14 }
0x1aea   :  { %v3601_v4 = vmul.f32 1.442695, %v3600_v3 }
0x1aeb   :  { %v3833_v20 = vpop.permute.xlu1 %3832 }
0x1aec   :  { %16728 = vpow2.f32 %v3601_v4 }
0x1af4   :  { %v16727_v5 = vpop.eup %16726 }
0x1af5   :  { %v3436_v53 = vsel %vm1030_vm7, %v16727_v5, 0.0 }
0x1af6   :  { %3437 = vadd.xlane.f32.xlu0 %v3436_v53 }
0x1af9   :  { %v16729_v6 = vpop.eup %16728 }
0x1afa   :  { %v3603_v7 = vsel %vm1030_vm7, %v16729_v6, 0.0 }
0x1afb   :  { %3604 = vadd.xlane.f32.xlu0 %v3603_v7 }
0x1b11   :  { %3608 = vrot.lane.b32.xlu0 %v18720_v43, %s17990_s12 }
0x1b15   :  { %3830 = vrot.lane.b32.xlu0 %v18720_v43, %s17987_s28 }
0x1b7f   :  { %v3438_v9 = vpop.xlane.xlu0 %3437 }
0x1b80   :  { %16730 = vrcp.f32 %v3438_v9 }
0x1b84   :  { %v3605_v10 = vpop.xlane.xlu0 %3604 }
0x1b85   :  { %16732 = vrcp.f32 %v3605_v10 }
0x1b88   :  { %v3609_v12 = vpop.permute.xlu0 %3608 }
0x1b8c   :  { %v3831_v59 = vpop.permute.xlu0 %3830 }
0x1b8d   :  { %v16731_v46 = vpop.eup %16730 }
0x1b8e   :  { %v3440_v11 = vmul.f32 %v16731_v46, %v16727_v5 }
0x1b90   :  { %15755 = vmatmul.mubr.msk.f32.vlgmr.msra.gmra.mxu1 %vm1030_vm7, %v3440_v11 }
0x1b91   :  { %15763 = vmatpush3.msra.mxu1 %v3609_v12  ;;  %15764 = vmatprep.mubr.msk.f32.mxu1 %vm17983_vm6, %v17980_v14 }
0x1b92   :  { %v16733_v13 = vpop.eup %16732  ;;  %15772 = vmatprep.subr.mxu1 %v17980_v14 }
0x1b93   :  { %v3607_v15 = vmul.f32 %v16733_v13, %v16729_v6  ;;  %v18837_v13 = vld [vmem:[%s20060_s10 + $0x18] sm:$0xff] }
0x1b95   :  { %15765 = vmatmul.mubr.msk.f32.vlgmr.msra.gmra.mxu1 %vm1030_vm7, %v3607_v15 }
0x1b96   :  { %15774 = vmatprep.mubr.msk.f32.mxu1 %vm17983_vm6, %v17980_v14  ;;  %15773 = vmatpush3.msra.mxu1 %v18762_v16 }
0x1b97   :  { %15782 = vmatprep.subr.mxu1 %v17980_v14 }
0x1c50   :  { %v3513_v17 = vpop.f32.mrf.mxu1 }
0x1c51   :  { %15775 = vmatmul.mubr.msk.f32.vlgmr.msra.gmra.mxu1 %vm1030_vm7, %v3513_v17 }
0x1c52   :  { %v15756_v18 = vpop.f32.mrf.mxu1  ;;  %15784 = vmatprep.mubr.msk.f32.mxu1 %vm17983_vm6, %v17980_v14 }
0x1c55   :  { %v3680_v19 = vpop.f32.mrf.mxu1 }
0x1c56   :  { %15770 = vmatmul.mubr.msk.f32.vlgmr.msra.gmra.mxu0 %vm1030_vm7, %v3680_v19 }
0x1c57   :  { %15778 = vmatpush3.xpose.msk.msra.mxu0 %vm1030_vm7, %v3833_v20  ;;  %v15766_v50 = vpop.f32.mrf.mxu1  ;;  %15779 = vmatprep.mubr.msk.f32.mxu0 %vm17983_vm6, %v17980_v14 }
0x1c58   :  { %15787 = vmatprep.subr.mxu0 %v17980_v14 }
0x1c5a   :  { %15780 = vmatmul.mubr.msk.f32.vlgmr.msra.gmra.mxu0 %vm1030_vm7, %v3831_v59 }
0x1c5b   :  { %15789 = vmatprep.mubr.msk.f32.mxu0 %vm17983_vm6, %v17980_v14  ;;  %15788 = vmatpush3.msra.mxu0 %v18801_v54 }
0x1c5c   :  { %15797 = vmatprep.subr.mxu0 %v17980_v14 }
0x1d11   :  { %v3826_v22 = vpop.f32.mrf.mxu1 }
0x1d13   :  { %v15776_v23 = vpop.f32.mrf.mxu1 }
0x1d16   :  { %v3753_v24 = vpop.f32.mrf.mxu0 }
0x1d17   :  { %v3827_v28 = vadd.f32 %v3826_v22, %v3753_v24 }
0x1d18   :  { %v15771_v29 = vpop.f32.mrf.mxu0 }
0x1d1a   :  { %v3904_v30 = vpop.f32.mrf.mxu0 }
0x1d1b   :  { %v3908_v31 = vmul.f32 0.35355338, %v3904_v30 }
0x1d1c   :  { %v15781_v32 = vpop.f32.mrf.mxu0 }
0x1d1d   :  { %v3909_v33 = vadd.f32 %v3908_v31, %v18494_v57 }
0x1d1f   :  { %v3910_v34 = vsel %vm1030_vm7, %v3909_v33, -inf }
0x1d20   :  { %3911 = vmax.xlane.f32.xlu0 %v3910_v34 }
0x1d36   :  { %3921 = vrot.lane.b32.xlu0 %v18720_v43, %s17993_s27 }
0x1d3a   :  { %4071 = vrot.lane.b32.xlu0 %v18720_v43, %s17992_s0 }
0x1da9   :  { %v3912_v36 = vpop.xlane.xlu0 %3911 }
0x1daa   :  { %v3913_v39 = vsub.f32 %v3909_v33, %v3912_v36 }
0x1dac   :  { %v3914_v40 = vmul.f32 1.442695, %v3913_v39 }
0x1dad   :  { %v3922_v42 = vpop.permute.xlu0 %3921 }
0x1dae   :  { %16734 = vpow2.f32 %v3914_v40  ;;  %15783 = vmatpush3.msra.mxu1 %v3922_v42 }
0x1daf   :  { %15792 = vmatprep.subr.mxu1 %v17980_v14 }
0x1db1   :  { %v4072_v52 = vpop.permute.xlu0 %4071 }
0x1dbb   :  { %v16735_v44 = vpop.eup %16734 }
0x1dbc   :  { %v3916_v27 = vsel %vm1030_vm7, %v16735_v44, 0.0 }
0x1dbd   :  { %3917 = vadd.xlane.f32.xlu1 %v3916_v27 }
0x1dce   :  { %4073 = vrot.lane.b32.xlu1 %v18720_v43, %s17991_s25 }
0x1e46   :  { %v3918_v45 = vpop.xlane.xlu1 %3917 }
0x1e47   :  { %16736 = vrcp.f32 %v3918_v45 }
0x1e4a   :  { %v4074_v51 = vpop.permute.xlu1 %4073 }
0x1e54   :  { %v16737_v47 = vpop.eup %16736 }
0x1e55   :  { %v3920_v48 = vmul.f32 %v16737_v47, %v16735_v44 }
0x1e57   :  { %15785 = vmatmul.mubr.msk.f32.vlgmr.msra.gmra.mxu1 %vm1030_vm7, %v3920_v48 }
0x1e58   :  { %15793 = vmatpush3.xpose.msk.msra.mxu1 %vm1030_vm7, %v4074_v51  ;;  %15794 = vmatprep.mubr.msk.f32.mxu1 %vm17983_vm6, %v17980_v14 }
0x1e59   :  { %15802 = vmatprep.subr.mxu1 %v17980_v14 }
0x1e5b   :  { %15795 = vmatmul.mubr.msk.f32.vlgmr.msra.gmra.mxu1 %vm1030_vm7, %v4072_v52 }
0x1e5c   :  { %15804 = vmatprep.mubr.msk.f32.mxu1 %vm17983_vm6, %v17980_v14  ;;  %15803 = vmatpush3.msra.mxu1 %v18837_v13 }
0x1e5d   :  { %15812 = vmatprep.subr.mxu1 %v17980_v14 }
0x1f17   :  { %v3993_v56 = vpop.f32.mrf.mxu1 }
0x1f18   :  { %15790 = vmatmul.mubr.msk.f32.vlgmr.msra.gmra.mxu0 %vm1030_vm7, %v3993_v56 }
0x1f19   :  { %v15786_v58 = vpop.f32.mrf.mxu1  ;;  %15799 = vmatprep.mubr.msk.f32.mxu0 %vm17983_vm6, %v17980_v14 }
0x1f1b   :  { %v4145_v60 = vpop.f32.mrf.mxu1 }
0x1f1c   :  { %v4149_v61 = vmul.f32 0.35355338, %v4145_v60 }
0x1f1d   :  { %v15796_v62 = vpop.f32.mrf.mxu1 }
0x1f1e   :  { %v4150_v49 = vadd.f32 %v4149_v61, %v18494_v57 }
0x1f20   :  { %v4151_v63 = vsel %vm1030_vm7, %v4150_v49, -inf }
0x1f21   :  { %4152 = vmax.xlane.f32.xlu0 %v4151_v63 }
0x1f37   :  { %4162 = vrot.lane.b32.xlu0 %v18720_v43, %s17994_s9 }
0x1f3b   :  { %4481 = vrot.lane.b32.xlu0 %v18718_v41, %s17985_s14 }
0x1f3f   :  { %4479 = vrot.lane.b32.xlu0 %v18718_v41, %s17986_s26 }
0x1faa   :  { %v4153_v0 = vpop.xlane.xlu0 %4152 }
0x1fab   :  { %v4154_v1 = vsub.f32 %v4150_v49, %v4153_v0 }
0x1fad   :  { %v4155_v2 = vmul.f32 1.442695, %v4154_v1 }
0x1fae   :  { %v4163_v3 = vpop.permute.xlu0 %4162 }
0x1faf   :  { %16738 = vpow2.f32 %v4155_v2  ;;  %15798 = vmatpush3.msra.mxu0 %v4163_v3 }
0x1fb0   :  { %15807 = vmatprep.subr.mxu0 %v17980_v14 }
0x1fb2   :  { %v4482_v11 = vpop.permute.xlu0 %4481 }
0x1fb6   :  { %v4480_v12 = vpop.permute.xlu0 %4479 }
0x1fbc   :  { %v16739_v4 = vpop.eup %16738 }
0x1fbd   :  { %v4157_v5 = vsel %vm1030_vm7, %v16739_v4, 0.0 }
0x1fbe   :  { %4158 = vadd.xlane.f32.xlu1 %v4157_v5 }
0x1fcf   :  { %4314 = vrot.lane.b32.xlu1 %v18718_v41, %s17984_s23 }
0x1fd8   :  { %v4066_v43 = vpop.f32.mrf.mxu0 }
0x1fd9   :  { %v4070_v53 = vadd.f32 %v4066_v43, %v3827_v28 }
0x1fda   :  { %v15791_v6 = vpop.f32.mrf.mxu0 }
0x2047   :  { %v4159_v7 = vpop.xlane.xlu1 %4158 }
0x2048   :  { %16740 = vrcp.f32 %v4159_v7 }
0x204b   :  { %v4315_v46 = vpop.permute.xlu1 %4314 }
0x2055   :  { %v16741_v9 = vpop.eup %16740 }
0x2056   :  { %v4161_v10 = vmul.f32 %v16741_v9, %v16739_v4 }
0x2058   :  { %15800 = vmatmul.mubr.msk.f32.vlgmr.msra.gmra.mxu0 %vm1030_vm7, %v4161_v10 }
0x2059   :  { %15808 = vmatpush3.xpose.msk.msra.mxu0 %vm1030_vm7, %v4315_v46  ;;  %15809 = vmatprep.mubr.msk.f32.mxu0 %vm17983_vm6, %v17980_v14 }
0x205a   :  { %15817 = vmatprep.subr.mxu0 %v17980_v14 }
0x205c   :  { %15810 = vmatmul.mubr.msk.f32.vlgmr.msra.gmra.mxu0 %vm1030_vm7, %v18718_v41 }
0x205d   :  { %15818 = vmatpush3.xpose.msk.msra.mxu0 %vm1030_vm7, %v4482_v11  ;;  %15819 = vmatprep.mubr.msk.f32.mxu0 %vm17983_vm6, %v17980_v14 }
0x205e   :  { %15827 = vmatprep.subr.mxu0 %v17980_v14 }
0x2060   :  { %15820 = vmatmul.mubr.msk.f32.vlgmr.msra.gmra.mxu0 %vm1030_vm7, %v4480_v12 }
0x2061   :  { %15828 = vmatpush3.msra.mxu0 %v18766_v55  ;;  %15829 = vmatprep.mubr.msk.f32.mxu0 %vm17983_vm6, %v17980_v14 }
0x2062   :  { %15837 = vmatprep.subr.mxu0 %v17980_v14 }
0x2118   :  { %v4234_v15 = vpop.f32.mrf.mxu0 }
0x2119   :  { %15805 = vmatmul.mubr.msk.f32.vlgmr.msra.gmra.mxu1 %vm1030_vm7, %v4234_v15 }
0x211a   :  { %v15801_v17 = vpop.f32.mrf.mxu0  ;;  %15814 = vmatprep.mubr.msk.f32.mxu1 %vm17983_vm6, %v17980_v14 }
0x211c   :  { %v4386_v18 = vpop.f32.mrf.mxu0 }
0x211d   :  { %v4390_v55 = vmul.f32 0.35355338, %v4386_v18 }
0x211e   :  { %v15811_v19 = vpop.f32.mrf.mxu0 }
0x211f   :  { %v4391_v20 = vadd.f32 %v4390_v55, %v18437_v21 }
0x2120   :  { %v4553_v50 = vpop.f32.mrf.mxu0 }
0x2121   :  { %v4557_v59 = vmul.f32 0.35355338, %v4553_v50  ;;  %v4392_v22 = vsel %vm1030_vm7, %v4391_v20, -inf }
0x2122   :  { %4393 = vmax.xlane.f32.xlu0 %v4392_v22  ;;  %v15821_v23 = vpop.f32.mrf.mxu0 }
0x2123   :  { %v4558_v24 = vadd.f32 %v4557_v59, %v18437_v21 }
0x2125   :  { %v4559_v28 = vsel %vm1030_vm7, %v4558_v24, -inf }
0x2126   :  { %4560 = vmax.xlane.f32.xlu1 %v4559_v28 }
0x2137   :  { %4403 = vrot.lane.b32.xlu1 %v18718_v41, %s17988_s1 }
0x213b   :  { %4794 = vrot.lane.b32.xlu1 %v18718_v41, %s17989_s2 }
0x213f   :  { %4792 = vrot.lane.b32.xlu1 %v18718_v41, %s17987_s28 }
0x21ab   :  { %v4394_v29 = vpop.xlane.xlu0 %4393 }
0x21ac   :  { %v4395_v30 = vsub.f32 %v4391_v20, %v4394_v29 }
0x21ae   :  { %v4396_v31 = vmul.f32 1.442695, %v4395_v30 }
0x21af   :  { %v4561_v32 = vpop.xlane.xlu1 %4560 }
0x21b0   :  { %16742 = vpow2.f32 %v4396_v31  ;;  %v4562_v33 = vsub.f32 %v4558_v24, %v4561_v32  ;;  %v14906_v24 = vld [vmem:[#allocation64] ss:$0 sm:$0xff] }
0x21b2   :  { %v4563_v34 = vmul.f32 1.442695, %v4562_v33 }
0x21b3   :  { %v4404_v36 = vpop.permute.xlu1 %4403 }
0x21b4   :  { %16744 = vpow2.f32 %v4563_v34  ;;  %15813 = vmatpush3.msra.mxu1 %v4404_v36 }
0x21b5   :  { %15822 = vmatprep.subr.mxu1 %v17980_v14 }
0x21b7   :  { %v4795_v49 = vpop.permute.xlu1 %4794 }
0x21bd   :  { %v16743_v39 = vpop.eup %16742 }
0x21be   :  { %v4398_v40 = vsel %vm1030_vm7, %v16743_v39, 0.0 }
0x21bf   :  { %4399 = vadd.xlane.f32.xlu0 %v4398_v40 }
0x21c1   :  { %v16745_v42 = vpop.eup %16744 }
0x21c2   :  { %v4565_v44 = vsel %vm1030_vm7, %v16745_v42, 0.0 }
0x21c3   :  { %4566 = vadd.xlane.f32.xlu0 %v4565_v44 }
0x21d9   :  { %v4307_v27 = vpop.f32.mrf.mxu1  ;;  %4570 = vrot.lane.b32.xlu0 %v18718_v41, %s17990_s12 }
0x21da   :  { %v4311_v45 = vadd.f32 %v4307_v27, %v4070_v53  ;;  %v5569_v27 = vld [vmem:[%s18363_s20 + $0x8] sm:$0xff] }
0x21db   :  { %v15806_v47 = vpop.f32.mrf.mxu1 }
0x21dc   :  { %4312 = vst.msk [vmem:[#allocation2] sm:$0xff] %vm941_vm5, %v4311_v45 }
0x21e3   :  { %v5275_v23 = vld [vmem:[#allocation2] sm:$0xff] }
0x21e4   :  { %v5284_v30 = vadd.f32 %v14906_v24, %v5275_v23  ;;  %v5433_v23 = vld [vmem:[%s20062_s11 + $0x38] sm:$0xff] }
0x21e6   :  { %v5286_v33 = vadd.f32 %v5284_v30, %v18708_v35 }
0x21e8   :  { %v5288_v34 = vsel %vm941_vm5, %v5286_v33, 0.0 }
0x2248   :  { %v4400_v48 = vpop.xlane.xlu0 %4399 }
0x2249   :  { %16746 = vrcp.f32 %v4400_v48 }
0x224c   :  { %v4567_v51 = vpop.xlane.xlu0 %4566 }
0x224d   :  { %16748 = vrcp.f32 %v4567_v51 }
0x2250   :  { %v4571_v58 = vpop.permute.xlu0 %4570 }
0x2256   :  { %v16747_v52 = vpop.eup %16746 }
0x2257   :  { %v4402_v56 = vmul.f32 %v16747_v52, %v16743_v39 }
0x2259   :  { %15815 = vmatmul.mubr.msk.f32.vlgmr.msra.gmra.mxu1 %vm1030_vm7, %v4402_v56 }
0x225a   :  { %v16749_v60 = vpop.eup %16748  ;;  %15823 = vmatpush3.msra.mxu1 %v4571_v58  ;;  %15824 = vmatprep.mubr.msk.f32.mxu1 %vm17983_vm6, %v17980_v14 }
0x225b   :  { %v4569_v61 = vmul.f32 %v16749_v60, %v16745_v42  ;;  %15832 = vmatprep.subr.mxu1 %v17980_v14 }
0x225d   :  { %15825 = vmatmul.mubr.msk.f32.vlgmr.msra.gmra.mxu1 %vm1030_vm7, %v4569_v61 }
0x225e   :  { %15833 = vmatpush3.msra.mxu1 %v18762_v16  ;;  %15834 = vmatprep.mubr.msk.f32.mxu1 %vm17983_vm6, %v17980_v14  ;;  %v4793_v16 = vpop.permute.xlu1 %4792 }
0x225f   :  { %15842 = vmatprep.subr.mxu1 %v17980_v14 }
0x2319   :  { %v4475_v62 = vpop.f32.mrf.mxu1 }
0x231a   :  { %15835 = vmatmul.mubr.msk.f32.vlgmr.msra.gmra.mxu1 %vm1030_vm7, %v4475_v62 }
0x231b   :  { %v15816_v63 = vpop.f32.mrf.mxu1  ;;  %15844 = vmatprep.mubr.msk.f32.mxu1 %vm17983_vm6, %v17980_v14 }
0x231d   :  { %v4642_v0 = vpop.f32.mrf.mxu1 }
0x231e   :  { %15830 = vmatmul.mubr.msk.f32.vlgmr.msra.gmra.mxu0 %vm1030_vm7, %v4642_v0 }
0x231f   :  { %15838 = vmatpush3.xpose.msk.msra.mxu0 %vm1030_vm7, %v4795_v49  ;;  %v15826_v1 = vpop.f32.mrf.mxu1  ;;  %15839 = vmatprep.mubr.msk.f32.mxu0 %vm17983_vm6, %v17980_v14 }
0x2320   :  { %15847 = vmatprep.subr.mxu0 %v17980_v14 }
0x2322   :  { %15840 = vmatmul.mubr.msk.f32.vlgmr.msra.gmra.mxu0 %vm1030_vm7, %v4793_v16 }
0x2323   :  { %15848 = vmatpush3.msra.mxu0 %v18801_v54  ;;  %15849 = vmatprep.mubr.msk.f32.mxu0 %vm17983_vm6, %v17980_v14 }
0x2324   :  { %15857 = vmatprep.subr.mxu0 %v17980_v14 }
0x23da   :  { %v4788_v2 = vpop.f32.mrf.mxu1 }
0x23dc   :  { %v15836_v3 = vpop.f32.mrf.mxu1 }
0x23de   :  { %v4715_v4 = vpop.f32.mrf.mxu0 }
0x23df   :  { %v4789_v5 = vadd.f32 %v4788_v2, %v4715_v4 }
0x23e0   :  { %v15831_v43 = vpop.f32.mrf.mxu0 }
0x23e2   :  { %v4866_v53 = vpop.f32.mrf.mxu0 }
0x23e3   :  { %v4870_v6 = vmul.f32 0.35355338, %v4866_v53 }
0x23e4   :  { %v15841_v7 = vpop.f32.mrf.mxu0 }
0x23e5   :  { %v4871_v9 = vadd.f32 %v4870_v6, %v18437_v21 }
0x23e7   :  { %v4872_v10 = vsel %vm1030_vm7, %v4871_v9, -inf }
0x23e8   :  { %4873 = vmax.xlane.f32.xlu0 %v4872_v10 }
0x23fe   :  { %4883 = vrot.lane.b32.xlu0 %v18718_v41, %s17993_s27 }
0x2402   :  { %5033 = vrot.lane.b32.xlu0 %v18718_v41, %s17992_s0 }
0x2471   :  { %v4874_v54 = vpop.xlane.xlu0 %4873 }
0x2472   :  { %v4875_v46 = vsub.f32 %v4871_v9, %v4874_v54 }
0x2474   :  { %v4876_v11 = vmul.f32 1.442695, %v4875_v46  ;;  %v14907_v46 = vld [vmem:[#allocation59] ss:$0 sm:$0xff] }
0x2475   :  { %v4884_v12 = vpop.permute.xlu0 %4883 }
0x2476   :  { %16750 = vpow2.f32 %v4876_v11  ;;  %15843 = vmatpush3.msra.mxu1 %v4884_v12  ;;  %v5568_v12 = vld [vmem:[%s18363_s20] sm:$0xff]  ;;  %s20063_s20 = sld [smem:[#allocation106_spill]] }
0x2477   :  { %15852 = vmatprep.subr.mxu1 %v17980_v14 }
0x2479   :  { %v5034_v50 = vpop.permute.xlu0 %5033 }
0x2483   :  { %v16751_v15 = vpop.eup %16750 }
0x2484   :  { %v4878_v17 = vsel %vm1030_vm7, %v16751_v15, 0.0 }
0x2485   :  { %4879 = vadd.xlane.f32.xlu1 %v4878_v17  ;;  %v5334_v17 = vld [vmem:[%s20061_s24 + $0x10] sm:$0xff] }
0x2496   :  { %5035 = vrot.lane.b32.xlu1 %v18718_v41, %s17991_s25 }
0x250e   :  { %v4880_v18 = vpop.xlane.xlu1 %4879 }
0x250f   :  { %16752 = vrcp.f32 %v4880_v18 }
0x2512   :  { %v5036_v20 = vpop.permute.xlu1 %5035 }
0x251c   :  { %v16753_v55 = vpop.eup %16752 }
0x251d   :  { %v4882_v19 = vmul.f32 %v16753_v55, %v16751_v15  ;;  %v5335_v15 = vld [vmem:[%s20061_s24 + $0x18] sm:$0xff] }
0x251e   :  { %v14908_v55 = vld [vmem:[#allocation58] ss:$0 sm:$0xff] }
0x251f   :  { %15845 = vmatmul.mubr.msk.f32.vlgmr.msra.gmra.mxu1 %vm1030_vm7, %v4882_v19  ;;  %v5333_v19 = vld [vmem:[%s20061_s24 + $0x8] sm:$0xff] }
0x2520   :  { %15853 = vmatpush3.xpose.msk.msra.mxu1 %vm1030_vm7, %v5036_v20  ;;  %15854 = vmatprep.mubr.msk.f32.mxu1 %vm17983_vm6, %v17980_v14 }
0x2521   :  { %15862 = vmatprep.subr.mxu1 %v17980_v14 }
0x2523   :  { %15855 = vmatmul.mubr.msk.f32.vlgmr.msra.gmra.mxu1 %vm1030_vm7, %v5034_v50  ;;  %v5332_v50 = vld [vmem:[%s20061_s24] sm:$0xff] }
0x2524   :  { %15863 = vmatpush3.msra.mxu1 %v18837_v13  ;;  %15864 = vmatprep.mubr.msk.f32.mxu1 %vm17983_vm6, %v17980_v14 }
0x2525   :  { %15878 = vmatprep.subr.mxu1 %v5433_v23 }
0x25df   :  { %v4955_v59 = vpop.f32.mrf.mxu1 }
0x25e0   :  { %15850 = vmatmul.mubr.msk.f32.vlgmr.msra.gmra.mxu0 %vm1030_vm7, %v4955_v59 }
0x25e1   :  { %v15846_v22 = vpop.f32.mrf.mxu1  ;;  %15859 = vmatprep.mubr.msk.f32.mxu0 %vm17983_vm6, %v17980_v14 }
0x25e2   :  { %v16918_v22 = vld [vmem:[%s20053_s30 + $0x78] sm:$0xff] }
0x25e3   :  { %v5107_v28 = vpop.f32.mrf.mxu1 }
0x25e4   :  { %v5111_v29 = vmul.f32 0.35355338, %v5107_v28  ;;  %v5431_v28 = vld [vmem:[%s20062_s11 + $0x28] sm:$0xff] }
0x25e5   :  { %v15856_v31 = vpop.f32.mrf.mxu1 }
0x25e6   :  { %v5112_v32 = vadd.f32 %v5111_v29, %v18437_v21  ;;  %v5430_v29 = vld [vmem:[%s20062_s11 + $0x20] sm:$0xff] }
0x25e8   :  { %v5113_v13 = vsel %vm1030_vm7, %v5112_v32, -inf }
0x25e9   :  { %5114 = vmax.xlane.f32.xlu1 %v5113_v13 }
0x25ed   :  { %5289 = vadd.xlane.f32.xlu1 %v5288_v34 }
0x2672   :  { %v5115_v36 = vpop.xlane.xlu1 %5114 }
0x2673   :  { %v5116_v39 = vsub.f32 %v5112_v32, %v5115_v36 }
0x2675   :  { %v5117_v40 = vmul.f32 1.442695, %v5116_v39 }
0x2676   :  { %v5290_v49 = vpop.xlane.xlu1 %5289 }
0x2677   :  { %16754 = vpow2.f32 %v5117_v40  ;;  %v5294_v63 = vmul.f32 0.03125, %v5290_v49  ;;  %v16919_v40 = vld [vmem:[%s20053_s30 + $0x70] sm:$0xff]  ;;  %v5429_v49 = vld [vmem:[%s20062_s11 + $0x18] sm:$0xff] }
0x2679   :  { %v5296_v1 = vsub.f32 %v5286_v33, %v5294_v63  ;;  %v5428_v63 = vld [vmem:[%s20062_s11 + $0x10] sm:$0xff] }
0x267b   :  { %v5298_v4 = vmul.f32 %v5296_v1, %v5296_v1 }
0x2684   :  { %v16755_v42 = vpop.eup %16754 }
0x2685   :  { %v5119_v44 = vsel %vm1030_vm7, %v16755_v42, 0.0 }
0x2686   :  { %5120 = vadd.xlane.f32.xlu0 %v5119_v44  ;;  %v16921_v44 = vld [vmem:[%s20053_s30 + $0x60] sm:$0xff] }
0x269c   :  { %5124 = vrot.lane.b32.xlu0 %v18718_v41, %s17994_s9 }
0x26a0   :  { %5574 = vperm.xlu0 %16684, %v5569_v27   ;;  %v5028_v45 = vpop.f32.mrf.mxu0  ;;  %v16922_v27 = vld [vmem:[%s20053_s30 + $0x58] sm:$0xff] }
0x26a1   :  { %v5032_v47 = vadd.f32 %v5028_v45, %v4789_v5  ;;  %v5300_v5 = vsel %vm941_vm5, %v5298_v4, 0.0  ;;  %v16923_v45 = vld [vmem:[%s20053_s30 + $0x50] sm:$0xff] }
0x26a2   :  { %v15851_v35 = vpop.f32.mrf.mxu0 }
0x26a3   :  { %v16925_v35 = vld [vmem:[%s20053_s30 + $0x40] sm:$0xff] }
0x270f   :  { %v5121_v48 = vpop.xlane.xlu0 %5120 }
0x2710   :  { %16756 = vrcp.f32 %v5121_v48  ;;  %v16926_v48 = vld [vmem:[%s20053_s30 + $0x38] sm:$0xff] }
0x2713   :  { %v5125_v51 = vpop.permute.xlu0 %5124 }
0x2714   :  { %15858 = vmatpush3.msra.mxu0 %v5125_v51  ;;  %v16927_v51 = vld [vmem:[%s20053_s30 + $0x30] sm:$0xff] }
0x2715   :  { %15867 = vmatprep.subr.mxu0 %v5335_v15 }
0x271d   :  { %v16757_v52 = vpop.eup %16756 }
0x271e   :  { %v5123_v56 = vmul.f32 %v16757_v52, %v16755_v42  ;;  %v16920_v42 = vld [vmem:[%s20053_s30 + $0x68] sm:$0xff] }
0x271f   :  { %v16928_v52 = vld [vmem:[%s20053_s30 + $0x28] sm:$0xff] }
0x2720   :  { %15860 = vmatmul.mubr.msk.f32.vlgmr.msra.gmra.mxu0 %vm1030_vm7, %v5123_v56  ;;  %v16929_v56 = vld [vmem:[%s20053_s30 + $0x20] sm:$0xff] }
0x2721   :  { %15868 = vmatpush3.msra.mxu0 %v5335_v15 }
0x2722   :  { %15869 = vmatprep.subr.mxu0 %v5334_v17 }
0x2723   :  { %15870 = vmatpush3.msra.mxu0 %v5334_v17 }
0x2724   :  { %15871 = vmatprep.subr.mxu0 %v5333_v19 }
0x2725   :  { %15872 = vmatpush3.msra.mxu0 %v5333_v19 }
0x2726   :  { %15873 = vmatprep.subr.mxu0 %v5332_v50 }
0x2727   :  { %15874 = vmatpush3.msra.mxu0 %v5332_v50 }
0x2728   :  { %15897 = vmatprep.subr.mxu0 %v16918_v22 }
0x27e0   :  { %v5196_v58 = vpop.f32.mrf.mxu0 }
0x27e1   :  { %15865 = vmatmul.mubr.msk.f32.vlgmr.msra.gmra.mxu1 %vm1030_vm7, %v5196_v58  ;;  %v16930_v58 = vld [vmem:[%s20053_s30 + $0x18] sm:$0xff] }
0x27e2   :  { %v15861_v60 = vpop.f32.mrf.mxu0  ;;  %15879 = vmatpush3.msra.mxu1 %v5433_v23 }
0x27e3   :  { %v16931_v60 = vld [vmem:[%s20053_s30 + $0x10] sm:$0xff] }
0x28a1   :  { %v5269_v61 = vpop.f32.mrf.mxu1 }
0x28a2   :  { %v5273_v62 = vadd.f32 %v5269_v61, %v5032_v47  ;;  %v16924_v47 = vld [vmem:[%s20053_s30 + $0x48] sm:$0xff]  ;;  %v5575_v61 = vpop.permute.xlu0 %5574 }
0x28a3   :  { %v15866_v41 = vpop.f32.mrf.mxu1  ;;  %vm5577_vm10 = vcmp.eq.s32.totalorder %v18421_v8, %v5575_v61 }
0x28a4   :  { %5274 = vst.msk [vmem:[#allocation2 + $0x8] sm:$0xff] %vm941_vm5, %v5273_v62  ;;  %v16932_v62 = vld [vmem:[%s20053_s30 + $0x8] sm:$0xff]  ;;  %v16933_v41 = vld [vmem:[%s20053_s30] sm:$0xff]  ;;  %s20072_s30 = sld [smem:[#allocation118_spill]] }
0x28ab   :  { %v5276_v0 = vld [vmem:[#allocation2 + $0x8] sm:$0xff] }
0x28ac   :  { %v5285_v16 = vadd.f32 %v14906_v24, %v5276_v0  ;;  %v5432_v24 = vld [vmem:[%s20062_s11 + $0x30] sm:$0xff]  ;;  %v5427_v0 = vld [vmem:[%s20062_s11 + $0x8] sm:$0xff] }
0x28ad   :  { %15880 = vmatprep.subr.mxu1 %v5432_v24 }
0x28ae   :  { %v5287_v2 = vadd.f32 %v5285_v16, %v18712_v38  ;;  %15881 = vmatpush3.msra.mxu1 %v5432_v24 }
0x28af   :  { %15882 = vmatprep.subr.mxu1 %v5431_v28 }
0x28b0   :  { %v5291_v3 = vsel %vm941_vm5, %v5287_v2, 0.0  ;;  %15883 = vmatpush3.msra.mxu1 %v5431_v28 }
0x28b1   :  { %5292 = vadd.xlane.f32.xlu1 %v5291_v3  ;;  %15884 = vmatprep.subr.mxu1 %v5430_v29 }
0x28b2   :  { %15885 = vmatpush3.msra.mxu1 %v5430_v29 }
0x28b3   :  { %15886 = vmatprep.subr.mxu1 %v5429_v49 }
0x28b4   :  { %15887 = vmatpush3.msra.mxu1 %v5429_v49 }
0x28b5   :  { %5301 = vadd.xlane.f32.xlu1 %v5300_v5  ;;  %15888 = vmatprep.subr.mxu1 %v5428_v63 }
0x28b6   :  { %15889 = vmatpush3.msra.mxu1 %v5428_v63 }
0x28b7   :  { %15890 = vmatprep.subr.mxu1 %v5427_v0 }
0x28b8   :  { %15891 = vmatpush3.msra.mxu1 %v5427_v0 }
0x293a   :  { %v5293_v43 = vpop.xlane.xlu1 %5292 }
0x293b   :  { %v5295_v53 = vmul.f32 0.03125, %v5293_v43 }
0x293d   :  { %v5297_v6 = vsub.f32 %v5287_v2, %v5295_v53  ;;  %v5665_v53 = vld [vmem:[%s20063_s20 + $0x10] sm:$0xff] }
0x293e   :  { %v5302_v7 = vpop.xlane.xlu1 %5301 }
0x293f   :  { %v5306_v9 = vmul.f32 0.03125, %v5302_v7  ;;  %v5299_v10 = vmul.f32 %v5297_v6, %v5297_v6  ;;  %v5663_v7 = vld [vmem:[%s20063_s20] sm:$0xff] }
0x2941   :  { %v5308_v54 = vadd.f32 1e-05, %v5306_v9  ;;  %v5303_v38 = vsel %vm941_vm5, %v5299_v10, 0.0 }
0x2942   :  { %5304 = vadd.xlane.f32.xlu1 %v5303_v38  ;;  %v5659_v38 = vld [vmem:[%s20064_s21] sm:$0xff] }
0x2943   :  { %16758 = vrsqrt.f32 %v5308_v54 }
0x2950   :  { %v16759_v11 = vpop.eup %16758 }
0x2951   :  { %v5312_v18 = vmul.f32 %v16759_v11, %v5296_v1  ;;  %v5426_v1 = vld [vmem:[%s20062_s11] sm:$0xff] }
0x2952   :  { %15892 = vmatprep.subr.mxu1 %v5426_v1 }
0x2953   :  { %v5321_v20 = vmul.f32 %v14907_v46, %v5312_v18  ;;  %5571 = vperm.xlu1 %16685, %v5568_v12   ;;  %15893 = vmatpush3.msra.mxu1 %v5426_v1  ;;  %v19027_v1 = vld [vmem:[%s20065_s8 + $0x8] sm:$0xff] }
0x2955   :  { %v18924_v59 = vadd.f32 %v14908_v55, %v5321_v20 }
0x2957   :  { %15875 = vmatprep.mubr.msk.f32.mxu0 %vm941_vm5, %v18924_v59 }
0x29cb   :  { %v5305_v30 = vpop.xlane.xlu1 %5304 }
0x29cc   :  { %v5307_v31 = vmul.f32 0.03125, %v5305_v30 }
0x29ce   :  { %v5309_v32 = vadd.f32 1e-05, %v5307_v31 }
0x29cf   :  { %v5572_v34 = vpop.permute.xlu1 %5571 }
0x29d0   :  { %16760 = vrsqrt.f32 %v5309_v32  ;;  %vm5576_vm9 = vcmp.eq.s32.totalorder %v18421_v8, %v5572_v34  ;;  %v5666_v8 = vld [vmem:[%s20063_s20 + $0x18] sm:$0xff] }
0x29d1   :  { %15932 = vmatprep.subr.mxu1 %v5666_v8 }
0x29dd   :  { %v16761_v13 = vpop.eup %16760 }
0x29de   :  { %v5313_v33 = vmul.f32 %v16761_v13, %v5297_v6  ;;  %v5664_v6 = vld [vmem:[%s20063_s20 + $0x8] sm:$0xff] }
0x29e0   :  { %v5322_v36 = vmul.f32 %v14907_v46, %v5313_v33  ;;  %v5660_v46 = vld [vmem:[%s20064_s21 + $0x8] sm:$0xff] }
0x29e2   :  { %v18933_v39 = vadd.f32 %v14908_v55, %v5322_v36  ;;  %v14921_v55 = vld [vmem:[#allocation22] ss:$0 sm:$0xff] }
0x29e4   :  { %15876 = vmatmul.mubr.msk.f32.vlgmr.msra.gmra.mxu0 %vm941_vm5, %v18933_v39 }
0x29e5   :  { %15898 = vmatpush3.msra.mxu0 %v16918_v22  ;;  %15929 = vmatprep.mubr.msk.f32.mxu0 %vm5576_vm9, %v17982_v37 }
0x29e6   :  { %15899 = vmatprep.subr.mxu0 %v16919_v40 }
0x29e7   :  { %15900 = vmatpush3.msra.mxu0 %v16919_v40 }
0x29e8   :  { %15901 = vmatprep.subr.mxu0 %v16920_v42 }
0x29e9   :  { %15902 = vmatpush3.msra.mxu0 %v16920_v42 }
0x29ea   :  { %15903 = vmatprep.subr.mxu0 %v16921_v44 }
0x29eb   :  { %15904 = vmatpush3.msra.mxu0 %v16921_v44 }
0x29ec   :  { %15905 = vmatprep.subr.mxu0 %v16922_v27 }
0x29ed   :  { %15906 = vmatpush3.msra.mxu0 %v16922_v27 }
0x29ee   :  { %15907 = vmatprep.subr.mxu0 %v16923_v45 }
0x29ef   :  { %15908 = vmatpush3.msra.mxu0 %v16923_v45 }
0x29f0   :  { %15909 = vmatprep.subr.mxu0 %v16924_v47 }
0x29f1   :  { %15910 = vmatpush3.msra.mxu0 %v16924_v47 }
0x29f2   :  { %15911 = vmatprep.subr.mxu0 %v16925_v35 }
0x29f3   :  { %15912 = vmatpush3.msra.mxu0 %v16925_v35 }
0x29f4   :  { %15913 = vmatprep.subr.mxu0 %v16926_v48 }
0x29f5   :  { %15914 = vmatpush3.msra.mxu0 %v16926_v48 }
0x29f6   :  { %15915 = vmatprep.subr.mxu0 %v16927_v51 }
0x29f7   :  { %15916 = vmatpush3.msra.mxu0 %v16927_v51 }
0x29f8   :  { %15917 = vmatprep.subr.mxu0 %v16928_v52 }
0x29f9   :  { %15918 = vmatpush3.msra.mxu0 %v16928_v52 }
0x29fa   :  { %15919 = vmatprep.subr.mxu0 %v16929_v56 }
0x29fb   :  { %15920 = vmatpush3.msra.mxu0 %v16929_v56 }
0x29fc   :  { %15921 = vmatprep.subr.mxu0 %v16930_v58 }
0x29fd   :  { %15922 = vmatpush3.msra.mxu0 %v16930_v58 }
0x29fe   :  { %15923 = vmatprep.subr.mxu0 %v16931_v60 }
0x29ff   :  { %15924 = vmatpush3.msra.mxu0 %v16931_v60 }
0x2a00   :  { %15925 = vmatprep.subr.mxu0 %v16932_v62 }
0x2a01   :  { %15926 = vmatpush3.msra.mxu0 %v16932_v62 }
0x2a02   :  { %15927 = vmatprep.subr.mxu0 %v16933_v41 }
0x2a03   :  { %15928 = vmatpush3.msra.mxu0 %v16933_v41 }
0x2a04   :  { %15930 = vmatmul.mubr.msk.f32.vlgmr.msra.gmra.mxu0 %vm5577_vm10, %v17982_v37  ;;  %15963 = vmatprep.subr.mxu0 %v17980_v14  ;;  %v14909_v37 = vld [vmem:[#allocation55] ss:$0 sm:$0xff] }
0x2a05   :  { %15965 = vmatprep.mubr.msk.f32.mxu0 %vm17983_vm6, %v17980_v14  ;;  %15964 = vmatpush3.msra.mxu0 %v19027_v1 }
0x2a06   :  { %15973 = vmatprep.subr.mxu0 %v17980_v14 }
0x2aa4   :  { %v15877_v16 = vpop.f32.mrf.mxu0 }
0x2aa5   :  { %v5421_v2 = vadd.f32 %v15877_v16, %v14909_v37 }
0x2aa6   :  { %v5415_v3 = vpop.f32.mrf.mxu0 }
0x2aa7   :  { %v5416_v4 = vadd.f32 %v14909_v37, %v5415_v3  ;;  %v5425_v43 = vmax.f32 %v5421_v2, 0.0  ;;  %v19032_v2 = vld [vmem:[%s20065_s8] sm:$0xff] }
0x2aa9   :  { %v5424_v5 = vmax.f32 %v5416_v4, 0.0 }
0x2aab   :  { %15894 = vmatprep.mubr.msk.f32.mxu1 %vm3127_vm8, %v5424_v5 }
0x2aac   :  { %15895 = vmatmul.mubr.msk.f32.vlgmr.msra.gmra.mxu1 %vm3127_vm8, %v5425_v43 }
0x2aad   :  { %15933 = vmatpush3.msra.mxu1 %v5666_v8 }
0x2aae   :  { %15934 = vmatprep.subr.mxu1 %v5665_v53 }
0x2aaf   :  { %15935 = vmatpush3.msra.mxu1 %v5665_v53 }
0x2ab0   :  { %15936 = vmatprep.subr.mxu1 %v5664_v6 }
0x2ab1   :  { %15937 = vmatpush3.msra.mxu1 %v5664_v6 }
0x2ab2   :  { %15938 = vmatprep.subr.mxu1 %v5663_v7 }
0x2ab3   :  { %15939 = vmatpush3.msra.mxu1 %v5663_v7 }
0x2ab4   :  { %15943 = vmatprep.subr.mxu1 %v17980_v14 }
0x2ac4   :  { %v15931_v9 = vpop.f32.mrf.mxu0 }
0x2ac5   :  { %v5658_v10 = vmul.f32 5.656854, %v15931_v9 }
0x2ac6   :  { %v5648_v54 = vpop.f32.mrf.mxu0 }
0x2ac7   :  { %v5657_v11 = vmul.f32 5.656854, %v5648_v54  ;;  %v18974_v15 = vadd.f32 %v5660_v46, %v5658_v10 }
0x2ac9   :  { %v18972_v12 = vadd.f32 %v5659_v38, %v5657_v11 }
0x2acb   :  { %15940 = vmatprep.mubr.msk.f32.mxu1 %vm941_vm5, %v18972_v12 }
0x2acc   :  { %15941 = vmatmul.mubr.msk.f32.vlgmr.msra.gmra.mxu1 %vm941_vm5, %v18974_v15 }
0x2acd   :  { %15945 = vmatprep.mubr.msk.f32.mxu1 %vm17983_vm6, %v17980_v14 }
0x2b6c   :  { %v18982_v17 = vpop.f32.mrf.mxu1 }
0x2b6e   :  { %v18984_v18 = vpop.f32.mrf.mxu1 }
0x2b8c   :  { %v15942_v19 = vpop.f32.mrf.mxu1 }
0x2b8d   :  { %v18986_v20 = vadd.f32 %v15942_v19, %v14921_v55 }
0x2b8e   :  { %v5746_v50 = vpop.f32.mrf.mxu1 }
0x2b8f   :  { %v18988_v22 = vadd.f32 %v14921_v55, %v5746_v50 }
0x2b91   :  { %5765 = vrot.lane.b32.xlu0 %v18988_v22, %s17984_s23 }
0x2c03   :  { %v5766_v23 = vpop.permute.xlu0 %5765 }
0x2c04   :  { %15944 = vmatpush3.xpose.msk.msra.mxu1 %vm1030_vm7, %v5766_v23 }
0x2c05   :  { %15948 = vmatprep.subr.mxu1 %v17980_v14 }
0x2c07   :  { %15946 = vmatmul.mubr.msk.f32.vlgmr.msra.gmra.mxu1 %vm1030_vm7, %v18988_v22 }
0x2c08   :  { %15950 = vmatprep.mubr.msk.f32.mxu1 %vm17983_vm6, %v17980_v14 }
0x2cc7   :  { %v5837_v24 = vpop.f32.mrf.mxu1 }
0x2cc8   :  { %v5841_v28 = vmul.f32 0.35355338, %v5837_v24 }
0x2cc9   :  { %v15947_v29 = vpop.f32.mrf.mxu1 }
0x2cca   :  { %v5842_v30 = vadd.f32 %v5841_v28, %v18442_v25 }
0x2ccc   :  { %v5843_v31 = vsel %vm1030_vm7, %v5842_v30, -inf }
0x2ccd   :  { %5844 = vmax.xlane.f32.xlu0 %v5843_v31 }
0x2ce3   :  { %5854 = vrot.lane.b32.xlu0 %v18988_v22, %s17988_s1 }
0x2ce7   :  { %5930 = vrot.lane.b32.xlu0 %v18988_v22, %s17986_s26 }
0x2d56   :  { %v5845_v32 = vpop.xlane.xlu0 %5844 }
0x2d57   :  { %v5846_v13 = vsub.f32 %v5842_v30, %v5845_v32 }
0x2d59   :  { %v5847_v33 = vmul.f32 1.442695, %v5846_v13 }
0x2d5a   :  { %v5855_v34 = vpop.permute.xlu0 %5854 }
0x2d5b   :  { %16762 = vpow2.f32 %v5847_v33  ;;  %15949 = vmatpush3.msra.mxu1 %v5855_v34  ;;  %v19073_v33 = vld [vmem:[%s20065_s8 + $0x10] sm:$0xff] }
0x2d5c   :  { %15953 = vmatprep.subr.mxu1 %v17980_v14 }
0x2d5e   :  { %v5931_v47 = vpop.permute.xlu0 %5930 }
0x2d68   :  { %v16763_v36 = vpop.eup %16762 }
0x2d69   :  { %v5849_v40 = vsel %vm1030_vm7, %v16763_v36, 0.0 }
0x2d6a   :  { %5850 = vadd.xlane.f32.xlu1 %v5849_v40 }
0x2d7b   :  { %5932 = vrot.lane.b32.xlu1 %v18988_v22, %s17985_s14 }
0x2df3   :  { %v5851_v42 = vpop.xlane.xlu1 %5850 }
0x2df4   :  { %16764 = vrcp.f32 %v5851_v42 }
0x2df7   :  { %v5933_v45 = vpop.permute.xlu1 %5932 }
0x2e01   :  { %v16765_v44 = vpop.eup %16764 }
0x2e02   :  { %v5853_v27 = vmul.f32 %v16765_v44, %v16763_v36 }
0x2e04   :  { %15951 = vmatmul.mubr.msk.f32.vlgmr.msra.gmra.mxu1 %vm1030_vm7, %v5853_v27 }
0x2e05   :  { %15954 = vmatpush3.xpose.msk.msra.mxu1 %vm1030_vm7, %v5933_v45  ;;  %15955 = vmatprep.mubr.msk.f32.mxu1 %vm17983_vm6, %v17980_v14 }
0x2e06   :  { %15958 = vmatprep.subr.mxu1 %v17980_v14 }
0x2e08   :  { %15956 = vmatmul.mubr.msk.f32.vlgmr.msra.gmra.mxu1 %vm1030_vm7, %v5931_v47 }
0x2e09   :  { %15960 = vmatprep.mubr.msk.f32.mxu1 %vm17983_vm6, %v17980_v14 }
0x2ec4   :  { %v5926_v35 = vpop.f32.mrf.mxu1 }
0x2ec6   :  { %v15952_v48 = vpop.f32.mrf.mxu1 }
0x2ec8   :  { %v6004_v51 = vpop.f32.mrf.mxu1 }
0x2ec9   :  { %v6008_v52 = vmul.f32 0.35355338, %v6004_v51 }
0x2eca   :  { %v15957_v56 = vpop.f32.mrf.mxu1 }
0x2ecb   :  { %v6009_v58 = vadd.f32 %v6008_v52, %v18442_v25 }
0x2ecd   :  { %v6010_v60 = vsel %vm1030_vm7, %v6009_v58, -inf }
0x2ece   :  { %6011 = vmax.xlane.f32.xlu0 %v6010_v60 }
0x2ee4   :  { %6021 = vrot.lane.b32.xlu0 %v18988_v22, %s17990_s12 }
0x2ee8   :  { %6243 = vrot.lane.b32.xlu0 %v18988_v22, %s17987_s28 }
0x2f57   :  { %v6012_v61 = vpop.xlane.xlu0 %6011 }
0x2f58   :  { %v6013_v62 = vsub.f32 %v6009_v58, %v6012_v61 }
0x2f5a   :  { %v6014_v41 = vmul.f32 1.442695, %v6013_v62 }
0x2f5b   :  { %v6022_v49 = vpop.permute.xlu0 %6021 }
0x2f5c   :  { %16766 = vpow2.f32 %v6014_v41  ;;  %15959 = vmatpush3.msra.mxu1 %v6022_v49 }
0x2f5d   :  { %15968 = vmatprep.subr.mxu1 %v17980_v14 }
0x2f5f   :  { %v6244_v43 = vpop.permute.xlu0 %6243 }
0x2f69   :  { %v16767_v63 = vpop.eup %16766 }
0x2f6a   :  { %v6016_v0 = vsel %vm1030_vm7, %v16767_v63, 0.0 }
0x2f6b   :  { %6017 = vadd.xlane.f32.xlu1 %v6016_v0 }
0x2f7c   :  { %6245 = vrot.lane.b32.xlu1 %v18988_v22, %s17989_s2 }
0x2ff4   :  { %v6018_v8 = vpop.xlane.xlu1 %6017 }
0x2ff5   :  { %16768 = vrcp.f32 %v6018_v8 }
0x2ff8   :  { %v6246_v4 = vpop.permute.xlu1 %6245 }
0x3002   :  { %v16769_v37 = vpop.eup %16768 }
0x3003   :  { %v6020_v16 = vmul.f32 %v16769_v37, %v16767_v63  ;;  %v19108_v37 = vld [vmem:[%s20065_s8 + $0x18] sm:$0xff] }
0x3005   :  { %15961 = vmatmul.mubr.msk.f32.vlgmr.msra.gmra.mxu1 %vm1030_vm7, %v6020_v16 }
0x3006   :  { %15969 = vmatpush3.msra.mxu1 %v19032_v2  ;;  %15970 = vmatprep.mubr.msk.f32.mxu1 %vm17983_vm6, %v17980_v14 }
0x3007   :  { %15978 = vmatprep.subr.mxu1 %v17980_v14 }
0x3009   :  { %15971 = vmatmul.mubr.msk.f32.vlgmr.msra.gmra.mxu1 %vm1030_vm7, %v5926_v35 }
0x300a   :  { %15980 = vmatprep.mubr.msk.f32.mxu1 %vm17983_vm6, %v17980_v14 }
0x30c5   :  { %v6093_v3 = vpop.f32.mrf.mxu1 }
0x30c6   :  { %15966 = vmatmul.mubr.msk.f32.vlgmr.msra.gmra.mxu0 %vm1030_vm7, %v6093_v3 }
0x30c7   :  { %15974 = vmatpush3.xpose.msk.msra.mxu0 %vm1030_vm7, %v6246_v4  ;;  %v15962_v5 = vpop.f32.mrf.mxu1  ;;  %15975 = vmatprep.mubr.msk.f32.mxu0 %vm17983_vm6, %v17980_v14 }
0x30c8   :  { %15983 = vmatprep.subr.mxu0 %v17980_v14 }
0x30c9   :  { %v19047_v53 = vpop.f32.mrf.mxu1 }
0x30ca   :  { %15976 = vmatmul.mubr.msk.f32.vlgmr.msra.gmra.mxu0 %vm1030_vm7, %v6244_v43 }
0x30cb   :  { %v15972_v6 = vpop.f32.mrf.mxu1  ;;  %15985 = vmatprep.mubr.msk.f32.mxu0 %vm17983_vm6, %v17980_v14  ;;  %15984 = vmatpush3.msra.mxu0 %v19073_v33 }
0x30cc   :  { %15993 = vmatprep.subr.mxu0 %v17980_v14 }
0x3186   :  { %v6166_v7 = vpop.f32.mrf.mxu0 }
0x3188   :  { %v15967_v9 = vpop.f32.mrf.mxu0 }
0x318a   :  { %v6317_v10 = vpop.f32.mrf.mxu0 }
0x318b   :  { %v6321_v54 = vmul.f32 0.35355338, %v6317_v10 }
0x318c   :  { %v15977_v38 = vpop.f32.mrf.mxu0 }
0x318d   :  { %v6322_v46 = vadd.f32 %v6321_v54, %v18442_v25 }
0x318f   :  { %v6323_v11 = vsel %vm1030_vm7, %v6322_v46, -inf }
0x3190   :  { %6324 = vmax.xlane.f32.xlu1 %v6323_v11 }
0x31a1   :  { %6486 = vrot.lane.b32.xlu1 %v18988_v22, %s17991_s25 }
0x31a5   :  { %6484 = vrot.lane.b32.xlu1 %v18988_v22, %s17992_s0 }
0x31a9   :  { %6732 = vrot.lane.b32.xlu1 %v18986_v20, %s17984_s23 }
0x3219   :  { %v6325_v55 = vpop.xlane.xlu1 %6324 }
0x321a   :  { %v6326_v19 = vsub.f32 %v6322_v46, %v6325_v55 }
0x321c   :  { %v6327_v50 = vmul.f32 1.442695, %v6326_v19 }
0x321d   :  { %v6487_v31 = vpop.permute.xlu1 %6486 }
0x321e   :  { %16770 = vpow2.f32 %v6327_v50 }
0x3221   :  { %v6485_v13 = vpop.permute.xlu1 %6484 }
0x3225   :  { %v6733_v62 = vpop.permute.xlu1 %6732 }
0x322b   :  { %v16771_v23 = vpop.eup %16770 }
0x322c   :  { %v6329_v24 = vsel %vm1030_vm7, %v16771_v23, 0.0 }
0x322d   :  { %6330 = vadd.xlane.f32.xlu0 %v6329_v24 }
0x3243   :  { %6334 = vrot.lane.b32.xlu0 %v18988_v22, %s17993_s27 }
0x32b6   :  { %v6331_v28 = vpop.xlane.xlu0 %6330 }
0x32b7   :  { %16772 = vrcp.f32 %v6331_v28 }
0x32ba   :  { %v6335_v29 = vpop.permute.xlu0 %6334 }
0x32bb   :  { %15979 = vmatpush3.msra.mxu1 %v6335_v29 }
0x32bc   :  { %15988 = vmatprep.subr.mxu1 %v17980_v14 }
0x32c4   :  { %v16773_v30 = vpop.eup %16772 }
0x32c5   :  { %v6333_v32 = vmul.f32 %v16773_v30, %v16771_v23 }
0x32c7   :  { %15981 = vmatmul.mubr.msk.f32.vlgmr.msra.gmra.mxu1 %vm1030_vm7, %v6333_v32 }
0x32c8   :  { %15989 = vmatpush3.xpose.msk.msra.mxu1 %vm1030_vm7, %v6487_v31  ;;  %15990 = vmatprep.mubr.msk.f32.mxu1 %vm17983_vm6, %v17980_v14 }
0x32c9   :  { %15998 = vmatprep.subr.mxu1 %v17980_v14 }
0x32cb   :  { %15991 = vmatmul.mubr.msk.f32.vlgmr.msra.gmra.mxu1 %vm1030_vm7, %v6485_v13 }
0x32cc   :  { %16000 = vmatprep.mubr.msk.f32.mxu1 %vm17983_vm6, %v17980_v14  ;;  %15999 = vmatpush3.msra.mxu1 %v19108_v37 }
0x32cd   :  { %16008 = vmatprep.subr.mxu1 %v17980_v14 }
0x3387   :  { %v6406_v34 = vpop.f32.mrf.mxu1 }
0x3388   :  { %15986 = vmatmul.mubr.msk.f32.vlgmr.msra.gmra.mxu0 %vm1030_vm7, %v6406_v34 }
0x3389   :  { %v15982_v36 = vpop.f32.mrf.mxu1  ;;  %15995 = vmatprep.mubr.msk.f32.mxu0 %vm17983_vm6, %v17980_v14 }
0x338b   :  { %v6558_v40 = vpop.f32.mrf.mxu1 }
0x338c   :  { %v6562_v42 = vmul.f32 0.35355338, %v6558_v40 }
0x338d   :  { %v15992_v44 = vpop.f32.mrf.mxu1 }
0x338e   :  { %v6563_v27 = vadd.f32 %v6562_v42, %v18442_v25 }
0x3390   :  { %v6564_v45 = vsel %vm1030_vm7, %v6563_v27, -inf }
0x3391   :  { %6565 = vmax.xlane.f32.xlu0 %v6564_v45 }
0x33a7   :  { %6575 = vrot.lane.b32.xlu0 %v18988_v22, %s17994_s9  ;;  %v6240_v22 = vadd.f32 %v19047_v53, %v6166_v7 }
0x33ab   :  { %6899 = vrot.lane.b32.xlu0 %v18986_v20, %s17985_s14 }
0x341a   :  { %v6566_v47 = vpop.xlane.xlu0 %6565 }
0x341b   :  { %v6567_v35 = vsub.f32 %v6563_v27, %v6566_v47 }
0x341d   :  { %v6568_v48 = vmul.f32 1.442695, %v6567_v35 }
0x341e   :  { %v6576_v51 = vpop.permute.xlu0 %6575 }
0x341f   :  { %16774 = vpow2.f32 %v6568_v48  ;;  %15994 = vmatpush3.msra.mxu0 %v6576_v51 }
0x3420   :  { %16003 = vmatprep.subr.mxu0 %v17980_v14 }
0x3422   :  { %v6900_v0 = vpop.permute.xlu0 %6899 }
0x342c   :  { %v16775_v52 = vpop.eup %16774 }
0x342d   :  { %v6570_v56 = vsel %vm1030_vm7, %v16775_v52, 0.0 }
0x342e   :  { %6571 = vadd.xlane.f32.xlu1 %v6570_v56 }
0x343f   :  { %6897 = vrot.lane.b32.xlu1 %v18986_v20, %s17986_s26 }
0x3448   :  { %v6479_v58 = vpop.f32.mrf.mxu0 }
0x3449   :  { %v6483_v60 = vadd.f32 %v6479_v58, %v6240_v22 }
0x344a   :  { %v15987_v61 = vpop.f32.mrf.mxu0 }
0x34b7   :  { %v6572_v41 = vpop.xlane.xlu1 %6571 }
0x34b8   :  { %16776 = vrcp.f32 %v6572_v41 }
0x34bb   :  { %v6898_v8 = vpop.permute.xlu1 %6897 }
0x34c5   :  { %v16777_v49 = vpop.eup %16776 }
0x34c6   :  { %v6574_v63 = vmul.f32 %v16777_v49, %v16775_v52 }
0x34c8   :  { %15996 = vmatmul.mubr.msk.f32.vlgmr.msra.gmra.mxu0 %vm1030_vm7, %v6574_v63 }
0x34c9   :  { %16004 = vmatpush3.xpose.msk.msra.mxu0 %vm1030_vm7, %v6733_v62  ;;  %16005 = vmatprep.mubr.msk.f32.mxu0 %vm17983_vm6, %v17980_v14 }
0x34ca   :  { %16013 = vmatprep.subr.mxu0 %v17980_v14 }
0x34cc   :  { %16006 = vmatmul.mubr.msk.f32.vlgmr.msra.gmra.mxu0 %vm1030_vm7, %v18986_v20 }
0x34cd   :  { %16014 = vmatpush3.xpose.msk.msra.mxu0 %vm1030_vm7, %v6900_v0  ;;  %16015 = vmatprep.mubr.msk.f32.mxu0 %vm17983_vm6, %v17980_v14 }
0x34ce   :  { %16023 = vmatprep.subr.mxu0 %v17980_v14 }
0x34d0   :  { %16016 = vmatmul.mubr.msk.f32.vlgmr.msra.gmra.mxu0 %vm1030_vm7, %v6898_v8 }
0x34d1   :  { %16024 = vmatpush3.msra.mxu0 %v19027_v1  ;;  %16025 = vmatprep.mubr.msk.f32.mxu0 %vm17983_vm6, %v17980_v14 }
0x34d2   :  { %16033 = vmatprep.subr.mxu0 %v17980_v14 }
0x3588   :  { %v6647_v16 = vpop.f32.mrf.mxu0 }
0x3589   :  { %16001 = vmatmul.mubr.msk.f32.vlgmr.msra.gmra.mxu1 %vm1030_vm7, %v6647_v16 }
0x358a   :  { %v15997_v3 = vpop.f32.mrf.mxu0  ;;  %16010 = vmatprep.mubr.msk.f32.mxu1 %vm17983_vm6, %v17980_v14 }
0x358c   :  { %v6804_v4 = vpop.f32.mrf.mxu0 }
0x358d   :  { %v6808_v1 = vmul.f32 0.35355338, %v6804_v4 }
0x358e   :  { %v16007_v5 = vpop.f32.mrf.mxu0 }
0x358f   :  { %v6809_v43 = vadd.f32 %v6808_v1, %v18444_v26 }
0x3590   :  { %v6971_v53 = vpop.f32.mrf.mxu0 }
0x3591   :  { %v6975_v6 = vmul.f32 0.35355338, %v6971_v53  ;;  %v6810_v7 = vsel %vm1030_vm7, %v6809_v43, -inf }
0x3592   :  { %6811 = vmax.xlane.f32.xlu0 %v6810_v7  ;;  %v16017_v9 = vpop.f32.mrf.mxu0 }
0x3593   :  { %v6976_v10 = vadd.f32 %v6975_v6, %v18444_v26 }
0x3595   :  { %v6977_v54 = vsel %vm1030_vm7, %v6976_v10, -inf }
0x3596   :  { %6978 = vmax.xlane.f32.xlu1 %v6977_v54  ;;  %v14912_v54 = vld [vmem:[#allocation56] ss:$0 sm:$0xff] }
0x35a7   :  { %6821 = vrot.lane.b32.xlu1 %v18986_v20, %s17988_s1 }
0x35ab   :  { %7212 = vrot.lane.b32.xlu1 %v18986_v20, %s17989_s2 }
0x35af   :  { %7210 = vrot.lane.b32.xlu1 %v18986_v20, %s17987_s28 }
0x361b   :  { %v6812_v38 = vpop.xlane.xlu0 %6811 }
0x361c   :  { %v6813_v46 = vsub.f32 %v6809_v43, %v6812_v38 }
0x361e   :  { %v6814_v11 = vmul.f32 1.442695, %v6813_v46  ;;  %v5514_v46 = vadd.f32 %v14912_v54, %v18984_v18 }
0x361f   :  { %v6979_v55 = vpop.xlane.xlu1 %6978 }
0x3620   :  { %16778 = vpow2.f32 %v6814_v11  ;;  %v6980_v19 = vsub.f32 %v6976_v10, %v6979_v55 }
0x3622   :  { %v6981_v50 = vmul.f32 1.442695, %v6980_v19 }
0x3623   :  { %v6822_v23 = vpop.permute.xlu1 %6821 }
0x3624   :  { %16780 = vpow2.f32 %v6981_v50  ;;  %16009 = vmatpush3.msra.mxu1 %v6822_v23  ;;  %v5522_v50 = vadd.f32 %v5514_v46, %v18924_v59 }
0x3625   :  { %16018 = vmatprep.subr.mxu1 %v17980_v14 }
0x3627   :  { %v7213_v35 = vpop.permute.xlu1 %7212 }
0x362d   :  { %v16779_v24 = vpop.eup %16778 }
0x362e   :  { %v6816_v28 = vsel %vm1030_vm7, %v16779_v24, 0.0 }
0x362f   :  { %6817 = vadd.xlane.f32.xlu0 %v6816_v28  ;;  %v14956_v28 = vld [vmem:[#allocation20] ss:$0 sm:$0xff] }
0x3631   :  { %v16781_v29 = vpop.eup %16780 }
0x3632   :  { %v6983_v30 = vsel %vm1030_vm7, %v16781_v29, 0.0 }
0x3633   :  { %6984 = vadd.xlane.f32.xlu0 %v6983_v30  ;;  %v5524_v30 = vsel %vm941_vm5, %v5522_v50, 0.0 }
0x3649   :  { %6988 = vrot.lane.b32.xlu0 %v18986_v20, %s17990_s12  ;;  %v6720_v31 = vpop.f32.mrf.mxu1 }
0x364a   :  { %v6724_v32 = vadd.f32 %v6720_v31, %v6483_v60 }
0x364b   :  { %v16002_v13 = vpop.f32.mrf.mxu1 }
0x364c   :  { %6725 = vst.msk [vmem:[#allocation2] sm:$0xff] %vm941_vm5, %v6724_v32 }
0x36b8   :  { %v6818_v34 = vpop.xlane.xlu0 %6817 }
0x36b9   :  { %16782 = vrcp.f32 %v6818_v34 }
0x36bc   :  { %v6985_v36 = vpop.xlane.xlu0 %6984 }
0x36bd   :  { %16784 = vrcp.f32 %v6985_v36 }
0x36c0   :  { %v6989_v44 = vpop.permute.xlu0 %6988 }
0x36c6   :  { %v16783_v40 = vpop.eup %16782 }
0x36c7   :  { %v6820_v42 = vmul.f32 %v16783_v40, %v16779_v24  ;;  %v7693_v24 = vld [vmem:[#allocation2] sm:$0xff] }
0x36c8   :  { %v7702_v31 = vadd.f32 %v14956_v28, %v7693_v24 }
0x36c9   :  { %16011 = vmatmul.mubr.msk.f32.vlgmr.msra.gmra.mxu1 %vm1030_vm7, %v6820_v42 }
0x36ca   :  { %v16785_v27 = vpop.eup %16784  ;;  %16019 = vmatpush3.msra.mxu1 %v6989_v44  ;;  %16020 = vmatprep.mubr.msk.f32.mxu1 %vm17983_vm6, %v17980_v14  ;;  %v7704_v32 = vadd.f32 %v7702_v31, %v18972_v12 }
0x36cb   :  { %v6987_v45 = vmul.f32 %v16785_v27, %v16781_v29  ;;  %16028 = vmatprep.subr.mxu1 %v17980_v14 }
0x36cd   :  { %16021 = vmatmul.mubr.msk.f32.vlgmr.msra.gmra.mxu1 %vm1030_vm7, %v6987_v45 }
0x36ce   :  { %16029 = vmatpush3.msra.mxu1 %v19032_v2  ;;  %16030 = vmatprep.mubr.msk.f32.mxu1 %vm17983_vm6, %v17980_v14  ;;  %v7211_v2 = vpop.permute.xlu1 %7210 }
0x36cf   :  { %16038 = vmatprep.subr.mxu1 %v17980_v14 }
0x3789   :  { %v6893_v47 = vpop.f32.mrf.mxu1 }
0x378a   :  { %16031 = vmatmul.mubr.msk.f32.vlgmr.msra.gmra.mxu1 %vm1030_vm7, %v6893_v47 }
0x378b   :  { %v16012_v48 = vpop.f32.mrf.mxu1  ;;  %16040 = vmatprep.mubr.msk.f32.mxu1 %vm17983_vm6, %v17980_v14 }
0x378d   :  { %v7060_v51 = vpop.f32.mrf.mxu1 }
0x378e   :  { %16026 = vmatmul.mubr.msk.f32.vlgmr.msra.gmra.mxu0 %vm1030_vm7, %v7060_v51 }
0x378f   :  { %16034 = vmatpush3.xpose.msk.msra.mxu0 %vm1030_vm7, %v7213_v35  ;;  %v16022_v52 = vpop.f32.mrf.mxu1  ;;  %16035 = vmatprep.mubr.msk.f32.mxu0 %vm17983_vm6, %v17980_v14 }
0x3790   :  { %16043 = vmatprep.subr.mxu0 %v17980_v14 }
0x3792   :  { %16036 = vmatmul.mubr.msk.f32.vlgmr.msra.gmra.mxu0 %vm1030_vm7, %v7211_v2 }
0x3793   :  { %16044 = vmatpush3.msra.mxu0 %v19073_v33  ;;  %16045 = vmatprep.mubr.msk.f32.mxu0 %vm17983_vm6, %v17980_v14 }
0x3794   :  { %16053 = vmatprep.subr.mxu0 %v17980_v14 }
0x384a   :  { %v7206_v56 = vpop.f32.mrf.mxu1 }
0x384c   :  { %v16032_v22 = vpop.f32.mrf.mxu1 }
0x384e   :  { %v7133_v58 = vpop.f32.mrf.mxu0 }
0x384f   :  { %v19153_v60 = vadd.f32 %v7206_v56, %v7133_v58 }
0x3850   :  { %v16027_v61 = vpop.f32.mrf.mxu0 }
0x3852   :  { %v7284_v62 = vpop.f32.mrf.mxu0 }
0x3853   :  { %v7288_v41 = vmul.f32 0.35355338, %v7284_v62  ;;  %v19193_v62 = vld [vmem:[#allocation13] ss:$0 sm:$0xff] }
0x3854   :  { %v16037_v49 = vpop.f32.mrf.mxu0 }
0x3855   :  { %v7289_v63 = vadd.f32 %v7288_v41, %v18444_v26  ;;  %v19195_v49 = vld [vmem:[#allocation11] ss:$0 sm:$0xff] }
0x3857   :  { %v7290_v0 = vsel %vm1030_vm7, %v7289_v63, -inf }
0x3858   :  { %7291 = vmax.xlane.f32.xlu0 %v7290_v0 }
0x386e   :  { %7301 = vrot.lane.b32.xlu0 %v18986_v20, %s17993_s27 }
0x3872   :  { %7451 = vrot.lane.b32.xlu0 %v18986_v20, %s17992_s0 }
0x38e1   :  { %v7292_v33 = vpop.xlane.xlu0 %7291 }
0x38e2   :  { %v7293_v8 = vsub.f32 %v7289_v63, %v7292_v33 }
0x38e4   :  { %v7294_v16 = vmul.f32 1.442695, %v7293_v8 }
0x38e5   :  { %v7302_v3 = vpop.permute.xlu0 %7301 }
0x38e6   :  { %16786 = vpow2.f32 %v7294_v16  ;;  %16039 = vmatpush3.msra.mxu1 %v7302_v3 }
0x38e7   :  { %16048 = vmatprep.subr.mxu1 %v17980_v14 }
0x38e9   :  { %v7452_v7 = vpop.permute.xlu0 %7451 }
0x38f3   :  { %v16787_v4 = vpop.eup %16786 }
0x38f4   :  { %v7296_v1 = vsel %vm1030_vm7, %v16787_v4, 0.0 }
0x38f5   :  { %7297 = vadd.xlane.f32.xlu1 %v7296_v1 }
0x3906   :  { %7453 = vrot.lane.b32.xlu1 %v18986_v20, %s17991_s25 }
0x397e   :  { %v7298_v5 = vpop.xlane.xlu1 %7297 }
0x397f   :  { %16788 = vrcp.f32 %v7298_v5 }
0x3982   :  { %v7454_v6 = vpop.permute.xlu1 %7453 }
0x398c   :  { %v16789_v43 = vpop.eup %16788 }
0x398d   :  { %v7300_v53 = vmul.f32 %v16789_v43, %v16787_v4 }
0x398f   :  { %16041 = vmatmul.mubr.msk.f32.vlgmr.msra.gmra.mxu1 %vm1030_vm7, %v7300_v53 }
0x3990   :  { %16049 = vmatpush3.xpose.msk.msra.mxu1 %vm1030_vm7, %v7454_v6  ;;  %16050 = vmatprep.mubr.msk.f32.mxu1 %vm17983_vm6, %v17980_v14 }
0x3991   :  { %16058 = vmatprep.subr.mxu1 %v17980_v14 }
0x3993   :  { %16051 = vmatmul.mubr.msk.f32.vlgmr.msra.gmra.mxu1 %vm1030_vm7, %v7452_v7 }
0x3994   :  { %16059 = vmatpush3.msra.mxu1 %v19108_v37  ;;  %16060 = vmatprep.mubr.msk.f32.mxu1 %vm17983_vm6, %v17980_v14  ;;  %v5519_v37 = vadd.f32 %v18982_v17, %v14912_v54  ;;  %v7706_v17 = vsel %vm941_vm5, %v7704_v32, 0.0 }
0x3996   :  { %v5523_v29 = vadd.f32 %v5519_v37, %v18933_v39  ;;  %v7843_v37 = vld [vmem:[%s20066_s15 + $0x8] sm:$0xff] }
0x3998   :  { %v5527_v18 = vsel %vm941_vm5, %v5523_v29, 0.0 }
0x3a4f   :  { %v7373_v9 = vpop.f32.mrf.mxu1 }
0x3a50   :  { %16046 = vmatmul.mubr.msk.f32.vlgmr.msra.gmra.mxu0 %vm1030_vm7, %v7373_v9 }
0x3a51   :  { %v16042_v10 = vpop.f32.mrf.mxu1  ;;  %16055 = vmatprep.mubr.msk.f32.mxu0 %vm17983_vm6, %v17980_v14 }
0x3a53   :  { %v7525_v38 = vpop.f32.mrf.mxu1 }
0x3a54   :  { %v7529_v11 = vmul.f32 0.35355338, %v7525_v38 }
0x3a55   :  { %v16052_v55 = vpop.f32.mrf.mxu1 }
0x3a56   :  { %v7530_v19 = vadd.f32 %v7529_v11, %v18444_v26  ;;  %v7845_v55 = vld [vmem:[%s20066_s15 + $0x18] sm:$0xff] }
0x3a57   :  { %16074 = vmatprep.subr.mxu1 %v7845_v55 }
0x3a58   :  { %v7531_v23 = vsel %vm1030_vm7, %v7530_v19, -inf }
0x3a59   :  { %7532 = vmax.xlane.f32.xlu1 %v7531_v23 }
0x3a5d   :  { %5525 = vadd.xlane.f32.xlu1 %v5524_v30 }
0x3a61   :  { %5528 = vadd.xlane.f32.xlu1 %v5527_v18 }
0x3a65   :  { %7707 = vadd.xlane.f32.xlu1 %v7706_v17 }
0x3ae2   :  { %v7533_v59 = vpop.xlane.xlu1 %7532 }
0x3ae3   :  { %v7534_v13 = vsub.f32 %v7530_v19, %v7533_v59  ;;  %v7844_v19 = vld [vmem:[%s20066_s15 + $0x10] sm:$0xff] }
0x3ae5   :  { %v7535_v34 = vmul.f32 1.442695, %v7534_v13 }
0x3ae6   :  { %v5526_v39 = vpop.xlane.xlu1 %5525 }
0x3ae7   :  { %16790 = vpow2.f32 %v7535_v34  ;;  %v5530_v1 = vmul.f32 0.03125, %v5526_v39  ;;  %v14915_v34 = vld [vmem:[#allocation62] ss:$0 sm:$0xff] }
0x3ae9   :  { %v5532_v43 = vsub.f32 %v5522_v50, %v5530_v1 }
0x3aea   :  { %v5529_v27 = vpop.xlane.xlu1 %5528 }
0x3aeb   :  { %v5531_v53 = vmul.f32 0.03125, %v5529_v27  ;;  %v5534_v54 = vmul.f32 %v5532_v43, %v5532_v43 }
0x3aed   :  { %v5533_v9 = vsub.f32 %v5523_v29, %v5531_v53  ;;  %v5536_v38 = vsel %vm941_vm5, %v5534_v54, 0.0 }
0x3aee   :  { %v7708_v45 = vpop.xlane.xlu1 %7707 }
0x3aef   :  { %v7712_v47 = vmul.f32 0.03125, %v7708_v45  ;;  %v5535_v46 = vmul.f32 %v5533_v9, %v5533_v9  ;;  %v7750_v45 = vld [vmem:[%s20067_s17] sm:$0xff] }
0x3af1   :  { %v7714_v35 = vsub.f32 %v7704_v32, %v7712_v47  ;;  %v5539_v11 = vsel %vm941_vm5, %v5535_v46, 0.0 }
0x3af3   :  { %v7716_v48 = vmul.f32 %v7714_v35, %v7714_v35 }
0x3af4   :  { %v16791_v36 = vpop.eup %16790 }
0x3af5   :  { %v7537_v40 = vsel %vm1030_vm7, %v16791_v36, 0.0  ;;  %v7718_v51 = vsel %vm941_vm5, %v7716_v48, 0.0 }
0x3af6   :  { %7538 = vadd.xlane.f32.xlu0 %v7537_v40  ;;  %v7752_v40 = vld [vmem:[%s20067_s17 + $0x10] sm:$0xff] }
0x3b0c   :  { %7542 = vrot.lane.b32.xlu0 %v18986_v20, %s17994_s9 }
0x3b10   :  { %v7446_v42 = vpop.f32.mrf.mxu0 }
0x3b11   :  { %v7450_v44 = vadd.f32 %v7446_v42, %v19153_v60  ;;  %v14916_v42 = vld [vmem:[#allocation61] ss:$0 sm:$0xff] }
0x3b12   :  { %v16047_v12 = vpop.f32.mrf.mxu0 }
0x3b2b   :  { %7719 = vadd.xlane.f32.xlu0 %v7718_v51 }
0x3b7f   :  { %v7539_v52 = vpop.xlane.xlu0 %7538 }
0x3b80   :  { %16792 = vrcp.f32 %v7539_v52 }
0x3b83   :  { %v7543_v2 = vpop.permute.xlu0 %7542 }
0x3b84   :  { %16054 = vmatpush3.msra.mxu0 %v7543_v2 }
0x3b8d   :  { %v16793_v56 = vpop.eup %16792 }
0x3b8e   :  { %v7541_v22 = vmul.f32 %v16793_v56, %v16791_v36  ;;  %v7753_v36 = vld [vmem:[%s20067_s17 + $0x18] sm:$0xff] }
0x3b8f   :  { %16063 = vmatprep.subr.mxu0 %v7753_v36 }
0x3b90   :  { %16056 = vmatmul.mubr.msk.f32.vlgmr.msra.gmra.mxu0 %vm1030_vm7, %v7541_v22 }
0x3b91   :  { %16064 = vmatpush3.msra.mxu0 %v7753_v36 }
0x3b92   :  { %16065 = vmatprep.subr.mxu0 %v7752_v40 }
0x3b93   :  { %16066 = vmatpush3.msra.mxu0 %v7752_v40  ;;  %v19285_v40 = vld [vmem:[%s20068_s16] sm:$0xff] }
0x3bb4   :  { %v7720_v20 = vpop.xlane.xlu0 %7719 }
0x3bb5   :  { %v7724_v58 = vmul.f32 0.03125, %v7720_v20 }
0x3bb7   :  { %v7726_v60 = vadd.f32 1e-05, %v7724_v58 }
0x3bb9   :  { %16794 = vrsqrt.f32 %v7726_v60 }
0x3bc6   :  { %v16795_v61 = vpop.eup %16794 }
0x3bc7   :  { %v7730_v41 = vmul.f32 %v16795_v61, %v7714_v35  ;;  %v14962_v61 = vld [vmem:[#allocation3] ss:$0 sm:$0xff] }
0x3bc9   :  { %v7739_v63 = vmul.f32 %v19193_v62, %v7730_v41 }
0x3bcb   :  { %v19199_v0 = vadd.f32 %v19195_v49, %v7739_v63 }
0x3bcd   :  { %16071 = vmatprep.mubr.msk.f32.mxu0 %vm941_vm5, %v19199_v0 }
0x3c50   :  { %v7614_v33 = vpop.f32.mrf.mxu0 }
0x3c51   :  { %16061 = vmatmul.mubr.msk.f32.vlgmr.msra.gmra.mxu1 %vm1030_vm7, %v7614_v33 }
0x3c52   :  { %v16057_v8 = vpop.f32.mrf.mxu0  ;;  %16075 = vmatpush3.msra.mxu1 %v7845_v55 }
0x3c53   :  { %16076 = vmatprep.subr.mxu1 %v7844_v19 }
0x3c54   :  { %16077 = vmatpush3.msra.mxu1 %v7844_v19 }
0x3c55   :  { %16078 = vmatprep.subr.mxu1 %v7843_v37 }
0x3c56   :  { %16079 = vmatpush3.msra.mxu1 %v7843_v37 }
0x3d11   :  { %v7687_v16 = vpop.f32.mrf.mxu1 }
0x3d12   :  { %v7691_v3 = vadd.f32 %v7687_v16, %v7450_v44  ;;  %v7751_v44 = vld [vmem:[%s20067_s17 + $0x8] sm:$0xff] }
0x3d13   :  { %v16062_v4 = vpop.f32.mrf.mxu1  ;;  %16067 = vmatprep.subr.mxu0 %v7751_v44 }
0x3d14   :  { %7692 = vst.msk [vmem:[#allocation2 + $0x8] sm:$0xff] %vm941_vm5, %v7691_v3  ;;  %16068 = vmatpush3.msra.mxu0 %v7751_v44 }
0x3d15   :  { %16069 = vmatprep.subr.mxu0 %v7750_v45 }
0x3d16   :  { %16070 = vmatpush3.msra.mxu0 %v7750_v45 }
0x3d17   :  { %16085 = vmatprep.subr.mxu0 %v17980_v14 }
0x3d1b   :  { %v7694_v5 = vld [vmem:[#allocation2 + $0x8] sm:$0xff] }
0x3d1c   :  { %v7703_v6 = vadd.f32 %v14956_v28, %v7694_v5 }
0x3d1e   :  { %v7705_v7 = vadd.f32 %v7703_v6, %v18974_v15  ;;  %v7842_v15 = vld [vmem:[%s20066_s15] sm:$0xff] }
0x3d1f   :  { %16080 = vmatprep.subr.mxu1 %v7842_v15 }
0x3d20   :  { %v7709_v10 = vsel %vm941_vm5, %v7705_v7, 0.0  ;;  %16081 = vmatpush3.msra.mxu1 %v7842_v15 }
0x3d21   :  { %7710 = vadd.xlane.f32.xlu1 %v7709_v10  ;;  %16090 = vmatprep.subr.mxu1 %v17980_v14 }
0x3d25   :  { %5537 = vadd.xlane.f32.xlu1 %v5536_v38 }
0x3d29   :  { %5540 = vadd.xlane.f32.xlu1 %v5539_v11 }
0x3daa   :  { %v7711_v50 = vpop.xlane.xlu1 %7710 }
0x3dab   :  { %v7713_v23 = vmul.f32 0.03125, %v7711_v50 }
0x3dad   :  { %v7715_v24 = vsub.f32 %v7705_v7, %v7713_v23 }
0x3dae   :  { %v5538_v28 = vpop.xlane.xlu1 %5537 }
0x3daf   :  { %v5542_v29 = vmul.f32 0.03125, %v5538_v28  ;;  %v7717_v30 = vmul.f32 %v7715_v24, %v7715_v24 }
0x3db1   :  { %v5544_v31 = vadd.f32 1e-05, %v5542_v29  ;;  %v7721_v18 = vsel %vm941_vm5, %v7717_v30, 0.0 }
0x3db2   :  { %7722 = vadd.xlane.f32.xlu1 %v7721_v18  ;;  %v5541_v32 = vpop.xlane.xlu1 %5540 }
0x3db3   :  { %16796 = vrsqrt.f32 %v5544_v31  ;;  %v5543_v17 = vmul.f32 0.03125, %v5541_v32 }
0x3db5   :  { %v5545_v59 = vadd.f32 1e-05, %v5543_v17 }
0x3db7   :  { %16798 = vrsqrt.f32 %v5545_v59 }
0x3dc0   :  { %v16797_v13 = vpop.eup %16796 }
0x3dc1   :  { %v5548_v39 = vmul.f32 %v16797_v13, %v5532_v43 }
0x3dc3   :  { %v5557_v12 = vmul.f32 %v14915_v34, %v5548_v39  ;;  %v19289_v39 = vld [vmem:[%s20068_s16 + $0x8] sm:$0xff] }
0x3dc4   :  { %v16799_v27 = vpop.eup %16798 }
0x3dc5   :  { %v5549_v47 = vmul.f32 %v16799_v27, %v5533_v9  ;;  %v19219_v35 = vadd.f32 %v14916_v42, %v5557_v12 }
0x3dc7   :  { %v5558_v48 = vmul.f32 %v14915_v34, %v5549_v47  ;;  %16082 = vmatprep.mubr.msk.f32.mxu1 %vm941_vm5, %v19219_v35 }
0x3dc9   :  { %v19223_v51 = vadd.f32 %v14916_v42, %v5558_v48 }
0x3dcb   :  { %16083 = vmatmul.mubr.msk.f32.vlgmr.msra.gmra.mxu1 %vm941_vm5, %v19223_v51 }
0x3dcc   :  { %16092 = vmatprep.mubr.msk.f32.mxu1 %vm17983_vm6, %v17980_v14 }
0x3e3b   :  { %v7723_v52 = vpop.xlane.xlu1 %7722 }
0x3e3c   :  { %v7725_v2 = vmul.f32 0.03125, %v7723_v52 }
0x3e3e   :  { %v7727_v56 = vadd.f32 1e-05, %v7725_v2 }
0x3e40   :  { %16800 = vrsqrt.f32 %v7727_v56 }
0x3e4d   :  { %v16801_v22 = vpop.eup %16800 }
0x3e4e   :  { %v7731_v20 = vmul.f32 %v16801_v22, %v7715_v24 }
0x3e50   :  { %v7740_v58 = vmul.f32 %v19193_v62, %v7731_v20  ;;  %v14959_v62 = vld [vmem:[#allocation7] ss:$0 sm:$0xff] }
0x3e52   :  { %v19232_v60 = vadd.f32 %v19195_v49, %v7740_v58 }
0x3e54   :  { %16072 = vmatmul.mubr.msk.f32.vlgmr.msra.gmra.mxu0 %vm941_vm5, %v19232_v60 }
0x3e55   :  { %16087 = vmatprep.mubr.msk.f32.mxu0 %vm17983_vm6, %v17980_v14 }
0x3e8b   :  { %v16084_v41 = vpop.f32.mrf.mxu1 }
0x3e8c   :  { %v19238_v63 = vadd.f32 %v16084_v41, %v14962_v61 }
0x3e8d   :  { %v7925_v33 = vpop.f32.mrf.mxu1 }
0x3e8e   :  { %v19240_v8 = vadd.f32 %v14962_v61, %v7925_v33 }
0x3e90   :  { %8105 = vrot.lane.b32.xlu1 %v19240_v8, %s17986_s26  ;;  %16086 = vmatpush3.xpose.msk.msra.mxu0 %vm1030_vm7, %v19240_v8 }
0x3e91   :  { %16095 = vmatprep.subr.mxu0 %v17980_v14 }
0x3f02   :  { %v8106_v1 = vpop.permute.xlu1 %8105 }
0x3f14   :  { %v16073_v49 = vpop.f32.mrf.mxu0 }
0x3f15   :  { %v19247_v16 = vadd.f32 %v16073_v49, %v14959_v62 }
0x3f16   :  { %v7833_v3 = vpop.f32.mrf.mxu0 }
0x3f17   :  { %v19249_v4 = vadd.f32 %v14959_v62, %v7833_v3 }
0x3f19   :  { %8103 = vrot.lane.b32.xlu1 %v19249_v4, %s17986_s26  ;;  %16088 = vmatmul.mubr.msk.f32.vlgmr.msra.gmra.mxu0 %vm1030_vm7, %v19249_v4 }
0x3f1a   :  { %16096 = vmatpush3.xpose.msk.msra.mxu0 %vm1030_vm7, %v8106_v1  ;;  %16097 = vmatprep.mubr.msk.f32.mxu0 %vm17983_vm6, %v17980_v14 }
0x3f1b   :  { %16105 = vmatprep.subr.mxu0 %v17980_v14 }
0x3f8b   :  { %v8104_v5 = vpop.permute.xlu1 %8103 }
0x3f8c   :  { %16098 = vmatmul.mubr.msk.f32.vlgmr.msra.gmra.mxu0 %vm1030_vm7, %v8104_v5 }
0x3f8d   :  { %16107 = vmatprep.mubr.msk.f32.mxu0 %vm17983_vm6, %v17980_v14  ;;  %16106 = vmatpush3.msra.mxu0 %v19289_v39 }
0x3f8e   :  { %16115 = vmatprep.subr.mxu0 %v17980_v14 }
0x3fd9   :  { %v8010_v43 = vpop.f32.mrf.mxu0 }
0x3fda   :  { %v8014_v53 = vmul.f32 0.35355338, %v8010_v43 }
0x3fdb   :  { %v16089_v6 = vpop.f32.mrf.mxu0 }
0x3fdc   :  { %v8015_v7 = vadd.f32 %v8014_v53, %v18494_v57 }
0x3fde   :  { %v8016_v9 = vsel %vm1030_vm7, %v8015_v7, -inf }
0x3fdf   :  { %8017 = vmax.xlane.f32.xlu1 %v8016_v9 }
0x3ff0   :  { %8194 = vrot.lane.b32.xlu1 %v19240_v8, %s17985_s14 }
0x404c   :  { %v8177_v10 = vpop.f32.mrf.mxu0 }
0x404d   :  { %v8181_v54 = vmul.f32 0.35355338, %v8177_v10  ;;  %v19324_v10 = vld [vmem:[%s20068_s16 + $0x10] sm:$0xff] }
0x404e   :  { %v16099_v38 = vpop.f32.mrf.mxu0 }
0x404f   :  { %v8182_v46 = vadd.f32 %v8181_v54, %v18494_v57 }
0x4051   :  { %v8183_v11 = vsel %vm1030_vm7, %v8182_v46, -inf }
0x4052   :  { %8184 = vmax.xlane.f32.xlu0 %v8183_v11 }
0x4068   :  { %v8018_v55 = vpop.xlane.xlu1 %8017 }
0x4069   :  { %v8019_v19 = vsub.f32 %v8015_v7, %v8018_v55 }
0x406b   :  { %v8020_v37 = vmul.f32 1.442695, %v8019_v19 }
0x406c   :  { %v8195_v13 = vpop.permute.xlu1 %8194 }
0x406d   :  { %16802 = vpow2.f32 %v8020_v37 }
0x407a   :  { %v16803_v15 = vpop.eup %16802 }
0x407b   :  { %v8022_v50 = vsel %vm1030_vm7, %v16803_v15, 0.0 }
0x407c   :  { %8023 = vadd.xlane.f32.xlu0 %v8022_v50 }
0x40db   :  { %v8185_v23 = vpop.xlane.xlu0 %8184 }
0x40dc   :  { %v8186_v24 = vsub.f32 %v8182_v46, %v8185_v23 }
0x40de   :  { %v8187_v28 = vmul.f32 1.442695, %v8186_v24 }
0x40e0   :  { %16804 = vpow2.f32 %v8187_v28 }
0x40ed   :  { %v16805_v29 = vpop.eup %16804 }
0x40ee   :  { %v8189_v30 = vsel %vm1030_vm7, %v16805_v29, 0.0 }
0x40ef   :  { %8190 = vadd.xlane.f32.xlu0 %v8189_v30 }
0x4105   :  { %8027 = vrot.lane.b32.xlu0 %v19240_v8, %s17984_s23  ;;  %v8024_v31 = vpop.xlane.xlu0 %8023 }
0x4106   :  { %16806 = vrcp.f32 %v8024_v31 }
0x4109   :  { %8418 = vrot.lane.b32.xlu0 %v19240_v8, %s17987_s28 }
0x410d   :  { %8416 = vrot.lane.b32.xlu0 %v19249_v4, %s17987_s28 }
0x4113   :  { %v16807_v32 = vpop.eup %16806 }
0x4114   :  { %v8026_v59 = vmul.f32 %v16807_v32, %v16803_v15 }
0x4178   :  { %v8191_v18 = vpop.xlane.xlu0 %8190 }
0x4179   :  { %16808 = vrcp.f32 %v8191_v18 }
0x417c   :  { %v8028_v17 = vpop.permute.xlu0 %8027 }
0x417d   :  { %16091 = vmatpush3.msra.mxu1 %v8028_v17 }
0x417e   :  { %16093 = vmatmul.mubr.msk.f32.vlgmr.msra.gmra.mxu1 %vm1030_vm7, %v8026_v59  ;;  %16100 = vmatprep.subr.mxu1 %v17980_v14 }
0x417f   :  { %16101 = vmatpush3.msra.mxu1 %v8195_v13  ;;  %16102 = vmatprep.mubr.msk.f32.mxu1 %vm17983_vm6, %v17980_v14 }
0x4180   :  { %16110 = vmatprep.subr.mxu1 %v17980_v14  ;;  %v8419_v12 = vpop.permute.xlu0 %8418 }
0x4184   :  { %v8417_v47 = vpop.permute.xlu0 %8416 }
0x4186   :  { %v16809_v34 = vpop.eup %16808 }
0x4187   :  { %v8193_v36 = vmul.f32 %v16809_v34, %v16805_v29  ;;  %v19359_v34 = vld [vmem:[%s20068_s16 + $0x18] sm:$0xff] }
0x4189   :  { %16103 = vmatmul.mubr.msk.f32.vlgmr.msra.gmra.mxu1 %vm1030_vm7, %v8193_v36 }
0x418a   :  { %16112 = vmatprep.mubr.msk.f32.mxu1 %vm17983_vm6, %v17980_v14  ;;  %16111 = vmatpush3.msra.mxu1 %v19285_v40 }
0x418b   :  { %16120 = vmatprep.subr.mxu1 %v17980_v14 }
0x423e   :  { %v8099_v42 = vpop.f32.mrf.mxu1 }
0x423f   :  { %16113 = vmatmul.mubr.msk.f32.vlgmr.msra.gmra.mxu1 %vm1030_vm7, %v8099_v42 }
0x4240   :  { %v16094_v44 = vpop.f32.mrf.mxu1  ;;  %16122 = vmatprep.mubr.msk.f32.mxu1 %vm17983_vm6, %v17980_v14 }
0x4249   :  { %v8266_v27 = vpop.f32.mrf.mxu1 }
0x424a   :  { %16108 = vmatmul.mubr.msk.f32.vlgmr.msra.gmra.mxu0 %vm1030_vm7, %v8266_v27 }
0x424b   :  { %16116 = vmatpush3.xpose.msk.msra.mxu0 %vm1030_vm7, %v8419_v12  ;;  %v16104_v45 = vpop.f32.mrf.mxu1  ;;  %16117 = vmatprep.mubr.msk.f32.mxu0 %vm17983_vm6, %v17980_v14 }
0x424c   :  { %16125 = vmatprep.subr.mxu0 %v17980_v14 }
0x424e   :  { %16118 = vmatmul.mubr.msk.f32.vlgmr.msra.gmra.mxu0 %vm1030_vm7, %v8417_v47 }
0x424f   :  { %16127 = vmatprep.mubr.msk.f32.mxu0 %vm17983_vm6, %v17980_v14  ;;  %16126 = vmatpush3.msra.mxu0 %v19324_v10 }
0x4250   :  { %16135 = vmatprep.subr.mxu0 %v17980_v14 }
0x42ff   :  { %v8412_v48 = vpop.f32.mrf.mxu1 }
0x4301   :  { %v16114_v52 = vpop.f32.mrf.mxu1 }
0x430a   :  { %v8339_v2 = vpop.f32.mrf.mxu0 }
0x430b   :  { %v8413_v56 = vadd.f32 %v8412_v48, %v8339_v2 }
0x430c   :  { %v16109_v22 = vpop.f32.mrf.mxu0 }
0x430e   :  { %v8490_v20 = vpop.f32.mrf.mxu0 }
0x430f   :  { %v8494_v58 = vmul.f32 0.35355338, %v8490_v20 }
0x4310   :  { %v16119_v61 = vpop.f32.mrf.mxu0 }
0x4311   :  { %v8495_v41 = vadd.f32 %v8494_v58, %v18494_v57 }
0x4313   :  { %v8496_v33 = vsel %vm1030_vm7, %v8495_v41, -inf }
0x4314   :  { %8497 = vmax.xlane.f32.xlu0 %v8496_v33 }
0x432a   :  { %8507 = vrot.lane.b32.xlu0 %v19240_v8, %s17989_s2 }
0x432e   :  { %8657 = vrot.lane.b32.xlu0 %v19249_v4, %s17992_s0 }
0x439d   :  { %v8498_v62 = vpop.xlane.xlu0 %8497 }
0x439e   :  { %v8499_v49 = vsub.f32 %v8495_v41, %v8498_v62 }
0x43a0   :  { %v8500_v3 = vmul.f32 1.442695, %v8499_v49 }
0x43a1   :  { %v8508_v1 = vpop.permute.xlu0 %8507 }
0x43a2   :  { %16810 = vpow2.f32 %v8500_v3  ;;  %16121 = vmatpush3.msra.mxu1 %v8508_v1 }
0x43a3   :  { %16130 = vmatprep.subr.mxu1 %v17980_v14 }
0x43a5   :  { %v8658_v9 = vpop.permute.xlu0 %8657 }
0x43af   :  { %v16811_v5 = vpop.eup %16810 }
0x43b0   :  { %v8502_v43 = vsel %vm1030_vm7, %v16811_v5, 0.0 }
0x43b1   :  { %8503 = vadd.xlane.f32.xlu1 %v8502_v43 }
0x43c2   :  { %8659 = vrot.lane.b32.xlu1 %v19240_v8, %s17992_s0 }
0x443a   :  { %v8504_v53 = vpop.xlane.xlu1 %8503 }
0x443b   :  { %16812 = vrcp.f32 %v8504_v53 }
0x443e   :  { %v8660_v7 = vpop.permute.xlu1 %8659 }
0x4448   :  { %v16813_v6 = vpop.eup %16812 }
0x4449   :  { %v8506_v4 = vmul.f32 %v16813_v6, %v16811_v5 }
0x444b   :  { %16123 = vmatmul.mubr.msk.f32.vlgmr.msra.gmra.mxu1 %vm1030_vm7, %v8506_v4 }
0x444c   :  { %16131 = vmatpush3.xpose.msk.msra.mxu1 %vm1030_vm7, %v8660_v7  ;;  %16132 = vmatprep.mubr.msk.f32.mxu1 %vm17983_vm6, %v17980_v14 }
0x444d   :  { %16140 = vmatprep.subr.mxu1 %v17980_v14 }
0x444f   :  { %16133 = vmatmul.mubr.msk.f32.vlgmr.msra.gmra.mxu1 %vm1030_vm7, %v8658_v9 }
0x4450   :  { %16142 = vmatprep.mubr.msk.f32.mxu1 %vm17983_vm6, %v17980_v14  ;;  %16141 = vmatpush3.msra.mxu1 %v19359_v34 }
0x4451   :  { %16150 = vmatprep.subr.mxu1 %v17980_v14 }
0x450b   :  { %v8579_v54 = vpop.f32.mrf.mxu1 }
0x450c   :  { %16128 = vmatmul.mubr.msk.f32.vlgmr.msra.gmra.mxu0 %vm1030_vm7, %v8579_v54 }
0x450d   :  { %v16124_v38 = vpop.f32.mrf.mxu1  ;;  %16137 = vmatprep.mubr.msk.f32.mxu0 %vm17983_vm6, %v17980_v14 }
0x450f   :  { %v8731_v46 = vpop.f32.mrf.mxu1 }
0x4510   :  { %v8735_v11 = vmul.f32 0.35355338, %v8731_v46 }
0x4511   :  { %v16134_v55 = vpop.f32.mrf.mxu1 }
0x4512   :  { %v8736_v19 = vadd.f32 %v8735_v11, %v18494_v57 }
0x4514   :  { %v8737_v37 = vsel %vm1030_vm7, %v8736_v19, -inf }
0x4515   :  { %8738 = vmax.xlane.f32.xlu0 %v8737_v37 }
0x452b   :  { %8748 = vrot.lane.b32.xlu0 %v19240_v8, %s17991_s25 }
0x452f   :  { %9064 = vrot.lane.b32.xlu0 %v19247_v16, %s17986_s26 }
0x459e   :  { %v8739_v15 = vpop.xlane.xlu0 %8738 }
0x459f   :  { %v8740_v50 = vsub.f32 %v8736_v19, %v8739_v15 }
0x45a1   :  { %v8741_v23 = vmul.f32 1.442695, %v8740_v50 }
0x45a2   :  { %v8749_v24 = vpop.permute.xlu0 %8748 }
0x45a3   :  { %16814 = vpow2.f32 %v8741_v23  ;;  %16136 = vmatpush3.msra.mxu0 %v8749_v24 }
0x45a4   :  { %16145 = vmatprep.subr.mxu0 %v17980_v14 }
0x45a6   :  { %v9065_v13 = vpop.permute.xlu0 %9064 }
0x45b0   :  { %v16815_v28 = vpop.eup %16814 }
0x45b1   :  { %v8743_v29 = vsel %vm1030_vm7, %v16815_v28, 0.0 }
0x45b2   :  { %8744 = vadd.xlane.f32.xlu1 %v8743_v29 }
0x45c3   :  { %9066 = vrot.lane.b32.xlu1 %v19238_v63, %s17986_s26 }
0x45cc   :  { %v8652_v30 = vpop.f32.mrf.mxu0 }
0x45cd   :  { %v8656_v8 = vadd.f32 %v8652_v30, %v8413_v56 }
0x45ce   :  { %v16129_v31 = vpop.f32.mrf.mxu0 }
0x463b   :  { %v8745_v18 = vpop.xlane.xlu1 %8744 }
0x463c   :  { %16816 = vrcp.f32 %v8745_v18 }
0x463f   :  { %v9067_v59 = vpop.permute.xlu1 %9066 }
0x4649   :  { %v16817_v32 = vpop.eup %16816 }
0x464a   :  { %v8747_v17 = vmul.f32 %v16817_v32, %v16815_v28 }
0x464c   :  { %16138 = vmatmul.mubr.msk.f32.vlgmr.msra.gmra.mxu0 %vm1030_vm7, %v8747_v17 }
0x464d   :  { %16146 = vmatpush3.xpose.msk.msra.mxu0 %vm1030_vm7, %v19238_v63  ;;  %16147 = vmatprep.mubr.msk.f32.mxu0 %vm17983_vm6, %v17980_v14 }
0x464e   :  { %16155 = vmatprep.subr.mxu0 %v17980_v14 }
0x4650   :  { %16148 = vmatmul.mubr.msk.f32.vlgmr.msra.gmra.mxu0 %vm1030_vm7, %v19247_v16 }
0x4651   :  { %16156 = vmatpush3.xpose.msk.msra.mxu0 %vm1030_vm7, %v9067_v59  ;;  %16157 = vmatprep.mubr.msk.f32.mxu0 %vm17983_vm6, %v17980_v14 }
0x4652   :  { %16165 = vmatprep.subr.mxu0 %v17980_v14 }
0x4654   :  { %16158 = vmatmul.mubr.msk.f32.vlgmr.msra.gmra.mxu0 %vm1030_vm7, %v9065_v13 }
0x4655   :  { %16166 = vmatpush3.msra.mxu0 %v19289_v39  ;;  %16167 = vmatprep.mubr.msk.f32.mxu0 %vm17983_vm6, %v17980_v14 }
0x4656   :  { %16175 = vmatprep.subr.mxu0 %v17980_v14 }
0x470c   :  { %v8820_v36 = vpop.f32.mrf.mxu0 }
0x470d   :  { %16143 = vmatmul.mubr.msk.f32.vlgmr.msra.gmra.mxu1 %vm1030_vm7, %v8820_v36 }
0x470e   :  { %v16139_v42 = vpop.f32.mrf.mxu0  ;;  %16152 = vmatprep.mubr.msk.f32.mxu1 %vm17983_vm6, %v17980_v14 }
0x4710   :  { %v8971_v44 = vpop.f32.mrf.mxu0 }
0x4711   :  { %v8975_v39 = vmul.f32 0.35355338, %v8971_v44 }
0x4712   :  { %v16149_v12 = vpop.f32.mrf.mxu0 }
0x4713   :  { %v8976_v27 = vadd.f32 %v8975_v39, %v18437_v21 }
0x4714   :  { %v9138_v45 = vpop.f32.mrf.mxu0 }
0x4715   :  { %v9142_v47 = vmul.f32 0.35355338, %v9138_v45  ;;  %v8977_v48 = vsel %vm1030_vm7, %v8976_v27, -inf }
0x4716   :  { %8978 = vmax.xlane.f32.xlu0 %v8977_v48  ;;  %v16159_v52 = vpop.f32.mrf.mxu0 }
0x4717   :  { %v9143_v2 = vadd.f32 %v9142_v47, %v18437_v21 }
0x4719   :  { %v9144_v56 = vsel %vm1030_vm7, %v9143_v2, -inf }
0x471a   :  { %9145 = vmax.xlane.f32.xlu1 %v9144_v56 }
0x472b   :  { %8988 = vrot.lane.b32.xlu1 %v19238_v63, %s17984_s23 }
0x472f   :  { %9379 = vrot.lane.b32.xlu1 %v19238_v63, %s17987_s28 }
0x4733   :  { %9377 = vrot.lane.b32.xlu1 %v19247_v16, %s17987_s28 }
0x479f   :  { %v8979_v22 = vpop.xlane.xlu0 %8978 }
0x47a0   :  { %v8980_v20 = vsub.f32 %v8976_v27, %v8979_v22 }
0x47a2   :  { %v8981_v58 = vmul.f32 1.442695, %v8980_v20 }
0x47a3   :  { %v9146_v61 = vpop.xlane.xlu1 %9145 }
0x47a4   :  { %16818 = vpow2.f32 %v8981_v58  ;;  %v9147_v41 = vsub.f32 %v9143_v2, %v9146_v61  ;;  %v14997_v2 = vld [vmem:[#allocation5] ss:$0 sm:$0xff] }
0x47a6   :  { %v9148_v33 = vmul.f32 1.442695, %v9147_v41 }
0x47a7   :  { %v8989_v62 = vpop.permute.xlu1 %8988 }
0x47a8   :  { %16820 = vpow2.f32 %v9148_v33  ;;  %16151 = vmatpush3.msra.mxu1 %v8989_v62 }
0x47a9   :  { %16160 = vmatprep.subr.mxu1 %v17980_v14 }
0x47ab   :  { %v9380_v19 = vpop.permute.xlu1 %9379 }
0x47b1   :  { %v16819_v49 = vpop.eup %16818 }
0x47b2   :  { %v8983_v3 = vsel %vm1030_vm7, %v16819_v49, 0.0 }
0x47b3   :  { %8984 = vadd.xlane.f32.xlu0 %v8983_v3 }
0x47b5   :  { %v16821_v1 = vpop.eup %16820 }
0x47b6   :  { %v9150_v5 = vsel %vm1030_vm7, %v16821_v1, 0.0 }
0x47b7   :  { %9151 = vadd.xlane.f32.xlu0 %v9150_v5 }
0x47cd   :  { %9155 = vrot.lane.b32.xlu0 %v19238_v63, %s17985_s14  ;;  %v8893_v43 = vpop.f32.mrf.mxu1 }
0x47ce   :  { %v8897_v53 = vadd.f32 %v8893_v43, %v8656_v8 }
0x47cf   :  { %v16144_v6 = vpop.f32.mrf.mxu1 }
0x47d0   :  { %8898 = vst.msk [vmem:[#allocation2] sm:$0xff] %vm941_vm5, %v8897_v53 }
0x47d7   :  { %v9860_v52 = vld [vmem:[#allocation2] sm:$0xff] }
0x47d8   :  { %v9869_v20 = vadd.f32 %v14997_v2, %v9860_v52  ;;  %v10015_v52 = vld [vmem:[%s20070_s19 + $0x20] sm:$0xff] }
0x47da   :  { %v9871_v41 = vadd.f32 %v9869_v20, %v19199_v0 }
0x47dc   :  { %v9873_v33 = vsel %vm941_vm5, %v9871_v41, 0.0 }
0x483c   :  { %v8985_v4 = vpop.xlane.xlu0 %8984 }
0x483d   :  { %16822 = vrcp.f32 %v8985_v4 }
0x4840   :  { %v9152_v7 = vpop.xlane.xlu0 %9151 }
0x4841   :  { %16824 = vrcp.f32 %v9152_v7 }
0x4844   :  { %v9156_v38 = vpop.permute.xlu0 %9155 }
0x484a   :  { %v16823_v9 = vpop.eup %16822 }
0x484b   :  { %v8987_v54 = vmul.f32 %v16823_v9, %v16819_v49 }
0x484d   :  { %16153 = vmatmul.mubr.msk.f32.vlgmr.msra.gmra.mxu1 %vm1030_vm7, %v8987_v54 }
0x484e   :  { %v16825_v46 = vpop.eup %16824  ;;  %16161 = vmatpush3.msra.mxu1 %v9156_v38  ;;  %16162 = vmatprep.mubr.msk.f32.mxu1 %vm17983_vm6, %v17980_v14 }
0x484f   :  { %v9154_v11 = vmul.f32 %v16825_v46, %v16821_v1  ;;  %16170 = vmatprep.subr.mxu1 %v17980_v14 }
0x4851   :  { %16163 = vmatmul.mubr.msk.f32.vlgmr.msra.gmra.mxu1 %vm1030_vm7, %v9154_v11 }
0x4852   :  { %16171 = vmatpush3.msra.mxu1 %v19285_v40  ;;  %16172 = vmatprep.mubr.msk.f32.mxu1 %vm17983_vm6, %v17980_v14  ;;  %v9378_v40 = vpop.permute.xlu1 %9377 }
0x4853   :  { %16180 = vmatprep.subr.mxu1 %v17980_v14 }
0x490d   :  { %v9060_v55 = vpop.f32.mrf.mxu1 }
0x490e   :  { %16173 = vmatmul.mubr.msk.f32.vlgmr.msra.gmra.mxu1 %vm1030_vm7, %v9060_v55 }
0x490f   :  { %v16154_v37 = vpop.f32.mrf.mxu1  ;;  %16182 = vmatprep.mubr.msk.f32.mxu1 %vm17983_vm6, %v17980_v14 }
0x4911   :  { %v9227_v15 = vpop.f32.mrf.mxu1 }
0x4912   :  { %16168 = vmatmul.mubr.msk.f32.vlgmr.msra.gmra.mxu0 %vm1030_vm7, %v9227_v15 }
0x4913   :  { %16176 = vmatpush3.xpose.msk.msra.mxu0 %vm1030_vm7, %v9380_v19  ;;  %v16164_v50 = vpop.f32.mrf.mxu1  ;;  %16177 = vmatprep.mubr.msk.f32.mxu0 %vm17983_vm6, %v17980_v14 }
0x4914   :  { %16185 = vmatprep.subr.mxu0 %v17980_v14 }
0x4916   :  { %16178 = vmatmul.mubr.msk.f32.vlgmr.msra.gmra.mxu0 %vm1030_vm7, %v9378_v40 }
0x4917   :  { %16186 = vmatpush3.msra.mxu0 %v19324_v10  ;;  %16187 = vmatprep.mubr.msk.f32.mxu0 %vm17983_vm6, %v17980_v14 }
0x4918   :  { %16195 = vmatprep.subr.mxu0 %v17980_v14 }
0x49ce   :  { %v9373_v23 = vpop.f32.mrf.mxu1 }
0x49d0   :  { %v16174_v24 = vpop.f32.mrf.mxu1 }
0x49d2   :  { %v9300_v28 = vpop.f32.mrf.mxu0 }
0x49d3   :  { %v9374_v29 = vadd.f32 %v9373_v23, %v9300_v28 }
0x49d4   :  { %v16169_v30 = vpop.f32.mrf.mxu0 }
0x49d6   :  { %v9451_v8 = vpop.f32.mrf.mxu0 }
0x49d7   :  { %v9455_v31 = vmul.f32 0.35355338, %v9451_v8 }
0x49d8   :  { %v16179_v18 = vpop.f32.mrf.mxu0 }
0x49d9   :  { %v9456_v32 = vadd.f32 %v9455_v31, %v18437_v21 }
0x49db   :  { %v9457_v17 = vsel %vm1030_vm7, %v9456_v32, -inf }
0x49dc   :  { %9458 = vmax.xlane.f32.xlu0 %v9457_v17 }
0x49f2   :  { %9468 = vrot.lane.b32.xlu0 %v19238_v63, %s17989_s2 }
0x49f6   :  { %9618 = vrot.lane.b32.xlu0 %v19247_v16, %s17992_s0 }
0x4a65   :  { %v9459_v10 = vpop.xlane.xlu0 %9458 }
0x4a66   :  { %v9460_v59 = vsub.f32 %v9456_v32, %v9459_v10 }
0x4a68   :  { %v9461_v13 = vmul.f32 1.442695, %v9460_v59  ;;  %v14998_v59 = vld [vmem:[#allocation16] ss:$0 sm:$0xff] }
0x4a69   :  { %v9469_v36 = vpop.permute.xlu0 %9468 }
0x4a6a   :  { %16826 = vpow2.f32 %v9461_v13  ;;  %16181 = vmatpush3.msra.mxu1 %v9469_v36  ;;  %v14999_v36 = vld [vmem:[#allocation14] ss:$0 sm:$0xff] }
0x4a6b   :  { %16190 = vmatprep.subr.mxu1 %v17980_v14 }
0x4a6d   :  { %v9619_v45 = vpop.permute.xlu0 %9618 }
0x4a77   :  { %v16827_v42 = vpop.eup %16826 }
0x4a78   :  { %v9463_v44 = vsel %vm1030_vm7, %v16827_v42, 0.0 }
0x4a79   :  { %9464 = vadd.xlane.f32.xlu1 %v9463_v44 }
0x4a8a   :  { %9620 = vrot.lane.b32.xlu1 %v19238_v63, %s17992_s0 }
0x4b02   :  { %v9465_v39 = vpop.xlane.xlu1 %9464 }
0x4b03   :  { %16828 = vrcp.f32 %v9465_v39  ;;  %v9920_v39 = vld [vmem:[%s20069_s18 + $0x18] sm:$0xff] }
0x4b06   :  { %v9621_v16 = vpop.permute.xlu1 %9620 }
0x4b10   :  { %v16829_v12 = vpop.eup %16828 }
0x4b11   :  { %v9467_v27 = vmul.f32 %v16829_v12, %v16827_v42  ;;  %v9919_v12 = vld [vmem:[%s20069_s18 + $0x10] sm:$0xff] }
0x4b13   :  { %16183 = vmatmul.mubr.msk.f32.vlgmr.msra.gmra.mxu1 %vm1030_vm7, %v9467_v27  ;;  %v9918_v27 = vld [vmem:[%s20069_s18 + $0x8] sm:$0xff] }
0x4b14   :  { %16191 = vmatpush3.xpose.msk.msra.mxu1 %vm1030_vm7, %v9621_v16  ;;  %16192 = vmatprep.mubr.msk.f32.mxu1 %vm17983_vm6, %v17980_v14  ;;  %v9917_v16 = vld [vmem:[%s20069_s18] sm:$0xff] }
0x4b15   :  { %16200 = vmatprep.subr.mxu1 %v17980_v14 }
0x4b17   :  { %16193 = vmatmul.mubr.msk.f32.vlgmr.msra.gmra.mxu1 %vm1030_vm7, %v9619_v45  ;;  %v10018_v45 = vld [vmem:[%s20070_s19 + $0x38] sm:$0xff] }
0x4b18   :  { %16201 = vmatpush3.msra.mxu1 %v19359_v34  ;;  %16202 = vmatprep.mubr.msk.f32.mxu1 %vm17983_vm6, %v17980_v14 }
0x4b19   :  { %16216 = vmatprep.subr.mxu1 %v10018_v45 }
0x4bd3   :  { %v9540_v47 = vpop.f32.mrf.mxu1 }
0x4bd4   :  { %16188 = vmatmul.mubr.msk.f32.vlgmr.msra.gmra.mxu0 %vm1030_vm7, %v9540_v47  ;;  %v10017_v47 = vld [vmem:[%s20070_s19 + $0x30] sm:$0xff] }
0x4bd5   :  { %v16184_v48 = vpop.f32.mrf.mxu1  ;;  %16197 = vmatprep.mubr.msk.f32.mxu0 %vm17983_vm6, %v17980_v14 }
0x4bd6   :  { %v10016_v48 = vld [vmem:[%s20070_s19 + $0x28] sm:$0xff] }
0x4bd7   :  { %v9692_v56 = vpop.f32.mrf.mxu1 }
0x4bd8   :  { %v9696_v22 = vmul.f32 0.35355338, %v9692_v56 }
0x4bd9   :  { %v16194_v58 = vpop.f32.mrf.mxu1 }
0x4bda   :  { %v9697_v61 = vadd.f32 %v9696_v22, %v18437_v21 }
0x4bdc   :  { %v9698_v34 = vsel %vm1030_vm7, %v9697_v61, -inf }
0x4bdd   :  { %9699 = vmax.xlane.f32.xlu1 %v9698_v34 }
0x4be1   :  { %9874 = vadd.xlane.f32.xlu1 %v9873_v33  ;;  %v10013_v33 = vld [vmem:[%s20070_s19 + $0x10] sm:$0xff] }
0x4c66   :  { %v9700_v62 = vpop.xlane.xlu1 %9699 }
0x4c67   :  { %v9701_v49 = vsub.f32 %v9697_v61, %v9700_v62  ;;  %v10012_v62 = vld [vmem:[%s20070_s19 + $0x8] sm:$0xff] }
0x4c69   :  { %v9702_v3 = vmul.f32 1.442695, %v9701_v49  ;;  %v10011_v49 = vld [vmem:[%s20070_s19] sm:$0xff] }
0x4c6b   :  { %16830 = vpow2.f32 %v9702_v3  ;;  %v15000_v3 = vld [vmem:[#allocation8] ss:$0 sm:$0xff] }
0x4c78   :  { %v16831_v1 = vpop.eup %16830 }
0x4c79   :  { %v9704_v5 = vsel %vm1030_vm7, %v16831_v1, 0.0 }
0x4c7a   :  { %9705 = vadd.xlane.f32.xlu0 %v9704_v5 }
0x4c90   :  { %9709 = vrot.lane.b32.xlu0 %v19238_v63, %s17991_s25  ;;  %v9875_v63 = vpop.xlane.xlu1 %9874 }
0x4c91   :  { %v9879_v19 = vmul.f32 0.03125, %v9875_v63 }
0x4c93   :  { %v9881_v15 = vsub.f32 %v9871_v41, %v9879_v19  ;;  %v10014_v41 = vld [vmem:[%s20070_s19 + $0x18] sm:$0xff] }
0x4c94   :  { %v9613_v43 = vpop.f32.mrf.mxu0 }
0x4c95   :  { %v9617_v53 = vadd.f32 %v9613_v43, %v9374_v29  ;;  %v9883_v24 = vmul.f32 %v9881_v15, %v9881_v15 }
0x4c96   :  { %v16189_v6 = vpop.f32.mrf.mxu0 }
0x4c97   :  { %v9885_v28 = vsel %vm941_vm5, %v9883_v24, 0.0 }
0x4d03   :  { %v9706_v4 = vpop.xlane.xlu0 %9705 }
0x4d04   :  { %16832 = vrcp.f32 %v9706_v4 }
0x4d07   :  { %v9710_v0 = vpop.permute.xlu0 %9709 }
0x4d08   :  { %16196 = vmatpush3.msra.mxu0 %v9710_v0 }
0x4d09   :  { %16205 = vmatprep.subr.mxu0 %v9920_v39 }
0x4d11   :  { %v16833_v7 = vpop.eup %16832 }
0x4d12   :  { %v9708_v9 = vmul.f32 %v16833_v7, %v16831_v1  ;;  %v15003_v7 = vld [vmem:[#allocation10] ss:$0 sm:$0xff] }
0x4d14   :  { %16198 = vmatmul.mubr.msk.f32.vlgmr.msra.gmra.mxu0 %vm1030_vm7, %v9708_v9 }
0x4d15   :  { %16206 = vmatpush3.msra.mxu0 %v9920_v39 }
0x4d16   :  { %16207 = vmatprep.subr.mxu0 %v9919_v12 }
0x4d17   :  { %16208 = vmatpush3.msra.mxu0 %v9919_v12  ;;  %v15007_v12 = vld [vmem:[#allocation17] ss:$0 sm:$0xff] }
0x4d18   :  { %16209 = vmatprep.subr.mxu0 %v9918_v27 }
0x4d19   :  { %16210 = vmatpush3.msra.mxu0 %v9918_v27 }
0x4d1a   :  { %16211 = vmatprep.subr.mxu0 %v9917_v16 }
0x4d1b   :  { %16212 = vmatpush3.msra.mxu0 %v9917_v16 }
0x4dd4   :  { %v9781_v54 = vpop.f32.mrf.mxu0 }
0x4dd5   :  { %16203 = vmatmul.mubr.msk.f32.vlgmr.msra.gmra.mxu1 %vm1030_vm7, %v9781_v54 }
0x4dd6   :  { %v16199_v38 = vpop.f32.mrf.mxu0  ;;  %16217 = vmatpush3.msra.mxu1 %v10018_v45 }
0x4dd7   :  { %16218 = vmatprep.subr.mxu1 %v10017_v47 }
0x4dd8   :  { %16219 = vmatpush3.msra.mxu1 %v10017_v47 }
0x4dd9   :  { %16220 = vmatprep.subr.mxu1 %v10016_v48 }
0x4dda   :  { %16221 = vmatpush3.msra.mxu1 %v10016_v48 }
0x4ddb   :  { %16222 = vmatprep.subr.mxu1 %v10015_v52 }
0x4ddc   :  { %16223 = vmatpush3.msra.mxu1 %v10015_v52 }
0x4ddd   :  { %16224 = vmatprep.subr.mxu1 %v10014_v41 }
0x4dde   :  { %16225 = vmatpush3.msra.mxu1 %v10014_v41 }
0x4ddf   :  { %16226 = vmatprep.subr.mxu1 %v10013_v33 }
0x4de0   :  { %16227 = vmatpush3.msra.mxu1 %v10013_v33 }
0x4de1   :  { %16228 = vmatprep.subr.mxu1 %v10012_v62 }
0x4de2   :  { %16229 = vmatpush3.msra.mxu1 %v10012_v62 }
0x4de3   :  { %16230 = vmatprep.subr.mxu1 %v10011_v49 }
0x4de4   :  { %16231 = vmatpush3.msra.mxu1 %v10011_v49 }
0x4de5   :  { %16251 = vmatprep.subr.mxu1 %v17980_v14 }
0x4e95   :  { %v9854_v46 = vpop.f32.mrf.mxu1 }
0x4e96   :  { %v9858_v11 = vadd.f32 %v9854_v46, %v9617_v53 }
0x4e97   :  { %v16204_v55 = vpop.f32.mrf.mxu1 }
0x4e98   :  { %9859 = vst.msk [vmem:[#allocation2 + $0x8] sm:$0xff] %vm941_vm5, %v9858_v11 }
0x4e9f   :  { %v9861_v37 = vld [vmem:[#allocation2 + $0x8] sm:$0xff] }
0x4ea0   :  { %v9870_v50 = vadd.f32 %v14997_v2, %v9861_v37 }
0x4ea2   :  { %v9872_v40 = vadd.f32 %v9870_v50, %v19232_v60 }
0x4ea4   :  { %v9876_v23 = vsel %vm941_vm5, %v9872_v40, 0.0 }
0x4ea5   :  { %9877 = vadd.xlane.f32.xlu1 %v9876_v23 }
0x4ea9   :  { %9886 = vadd.xlane.f32.xlu1 %v9885_v28 }
0x4f2e   :  { %v9878_v29 = vpop.xlane.xlu1 %9877 }
0x4f2f   :  { %v9880_v30 = vmul.f32 0.03125, %v9878_v29 }
0x4f31   :  { %v9882_v8 = vsub.f32 %v9872_v40, %v9880_v30 }
0x4f32   :  { %v9887_v31 = vpop.xlane.xlu1 %9886 }
0x4f33   :  { %v9891_v18 = vmul.f32 0.03125, %v9887_v31  ;;  %v9884_v32 = vmul.f32 %v9882_v8, %v9882_v8  ;;  %v10155_v31 = vld [vmem:[%s20071_s22 + $0x10] sm:$0xff] }
0x4f35   :  { %v9893_v17 = vadd.f32 1e-05, %v9891_v18  ;;  %v9888_v10 = vsel %vm941_vm5, %v9884_v32, 0.0  ;;  %v10154_v18 = vld [vmem:[%s20071_s22 + $0x8] sm:$0xff]  ;;  %v10153_v32 = vld [vmem:[%s20071_s22] sm:$0xff] }
0x4f36   :  { %9889 = vadd.xlane.f32.xlu1 %v9888_v10 }
0x4f37   :  { %16834 = vrsqrt.f32 %v9893_v17 }
0x4f44   :  { %v16835_v60 = vpop.eup %16834 }
0x4f45   :  { %v9897_v13 = vmul.f32 %v16835_v60, %v9881_v15 }
0x4f47   :  { %v9906_v42 = vmul.f32 %v14998_v59, %v9897_v13 }
0x4f49   :  { %v19440_v44 = vadd.f32 %v14999_v36, %v9906_v42 }
0x4f4b   :  { %16213 = vmatprep.mubr.msk.f32.mxu0 %vm941_vm5, %v19440_v44 }
0x4fbf   :  { %v9890_v2 = vpop.xlane.xlu1 %9889 }
0x4fc0   :  { %v9892_v56 = vmul.f32 0.03125, %v9890_v2  ;;  %v15008_v2 = vld [vmem:[#allocation41] ss:$0 sm:$0xff] }
0x4fc2   :  { %v9894_v22 = vadd.f32 1e-05, %v9892_v56 }
0x4fc4   :  { %16836 = vrsqrt.f32 %v9894_v22 }
0x4fd1   :  { %v16837_v20 = vpop.eup %16836 }
0x4fd2   :  { %v9898_v58 = vmul.f32 %v16837_v20, %v9882_v8  ;;  %v10156_v8 = vld [vmem:[%s20071_s22 + $0x18] sm:$0xff] }
0x4fd3   :  { %16235 = vmatprep.subr.mxu0 %v10156_v8 }
0x4fd4   :  { %v9907_v61 = vmul.f32 %v14998_v59, %v9898_v58 }
0x4fd6   :  { %v9916_v34 = vadd.f32 %v14999_v36, %v9907_v61 }
0x4fd8   :  { %16214 = vmatmul.mubr.msk.f32.vlgmr.msra.gmra.mxu0 %vm941_vm5, %v9916_v34 }
0x4fd9   :  { %16236 = vmatpush3.msra.mxu0 %v10156_v8  ;;  %v19530_v8 = vld [vmem:[%s20072_s30 + $0x8] sm:$0xff] }
0x4fda   :  { %16237 = vmatprep.subr.mxu0 %v10155_v31 }
0x4fdb   :  { %16238 = vmatpush3.msra.mxu0 %v10155_v31 }
0x4fdc   :  { %16239 = vmatprep.subr.mxu0 %v10154_v18 }
0x4fdd   :  { %16240 = vmatpush3.msra.mxu0 %v10154_v18 }
0x4fde   :  { %16241 = vmatprep.subr.mxu0 %v10153_v32 }
0x4fdf   :  { %16242 = vmatpush3.msra.mxu0 %v10153_v32 }
0x4fe0   :  { %16246 = vmatprep.subr.mxu0 %v17980_v14 }
0x5098   :  { %v16215_v1 = vpop.f32.mrf.mxu0 }
0x5099   :  { %v10006_v5 = vadd.f32 %v16215_v1, %v15000_v3 }
0x509a   :  { %v10000_v43 = vpop.f32.mrf.mxu0 }
0x509b   :  { %v10001_v53 = vadd.f32 %v15000_v3, %v10000_v43  ;;  %v10010_v4 = vmax.f32 %v10006_v5, 0.0 }
0x509d   :  { %v10009_v6 = vmax.f32 %v10001_v53, 0.0 }
0x509f   :  { %16232 = vmatprep.mubr.msk.f32.mxu1 %vm3127_vm8, %v10009_v6 }
0x50a0   :  { %16233 = vmatmul.mubr.msk.f32.vlgmr.msra.gmra.mxu1 %vm3127_vm8, %v10010_v4 }
0x50a1   :  { %16253 = vmatprep.mubr.msk.f32.mxu1 %vm17983_vm6, %v17980_v14 }
0x5160   :  { %v16234_v0 = vpop.f32.mrf.mxu1 }
0x5161   :  { %v10104_v54 = vadd.f32 %v16234_v0, %v15003_v7 }
0x5162   :  { %v10098_v9 = vpop.f32.mrf.mxu1 }
0x5163   :  { %v10099_v38 = vadd.f32 %v15003_v7, %v10098_v9  ;;  %v10108_v11 = vadd.f32 %v10104_v54, %v9916_v34 }
0x5165   :  { %v10107_v46 = vadd.f32 %v10099_v38, %v19440_v44  ;;  %v10112_v63 = vsel %vm941_vm5, %v10108_v11, 0.0  ;;  %v15006_v44 = vld [vmem:[#allocation19] ss:$0 sm:$0xff] }
0x5167   :  { %v10109_v55 = vsel %vm941_vm5, %v10107_v46, 0.0 }
0x5168   :  { %10110 = vadd.xlane.f32.xlu1 %v10109_v55 }
0x516c   :  { %10113 = vadd.xlane.f32.xlu1 %v10112_v63 }
0x51f1   :  { %v10111_v19 = vpop.xlane.xlu1 %10110 }
0x51f2   :  { %v10115_v37 = vmul.f32 0.03125, %v10111_v19 }
0x51f4   :  { %v10117_v15 = vsub.f32 %v10107_v46, %v10115_v37 }
0x51f5   :  { %v10114_v50 = vpop.xlane.xlu1 %10113 }
0x51f6   :  { %v10116_v40 = vmul.f32 0.03125, %v10114_v50  ;;  %v10119_v23 = vmul.f32 %v10117_v15, %v10117_v15 }
0x51f8   :  { %v10118_v24 = vsub.f32 %v10108_v11, %v10116_v40  ;;  %v10121_v28 = vsel %vm941_vm5, %v10119_v23, 0.0 }
0x51f9   :  { %10122 = vadd.xlane.f32.xlu0 %v10121_v28 }
0x51fa   :  { %v10120_v29 = vmul.f32 %v10118_v24, %v10118_v24 }
0x51fc   :  { %v10124_v30 = vsel %vm941_vm5, %v10120_v29, 0.0 }
0x51fd   :  { %10125 = vadd.xlane.f32.xlu1 %v10124_v30  ;;  %v19526_v30 = vld [vmem:[%s20072_s30] sm:$0xff] }
0x5282   :  { %v10123_v17 = vpop.xlane.xlu0 %10122 }
0x5283   :  { %v10127_v10 = vmul.f32 0.03125, %v10123_v17 }
0x5285   :  { %v10129_v60 = vadd.f32 1e-05, %v10127_v10 }
0x5286   :  { %v10126_v59 = vpop.xlane.xlu1 %10125 }
0x5287   :  { %16838 = vrsqrt.f32 %v10129_v60  ;;  %v10128_v13 = vmul.f32 0.03125, %v10126_v59 }
0x5289   :  { %v10130_v36 = vadd.f32 1e-05, %v10128_v13 }
0x528b   :  { %16840 = vrsqrt.f32 %v10130_v36 }
0x5294   :  { %v16839_v42 = vpop.eup %16838 }
0x5295   :  { %v10133_v39 = vmul.f32 %v16839_v42, %v10117_v15 }
0x5297   :  { %v10142_v27 = vmul.f32 %v15006_v44, %v10133_v39 }
0x5298   :  { %v16841_v16 = vpop.eup %16840 }
0x5299   :  { %v10134_v45 = vmul.f32 %v16841_v16, %v10118_v24  ;;  %v19472_v47 = vadd.f32 %v15007_v12, %v10142_v27 }
0x529b   :  { %v10143_v48 = vmul.f32 %v15006_v44, %v10134_v45  ;;  %16243 = vmatprep.mubr.msk.f32.mxu0 %vm941_vm5, %v19472_v47 }
0x529d   :  { %v19476_v52 = vadd.f32 %v15007_v12, %v10143_v48 }
0x529f   :  { %16244 = vmatmul.mubr.msk.f32.vlgmr.msra.gmra.mxu0 %vm941_vm5, %v19476_v52 }
0x52a0   :  { %16248 = vmatprep.mubr.msk.f32.mxu0 %vm17983_vm6, %v17980_v14 }
0x535f   :  { %v16245_v56 = vpop.f32.mrf.mxu0 }
0x5360   :  { %v19482_v22 = vadd.f32 %v16245_v56, %v15008_v2 }
0x5361   :  { %v10236_v20 = vpop.f32.mrf.mxu0 }
0x5362   :  { %v19484_v58 = vadd.f32 %v15008_v2, %v10236_v20 }
0x5364   :  { %10250 = vrot.lane.b32.xlu1 %v19484_v58, %s17984_s23 }
0x5368   :  { %10417 = vrot.lane.b32.xlu1 %v19484_v58, %s17985_s14 }
0x536c   :  { %10415 = vrot.lane.b32.xlu1 %v19484_v58, %s17986_s26 }
0x53d6   :  { %v10251_v61 = vpop.permute.xlu1 %10250 }
0x53d7   :  { %16247 = vmatpush3.xpose.msk.msra.mxu0 %vm1030_vm7, %v10251_v61 }
0x53d8   :  { %16256 = vmatprep.subr.mxu0 %v17980_v14 }
0x53da   :  { %16249 = vmatmul.mubr.msk.f32.vlgmr.msra.gmra.mxu0 %vm1030_vm7, %v19484_v58  ;;  %v10418_v34 = vpop.permute.xlu1 %10417 }
0x53db   :  { %16257 = vmatpush3.xpose.msk.msra.mxu0 %vm1030_vm7, %v10418_v34  ;;  %16258 = vmatprep.mubr.msk.f32.mxu0 %vm17983_vm6, %v17980_v14 }
0x53dc   :  { %16266 = vmatprep.subr.mxu0 %v17980_v14 }
0x53de   :  { %v10416_v41 = vpop.permute.xlu1 %10415 }
0x53df   :  { %16259 = vmatmul.mubr.msk.f32.vlgmr.msra.gmra.mxu0 %vm1030_vm7, %v10416_v41 }
0x53e0   :  { %16268 = vmatprep.mubr.msk.f32.mxu0 %vm17983_vm6, %v17980_v14  ;;  %16267 = vmatpush3.msra.mxu0 %v19530_v8 }
0x53e1   :  { %16276 = vmatprep.subr.mxu0 %v17980_v14 }
0x549a   :  { %v10322_v33 = vpop.f32.mrf.mxu0 }
0x549b   :  { %v10326_v62 = vmul.f32 0.35355338, %v10322_v33 }
0x549c   :  { %v16250_v49 = vpop.f32.mrf.mxu0 }
0x549d   :  { %v10327_v3 = vadd.f32 %v10326_v62, %v18442_v25 }
0x549f   :  { %v10489_v1 = vpop.f32.mrf.mxu0  ;;  %v10328_v5 = vsel %vm1030_vm7, %v10327_v3, -inf }
0x54a0   :  { %v10493_v43 = vmul.f32 0.35355338, %v10489_v1  ;;  %10329 = vmax.xlane.f32.xlu0 %v10328_v5  ;;  %v19565_v1 = vld [vmem:[%s20072_s30 + $0x10] sm:$0xff] }
0x54a1   :  { %v16260_v53 = vpop.f32.mrf.mxu0 }
0x54a2   :  { %v10494_v6 = vadd.f32 %v10493_v43, %v18442_v25 }
0x54a4   :  { %v10495_v4 = vsel %vm1030_vm7, %v10494_v6, -inf }
0x54a5   :  { %10496 = vmax.xlane.f32.xlu1 %v10495_v4 }
0x54b6   :  { %10339 = vrot.lane.b32.xlu0 %v19484_v58, %s17988_s1  ;;  %10730 = vrot.lane.b32.xlu1 %v19484_v58, %s17989_s2 }
0x5529   :  { %v10330_v0 = vpop.xlane.xlu0 %10329 }
0x552a   :  { %v10331_v7 = vsub.f32 %v10327_v3, %v10330_v0 }
0x552c   :  { %v10332_v9 = vmul.f32 1.442695, %v10331_v7 }
0x552d   :  { %v10340_v54 = vpop.permute.xlu0 %10339 }
0x552e   :  { %16842 = vpow2.f32 %v10332_v9  ;;  %16252 = vmatpush3.msra.mxu1 %v10340_v54  ;;  %v10497_v38 = vpop.xlane.xlu1 %10496 }
0x552f   :  { %v10498_v46 = vsub.f32 %v10494_v6, %v10497_v38  ;;  %16261 = vmatprep.subr.mxu1 %v17980_v14 }
0x5531   :  { %v10499_v11 = vmul.f32 1.442695, %v10498_v46 }
0x5532   :  { %v10731_v17 = vpop.permute.xlu1 %10730 }
0x5533   :  { %16844 = vpow2.f32 %v10499_v11 }
0x553b   :  { %v16843_v55 = vpop.eup %16842 }
0x553c   :  { %v10334_v63 = vsel %vm1030_vm7, %v16843_v55, 0.0 }
0x553d   :  { %10335 = vadd.xlane.f32.xlu0 %v10334_v63 }
0x5540   :  { %v16845_v19 = vpop.eup %16844 }
0x5541   :  { %v10501_v37 = vsel %vm1030_vm7, %v16845_v19, 0.0 }
0x5542   :  { %10502 = vadd.xlane.f32.xlu0 %v10501_v37 }
0x5558   :  { %10506 = vrot.lane.b32.xlu0 %v19484_v58, %s17990_s12 }
0x555c   :  { %10728 = vrot.lane.b32.xlu0 %v19484_v58, %s17987_s28 }
0x55c6   :  { %v10336_v15 = vpop.xlane.xlu0 %10335 }
0x55c7   :  { %16846 = vrcp.f32 %v10336_v15 }
0x55cb   :  { %v10503_v50 = vpop.xlane.xlu0 %10502 }
0x55cc   :  { %16848 = vrcp.f32 %v10503_v50 }
0x55cf   :  { %v10507_v24 = vpop.permute.xlu0 %10506 }
0x55d3   :  { %v10729_v60 = vpop.permute.xlu0 %10728 }
0x55d4   :  { %v16847_v40 = vpop.eup %16846 }
0x55d5   :  { %v10338_v23 = vmul.f32 %v16847_v40, %v16843_v55 }
0x55d7   :  { %16254 = vmatmul.mubr.msk.f32.vlgmr.msra.gmra.mxu1 %vm1030_vm7, %v10338_v23 }
0x55d8   :  { %16262 = vmatpush3.msra.mxu1 %v10507_v24  ;;  %16263 = vmatprep.mubr.msk.f32.mxu1 %vm17983_vm6, %v17980_v14  ;;  %v19601_v24 = vld [vmem:[%s20072_s30 + $0x18] sm:$0xff] }
0x55d9   :  { %v16849_v28 = vpop.eup %16848  ;;  %16271 = vmatprep.subr.mxu1 %v17980_v14 }
0x55da   :  { %v10505_v29 = vmul.f32 %v16849_v28, %v16845_v19 }
0x55dc   :  { %16264 = vmatmul.mubr.msk.f32.vlgmr.msra.gmra.mxu1 %vm1030_vm7, %v10505_v29 }
0x55dd   :  { %16273 = vmatprep.mubr.msk.f32.mxu1 %vm17983_vm6, %v17980_v14  ;;  %16272 = vmatpush3.msra.mxu1 %v19526_v30 }
0x55de   :  { %16281 = vmatprep.subr.mxu1 %v17980_v14 }
0x5697   :  { %v10411_v31 = vpop.f32.mrf.mxu1 }
0x5698   :  { %16274 = vmatmul.mubr.msk.f32.vlgmr.msra.gmra.mxu1 %vm1030_vm7, %v10411_v31 }
0x5699   :  { %v16255_v18 = vpop.f32.mrf.mxu1  ;;  %16283 = vmatprep.mubr.msk.f32.mxu1 %vm17983_vm6, %v17980_v14 }
0x569c   :  { %v10578_v32 = vpop.f32.mrf.mxu1 }
0x569d   :  { %16269 = vmatmul.mubr.msk.f32.vlgmr.msra.gmra.mxu0 %vm1030_vm7, %v10578_v32 }
0x569e   :  { %16277 = vmatpush3.xpose.msk.msra.mxu0 %vm1030_vm7, %v10731_v17  ;;  %v16265_v10 = vpop.f32.mrf.mxu1  ;;  %16278 = vmatprep.mubr.msk.f32.mxu0 %vm17983_vm6, %v17980_v14 }
0x569f   :  { %16286 = vmatprep.subr.mxu0 %v17980_v14 }
0x56a1   :  { %16279 = vmatmul.mubr.msk.f32.vlgmr.msra.gmra.mxu0 %vm1030_vm7, %v10729_v60 }
0x56a2   :  { %16288 = vmatprep.mubr.msk.f32.mxu0 %vm17983_vm6, %v17980_v14  ;;  %16287 = vmatpush3.msra.mxu0 %v19565_v1 }
0x56a3   :  { %16296 = vmatprep.subr.mxu0 %v17980_v14 }
0x5758   :  { %v10724_v59 = vpop.f32.mrf.mxu1 }
0x575a   :  { %v16275_v13 = vpop.f32.mrf.mxu1 }
0x575d   :  { %v10651_v36 = vpop.f32.mrf.mxu0 }
0x575e   :  { %v10725_v42 = vadd.f32 %v10724_v59, %v10651_v36 }
0x575f   :  { %v16270_v44 = vpop.f32.mrf.mxu0 }
0x5761   :  { %v10802_v39 = vpop.f32.mrf.mxu0 }
0x5762   :  { %v10806_v12 = vmul.f32 0.35355338, %v10802_v39 }
0x5763   :  { %v16280_v27 = vpop.f32.mrf.mxu0 }
0x5764   :  { %v10807_v16 = vadd.f32 %v10806_v12, %v18442_v25 }
0x5766   :  { %v10808_v45 = vsel %vm1030_vm7, %v10807_v16, -inf }
0x5767   :  { %10809 = vmax.xlane.f32.xlu0 %v10808_v45 }
0x577d   :  { %10819 = vrot.lane.b32.xlu0 %v19484_v58, %s17993_s27 }
0x5781   :  { %10969 = vrot.lane.b32.xlu0 %v19484_v58, %s17992_s0 }
0x57f0   :  { %v10810_v48 = vpop.xlane.xlu0 %10809 }
0x57f1   :  { %v10811_v2 = vsub.f32 %v10807_v16, %v10810_v48 }
0x57f3   :  { %v10812_v56 = vmul.f32 1.442695, %v10811_v2 }
0x57f4   :  { %v10820_v20 = vpop.permute.xlu0 %10819 }
0x57f5   :  { %16850 = vpow2.f32 %v10812_v56  ;;  %16282 = vmatpush3.msra.mxu1 %v10820_v20 }
0x57f6   :  { %16291 = vmatprep.subr.mxu1 %v17980_v14 }
0x57f8   :  { %v10970_v3 = vpop.permute.xlu0 %10969 }
0x5802   :  { %v16851_v61 = vpop.eup %16850 }
0x5803   :  { %v10814_v34 = vsel %vm1030_vm7, %v16851_v61, 0.0 }
0x5804   :  { %10815 = vadd.xlane.f32.xlu1 %v10814_v34 }
0x5815   :  { %10971 = vrot.lane.b32.xlu1 %v19484_v58, %s17991_s25 }
0x588d   :  { %v10816_v41 = vpop.xlane.xlu1 %10815 }
0x588e   :  { %16852 = vrcp.f32 %v10816_v41 }
0x5891   :  { %v10972_v49 = vpop.permute.xlu1 %10971 }
0x589b   :  { %v16853_v33 = vpop.eup %16852 }
0x589c   :  { %v10818_v62 = vmul.f32 %v16853_v33, %v16851_v61 }
0x589e   :  { %16284 = vmatmul.mubr.msk.f32.vlgmr.msra.gmra.mxu1 %vm1030_vm7, %v10818_v62 }
0x589f   :  { %16292 = vmatpush3.xpose.msk.msra.mxu1 %vm1030_vm7, %v10972_v49  ;;  %16293 = vmatprep.mubr.msk.f32.mxu1 %vm17983_vm6, %v17980_v14 }
0x58a0   :  { %16301 = vmatprep.subr.mxu1 %v17980_v14 }
0x58a2   :  { %16294 = vmatmul.mubr.msk.f32.vlgmr.msra.gmra.mxu1 %vm1030_vm7, %v10970_v3 }
0x58a3   :  { %16303 = vmatprep.mubr.msk.f32.mxu1 %vm17983_vm6, %v17980_v14  ;;  %16302 = vmatpush3.msra.mxu1 %v19601_v24 }
0x58a4   :  { %16311 = vmatprep.subr.mxu1 %v17980_v14 }
0x595e   :  { %v10891_v5 = vpop.f32.mrf.mxu1 }
0x595f   :  { %16289 = vmatmul.mubr.msk.f32.vlgmr.msra.gmra.mxu0 %vm1030_vm7, %v10891_v5 }
0x5960   :  { %v16285_v43 = vpop.f32.mrf.mxu1  ;;  %16298 = vmatprep.mubr.msk.f32.mxu0 %vm17983_vm6, %v17980_v14 }
0x5962   :  { %v11043_v53 = vpop.f32.mrf.mxu1 }
0x5963   :  { %v11047_v6 = vmul.f32 0.35355338, %v11043_v53 }
0x5964   :  { %v16295_v4 = vpop.f32.mrf.mxu1 }
0x5965   :  { %v11048_v0 = vadd.f32 %v11047_v6, %v18442_v25 }
0x5967   :  { %v11049_v7 = vsel %vm1030_vm7, %v11048_v0, -inf }
0x5968   :  { %11050 = vmax.xlane.f32.xlu0 %v11049_v7 }
0x597e   :  { %11060 = vrot.lane.b32.xlu0 %v19484_v58, %s17994_s9 }
0x5982   :  { %11379 = vrot.lane.b32.xlu0 %v19482_v22, %s17985_s14 }
0x5986   :  { %11377 = vrot.lane.b32.xlu0 %v19482_v22, %s17986_s26 }
0x59f1   :  { %v11051_v9 = vpop.xlane.xlu0 %11050 }
0x59f2   :  { %v11052_v54 = vsub.f32 %v11048_v0, %v11051_v9 }
0x59f4   :  { %v11053_v38 = vmul.f32 1.442695, %v11052_v54 }
0x59f5   :  { %v11061_v46 = vpop.permute.xlu0 %11060 }
0x59f6   :  { %16854 = vpow2.f32 %v11053_v38  ;;  %16297 = vmatpush3.msra.mxu0 %v11061_v46 }
0x59f7   :  { %16306 = vmatprep.subr.mxu0 %v17980_v14 }
0x59f9   :  { %v11380_v40 = vpop.permute.xlu0 %11379 }
0x59fd   :  { %v11378_v23 = vpop.permute.xlu0 %11377 }
0x5a03   :  { %v16855_v25 = vpop.eup %16854 }
0x5a04   :  { %v11055_v11 = vsel %vm1030_vm7, %v16855_v25, 0.0 }
0x5a05   :  { %11056 = vadd.xlane.f32.xlu1 %v11055_v11 }
0x5a16   :  { %11212 = vrot.lane.b32.xlu1 %v19482_v22, %s17984_s23 }
0x5a1f   :  { %v10964_v58 = vpop.f32.mrf.mxu0 }
0x5a20   :  { %v10968_v55 = vadd.f32 %v10964_v58, %v10725_v42 }
0x5a21   :  { %v16290_v63 = vpop.f32.mrf.mxu0 }
0x5a8e   :  { %v11057_v19 = vpop.xlane.xlu1 %11056 }
0x5a8f   :  { %16856 = vrcp.f32 %v11057_v19 }
0x5a92   :  { %v11213_v50 = vpop.permute.xlu1 %11212 }
0x5a9c   :  { %v16857_v37 = vpop.eup %16856 }
0x5a9d   :  { %v11059_v15 = vmul.f32 %v16857_v37, %v16855_v25 }
0x5a9f   :  { %16299 = vmatmul.mubr.msk.f32.vlgmr.msra.gmra.mxu0 %vm1030_vm7, %v11059_v15 }
0x5aa0   :  { %16307 = vmatpush3.xpose.msk.msra.mxu0 %vm1030_vm7, %v11213_v50  ;;  %16308 = vmatprep.mubr.msk.f32.mxu0 %vm17983_vm6, %v17980_v14 }
0x5aa1   :  { %16316 = vmatprep.subr.mxu0 %v17980_v14 }
0x5aa3   :  { %16309 = vmatmul.mubr.msk.f32.vlgmr.msra.gmra.mxu0 %vm1030_vm7, %v19482_v22 }
0x5aa4   :  { %16317 = vmatpush3.xpose.msk.msra.mxu0 %vm1030_vm7, %v11380_v40  ;;  %16318 = vmatprep.mubr.msk.f32.mxu0 %vm17983_vm6, %v17980_v14 }
0x5aa5   :  { %16326 = vmatprep.subr.mxu0 %v17980_v14 }
0x5aa7   :  { %16319 = vmatmul.mubr.msk.f32.vlgmr.msra.gmra.mxu0 %vm1030_vm7, %v11378_v23 }
0x5aa8   :  { %16327 = vmatpush3.msra.mxu0 %v19530_v8  ;;  %16328 = vmatprep.mubr.msk.f32.mxu0 %vm17983_vm6, %v17980_v14 }
0x5aa9   :  { %16336 = vmatprep.subr.mxu0 %v17980_v14 }
0x5b5f   :  { %v11132_v28 = vpop.f32.mrf.mxu0 }
0x5b60   :  { %16304 = vmatmul.mubr.msk.f32.vlgmr.msra.gmra.mxu1 %vm1030_vm7, %v11132_v28 }
0x5b61   :  { %v16300_v29 = vpop.f32.mrf.mxu0  ;;  %16313 = vmatprep.mubr.msk.f32.mxu1 %vm17983_vm6, %v17980_v14 }
0x5b63   :  { %v11284_v31 = vpop.f32.mrf.mxu0 }
0x5b64   :  { %v11288_v8 = vmul.f32 0.35355338, %v11284_v31 }
0x5b65   :  { %v16310_v18 = vpop.f32.mrf.mxu0 }
0x5b66   :  { %v11289_v32 = vadd.f32 %v11288_v8, %v18444_v26 }
0x5b67   :  { %v11451_v17 = vpop.f32.mrf.mxu0 }
0x5b68   :  { %v11455_v10 = vmul.f32 0.35355338, %v11451_v17  ;;  %v11290_v60 = vsel %vm1030_vm7, %v11289_v32, -inf }
0x5b69   :  { %11291 = vmax.xlane.f32.xlu0 %v11290_v60  ;;  %v16320_v59 = vpop.f32.mrf.mxu0 }
0x5b6a   :  { %v11456_v13 = vadd.f32 %v11455_v10, %v18444_v26  ;;  %v15043_v59 = vld [vmem:[#allocation40] ss:$0 sm:$0xff] }
0x5b6c   :  { %v11457_v36 = vsel %vm1030_vm7, %v11456_v13, -inf }
0x5b6d   :  { %11458 = vmax.xlane.f32.xlu1 %v11457_v36 }
0x5b7e   :  { %11301 = vrot.lane.b32.xlu1 %v19482_v22, %s17988_s1 }
0x5b82   :  { %11692 = vrot.lane.b32.xlu1 %v19482_v22, %s17989_s2 }
0x5b86   :  { %11690 = vrot.lane.b32.xlu1 %v19482_v22, %s17987_s28 }
0x5bf2   :  { %v11292_v42 = vpop.xlane.xlu0 %11291 }
0x5bf3   :  { %v11293_v44 = vsub.f32 %v11289_v32, %v11292_v42 }
0x5bf5   :  { %v11294_v39 = vmul.f32 1.442695, %v11293_v44 }
0x5bf6   :  { %v11459_v12 = vpop.xlane.xlu1 %11458 }
0x5bf7   :  { %16858 = vpow2.f32 %v11294_v39  ;;  %v11460_v27 = vsub.f32 %v11456_v13, %v11459_v12 }
0x5bf9   :  { %v11461_v16 = vmul.f32 1.442695, %v11460_v27 }
0x5bfa   :  { %v11302_v45 = vpop.permute.xlu1 %11301 }
0x5bfb   :  { %16860 = vpow2.f32 %v11461_v16  ;;  %16312 = vmatpush3.msra.mxu1 %v11302_v45 }
0x5bfc   :  { %16321 = vmatprep.subr.mxu1 %v17980_v14 }
0x5bfe   :  { %v11693_v4 = vpop.permute.xlu1 %11692 }
0x5c04   :  { %v16859_v48 = vpop.eup %16858 }
0x5c05   :  { %v11296_v2 = vsel %vm1030_vm7, %v16859_v48, 0.0 }
0x5c06   :  { %11297 = vadd.xlane.f32.xlu0 %v11296_v2 }
0x5c08   :  { %v16861_v56 = vpop.eup %16860 }
0x5c09   :  { %v11463_v20 = vsel %vm1030_vm7, %v16861_v56, 0.0 }
0x5c0a   :  { %11464 = vadd.xlane.f32.xlu0 %v11463_v20 }
0x5c20   :  { %v11205_v61 = vpop.f32.mrf.mxu1  ;;  %11468 = vrot.lane.b32.xlu0 %v19482_v22, %s17990_s12 }
0x5c21   :  { %v11209_v34 = vadd.f32 %v11205_v61, %v10968_v55 }
0x5c22   :  { %v16305_v41 = vpop.f32.mrf.mxu1 }
0x5c23   :  { %11210 = vst.msk [vmem:[#allocation2] sm:$0xff] %vm941_vm5, %v11209_v34 }
0x5c2a   :  { %v12173_v60 = vld [vmem:[#allocation2] sm:$0xff] }
0x5c2b   :  { %v12182_v42 = vadd.f32 %v15043_v59, %v12173_v60  ;;  %v12231_v60 = vld [vmem:[%s20074_s5 + $0x8] sm:$0xff] }
0x5c2d   :  { %v12184_v12 = vadd.f32 %v12182_v42, %v19472_v47 }
0x5c2f   :  { %v12186_v27 = vsel %vm941_vm5, %v12184_v12, 0.0 }
0x5c8f   :  { %v11298_v33 = vpop.xlane.xlu0 %11297 }
0x5c90   :  { %16862 = vrcp.f32 %v11298_v33 }
0x5c93   :  { %v11465_v62 = vpop.xlane.xlu0 %11464 }
0x5c94   :  { %16864 = vrcp.f32 %v11465_v62  ;;  %v12325_v62 = vld [vmem:[%s20073_s3 + $0x18] sm:$0xff] }
0x5c97   :  { %v11469_v5 = vpop.permute.xlu0 %11468 }
0x5c9d   :  { %v16863_v49 = vpop.eup %16862 }
0x5c9e   :  { %v11300_v3 = vmul.f32 %v16863_v49, %v16859_v48 }
0x5ca0   :  { %16314 = vmatmul.mubr.msk.f32.vlgmr.msra.gmra.mxu1 %vm1030_vm7, %v11300_v3  ;;  %v12324_v3 = vld [vmem:[%s20073_s3 + $0x10] sm:$0xff] }
0x5ca1   :  { %v16865_v43 = vpop.eup %16864  ;;  %16322 = vmatpush3.msra.mxu1 %v11469_v5  ;;  %16323 = vmatprep.mubr.msk.f32.mxu1 %vm17983_vm6, %v17980_v14  ;;  %v12323_v5 = vld [vmem:[%s20073_s3 + $0x8] sm:$0xff] }
0x5ca2   :  { %v11467_v53 = vmul.f32 %v16865_v43, %v16861_v56  ;;  %16331 = vmatprep.subr.mxu1 %v17980_v14  ;;  %v12322_v43 = vld [vmem:[%s20073_s3] sm:$0xff] }
0x5ca4   :  { %16324 = vmatmul.mubr.msk.f32.vlgmr.msra.gmra.mxu1 %vm1030_vm7, %v11467_v53 }
0x5ca5   :  { %16332 = vmatpush3.msra.mxu1 %v19526_v30  ;;  %16333 = vmatprep.mubr.msk.f32.mxu1 %vm17983_vm6, %v17980_v14  ;;  %v11691_v30 = vpop.permute.xlu1 %11690 }
0x5ca6   :  { %16341 = vmatprep.subr.mxu1 %v17980_v14 }
0x5d60   :  { %v11373_v6 = vpop.f32.mrf.mxu1 }
0x5d61   :  { %16334 = vmatmul.mubr.msk.f32.vlgmr.msra.gmra.mxu1 %vm1030_vm7, %v11373_v6 }
0x5d62   :  { %v16315_v0 = vpop.f32.mrf.mxu1  ;;  %16343 = vmatprep.mubr.msk.f32.mxu1 %vm17983_vm6, %v17980_v14 }
0x5d63   :  { %v15049_v0 = vld [vmem:[#allocation23] ss:$0 sm:$0xff] }
0x5d64   :  { %v11540_v7 = vpop.f32.mrf.mxu1 }
0x5d65   :  { %16329 = vmatmul.mubr.msk.f32.vlgmr.msra.gmra.mxu0 %vm1030_vm7, %v11540_v7 }
0x5d66   :  { %16337 = vmatpush3.xpose.msk.msra.mxu0 %vm1030_vm7, %v11693_v4  ;;  %v16325_v9 = vpop.f32.mrf.mxu1  ;;  %16338 = vmatprep.mubr.msk.f32.mxu0 %vm17983_vm6, %v17980_v14 }
0x5d67   :  { %16346 = vmatprep.subr.mxu0 %v17980_v14 }
0x5d69   :  { %16339 = vmatmul.mubr.msk.f32.vlgmr.msra.gmra.mxu0 %vm1030_vm7, %v11691_v30 }
0x5d6a   :  { %16347 = vmatpush3.msra.mxu0 %v19565_v1  ;;  %16348 = vmatprep.mubr.msk.f32.mxu0 %vm17983_vm6, %v17980_v14 }
0x5d6b   :  { %16356 = vmatprep.subr.mxu0 %v17980_v14 }
0x5e21   :  { %v11686_v54 = vpop.f32.mrf.mxu1 }
0x5e23   :  { %v16335_v38 = vpop.f32.mrf.mxu1 }
0x5e25   :  { %v11613_v46 = vpop.f32.mrf.mxu0 }
0x5e26   :  { %v11687_v25 = vadd.f32 %v11686_v54, %v11613_v46 }
0x5e27   :  { %v16330_v11 = vpop.f32.mrf.mxu0 }
0x5e29   :  { %v11764_v58 = vpop.f32.mrf.mxu0 }
0x5e2a   :  { %v11768_v55 = vmul.f32 0.35355338, %v11764_v58 }
0x5e2b   :  { %v16340_v63 = vpop.f32.mrf.mxu0 }
0x5e2c   :  { %v11769_v19 = vadd.f32 %v11768_v55, %v18444_v26 }
0x5e2e   :  { %v11770_v37 = vsel %vm1030_vm7, %v11769_v19, -inf }
0x5e2f   :  { %11771 = vmax.xlane.f32.xlu0 %v11770_v37 }
0x5e45   :  { %11781 = vrot.lane.b32.xlu0 %v19482_v22, %s17993_s27 }
0x5e49   :  { %11931 = vrot.lane.b32.xlu0 %v19482_v22, %s17992_s0 }
0x5eb8   :  { %v11772_v1 = vpop.xlane.xlu0 %11771 }
0x5eb9   :  { %v11773_v15 = vsub.f32 %v11769_v19, %v11772_v1 }
0x5ebb   :  { %v11774_v50 = vmul.f32 1.442695, %v11773_v15 }
0x5ebc   :  { %v11782_v40 = vpop.permute.xlu0 %11781 }
0x5ebd   :  { %16866 = vpow2.f32 %v11774_v50  ;;  %16342 = vmatpush3.msra.mxu1 %v11782_v40 }
0x5ebe   :  { %16351 = vmatprep.subr.mxu1 %v17980_v14 }
0x5ec0   :  { %v11932_v32 = vpop.permute.xlu0 %11931 }
0x5eca   :  { %v16867_v23 = vpop.eup %16866 }
0x5ecb   :  { %v11776_v28 = vsel %vm1030_vm7, %v16867_v23, 0.0 }
0x5ecc   :  { %11777 = vadd.xlane.f32.xlu1 %v11776_v28  ;;  %v15044_v28 = vld [vmem:[#allocation32] ss:$0 sm:$0xff] }
0x5edd   :  { %11933 = vrot.lane.b32.xlu1 %v19482_v22, %s17991_s25 }
0x5f55   :  { %v11778_v29 = vpop.xlane.xlu1 %11777 }
0x5f56   :  { %16868 = vrcp.f32 %v11778_v29 }
0x5f59   :  { %v11934_v18 = vpop.permute.xlu1 %11933 }
0x5f63   :  { %v16869_v31 = vpop.eup %16868 }
0x5f64   :  { %v11780_v8 = vmul.f32 %v16869_v31, %v16867_v23 }
0x5f66   :  { %16344 = vmatmul.mubr.msk.f32.vlgmr.msra.gmra.mxu1 %vm1030_vm7, %v11780_v8  ;;  %v15045_v8 = vld [vmem:[#allocation31] ss:$0 sm:$0xff] }
0x5f67   :  { %16352 = vmatpush3.xpose.msk.msra.mxu1 %vm1030_vm7, %v11934_v18  ;;  %16353 = vmatprep.mubr.msk.f32.mxu1 %vm17983_vm6, %v17980_v14 }
0x5f68   :  { %16361 = vmatprep.subr.mxu1 %v17980_v14 }
0x5f6a   :  { %16354 = vmatmul.mubr.msk.f32.vlgmr.msra.gmra.mxu1 %vm1030_vm7, %v11932_v32 }
0x5f6b   :  { %16362 = vmatpush3.msra.mxu1 %v19601_v24  ;;  %16363 = vmatprep.mubr.msk.f32.mxu1 %vm17983_vm6, %v17980_v14 }
0x5f6c   :  { %16377 = vmatprep.subr.mxu1 %v12325_v62 }
0x6026   :  { %v11853_v17 = vpop.f32.mrf.mxu1 }
0x6027   :  { %16349 = vmatmul.mubr.msk.f32.vlgmr.msra.gmra.mxu0 %vm1030_vm7, %v11853_v17  ;;  %v12233_v17 = vld [vmem:[%s20074_s5 + $0x18] sm:$0xff] }
0x6028   :  { %v16345_v10 = vpop.f32.mrf.mxu1  ;;  %16358 = vmatprep.mubr.msk.f32.mxu0 %vm17983_vm6, %v17980_v14 }
0x6029   :  { %v12232_v10 = vld [vmem:[%s20074_s5 + $0x10] sm:$0xff] }
0x602a   :  { %v12005_v13 = vpop.f32.mrf.mxu1 }
0x602b   :  { %v12009_v36 = vmul.f32 0.35355338, %v12005_v13 }
0x602c   :  { %v16355_v44 = vpop.f32.mrf.mxu1 }
0x602d   :  { %v12010_v39 = vadd.f32 %v12009_v36, %v18444_v26 }
0x602f   :  { %v12011_v24 = vsel %vm1030_vm7, %v12010_v39, -inf }
0x6030   :  { %12012 = vmax.xlane.f32.xlu1 %v12011_v24 }
0x6034   :  { %12187 = vadd.xlane.f32.xlu1 %v12186_v27  ;;  %v15046_v27 = vld [vmem:[#allocation26] ss:$0 sm:$0xff] }
0x60b9   :  { %v12013_v16 = vpop.xlane.xlu1 %12012 }
0x60ba   :  { %v12014_v45 = vsub.f32 %v12010_v39, %v12013_v16 }
0x60bc   :  { %v12015_v48 = vmul.f32 1.442695, %v12014_v45 }
0x60be   :  { %16870 = vpow2.f32 %v12015_v48 }
0x60cb   :  { %v16871_v2 = vpop.eup %16870 }
0x60cc   :  { %v12017_v56 = vsel %vm1030_vm7, %v16871_v2, 0.0 }
0x60cd   :  { %12018 = vadd.xlane.f32.xlu0 %v12017_v56 }
0x60e3   :  { %12022 = vrot.lane.b32.xlu0 %v19482_v22, %s17994_s9 }
0x60e7   :  { %v11926_v26 = vpop.f32.mrf.mxu0 }
0x60e8   :  { %v11930_v20 = vadd.f32 %v11926_v26, %v11687_v25 }
0x60e9   :  { %v16350_v47 = vpop.f32.mrf.mxu0 }
0x6156   :  { %v12019_v61 = vpop.xlane.xlu0 %12018 }
0x6157   :  { %16872 = vrcp.f32 %v12019_v61 }
0x615a   :  { %v12023_v34 = vpop.permute.xlu0 %12022 }
0x615b   :  { %16357 = vmatpush3.msra.mxu0 %v12023_v34 }
0x615c   :  { %16366 = vmatprep.subr.mxu0 %v12233_v17 }
0x6164   :  { %v16873_v41 = vpop.eup %16872 }
0x6165   :  { %v12021_v33 = vmul.f32 %v16873_v41, %v16871_v2 }
0x6167   :  { %16359 = vmatmul.mubr.msk.f32.vlgmr.msra.gmra.mxu0 %vm1030_vm7, %v12021_v33 }
0x6168   :  { %16367 = vmatpush3.msra.mxu0 %v12233_v17 }
0x6169   :  { %16368 = vmatprep.subr.mxu0 %v12232_v10 }
0x616a   :  { %16369 = vmatpush3.msra.mxu0 %v12232_v10 }
0x616b   :  { %16370 = vmatprep.subr.mxu0 %v12231_v60 }
0x616c   :  { %16371 = vmatpush3.msra.mxu0 %v12231_v60 }
0x6227   :  { %v12094_v49 = vpop.f32.mrf.mxu0 }
0x6228   :  { %16364 = vmatmul.mubr.msk.f32.vlgmr.msra.gmra.mxu1 %vm1030_vm7, %v12094_v49 }
0x6229   :  { %16378 = vmatpush3.msra.mxu1 %v12325_v62  ;;  %v16360_v22 = vpop.f32.mrf.mxu0  ;;  %16385 = vmatprep.mubr.msk.f32.mxu1 %vm941_vm5, %v19219_v35  ;;  %v12188_v35 = vpop.xlane.xlu1 %12187 }
0x622a   :  { %16379 = vmatprep.subr.mxu1 %v12324_v3  ;;  %v12192_v7 = vmul.f32 0.03125, %v12188_v35 }
0x622b   :  { %16380 = vmatpush3.msra.mxu1 %v12324_v3 }
0x622c   :  { %16381 = vmatprep.subr.mxu1 %v12323_v5  ;;  %v12194_v38 = vsub.f32 %v12184_v12, %v12192_v7 }
0x622d   :  { %16382 = vmatpush3.msra.mxu1 %v12323_v5 }
0x622e   :  { %16383 = vmatprep.subr.mxu1 %v12322_v43  ;;  %v12196_v11 = vmul.f32 %v12194_v38, %v12194_v38 }
0x622f   :  { %16384 = vmatpush3.msra.mxu1 %v12322_v43 }
0x6230   :  { %16386 = vmatmul.mubr.msk.f32.vlgmr.msra.gmra.mxu1 %vm941_vm5, %v19223_v51  ;;  %16393 = vmatprep.subr.mxu1 %v17980_v14  ;;  %v12198_v58 = vsel %vm941_vm5, %v12196_v11, 0.0 }
0x6231   :  { %16395 = vmatprep.mubr.msk.f32.mxu1 %vm17983_vm6, %v17980_v14 }
0x62e8   :  { %v12167_v53 = vpop.f32.mrf.mxu1 }
0x62e9   :  { %v12171_v6 = vadd.f32 %v12167_v53, %v11930_v20 }
0x62ea   :  { %v16365_v4 = vpop.f32.mrf.mxu1 }
0x62eb   :  { %12172 = vst.msk [vmem:[#allocation2 + $0x8] sm:$0xff] %vm941_vm5, %v12171_v6 }
0x62f0   :  { %v16387_v9 = vpop.f32.mrf.mxu1 }
0x62f1   :  { %v19689_v30 = vadd.f32 %v16387_v9, %v15049_v0 }
0x62f2   :  { %v12174_v54 = vld [vmem:[#allocation2 + $0x8] sm:$0xff] }
0x62f3   :  { %v12183_v46 = vadd.f32 %v15043_v59, %v12174_v54  ;;  %v12230_v59 = vld [vmem:[%s20074_s5] sm:$0xff] }
0x62f4   :  { %16372 = vmatprep.subr.mxu0 %v12230_v59 }
0x62f5   :  { %v12185_v51 = vadd.f32 %v12183_v46, %v19476_v52  ;;  %v12399_v52 = vpop.f32.mrf.mxu1  ;;  %16373 = vmatpush3.msra.mxu0 %v12230_v59 }
0x62f6   :  { %v19695_v29 = vadd.f32 %v15049_v0, %v12399_v52  ;;  %16388 = vmatprep.subr.mxu0 %v17980_v14 }
0x62f7   :  { %v12189_v25 = vsel %vm941_vm5, %v12185_v51, 0.0 }
0x62f8   :  { %12190 = vadd.xlane.f32.xlu1 %v12189_v25 }
0x62fc   :  { %12199 = vadd.xlane.f32.xlu1 %v12198_v58 }
0x6381   :  { %v12191_v55 = vpop.xlane.xlu1 %12190 }
0x6382   :  { %v12193_v63 = vmul.f32 0.03125, %v12191_v55 }
0x6384   :  { %v12195_v19 = vsub.f32 %v12185_v51, %v12193_v63 }
0x6385   :  { %v12200_v37 = vpop.xlane.xlu1 %12199 }
0x6386   :  { %v12204_v1 = vmul.f32 0.03125, %v12200_v37  ;;  %v12197_v15 = vmul.f32 %v12195_v19, %v12195_v19  ;;  %v19759_v37 = vld [vmem:[%s20075_s4 + $0x8] sm:$0xff] }
0x6388   :  { %v12206_v50 = vadd.f32 1e-05, %v12204_v1  ;;  %v12201_v40 = vsel %vm941_vm5, %v12197_v15, 0.0 }
0x6389   :  { %12202 = vadd.xlane.f32.xlu1 %v12201_v40 }
0x638a   :  { %16874 = vrsqrt.f32 %v12206_v50 }
0x6397   :  { %v16875_v23 = vpop.eup %16874 }
0x6398   :  { %v12210_v31 = vmul.f32 %v16875_v23, %v12194_v38 }
0x639a   :  { %12579 = vrot.lane.b32.xlu1 %v19695_v29, %s17986_s26  ;;  %v12219_v18 = vmul.f32 %v15044_v28, %v12210_v31 }
0x639c   :  { %v19699_v32 = vadd.f32 %v15045_v8, %v12219_v18 }
0x639e   :  { %16374 = vmatprep.mubr.msk.f32.mxu0 %vm941_vm5, %v19699_v32 }
0x6412   :  { %v12203_v13 = vpop.xlane.xlu1 %12202 }
0x6413   :  { %v12205_v36 = vmul.f32 0.03125, %v12203_v13 }
0x6415   :  { %v12207_v42 = vadd.f32 1e-05, %v12205_v36 }
0x6416   :  { %v12580_v56 = vpop.permute.xlu1 %12579 }
0x6417   :  { %16876 = vrsqrt.f32 %v12207_v42 }
0x6424   :  { %v16877_v44 = vpop.eup %16876 }
0x6425   :  { %v12211_v39 = vmul.f32 %v16877_v44, %v12195_v19  ;;  %v19755_v19 = vld [vmem:[%s20075_s4] sm:$0xff] }
0x6427   :  { %v12220_v24 = vmul.f32 %v15044_v28, %v12211_v39 }
0x6429   :  { %v19708_v12 = vadd.f32 %v15045_v8, %v12220_v24 }
0x642b   :  { %16375 = vmatmul.mubr.msk.f32.vlgmr.msra.gmra.mxu0 %vm941_vm5, %v19708_v12 }
0x642c   :  { %16389 = vmatpush3.xpose.msk.msra.mxu0 %vm1030_vm7, %v19695_v29  ;;  %16390 = vmatprep.mubr.msk.f32.mxu0 %vm17983_vm6, %v17980_v14 }
0x642d   :  { %16398 = vmatprep.subr.mxu0 %v17980_v14 }
0x64eb   :  { %v16376_v16 = vpop.f32.mrf.mxu0 }
0x64ec   :  { %v19717_v45 = vadd.f32 %v16376_v16, %v15046_v27 }
0x64ed   :  { %v12313_v48 = vpop.f32.mrf.mxu0 }
0x64ee   :  { %v19719_v2 = vadd.f32 %v15046_v27, %v12313_v48 }
0x64f0   :  { %12577 = vrot.lane.b32.xlu0 %v19719_v2, %s17986_s26  ;;  %16391 = vmatmul.mubr.msk.f32.vlgmr.msra.gmra.mxu0 %vm1030_vm7, %v19719_v2 }
0x64f1   :  { %16399 = vmatpush3.xpose.msk.msra.mxu0 %vm1030_vm7, %v12580_v56  ;;  %16400 = vmatprep.mubr.msk.f32.mxu0 %vm17983_vm6, %v17980_v14 }
0x64f2   :  { %16408 = vmatprep.subr.mxu0 %v17980_v14 }
0x6562   :  { %v12578_v26 = vpop.permute.xlu0 %12577 }
0x6563   :  { %16401 = vmatmul.mubr.msk.f32.vlgmr.msra.gmra.mxu0 %vm1030_vm7, %v12578_v26 }
0x6564   :  { %16410 = vmatprep.mubr.msk.f32.mxu0 %vm17983_vm6, %v17980_v14  ;;  %16409 = vmatpush3.msra.mxu0 %v19759_v37 }
0x6565   :  { %16418 = vmatprep.subr.mxu0 %v17980_v14 }
0x65b0   :  { %v12484_v20 = vpop.f32.mrf.mxu0 }
0x65b1   :  { %v12488_v47 = vmul.f32 0.35355338, %v12484_v20 }
0x65b2   :  { %v16392_v61 = vpop.f32.mrf.mxu0 }
0x65b3   :  { %v12489_v34 = vadd.f32 %v12488_v47, %v18494_v57  ;;  %v19794_v47 = vld [vmem:[%s20075_s4 + $0x10] sm:$0xff] }
0x65b5   :  { %v12490_v41 = vsel %vm1030_vm7, %v12489_v34, -inf }
0x65b6   :  { %12491 = vmax.xlane.f32.xlu0 %v12490_v41 }
0x6623   :  { %v12651_v33 = vpop.f32.mrf.mxu0 }
0x6624   :  { %v12655_v62 = vmul.f32 0.35355338, %v12651_v33 }
0x6625   :  { %v16402_v49 = vpop.f32.mrf.mxu0 }
0x6626   :  { %v12656_v3 = vadd.f32 %v12655_v62, %v18494_v57 }
0x6628   :  { %v12657_v22 = vsel %vm1030_vm7, %v12656_v3, -inf }
0x6629   :  { %12658 = vmax.xlane.f32.xlu1 %v12657_v22 }
0x663a   :  { %12668 = vrot.lane.b32.xlu1 %v19695_v29, %s17985_s14 }
0x663e   :  { %12890 = vrot.lane.b32.xlu1 %v19719_v2, %s17987_s28 }
0x663f   :  { %v12492_v5 = vpop.xlane.xlu0 %12491 }
0x6640   :  { %v12493_v43 = vsub.f32 %v12489_v34, %v12492_v5 }
0x6642   :  { %v12494_v53 = vmul.f32 1.442695, %v12493_v43 }
0x6644   :  { %16878 = vpow2.f32 %v12494_v53 }
0x6651   :  { %v16879_v6 = vpop.eup %16878 }
0x6652   :  { %v12496_v4 = vsel %vm1030_vm7, %v16879_v6, 0.0 }
0x6653   :  { %12497 = vadd.xlane.f32.xlu0 %v12496_v4 }
0x66b2   :  { %v12659_v35 = vpop.xlane.xlu1 %12658 }
0x66b3   :  { %v12660_v0 = vsub.f32 %v12656_v3, %v12659_v35 }
0x66b5   :  { %v12661_v7 = vmul.f32 1.442695, %v12660_v0 }
0x66b6   :  { %v12669_v58 = vpop.permute.xlu1 %12668 }
0x66b7   :  { %16880 = vpow2.f32 %v12661_v7 }
0x66ba   :  { %v12891_v23 = vpop.permute.xlu1 %12890 }
0x66c4   :  { %v16881_v9 = vpop.eup %16880 }
0x66c5   :  { %v12663_v54 = vsel %vm1030_vm7, %v16881_v9, 0.0 }
0x66c6   :  { %12664 = vadd.xlane.f32.xlu0 %v12663_v54 }
0x66dc   :  { %12501 = vrot.lane.b32.xlu0 %v19695_v29, %s17984_s23  ;;  %v12498_v38 = vpop.xlane.xlu0 %12497 }
0x66dd   :  { %16882 = vrcp.f32 %v12498_v38 }
0x66e0   :  { %12892 = vrot.lane.b32.xlu0 %v19695_v29, %s17987_s28 }
0x66ea   :  { %v16883_v51 = vpop.eup %16882 }
0x66eb   :  { %v12500_v25 = vmul.f32 %v16883_v51, %v16879_v6 }
0x674f   :  { %v12665_v46 = vpop.xlane.xlu0 %12664 }
0x6750   :  { %16884 = vrcp.f32 %v12665_v46  ;;  %v19831_v46 = vld [vmem:[%s20075_s4 + $0x18] sm:$0xff] }
0x6753   :  { %v12502_v11 = vpop.permute.xlu0 %12501 }
0x6754   :  { %16394 = vmatpush3.msra.mxu1 %v12502_v11 }
0x6755   :  { %16396 = vmatmul.mubr.msk.f32.vlgmr.msra.gmra.mxu1 %vm1030_vm7, %v12500_v25  ;;  %16403 = vmatprep.subr.mxu1 %v17980_v14 }
0x6756   :  { %16404 = vmatpush3.msra.mxu1 %v12669_v58  ;;  %16405 = vmatprep.mubr.msk.f32.mxu1 %vm17983_vm6, %v17980_v14 }
0x6757   :  { %16413 = vmatprep.subr.mxu1 %v17980_v14  ;;  %v12893_v40 = vpop.permute.xlu0 %12892 }
0x675d   :  { %v16885_v55 = vpop.eup %16884 }
0x675e   :  { %v12667_v63 = vmul.f32 %v16885_v55, %v16881_v9 }
0x6760   :  { %16406 = vmatmul.mubr.msk.f32.vlgmr.msra.gmra.mxu1 %vm1030_vm7, %v12667_v63 }
0x6761   :  { %16415 = vmatprep.mubr.msk.f32.mxu1 %vm17983_vm6, %v17980_v14  ;;  %16414 = vmatpush3.msra.mxu1 %v19755_v19 }
0x6762   :  { %16423 = vmatprep.subr.mxu1 %v17980_v14 }
0x6815   :  { %v12573_v1 = vpop.f32.mrf.mxu1 }
0x6816   :  { %16416 = vmatmul.mubr.msk.f32.vlgmr.msra.gmra.mxu1 %vm1030_vm7, %v12573_v1 }
0x6817   :  { %v16397_v15 = vpop.f32.mrf.mxu1  ;;  %16425 = vmatprep.mubr.msk.f32.mxu1 %vm17983_vm6, %v17980_v14 }
0x6820   :  { %v12740_v50 = vpop.f32.mrf.mxu1 }
0x6821   :  { %16411 = vmatmul.mubr.msk.f32.vlgmr.msra.gmra.mxu0 %vm1030_vm7, %v12740_v50 }
0x6822   :  { %16419 = vmatpush3.xpose.msk.msra.mxu0 %vm1030_vm7, %v12893_v40  ;;  %v16407_v52 = vpop.f32.mrf.mxu1  ;;  %16420 = vmatprep.mubr.msk.f32.mxu0 %vm17983_vm6, %v17980_v14 }
0x6823   :  { %16428 = vmatprep.subr.mxu0 %v17980_v14 }
0x6825   :  { %16421 = vmatmul.mubr.msk.f32.vlgmr.msra.gmra.mxu0 %vm1030_vm7, %v12891_v23 }
0x6826   :  { %16430 = vmatprep.mubr.msk.f32.mxu0 %vm17983_vm6, %v17980_v14  ;;  %16429 = vmatpush3.msra.mxu0 %v19794_v47 }
0x6827   :  { %16438 = vmatprep.subr.mxu0 %v17980_v14 }
0x68d6   :  { %v12886_v28 = vpop.f32.mrf.mxu1 }
0x68d8   :  { %v16417_v31 = vpop.f32.mrf.mxu1 }
0x68e1   :  { %v12813_v8 = vpop.f32.mrf.mxu0 }
0x68e2   :  { %v12887_v18 = vadd.f32 %v12886_v28, %v12813_v8 }
0x68e3   :  { %v16412_v17 = vpop.f32.mrf.mxu0 }
0x68e5   :  { %v12964_v10 = vpop.f32.mrf.mxu0 }
0x68e6   :  { %v12968_v60 = vmul.f32 0.35355338, %v12964_v10 }
0x68e7   :  { %v16422_v59 = vpop.f32.mrf.mxu0 }
0x68e8   :  { %v12969_v13 = vadd.f32 %v12968_v60, %v18494_v57 }
0x68ea   :  { %v12970_v36 = vsel %vm1030_vm7, %v12969_v13, -inf }
0x68eb   :  { %12971 = vmax.xlane.f32.xlu0 %v12970_v36 }
0x6901   :  { %12981 = vrot.lane.b32.xlu0 %v19695_v29, %s17989_s2 }
0x6905   :  { %13131 = vrot.lane.b32.xlu0 %v19719_v2, %s17992_s0 }
0x6974   :  { %v12972_v42 = vpop.xlane.xlu0 %12971 }
0x6975   :  { %v12973_v44 = vsub.f32 %v12969_v13, %v12972_v42 }
0x6977   :  { %v12974_v39 = vmul.f32 1.442695, %v12973_v44 }
0x6978   :  { %v12982_v24 = vpop.permute.xlu0 %12981 }
0x6979   :  { %16886 = vpow2.f32 %v12974_v39  ;;  %16424 = vmatpush3.msra.mxu1 %v12982_v24 }
0x697a   :  { %16433 = vmatprep.subr.mxu1 %v17980_v14 }
0x697c   :  { %v13132_v20 = vpop.permute.xlu0 %13131 }
0x6986   :  { %v16887_v27 = vpop.eup %16886 }
0x6987   :  { %v12976_v16 = vsel %vm1030_vm7, %v16887_v27, 0.0 }
0x6988   :  { %12977 = vadd.xlane.f32.xlu1 %v12976_v16 }
0x6999   :  { %13133 = vrot.lane.b32.xlu1 %v19695_v29, %s17992_s0 }
0x6a11   :  { %v12978_v48 = vpop.xlane.xlu1 %12977 }
0x6a12   :  { %16888 = vrcp.f32 %v12978_v48 }
0x6a15   :  { %v13134_v26 = vpop.permute.xlu1 %13133 }
0x6a1f   :  { %v16889_v56 = vpop.eup %16888 }
0x6a20   :  { %v12980_v2 = vmul.f32 %v16889_v56, %v16887_v27 }
0x6a22   :  { %16426 = vmatmul.mubr.msk.f32.vlgmr.msra.gmra.mxu1 %vm1030_vm7, %v12980_v2 }
0x6a23   :  { %16434 = vmatpush3.xpose.msk.msra.mxu1 %vm1030_vm7, %v13134_v26  ;;  %16435 = vmatprep.mubr.msk.f32.mxu1 %vm17983_vm6, %v17980_v14 }
0x6a24   :  { %16443 = vmatprep.subr.mxu1 %v17980_v14 }
0x6a26   :  { %16436 = vmatmul.mubr.msk.f32.vlgmr.msra.gmra.mxu1 %vm1030_vm7, %v13132_v20 }
0x6a27   :  { %16445 = vmatprep.mubr.msk.f32.mxu1 %vm17983_vm6, %v17980_v14  ;;  %16444 = vmatpush3.msra.mxu1 %v19831_v46 }
0x6a28   :  { %16453 = vmatprep.subr.mxu1 %v17980_v14 }
0x6ae2   :  { %v13053_v61 = vpop.f32.mrf.mxu1 }
0x6ae3   :  { %16431 = vmatmul.mubr.msk.f32.vlgmr.msra.gmra.mxu0 %vm1030_vm7, %v13053_v61 }
0x6ae4   :  { %v16427_v34 = vpop.f32.mrf.mxu1  ;;  %16440 = vmatprep.mubr.msk.f32.mxu0 %vm17983_vm6, %v17980_v14 }
0x6ae6   :  { %v13205_v41 = vpop.f32.mrf.mxu1 }
0x6ae7   :  { %v13209_v33 = vmul.f32 0.35355338, %v13205_v41 }
0x6ae8   :  { %v16437_v62 = vpop.f32.mrf.mxu1 }
0x6ae9   :  { %v13210_v49 = vadd.f32 %v13209_v33, %v18494_v57 }
0x6aeb   :  { %v13211_v3 = vsel %vm1030_vm7, %v13210_v49, -inf }
0x6aec   :  { %13212 = vmax.xlane.f32.xlu1 %v13211_v3 }
0x6afd   :  { %13540 = vrot.lane.b32.xlu1 %v19689_v30, %s17986_s26 }
0x6b01   :  { %13538 = vrot.lane.b32.xlu1 %v19717_v45, %s17986_s26  ;;  %s20078_s26 = sld [smem:[#allocation145_spill]] }
0x6b75   :  { %v13213_v22 = vpop.xlane.xlu1 %13212 }
0x6b76   :  { %v13214_v5 = vsub.f32 %v13210_v49, %v13213_v22 }
0x6b78   :  { %v13215_v43 = vmul.f32 1.442695, %v13214_v5 }
0x6b79   :  { %v13541_v38 = vpop.permute.xlu1 %13540 }
0x6b7a   :  { %16890 = vpow2.f32 %v13215_v43 }
0x6b87   :  { %v16891_v53 = vpop.eup %16890 }
0x6b88   :  { %v13217_v6 = vsel %vm1030_vm7, %v16891_v53, 0.0 }
0x6b89   :  { %13218 = vadd.xlane.f32.xlu0 %v13217_v6 }
0x6b9f   :  { %13222 = vrot.lane.b32.xlu0 %v19695_v29, %s17991_s25  ;;  %v13539_v29 = vpop.permute.xlu1 %13538 }
0x6ba3   :  { %v13126_v57 = vpop.f32.mrf.mxu0 }
0x6ba4   :  { %v19810_v4 = vadd.f32 %v13126_v57, %v12887_v18 }
0x6ba5   :  { %v16432_v35 = vpop.f32.mrf.mxu0 }
0x6c12   :  { %v13219_v0 = vpop.xlane.xlu0 %13218 }
0x6c13   :  { %16892 = vrcp.f32 %v13219_v0 }
0x6c16   :  { %v13223_v7 = vpop.permute.xlu0 %13222 }
0x6c17   :  { %16439 = vmatpush3.msra.mxu0 %v13223_v7 }
0x6c18   :  { %16448 = vmatprep.subr.mxu0 %v17980_v14 }
0x6c20   :  { %v16893_v9 = vpop.eup %16892 }
0x6c21   :  { %v13221_v54 = vmul.f32 %v16893_v9, %v16891_v53 }
0x6c23   :  { %16441 = vmatmul.mubr.msk.f32.vlgmr.msra.gmra.mxu0 %vm1030_vm7, %v13221_v54 }
0x6c24   :  { %16449 = vmatpush3.xpose.msk.msra.mxu0 %vm1030_vm7, %v19689_v30  ;;  %16450 = vmatprep.mubr.msk.f32.mxu0 %vm17983_vm6, %v17980_v14 }
0x6c25   :  { %16458 = vmatprep.subr.mxu0 %v17980_v14 }
0x6c27   :  { %16451 = vmatmul.mubr.msk.f32.vlgmr.msra.gmra.mxu0 %vm1030_vm7, %v19717_v45 }
0x6c28   :  { %16459 = vmatpush3.xpose.msk.msra.mxu0 %vm1030_vm7, %v13541_v38  ;;  %16460 = vmatprep.mubr.msk.f32.mxu0 %vm17983_vm6, %v17980_v14 }
0x6c29   :  { %16468 = vmatprep.subr.mxu0 %v17980_v14 }
0x6c2b   :  { %16461 = vmatmul.mubr.msk.f32.vlgmr.msra.gmra.mxu0 %vm1030_vm7, %v13539_v29 }
0x6c2c   :  { %16469 = vmatpush3.msra.mxu0 %v19759_v37  ;;  %16470 = vmatprep.mubr.msk.f32.mxu0 %vm17983_vm6, %v17980_v14 }
0x6c2d   :  { %16478 = vmatprep.subr.mxu0 %v17980_v14 }
0x6ce3   :  { %v13294_v51 = vpop.f32.mrf.mxu0 }
0x6ce4   :  { %16446 = vmatmul.mubr.msk.f32.vlgmr.msra.gmra.mxu1 %vm1030_vm7, %v13294_v51 }
0x6ce5   :  { %v16442_v25 = vpop.f32.mrf.mxu0  ;;  %16455 = vmatprep.mubr.msk.f32.mxu1 %vm17983_vm6, %v17980_v14 }
0x6ce7   :  { %v13445_v11 = vpop.f32.mrf.mxu0 }
0x6ce8   :  { %v13449_v58 = vmul.f32 0.35355338, %v13445_v11 }
0x6ce9   :  { %v16452_v55 = vpop.f32.mrf.mxu0 }
0x6cea   :  { %v13450_v63 = vadd.f32 %v13449_v58, %v18437_v21 }
0x6ceb   :  { %v13612_v37 = vpop.f32.mrf.mxu0 }
0x6cec   :  { %v13616_v1 = vmul.f32 0.35355338, %v13612_v37  ;;  %v13451_v15 = vsel %vm1030_vm7, %v13450_v63, -inf }
0x6ced   :  { %13452 = vmax.xlane.f32.xlu0 %v13451_v15  ;;  %v16462_v50 = vpop.f32.mrf.mxu0 }
0x6cee   :  { %v13617_v40 = vadd.f32 %v13616_v1, %v18437_v21 }
0x6cf0   :  { %v13618_v52 = vsel %vm1030_vm7, %v13617_v40, -inf }
0x6cf1   :  { %13619 = vmax.xlane.f32.xlu1 %v13618_v52 }
0x6d02   :  { %13462 = vrot.lane.b32.xlu1 %v19689_v30, %s17984_s23  ;;  %s20076_s23 = sld [smem:[#allocation112_spill]] }
0x6d06   :  { %13853 = vrot.lane.b32.xlu1 %v19689_v30, %s17987_s28 }
0x6d0a   :  { %13851 = vrot.lane.b32.xlu1 %v19717_v45, %s17987_s28 }
0x6d76   :  { %v13453_v23 = vpop.xlane.xlu0 %13452 }
0x6d77   :  { %v13454_v28 = vsub.f32 %v13450_v63, %v13453_v23  ;;  %v15084_v63 = vld [vmem:[#allocation25] ss:$0 sm:$0xff] }
0x6d79   :  { %v13455_v31 = vmul.f32 1.442695, %v13454_v28 }
0x6d7a   :  { %v13620_v8 = vpop.xlane.xlu1 %13619 }
0x6d7b   :  { %16894 = vpow2.f32 %v13455_v31  ;;  %v13621_v18 = vsub.f32 %v13617_v40, %v13620_v8 }
0x6d7d   :  { %v13622_v17 = vmul.f32 1.442695, %v13621_v18 }
0x6d7e   :  { %v13463_v10 = vpop.permute.xlu1 %13462 }
0x6d7f   :  { %16896 = vpow2.f32 %v13622_v17  ;;  %16454 = vmatpush3.msra.mxu1 %v13463_v10 }
0x6d80   :  { %16463 = vmatprep.subr.mxu1 %v17980_v14 }
0x6d82   :  { %v13854_v61 = vpop.permute.xlu1 %13853 }
0x6d88   :  { %v16895_v60 = vpop.eup %16894 }
0x6d89   :  { %v13457_v59 = vsel %vm1030_vm7, %v16895_v60, 0.0 }
0x6d8a   :  { %13458 = vadd.xlane.f32.xlu0 %v13457_v59 }
0x6d8c   :  { %v16897_v13 = vpop.eup %16896 }
0x6d8d   :  { %v13624_v36 = vsel %vm1030_vm7, %v16897_v13, 0.0 }
0x6d8e   :  { %13625 = vadd.xlane.f32.xlu0 %v13624_v36 }
0x6da4   :  { %v13367_v42 = vpop.f32.mrf.mxu1  ;;  %13629 = vrot.lane.b32.xlu0 %v19689_v30, %s17985_s14  ;;  %s20077_s14 = sld [smem:[#allocation113_spill]] }
0x6da5   :  { %v13371_v44 = vadd.f32 %v13367_v42, %v19810_v4 }
0x6da6   :  { %v16447_v39 = vpop.f32.mrf.mxu1 }
0x6da7   :  { %13372 = vst.msk [vmem:[#allocation2] sm:$0xff] %vm941_vm5, %v13371_v44 }
0x6dae   :  { %v14334_v55 = vld [vmem:[#allocation2] sm:$0xff] }
0x6daf   :  { %v14343_v15 = vadd.f32 %v15084_v63, %v14334_v55 }
0x6db1   :  { %v14345_v52 = vadd.f32 %v14343_v15, %v19699_v32  ;;  %v14485_v15 = vld [vmem:[%s20077_s14] sm:$0xff] }
0x6db3   :  { %v14347_v23 = vsel %vm941_vm5, %v14345_v52, 0.0 }
0x6e13   :  { %v13459_v24 = vpop.xlane.xlu0 %13458 }
0x6e14   :  { %16898 = vrcp.f32 %v13459_v24 }
0x6e17   :  { %v13626_v27 = vpop.xlane.xlu0 %13625 }
0x6e18   :  { %16900 = vrcp.f32 %v13626_v27 }
0x6e1b   :  { %v13630_v56 = vpop.permute.xlu0 %13629 }
0x6e21   :  { %v16899_v16 = vpop.eup %16898 }
0x6e22   :  { %v13461_v48 = vmul.f32 %v16899_v16, %v16895_v60 }
0x6e24   :  { %16456 = vmatmul.mubr.msk.f32.vlgmr.msra.gmra.mxu1 %vm1030_vm7, %v13461_v48 }
0x6e25   :  { %v16901_v2 = vpop.eup %16900  ;;  %16464 = vmatpush3.msra.mxu1 %v13630_v56  ;;  %16465 = vmatprep.mubr.msk.f32.mxu1 %vm17983_vm6, %v17980_v14 }
0x6e26   :  { %v13628_v26 = vmul.f32 %v16901_v2, %v16897_v13  ;;  %16473 = vmatprep.subr.mxu1 %v17980_v14 }
0x6e28   :  { %16466 = vmatmul.mubr.msk.f32.vlgmr.msra.gmra.mxu1 %vm1030_vm7, %v13628_v26 }
0x6e29   :  { %16474 = vmatpush3.msra.mxu1 %v19755_v19  ;;  %16475 = vmatprep.mubr.msk.f32.mxu1 %vm17983_vm6, %v17980_v14  ;;  %v13852_v19 = vpop.permute.xlu1 %13851 }
0x6e2a   :  { %16483 = vmatprep.subr.mxu1 %v17980_v14 }
0x6ee4   :  { %v13534_v20 = vpop.f32.mrf.mxu1 }
0x6ee5   :  { %16476 = vmatmul.mubr.msk.f32.vlgmr.msra.gmra.mxu1 %vm1030_vm7, %v13534_v20 }
0x6ee6   :  { %v16457_v34 = vpop.f32.mrf.mxu1  ;;  %16485 = vmatprep.mubr.msk.f32.mxu1 %vm17983_vm6, %v17980_v14 }
0x6ee8   :  { %v13701_v41 = vpop.f32.mrf.mxu1 }
0x6ee9   :  { %16471 = vmatmul.mubr.msk.f32.vlgmr.msra.gmra.mxu0 %vm1030_vm7, %v13701_v41 }
0x6eea   :  { %16479 = vmatpush3.xpose.msk.msra.mxu0 %vm1030_vm7, %v13854_v61  ;;  %v16467_v33 = vpop.f32.mrf.mxu1  ;;  %16480 = vmatprep.mubr.msk.f32.mxu0 %vm17983_vm6, %v17980_v14 }
0x6eeb   :  { %16488 = vmatprep.subr.mxu0 %v17980_v14 }
0x6eed   :  { %16481 = vmatmul.mubr.msk.f32.vlgmr.msra.gmra.mxu0 %vm1030_vm7, %v13852_v19 }
0x6eee   :  { %16489 = vmatpush3.msra.mxu0 %v19794_v47  ;;  %16490 = vmatprep.mubr.msk.f32.mxu0 %vm17983_vm6, %v17980_v14 }
0x6eef   :  { %16498 = vmatprep.subr.mxu0 %v17980_v14 }
0x6fa5   :  { %v13847_v62 = vpop.f32.mrf.mxu1 }
0x6fa7   :  { %v16477_v49 = vpop.f32.mrf.mxu1 }
0x6fa9   :  { %v13774_v3 = vpop.f32.mrf.mxu0 }
0x6faa   :  { %v13848_v22 = vadd.f32 %v13847_v62, %v13774_v3 }
0x6fab   :  { %v16472_v5 = vpop.f32.mrf.mxu0 }
0x6fac   :  { %v15085_v5 = vld [vmem:[#allocation35] ss:$0 sm:$0xff] }
0x6fad   :  { %v13925_v43 = vpop.f32.mrf.mxu0 }
0x6fae   :  { %v13929_v53 = vmul.f32 0.35355338, %v13925_v43 }
0x6faf   :  { %v16482_v6 = vpop.f32.mrf.mxu0 }
0x6fb0   :  { %v13930_v57 = vadd.f32 %v13929_v53, %v18437_v21  ;;  %v15086_v53 = vld [vmem:[#allocation34] ss:$0 sm:$0xff] }
0x6fb2   :  { %v13931_v4 = vsel %vm1030_vm7, %v13930_v57, -inf }
0x6fb3   :  { %13932 = vmax.xlane.f32.xlu0 %v13931_v4  ;;  %v14394_v4 = vld [vmem:[%s20076_s23 + $0x18] sm:$0xff] }
0x6fc9   :  { %13942 = vrot.lane.b32.xlu0 %v19689_v30, %s17989_s2 }
0x6fcd   :  { %14092 = vrot.lane.b32.xlu0 %v19717_v45, %s17992_s0 }
0x703c   :  { %v13933_v47 = vpop.xlane.xlu0 %13932 }
0x703d   :  { %v13934_v35 = vsub.f32 %v13930_v57, %v13933_v47  ;;  %v14393_v47 = vld [vmem:[%s20076_s23 + $0x10] sm:$0xff] }
0x703f   :  { %v13935_v0 = vmul.f32 1.442695, %v13934_v35  ;;  %v14392_v35 = vld [vmem:[%s20076_s23 + $0x8] sm:$0xff] }
0x7040   :  { %v13943_v7 = vpop.permute.xlu0 %13942 }
0x7041   :  { %16902 = vpow2.f32 %v13935_v0  ;;  %16484 = vmatpush3.msra.mxu1 %v13943_v7  ;;  %v14391_v0 = vld [vmem:[%s20076_s23] sm:$0xff]  ;;  %v14492_v7 = vld [vmem:[%s20077_s14 + $0x38] sm:$0xff] }
0x7042   :  { %16493 = vmatprep.subr.mxu1 %v17980_v14 }
0x7044   :  { %v14093_v25 = vpop.permute.xlu0 %14092 }
0x704e   :  { %v16903_v9 = vpop.eup %16902 }
0x704f   :  { %v13937_v54 = vsel %vm1030_vm7, %v16903_v9, 0.0 }
0x7050   :  { %13938 = vadd.xlane.f32.xlu1 %v13937_v54  ;;  %v14490_v54 = vld [vmem:[%s20077_s14 + $0x28] sm:$0xff] }
0x7061   :  { %14094 = vrot.lane.b32.xlu1 %v19689_v30, %s17992_s0 }
0x70d9   :  { %v13939_v38 = vpop.xlane.xlu1 %13938 }
0x70da   :  { %16904 = vrcp.f32 %v13939_v38  ;;  %v14489_v38 = vld [vmem:[%s20077_s14 + $0x20] sm:$0xff] }
0x70dd   :  { %v14095_v45 = vpop.permute.xlu1 %14094 }
0x70e7   :  { %v16905_v29 = vpop.eup %16904 }
0x70e8   :  { %v13941_v51 = vmul.f32 %v16905_v29, %v16903_v9  ;;  %v14491_v9 = vld [vmem:[%s20077_s14 + $0x30] sm:$0xff] }
0x70ea   :  { %16486 = vmatmul.mubr.msk.f32.vlgmr.msra.gmra.mxu1 %vm1030_vm7, %v13941_v51 }
0x70eb   :  { %16494 = vmatpush3.xpose.msk.msra.mxu1 %vm1030_vm7, %v14095_v45  ;;  %16495 = vmatprep.mubr.msk.f32.mxu1 %vm17983_vm6, %v17980_v14 }
0x70ec   :  { %16503 = vmatprep.subr.mxu1 %v17980_v14 }
0x70ee   :  { %16496 = vmatmul.mubr.msk.f32.vlgmr.msra.gmra.mxu1 %vm1030_vm7, %v14093_v25 }
0x70ef   :  { %16504 = vmatpush3.msra.mxu1 %v19831_v46  ;;  %16505 = vmatprep.mubr.msk.f32.mxu1 %vm17983_vm6, %v17980_v14 }
0x70f0   :  { %16519 = vmatprep.subr.mxu1 %v14492_v7 }
0x71aa   :  { %v14014_v11 = vpop.f32.mrf.mxu1 }
0x71ab   :  { %16491 = vmatmul.mubr.msk.f32.vlgmr.msra.gmra.mxu0 %vm1030_vm7, %v14014_v11 }
0x71ac   :  { %v16487_v58 = vpop.f32.mrf.mxu1  ;;  %16500 = vmatprep.mubr.msk.f32.mxu0 %vm17983_vm6, %v17980_v14 }
0x71ae   :  { %v14166_v37 = vpop.f32.mrf.mxu1 }
0x71af   :  { %v14170_v1 = vmul.f32 0.35355338, %v14166_v37  ;;  %v14487_v37 = vld [vmem:[%s20077_s14 + $0x10] sm:$0xff] }
0x71b0   :  { %v16497_v50 = vpop.f32.mrf.mxu1 }
0x71b1   :  { %v14171_v40 = vadd.f32 %v14170_v1, %v18437_v21  ;;  %v14486_v1 = vld [vmem:[%s20077_s14 + $0x8] sm:$0xff]  ;;  %v15087_v50 = vld [vmem:[#allocation28] ss:$0 sm:$0xff] }
0x71b3   :  { %v14172_v46 = vsel %vm1030_vm7, %v14171_v40, -inf }
0x71b4   :  { %14173 = vmax.xlane.f32.xlu1 %v14172_v46 }
0x71b8   :  { %14348 = vadd.xlane.f32.xlu1 %v14347_v23 }
0x723d   :  { %v14174_v28 = vpop.xlane.xlu1 %14173 }
0x723e   :  { %v14175_v31 = vsub.f32 %v14171_v40, %v14174_v28 }
0x7240   :  { %v14176_v8 = vmul.f32 1.442695, %v14175_v31 }
0x7242   :  { %16906 = vpow2.f32 %v14176_v8 }
0x724f   :  { %v16907_v18 = vpop.eup %16906 }
0x7250   :  { %v14178_v14 = vsel %vm1030_vm7, %v16907_v18, 0.0 }
0x7251   :  { %14179 = vadd.xlane.f32.xlu0 %v14178_v14 }
0x7267   :  { %14183 = vrot.lane.b32.xlu0 %v19689_v30, %s17991_s25  ;;  %v14349_v30 = vpop.xlane.xlu1 %14348 }
0x7268   :  { %v14353_v27 = vmul.f32 0.03125, %v14349_v30 }
0x726a   :  { %v14355_v48 = vsub.f32 %v14345_v52, %v14353_v27 }
0x726b   :  { %v14087_v21 = vpop.f32.mrf.mxu0 }
0x726c   :  { %v14091_v17 = vadd.f32 %v14087_v21, %v13848_v22  ;;  %v14357_v20 = vmul.f32 %v14355_v48, %v14355_v48 }
0x726d   :  { %v16492_v10 = vpop.f32.mrf.mxu0 }
0x726e   :  { %v14359_v61 = vsel %vm941_vm5, %v14357_v20, 0.0  ;;  %v14627_v20 = vld [vmem:[%s20078_s26] sm:$0xff] }
0x72da   :  { %v14180_v60 = vpop.xlane.xlu0 %14179 }
0x72db   :  { %16908 = vrcp.f32 %v14180_v60 }
0x72de   :  { %v14184_v32 = vpop.permute.xlu0 %14183 }
0x72df   :  { %16499 = vmatpush3.msra.mxu0 %v14184_v32 }
0x72e0   :  { %16508 = vmatprep.subr.mxu0 %v14394_v4 }
0x72e8   :  { %v16909_v59 = vpop.eup %16908 }
0x72e9   :  { %v14182_v13 = vmul.f32 %v16909_v59, %v16907_v18  ;;  %v15090_v18 = vld [vmem:[#allocation29] ss:$0 sm:$0xff] }
0x72eb   :  { %16501 = vmatmul.mubr.msk.f32.vlgmr.msra.gmra.mxu0 %vm1030_vm7, %v14182_v13 }
0x72ec   :  { %16509 = vmatpush3.msra.mxu0 %v14394_v4 }
0x72ed   :  { %16510 = vmatprep.subr.mxu0 %v14393_v47 }
0x72ee   :  { %16511 = vmatpush3.msra.mxu0 %v14393_v47  ;;  %v15095_v47 = vld [vmem:[#allocation68] ss:$0 sm:$0xff] }
0x72ef   :  { %16512 = vmatprep.subr.mxu0 %v14392_v35 }
0x72f0   :  { %16513 = vmatpush3.msra.mxu0 %v14392_v35 }
0x72f1   :  { %16514 = vmatprep.subr.mxu0 %v14391_v0 }
0x72f2   :  { %16515 = vmatpush3.msra.mxu0 %v14391_v0 }
0x73ab   :  { %v14255_v36 = vpop.f32.mrf.mxu0 }
0x73ac   :  { %16506 = vmatmul.mubr.msk.f32.vlgmr.msra.gmra.mxu1 %vm1030_vm7, %v14255_v36 }
0x73ad   :  { %v16502_v42 = vpop.f32.mrf.mxu0  ;;  %16520 = vmatpush3.msra.mxu1 %v14492_v7 }
0x73ae   :  { %16521 = vmatprep.subr.mxu1 %v14491_v9 }
0x73af   :  { %16522 = vmatpush3.msra.mxu1 %v14491_v9 }
0x73b0   :  { %16523 = vmatprep.subr.mxu1 %v14490_v54 }
0x73b1   :  { %16524 = vmatpush3.msra.mxu1 %v14490_v54 }
0x73b2   :  { %16525 = vmatprep.subr.mxu1 %v14489_v38 }
0x73b3   :  { %16526 = vmatpush3.msra.mxu1 %v14489_v38 }
0x746c   :  { %v14328_v44 = vpop.f32.mrf.mxu1 }
0x746d   :  { %v14332_v39 = vadd.f32 %v14328_v44, %v14091_v17 }
0x746e   :  { %v16507_v24 = vpop.f32.mrf.mxu1 }
0x746f   :  { %14333 = vst.msk [vmem:[#allocation2 + $0x8] sm:$0xff] %vm941_vm5, %v14332_v39 }
0x7476   :  { %v14335_v16 = vld [vmem:[#allocation2 + $0x8] sm:$0xff] }
0x7477   :  { %v14344_v56 = vadd.f32 %v15084_v63, %v14335_v16  ;;  %v14488_v63 = vld [vmem:[%s20077_s14 + $0x18] sm:$0xff] }
0x7478   :  { %16527 = vmatprep.subr.mxu1 %v14488_v63 }
0x7479   :  { %v14346_v2 = vadd.f32 %v14344_v56, %v19708_v12  ;;  %16528 = vmatpush3.msra.mxu1 %v14488_v63  ;;  %v14630_v56 = vld [vmem:[%s20078_s26 + $0x18] sm:$0xff] }
0x747a   :  { %16529 = vmatprep.subr.mxu1 %v14487_v37  ;;  %16538 = vmatprep.subr.mxu0 %v14630_v56 }
0x747b   :  { %v14350_v26 = vsel %vm941_vm5, %v14346_v2, 0.0  ;;  %16530 = vmatpush3.msra.mxu1 %v14487_v37 }
0x747c   :  { %14351 = vadd.xlane.f32.xlu1 %v14350_v26  ;;  %16531 = vmatprep.subr.mxu1 %v14486_v1  ;;  %v14628_v26 = vld [vmem:[%s20078_s26 + $0x8] sm:$0xff] }
0x747d   :  { %16532 = vmatpush3.msra.mxu1 %v14486_v1 }
0x747e   :  { %16533 = vmatprep.subr.mxu1 %v14485_v15 }
0x747f   :  { %16534 = vmatpush3.msra.mxu1 %v14485_v15 }
0x7480   :  { %14360 = vadd.xlane.f32.xlu1 %v14359_v61 }
0x7505   :  { %v14352_v34 = vpop.xlane.xlu1 %14351 }
0x7506   :  { %v14354_v41 = vmul.f32 0.03125, %v14352_v34 }
0x7508   :  { %v14356_v33 = vsub.f32 %v14346_v2, %v14354_v41  ;;  %v14629_v2 = vld [vmem:[%s20078_s26 + $0x10] sm:$0xff] }
0x7509   :  { %v14361_v19 = vpop.xlane.xlu1 %14360 }
0x750a   :  { %v14365_v62 = vmul.f32 0.03125, %v14361_v19  ;;  %v14358_v49 = vmul.f32 %v14356_v33, %v14356_v33 }
0x750c   :  { %v14367_v3 = vadd.f32 1e-05, %v14365_v62  ;;  %v14362_v22 = vsel %vm941_vm5, %v14358_v49, 0.0 }
0x750d   :  { %14363 = vadd.xlane.f32.xlu1 %v14362_v22 }
0x750e   :  { %16910 = vrsqrt.f32 %v14367_v3  ;;  %v15093_v3 = vld [vmem:[#allocation38] ss:$0 sm:$0xff] }
0x751b   :  { %v16911_v12 = vpop.eup %16910 }
0x751c   :  { %v14371_v43 = vmul.f32 %v16911_v12, %v14355_v48  ;;  %v15094_v12 = vld [vmem:[#allocation37] ss:$0 sm:$0xff] }
0x751e   :  { %v14380_v6 = vmul.f32 %v15085_v5, %v14371_v43 }
0x7520   :  { %v14389_v57 = vadd.f32 %v15086_v53, %v14380_v6 }
0x7522   :  { %16516 = vmatprep.mubr.msk.f32.mxu0 %vm941_vm5, %v14389_v57 }
0x7596   :  { %v14364_v29 = vpop.xlane.xlu1 %14363 }
0x7597   :  { %v14366_v51 = vmul.f32 0.03125, %v14364_v29 }
0x7599   :  { %v14368_v45 = vadd.f32 1e-05, %v14366_v51 }
0x759b   :  { %16912 = vrsqrt.f32 %v14368_v45 }
0x75a8   :  { %v16913_v25 = vpop.eup %16912 }
0x75a9   :  { %v14372_v11 = vmul.f32 %v16913_v25, %v14356_v33 }
0x75ab   :  { %v14381_v58 = vmul.f32 %v15085_v5, %v14372_v11 }
0x75ad   :  { %v14390_v55 = vadd.f32 %v15086_v53, %v14381_v58 }
0x75af   :  { %16517 = vmatmul.mubr.msk.f32.vlgmr.msra.gmra.mxu0 %vm941_vm5, %v14390_v55 }
0x75b0   :  { %16539 = vmatpush3.msra.mxu0 %v14630_v56 }
0x75b1   :  { %16540 = vmatprep.subr.mxu0 %v14629_v2 }
0x75b2   :  { %16541 = vmatpush3.msra.mxu0 %v14629_v2 }
0x75b3   :  { %16542 = vmatprep.subr.mxu0 %v14628_v26 }
0x75b4   :  { %16543 = vmatpush3.msra.mxu0 %v14628_v26 }
0x75b5   :  { %16544 = vmatprep.subr.mxu0 %v14627_v20 }
0x75b6   :  { %16545 = vmatpush3.msra.mxu0 %v14627_v20 }
0x766f   :  { %v16518_v40 = vpop.f32.mrf.mxu0 }
0x7670   :  { %v14480_v46 = vadd.f32 %v16518_v40, %v15087_v50 }
0x7671   :  { %v14474_v52 = vpop.f32.mrf.mxu0 }
0x7672   :  { %v14475_v23 = vadd.f32 %v15087_v50, %v14474_v52  ;;  %v14484_v31 = vmax.f32 %v14480_v46, 0.0 }
0x7674   :  { %v14483_v28 = vmax.f32 %v14475_v23, 0.0 }
0x7676   :  { %16535 = vmatprep.mubr.msk.f32.mxu1 %vm3127_vm8, %v14483_v28 }
0x7677   :  { %16536 = vmatmul.mubr.msk.f32.vlgmr.msra.gmra.mxu1 %vm3127_vm8, %v14484_v31 }
0x7737   :  { %v16537_v8 = vpop.f32.mrf.mxu1 }
0x7738   :  { %v14578_v21 = vadd.f32 %v16537_v8, %v15090_v18 }
0x7739   :  { %v14572_v14 = vpop.f32.mrf.mxu1 }
0x773a   :  { %v14573_v17 = vadd.f32 %v15090_v18, %v14572_v14  ;;  %v14582_v60 = vadd.f32 %v14578_v21, %v14390_v55 }
0x773c   :  { %v14581_v10 = vadd.f32 %v14573_v17, %v14389_v57  ;;  %v14586_v59 = vsel %vm941_vm5, %v14582_v60, 0.0 }
0x773e   :  { %v14583_v32 = vsel %vm941_vm5, %v14581_v10, 0.0 }
0x773f   :  { %14584 = vadd.xlane.f32.xlu1 %v14583_v32 }
0x7743   :  { %14587 = vadd.xlane.f32.xlu1 %v14586_v59 }
0x77c8   :  { %v14585_v13 = vpop.xlane.xlu1 %14584 }
0x77c9   :  { %v14589_v36 = vmul.f32 0.03125, %v14585_v13 }
0x77cb   :  { %v14591_v42 = vsub.f32 %v14581_v10, %v14589_v36 }
0x77cc   :  { %v14588_v44 = vpop.xlane.xlu1 %14587 }
0x77cd   :  { %v14590_v39 = vmul.f32 0.03125, %v14588_v44  ;;  %v14593_v24 = vmul.f32 %v14591_v42, %v14591_v42 }
0x77cf   :  { %v14592_v30 = vsub.f32 %v14582_v60, %v14590_v39  ;;  %v14595_v27 = vsel %vm941_vm5, %v14593_v24, 0.0 }
0x77d0   :  { %14596 = vadd.xlane.f32.xlu0 %v14595_v27 }
0x77d1   :  { %v14594_v16 = vmul.f32 %v14592_v30, %v14592_v30 }
0x77d3   :  { %v14598_v48 = vsel %vm941_vm5, %v14594_v16, 0.0 }
0x77d4   :  { %14599 = vadd.xlane.f32.xlu1 %v14598_v48 }
0x7859   :  { %v14597_v61 = vpop.xlane.xlu0 %14596 }
0x785a   :  { %v14601_v34 = vmul.f32 0.03125, %v14597_v61 }
0x785c   :  { %v14603_v41 = vadd.f32 1e-05, %v14601_v34 }
0x785d   :  { %v14600_v33 = vpop.xlane.xlu1 %14599 }
0x785e   :  { %16914 = vrsqrt.f32 %v14603_v41  ;;  %v14602_v19 = vmul.f32 0.03125, %v14600_v33 }
0x7860   :  { %v14604_v62 = vadd.f32 1e-05, %v14602_v19 }
0x7862   :  { %16916 = vrsqrt.f32 %v14604_v62 }
0x786b   :  { %v16915_v49 = vpop.eup %16914 }
0x786c   :  { %v14607_v22 = vmul.f32 %v16915_v49, %v14591_v42 }
0x786e   :  { %v14616_v5 = vmul.f32 %v15093_v3, %v14607_v22 }
0x786f   :  { %v16917_v43 = vpop.eup %16916 }
0x7870   :  { %v14608_v53 = vmul.f32 %v16917_v43, %v14592_v30  ;;  %v14625_v6 = vadd.f32 %v15094_v12, %v14616_v5 }
0x7872   :  { %v14617_v57 = vmul.f32 %v15093_v3, %v14608_v53  ;;  %16546 = vmatprep.mubr.msk.f32.mxu0 %vm941_vm5, %v14625_v6 }
0x7874   :  { %v14626_v4 = vadd.f32 %v15094_v12, %v14617_v57 }
0x7876   :  { %16547 = vmatmul.mubr.msk.f32.vlgmr.msra.gmra.mxu0 %vm941_vm5, %v14626_v4 }
0x7936   :  { %v16548_v35 = vpop.f32.mrf.mxu0 }
0x7937   :  { %v14716_v0 = vadd.f32 %v16548_v35, %v15095_v47 }
0x7938   :  { %v14710_v7 = vpop.f32.mrf.mxu0 }
0x7939   :  { %14720 = vst [vmem:[%s18368_s13 + $0x8] sm:$0xff] %v14716_v0  ;;  %v14711_v9 = vadd.f32 %v15095_v47, %v14710_v7 }
0x793b   :  { %14719 = vst [vmem:[%s18368_s13] sm:$0xff] %v14711_v9 }
0x793c   :  { %14725 = vsyncpa [#allocation4], 1 }
0x793d   :  { %14726 = vsyncpa [#allocation6], 1 }
0x793e   :  { %14727 = vsyncpa [#allocation9], 1 }
0x793f   :  { %14728 = vsyncpa [#allocation12], 1 }
0x7940   :  { %14729 = vsyncpa [#allocation15], 1 }
0x7941   :  { %14730 = vsyncpa [#allocation18], 1 }
0x7942   :  { %14731 = vsyncpa [#allocation21], 1 }
0x7943   :  { %14732 = vsyncpa [#allocation24], 1 }
0x7944   :  { %14733 = vsyncpa [#allocation27], 1 }
0x7945   :  { %14734 = vsyncpa [#allocation30], 1 }
0x7946   :  { %14735 = vsyncpa [#allocation33], 1 }
0x7947   :  { %14736 = vsyncpa [#allocation36], 1 }
0x7948   :  { %14737 = vsyncpa [#allocation39], 1 }
0x7949   :  { %14738 = vsyncpa [#allocation42], 1 }
0x794a   :  { %14739 = vsyncpa [#allocation45], 1 }
0x794b   :  { %14740 = vsyncpa [#allocation48], 1 }
0x794c   :  { %14741 = vsyncpa [#allocation51], 1 }
0x794d   :  { %14742 = vsyncpa [#allocation54], 1 }
0x794e   :  { %14743 = vsyncpa [#allocation57], 1 }
0x794f   :  { %14744 = vsyncpa [#allocation60], 1 }
0x7950   :  { %14745 = vsyncpa [#allocation63], 1 }
0x7951   :  { %14746 = vsyncpa [#allocation66], 1 }
0x7952   :  { %14747 = vsyncpa [#allocation69], 1 }

</bundles_post_ra>
